<compile_context>
chip_gen: v7x
topology: tpu7x:2x2x1
jax: 0.10.0
libtpu: 0.0.40
codegen_flags: <defaults>
</compile_context>

<pallas_src>
import numpy as np
import jax
import jax.numpy as jnp
from jax.experimental import pallas as pl
from jax.experimental.pallas import tpu as pltpu

_CompilerParams = getattr(pltpu, "CompilerParams",
                          getattr(pltpu, "TPUCompilerParams", None))

LANES = 128  # carried channel width


def _compiler_params():
    if _CompilerParams is None:
        return None
    return _CompilerParams(dimension_semantics=("parallel",))


def _cost_estimate(flops, bytes_accessed):
    CE = getattr(pl, "CostEstimate", None)
    if CE is None:
        return None
    return CE(flops=int(flops), transcendentals=0,
              bytes_accessed=int(bytes_accessed))


def _round_up(x, m):
    return ((x + m - 1) // m) * m


def _cdiv(a, b):
    return -(-a // b)


def _choose_tm(M):
    """Row tile: >=2 grid steps when M>=16 (v7x megacore), rounded toward 256."""
    if M <= 16:
        return 16
    nsteps = max(2, _cdiv(M, 256))
    return _round_up(_cdiv(M, nsteps), 16)


# ----------------------------------------------------------------------------
# Pallas kernels
# ----------------------------------------------------------------------------
def _make_mm_kernel(n_dots, has_bias, relu, has_mult):
    """out = [relu]( sum_i A_i@B_i [+ bias] ) [* mult], f32 accumulation."""
    def kernel(*refs):
        out_ref = refs[-1]
        acc = jnp.dot(refs[0][...], refs[1][...],
                      preferred_element_type=jnp.float32)
        p = 2
        for _ in range(n_dots - 1):
            acc = acc + jnp.dot(refs[p][...], refs[p + 1][...],
                                preferred_element_type=jnp.float32)
            p += 2
        if has_bias:
            acc = acc + refs[p][...]
            p += 1
        if relu:
            acc = jnp.maximum(acc, 0.0)
        if has_mult:
            acc = acc * refs[p][...]
            p += 1
        out_ref[...] = acc.astype(out_ref.dtype)
    return kernel


def _max3_kernel(a_ref, b_ref, c_ref, o_ref):
    o_ref[...] = jnp.maximum(jnp.maximum(a_ref[...], b_ref[...]), c_ref[...])


# ----------------------------------------------------------------------------
# Fused matmul wrapper
# ----------------------------------------------------------------------------
def fused_matmul(pairs, bias=None, relu=False, mult=None,
                 out_dtype=jnp.bfloat16):
    """out[:M] = [relu](sum_i A_i@B_i [+bias]) [*mult].

    Each (A_i, B_i): A_i (M, K_i), B_i (K_i, Np) with Np % 128 == 0 (weights
    are pre-padded at prep time so no per-call N pad/slice is needed)."""
    M = pairs[0][0].shape[0]
    Np = pairs[0][1].shape[1]
    assert Np % LANES == 0, Np

    TM = _choose_tm(M)
    Mp = _round_up(M, TM)

    operands, in_specs = [], []
    flops = 0
    bytes_acc = Mp * Np * jnp.dtype(out_dtype).itemsize
    for (A, B) in pairs:
        K = A.shape[1]
        assert A.shape[0] == M and B.shape[0] == K and B.shape[1] == Np
        opd = jnp.bfloat16 if K >= 8 else jnp.float32  # tiny-K ops stay f32
        A = A.astype(opd)
        B = B.astype(opd)
        if Mp != M:
            A = jnp.pad(A, ((0, Mp - M), (0, 0)))
        operands += [A, B]
        in_specs += [pl.BlockSpec((TM, K), lambda i: (i, 0)),
                     pl.BlockSpec((K, Np), lambda i: (0, 0))]
        flops += 2 * Mp * K * Np
        bytes_acc += (Mp * K + K * Np) * jnp.dtype(opd).itemsize

    has_bias = bias is not None
    if has_bias:
        bias = bias.reshape(1, Np).astype(jnp.float32)
        operands.append(bias)
        in_specs.append(pl.BlockSpec((1, Np), lambda i: (0, 0)))
        bytes_acc += Np * 4

    has_mult = mult is not None
    if has_mult:
        mult = mult.astype(jnp.float32)
        if Mp != M:
            mult = jnp.pad(mult, ((0, Mp - M), (0, 0)))
        operands.append(mult)
        in_specs.append(pl.BlockSpec((TM, Np), lambda i: (i, 0)))
        bytes_acc += Mp * Np * 4

    out = pl.pallas_call(
        _make_mm_kernel(len(pairs), has_bias, relu, has_mult),
        out_shape=jax.ShapeDtypeStruct((Mp, Np), out_dtype),
        grid=(Mp // TM,),
        in_specs=in_specs,
        out_specs=pl.BlockSpec((TM, Np), lambda i: (i, 0)),
        compiler_params=_compiler_params(),
        cost_estimate=_cost_estimate(flops, bytes_acc),
    )(*operands)
    return out[:M] if Mp != M else out


def max3_rows(a, b, c):
    """Elementwise max of three (M, C) slabs (C % 128 == 0)."""
    M, C = a.shape
    assert C % LANES == 0
    TM = _choose_tm(M)
    Mp = _round_up(M, TM)
    if Mp != M:
        pad = ((0, Mp - M), (0, 0))
        a, b, c = jnp.pad(a, pad), jnp.pad(b, pad), jnp.pad(c, pad)
    out = pl.pallas_call(
        _max3_kernel,
        out_shape=jax.ShapeDtypeStruct((Mp, C), a.dtype),
        grid=(Mp // TM,),
        in_specs=[pl.BlockSpec((TM, C), lambda i: (i, 0))] * 3,
        out_specs=pl.BlockSpec((TM, C), lambda i: (i, 0)),
        compiler_params=_compiler_params(),
    )(a, b, c)
    return out[:M] if Mp != M else out


# ----------------------------------------------------------------------------
# NN building blocks (NHWC, channels carried 128-padded, bf16 activations)
# ----------------------------------------------------------------------------
def im2col(x, kh, kw, stride, padding, dilation):
    """bf16 im2col with K zero-padded to a multiple of 128 (unmasked vld)."""
    N, H, W, C = x.shape
    xp = jnp.pad(x, ((0, 0), (padding, padding),
                     (padding, padding), (0, 0))).astype(jnp.bfloat16)
    Ho = (H + 2 * padding - dilation * (kh - 1) - 1) // stride + 1
    Wo = (W + 2 * padding - dilation * (kw - 1) - 1) // stride + 1
    patches = []
    for i in range(kh):
        for j in range(kw):
            patches.append(
                xp[:, i * dilation:i * dilation + (Ho - 1) * stride + 1:stride,
                      j * dilation:j * dilation + (Wo - 1) * stride + 1:stride, :])
    K = kh * kw * C
    Kp = _round_up(K, LANES)
    if Kp != K:
        patches.append(jnp.zeros((N, Ho, Wo, Kp - K), jnp.bfloat16))
    cols = jnp.concatenate(patches, axis=-1)
    return cols.reshape(N * Ho * Wo, Kp), Ho, Wo


def conv_bn_relu(x, Wmat, bias, kh, kw, stride=1, padding=0, dilation=1,
                 relu=True, out_dtype=jnp.bfloat16):
    N = x.shape[0]
    cols, Ho, Wo = im2col(x, kh, kw, stride, padding, dilation)
    y = fused_matmul([(cols, Wmat)], bias=bias, relu=relu, out_dtype=out_dtype)
    return y.reshape(N, Ho, Wo, Wmat.shape[1])


def maxpool_3x3_s2_p1(x):
    """Separable 3x3/stride-2/pad-1 max pool: 3-tap W max, then 3-tap H max."""
    N, H, W, C = x.shape
    # Input is post-ReLU (>=0); -1e30 border padding is safe here.
    xp = jnp.pad(x, ((0, 0), (1, 1), (1, 1), (0, 0)), constant_values=-1e30)
    Hp = H + 2
    Ho = (H + 2 - 3) // 2 + 1
    Wo = (W + 2 - 3) // 2 + 1
    # W pass
    wslabs = [xp[:, :, j:j + 2 * (Wo - 1) + 1:2, :].reshape(N * Hp * Wo, C)
              for j in range(3)]
    mw = max3_rows(*wslabs).reshape(N, Hp, Wo, C)
    # H pass
    hslabs = [mw[:, i:i + 2 * (Ho - 1) + 1:2, :, :].reshape(N * Ho * Wo, C)
              for i in range(3)]
    return max3_rows(*hslabs).reshape(N, Ho, Wo, C)


def bilinear_matrix(T, S):
    """1-D bilinear interpolation matrix (align_corners=True), shape (T, S)."""
    Wm = np.zeros((T, S), np.float32)
    src = np.zeros((T,)) if T == 1 else np.arange(T) * (S - 1) / (T - 1)
    i0 = np.clip(np.floor(src).astype(int), 0, S - 1)
    i1 = np.minimum(i0 + 1, S - 1)
    frac = src - i0
    for t in range(T):
        Wm[t, i0[t]] += 1.0 - frac[t]
        Wm[t, i1[t]] += frac[t]
    return jnp.asarray(Wm)


def pool_matrix(B, S):
    """1-D adaptive average pool matrix (PyTorch semantics), shape (B, S)."""
    A = np.zeros((B, S), np.float32)
    for j in range(B):
        s = (j * S) // B
        e = -(-((j + 1) * S) // B)
        A[j, s:e] = 1.0 / (e - s)
    return jnp.asarray(A)


def apply_sep_spatial(x, Ah, Aw, out_dtype=jnp.bfloat16):
    """y[n,th,tw,c] = sum_{h,w} Ah[th,h] Aw[tw,w] x[n,h,w,c] via two lane-dense
    matmuls (the wide N*...*C operand always sits on the lanes)."""
    N, H, W, C = x.shape
    TH, TW = Ah.shape[0], Aw.shape[0]
    xw = jnp.transpose(x, (2, 0, 1, 3)).reshape(W, N * H * C)
    yw = fused_matmul([(Aw, xw)], out_dtype=jnp.bfloat16).reshape(TW, N, H, C)
    xh = jnp.transpose(yw, (2, 1, 0, 3)).reshape(H, N * TW * C)
    yh = fused_matmul([(Ah, xh)], out_dtype=out_dtype).reshape(TH, N, TW, C)
    return jnp.transpose(yh, (1, 0, 2, 3))


def bottleneck(x, bp, stride=1, dilation=1):
    """Bottleneck with the downsample conv fused into the conv3 kernel."""
    N, H, W, C = x.shape
    # conv1 1x1 + BN + ReLU
    h1 = fused_matmul([(x.reshape(N * H * W, C), bp['w1'])],
                      bias=bp['b1'], relu=True).reshape(N, H, W, LANES)
    # conv2 3x3 (stride/dilation) + BN + ReLU
    cols, Ho, Wo = im2col(h1, 3, 3, stride, dilation, dilation)
    h2 = fused_matmul([(cols, bp['w2'])], bias=bp['b2'], relu=True)
    # conv3 + BN3  and  downsample conv + BNd  fused in ONE dual-matmul kernel,
    # followed by the residual add (implicit) and ReLU.
    xs = x if stride == 1 else x[:, ::stride, ::stride, :]
    a2 = xs.reshape(N * Ho * Wo, C)
    out = fused_matmul([(h2, bp['w3']), (a2, bp['wd'])],
                       bias=bp['b3d'], relu=True)
    return out.reshape(N, Ho, Wo, LANES)


def _ppm_mask(N, bins, red, C):
    """Block-diagonal (spatial-block x channel-slice) 0/1 mask for batched PPM."""
    sumB = sum(bins)
    m = np.zeros((sumB, sumB, C), np.float32)
    off = 0
    for k, b in enumerate(bins):
        m[off:off + b, off:off + b, k * red:(k + 1) * red] = 1.0
        off += b
    m = np.broadcast_to(m[None], (N, sumB, sumB, C))
    return jnp.asarray(np.ascontiguousarray(m).reshape(N * sumB * sumB, C))


def ppm_forward(x, ppm_w, ppm_b, bins):
    N, H, W, C = x.shape
    sumB = sum(bins)
    # Batched adaptive average pooling for all bins (one separable pass).
    Ah = jnp.concatenate([pool_matrix(b, H) for b in bins], axis=0)
    Aw = jnp.concatenate([pool_matrix(b, W) for b in bins], axis=0)
    pooled = apply_sep_spatial(x, Ah, Aw)                 # (N, sumB, sumB, C)
    # Batched 1x1 reduction convs (+BN+ReLU) with block-diagonal mask fused.
    red = ppm_w.shape[1] // len(bins)
    mask = _ppm_mask(N, bins, red, ppm_w.shape[1])
    z = fused_matmul([(pooled.reshape(N * sumB * sumB, C), ppm_w)],
                     bias=ppm_b, relu=True, mult=mask)
    z = z.reshape(N, sumB, sumB, ppm_w.shape[1])
    # Batched block-diagonal bilinear upsample for all bins (one pass).
    Ah_up = jnp.concatenate([bilinear_matrix(H, b) for b in bins], axis=1)
    Aw_up = jnp.concatenate([bilinear_matrix(W, b) for b in bins], axis=1)
    up = apply_sep_spatial(z, Ah_up, Aw_up)               # (N, H, W, nb*red)
    return jnp.concatenate([x, up], axis=-1)


# ----------------------------------------------------------------------------
# Parameter initialization (synthetic, deterministic) + one-time prep
# ----------------------------------------------------------------------------
def init_conv(key, kh, kw, cin, cout):
    return 0.1 * jax.random.normal(key, (kh, kw, cin, cout), jnp.float32)


def init_bn(key, c):
    k1, k2, k3, k4 = jax.random.split(key, 4)
    gamma = 1.0 + 0.1 * jax.random.normal(k1, (c,), jnp.float32)
    beta = 0.1 * jax.random.normal(k2, (c,), jnp.float32)
    mean = 0.1 * jax.random.normal(k3, (c,), jnp.float32)
    var = 1.0 + 0.1 * jax.random.uniform(k4, (c,), jnp.float32)
    return (gamma, beta, mean, var)


def init_bottleneck(key, cin, cmid, cout):
    ks = jax.random.split(key, 8)
    return dict(
        w1=init_conv(ks[0], 1, 1, cin, cmid), bn1=init_bn(ks[1], cmid),
        w2=init_conv(ks[2], 3, 3, cmid, cmid), bn2=init_bn(ks[3], cmid),
        w3=init_conv(ks[4], 1, 1, cmid, cout), bn3=init_bn(ks[5], cout),
        wd=init_conv(ks[6], 1, 1, cin, cout), bnd=init_bn(ks[7], cout),
    )


def init_params(key, bins, classes):
    # Scaled-down channel plan with the structure of a ResNet-50 PSPNet.
    ks = jax.random.split(key, 20)
    fea = 128
    red = fea // len(bins)
    return dict(
        conv0=init_conv(ks[0], 7, 7, 3, 8), bn0=init_bn(ks[1], 8),
        layer1=init_bottleneck(ks[2], 8, 4, 16),
        layer2=init_bottleneck(ks[3], 16, 8, 32),
        layer3=init_bottleneck(ks[4], 32, 16, 64),
        layer4=init_bottleneck(ks[5], 64, 32, fea),
        ppm=[(init_conv(jax.random.fold_in(ks[6], i), 1, 1, fea, red),
              init_bn(jax.random.fold_in(ks[7], i), red))
             for i, _ in enumerate(bins)],
        cls_w1=init_conv(ks[8], 3, 3, 2 * fea, 32), cls_bn=init_bn(ks[9], 32),
        cls_w2=init_conv(ks[10], 1, 1, 32, classes),
        cls_b2=0.1 * jax.random.normal(ks[11], (classes,), jnp.float32),
    )


def prepare_params(P, bins, eps=1e-5):
    """One-time prep (outside jit): fold BN into weights, pad K/N to 128
    multiples, cast weights to bf16, merge conv3/downsample biases."""
    def fold_conv(w, bn=None, bias=None, cin_pad=None, cout_pad=LANES):
        kh, kw, cin, cout = w.shape
        if bn is not None:
            gamma, beta, mean, var = bn
            scale = gamma * jax.lax.rsqrt(var + eps)
            shift = beta - mean * scale
            w = w * scale[None, None, None, :]
        else:
            shift = bias if bias is not None else jnp.zeros((cout,), jnp.float32)
        if cin_pad is not None and cin_pad > cin:
            w = jnp.pad(w, ((0, 0), (0, 0), (0, cin_pad - cin), (0, 0)))
        if cout_pad > cout:
            w = jnp.pad(w, ((0, 0), (0, 0), (0, 0), (0, cout_pad - cout)))
            shift = jnp.pad(shift, (0, cout_pad - cout))
        K = kh * kw * w.shape[2]
        Wmat = w.reshape(K, w.shape[3])
        Kp = _round_up(K, LANES)
        if Kp != K:
            Wmat = jnp.pad(Wmat, ((0, Kp - K), (0, 0)))
        return Wmat.astype(jnp.bfloat16), shift.reshape(1, -1).astype(jnp.float32)

    def prep_block(p):
        w1, b1 = fold_conv(p['w1'], p['bn1'], cin_pad=LANES)
        w2, b2 = fold_conv(p['w2'], p['bn2'], cin_pad=LANES)
        w3, b3 = fold_conv(p['w3'], p['bn3'], cin_pad=LANES)
        wd, bd = fold_conv(p['wd'], p['bnd'], cin_pad=LANES)
        return dict(w1=w1, b1=b1, w2=w2, b2=b2, w3=w3, wd=wd, b3d=b3 + bd)

    PP = dict(
        conv0=fold_conv(P['conv0'], P['bn0']),
        layer1=prep_block(P['layer1']),
        layer2=prep_block(P['layer2']),
        layer3=prep_block(P['layer3']),
        layer4=prep_block(P['layer4']),
    )
    # PPM: batched (fea -> nb*red) reduction weight, BN folded, per-bin columns.
    ws, bs = [], []
    for (w, bn) in P['ppm']:
        gamma, beta, mean, var = bn
        scale = gamma * jax.lax.rsqrt(var + eps)
        ws.append(w[0, 0] * scale[None, :])
        bs.append(beta - mean * scale)
    PP['ppm_w'] = jnp.concatenate(ws, axis=1).astype(jnp.bfloat16)
    PP['ppm_b'] = jnp.concatenate(bs).reshape(1, -1).astype(jnp.float32)
    PP['cls1_w'], PP['cls1_b'] = fold_conv(P['cls_w1'], P['cls_bn'])
    PP['cls2_w'], PP['cls2_b'] = fold_conv(P['cls_w2'], bn=None,
                                           bias=P['cls_b2'], cin_pad=LANES)
    return PP


# ----------------------------------------------------------------------------
# PSPNet_TL forward (y=None inference path -> returns logits, like the module)
# ----------------------------------------------------------------------------
def pspnet_tl_forward(x_nchw, PP, bins=(1, 2, 3, 6), zoom_factor=8, classes=2):
    N, _, H, W = x_nchw.shape
    h = (H - 1) // 8 * zoom_factor + 1
    w = (W - 1) // 8 * zoom_factor + 1

    x = jnp.transpose(x_nchw, (0, 2, 3, 1))                        # -> NHWC

    # layer0: 7x7 conv s2 (BN+ReLU fused) + separable 3x3 maxpool s2
    x = conv_bn_relu(x, PP['conv0'][0], PP['conv0'][1], 7, 7,
                     stride=2, padding=3)
    x = maxpool_3x3_s2_p1(x)

    # layer1..layer4 (output stride 8; layer3/layer4 dilated)
    x = bottleneck(x, PP['layer1'], stride=1, dilation=1)
    x = bottleneck(x, PP['layer2'], stride=2, dilation=1)
    x_tmp = bottleneck(x, PP['layer3'], stride=1, dilation=2)
    x = bottleneck(x_tmp, PP['layer4'], stride=1, dilation=4)

    # PPM (batched pools / reduction / upsample)
    x = ppm_forward(x, PP['ppm_w'], PP['ppm_b'], bins)

    # cls head: 3x3 conv + BN + ReLU
    x = conv_bn_relu(x, PP['cls1_w'], PP['cls1_b'], 3, 3, padding=1)
    # TODO(synk): nn.Dropout2d(p=0.1) treated as identity (inference semantics).

    # Swap: bilinear upsample (linear, rows sum to 1) commutes with the 1x1
    # classifier conv (+bias), so upsample the lane-dense 128-ch features first
    # and run the classifier at full resolution (big-M, multi-step grid).
    if zoom_factor != 1:
        x = apply_sep_spatial(x, bilinear_matrix(h, x.shape[1]),
                              bilinear_matrix(w, x.shape[2]))
    Nn, Hh, Ww, Cc = x.shape
    logits = fused_matmul([(x.reshape(Nn * Hh * Ww, Cc), PP['cls2_w'])],
                          bias=PP['cls2_b'], relu=False,
                          out_dtype=jnp.float32)
    logits = logits[:, :classes].reshape(Nn, Hh, Ww, classes)

    # NOTE: the torch module's aux head output is discarded when y is None;
    # it is omitted here (dead code) so no wasted pallas_calls are launched.
    del x_tmp
    return jnp.transpose(logits, (0, 3, 1, 2))                     # -> NCHW


if __name__ == "__main__":
    key = jax.random.PRNGKey(0)
    k_param, k_x = jax.random.split(key)

    bins = (1, 2, 3, 6)
    classes = 2
    raw_params = init_params(k_param, bins, classes)
    prepped = prepare_params(raw_params, bins)          # one-time, outside jit

    # Small input consistent with PSPNet conventions: (H-1) % 8 == 0.
    x = jax.random.normal(k_x, (2, 3, 33, 33), jnp.float32)

    fwd = jax.jit(pspnet_tl_forward,
                  static_argnames=("bins", "zoom_factor", "classes"))
    out = fwd(x, prepped, bins=bins, zoom_factor=8, classes=classes)
    out = jax.block_until_ready(out)

    assert out.shape == (2, classes, 33, 33), out.shape
    assert jnp.all(jnp.isfinite(out))
    print("KERNEL_OK")
</pallas_src>

<mosaic_0001>
module attributes {stable_mosaic.version = 11 : i64} {
  func.func @kernel(%arg0: i32, %arg1: memref<208x256xbf16, #tpu.memory_space<vmem>>, %arg2: memref<256x128xbf16, #tpu.memory_space<vmem>>, %arg3: memref<1x128xf32, #tpu.memory_space<vmem>>, %arg4: memref<208x128xbf16, #tpu.memory_space<vmem>>) attributes {dimension_semantics = [#tpu.dimension_semantics<parallel>], iteration_bounds = array<i64: 3>, scalar_prefetch = 0 : i64, scratch_operands = 0 : i64, tpu.core_type = #tpu.core_type<tc>, window_params = [{transform_indices = @transform_0, window_bounds = array<i64: 208, 256>}, {pipeline_mode = #tpu.pipeline_mode<synchronous>, transform_indices = @transform_1, window_bounds = array<i64: 256, 128>}, {pipeline_mode = #tpu.pipeline_mode<synchronous>, transform_indices = @transform_2, window_bounds = array<i64: 1, 128>}, {transform_indices = @transform_3, window_bounds = array<i64: 208, 128>}]} {
    %c0 = arith.constant 0 : index
    %c0_0 = arith.constant 0 : index
    %0 = vector.load %arg1[%c0, %c0_0] : memref<208x256xbf16, #tpu.memory_space<vmem>>, vector<208x256xbf16>
    %c0_1 = arith.constant 0 : index
    %c0_2 = arith.constant 0 : index
    %1 = vector.load %arg2[%c0_1, %c0_2] : memref<256x128xbf16, #tpu.memory_space<vmem>>, vector<256x128xbf16>
    %cst = arith.constant dense<0.000000e+00> : vector<208x128xf32>
    %2 = tpu.matmul %0, %1, %cst {dimension_numbers = #tpu.dot_dimension_numbers<[1], [0], [0], [1], [0, 0, 1, 1], [], []>} : vector<208x256xbf16>, vector<256x128xbf16>, vector<208x128xf32> -> vector<208x128xf32>
    %c0_3 = arith.constant 0 : index
    %c0_4 = arith.constant 0 : index
    %3 = vector.load %arg3[%c0_3, %c0_4] : memref<1x128xf32, #tpu.memory_space<vmem>>, vector<1x128xf32>
    %4 = vector.broadcast %3 : vector<1x128xf32> to vector<208x128xf32>
    %5 = arith.addf %2, %4 : vector<208x128xf32>
    %cst_5 = arith.constant 0.000000e+00 : f32
    %6 = vector.broadcast %cst_5 : f32 to vector<208x128xf32>
    %7 = arith.maximumf %5, %6 : vector<208x128xf32>
    %8 = arith.truncf %7 : vector<208x128xf32> to vector<208x128xbf16>
    %c0_6 = arith.constant 0 : index
    %c0_7 = arith.constant 0 : index
    %9 = vector.load %arg4[%c0_6, %c0_7] : memref<208x128xbf16, #tpu.memory_space<vmem>>, vector<208x128xbf16>
    tpu.vector_store %arg4[%c0_6, %c0_7], %8 {strides = array<i32>} : memref<208x128xbf16, #tpu.memory_space<vmem>>, vector<208x128xbf16>,
    return
  }
  func.func @transform_0(%arg0: i32) -> (i32, i32) {
    %c0_i32 = arith.constant 0 : i32
    %c0_i32_0 = arith.constant 0 : i32
    return %arg0, %c0_i32 : i32, i32
  }
  func.func @transform_1(%arg0: i32) -> (i32, i32) {
    %c0_i32 = arith.constant 0 : i32
    %c0_i32_0 = arith.constant 0 : i32
    %c0_i32_1 = arith.constant 0 : i32
    return %c0_i32, %c0_i32_0 : i32, i32
  }
  func.func @transform_2(%arg0: i32) -> (i32, i32) {
    %c0_i32 = arith.constant 0 : i32
    %c0_i32_0 = arith.constant 0 : i32
    %c0_i32_1 = arith.constant 0 : i32
    return %c0_i32, %c0_i32_0 : i32, i32
  }
  func.func @transform_3(%arg0: i32) -> (i32, i32) {
    %c0_i32 = arith.constant 0 : i32
    %c0_i32_0 = arith.constant 0 : i32
    return %arg0, %c0_i32 : i32, i32
  }
}

module attributes {stable_mosaic.version = 11 : i64} {
  func.func @_max3_kernel(%arg0: i32, %arg1: memref<176x128xbf16, #tpu.memory_space<vmem>>, %arg2: memref<176x128xbf16, #tpu.memory_space<vmem>>, %arg3: memref<176x128xbf16, #tpu.memory_space<vmem>>, %arg4: memref<176x128xbf16, #tpu.memory_space<vmem>>) attributes {dimension_semantics = [#tpu.dimension_semantics<parallel>], iteration_bounds = array<i64: 2>, scalar_prefetch = 0 : i64, scratch_operands = 0 : i64, tpu.core_type = #tpu.core_type<tc>, window_params = [{transform_indices = @transform_0, window_bounds = array<i64: 176, 128>}, {transform_indices = @transform_1, window_bounds = array<i64: 176, 128>}, {transform_indices = @transform_2, window_bounds = array<i64: 176, 128>}, {transform_indices = @transform_3, window_bounds = array<i64: 176, 128>}]} {
    %c0 = arith.constant 0 : index
    %c0_0 = arith.constant 0 : index
    %0 = vector.load %arg1[%c0, %c0_0] : memref<176x128xbf16, #tpu.memory_space<vmem>>, vector<176x128xbf16>
    %c0_1 = arith.constant 0 : index
    %c0_2 = arith.constant 0 : index
    %1 = vector.load %arg2[%c0_1, %c0_2] : memref<176x128xbf16, #tpu.memory_space<vmem>>, vector<176x128xbf16>
    %2 = arith.maximumf %0, %1 : vector<176x128xbf16>
    %c0_3 = arith.constant 0 : index
    %c0_4 = arith.constant 0 : index
    %3 = vector.load %arg3[%c0_3, %c0_4] : memref<176x128xbf16, #tpu.memory_space<vmem>>, vector<176x128xbf16>
    %4 = arith.maximumf %2, %3 : vector<176x128xbf16>
    %c0_5 = arith.constant 0 : index
    %c0_6 = arith.constant 0 : index
    %5 = vector.load %arg4[%c0_5, %c0_6] : memref<176x128xbf16, #tpu.memory_space<vmem>>, vector<176x128xbf16>
    tpu.vector_store %arg4[%c0_5, %c0_6], %4 {strides = array<i32>} : memref<176x128xbf16, #tpu.memory_space<vmem>>, vector<176x128xbf16>,
    return
  }
  func.func @transform_0(%arg0: i32) -> (i32, i32) {
    %c0_i32 = arith.constant 0 : i32
    %c0_i32_0 = arith.constant 0 : i32
    return %arg0, %c0_i32 : i32, i32
  }
  func.func @transform_1(%arg0: i32) -> (i32, i32) {
    %c0_i32 = arith.constant 0 : i32
    %c0_i32_0 = arith.constant 0 : i32
    return %arg0, %c0_i32 : i32, i32
  }
  func.func @transform_2(%arg0: i32) -> (i32, i32) {
    %c0_i32 = arith.constant 0 : i32
    %c0_i32_0 = arith.constant 0 : i32
    return %arg0, %c0_i32 : i32, i32
  }
  func.func @transform_3(%arg0: i32) -> (i32, i32) {
    %c0_i32 = arith.constant 0 : i32
    %c0_i32_0 = arith.constant 0 : i32
    return %arg0, %c0_i32 : i32, i32
  }
}

module attributes {stable_mosaic.version = 11 : i64} {
  func.func @_max3_kernel(%arg0: i32, %arg1: memref<96x128xbf16, #tpu.memory_space<vmem>>, %arg2: memref<96x128xbf16, #tpu.memory_space<vmem>>, %arg3: memref<96x128xbf16, #tpu.memory_space<vmem>>, %arg4: memref<96x128xbf16, #tpu.memory_space<vmem>>) attributes {dimension_semantics = [#tpu.dimension_semantics<parallel>], iteration_bounds = array<i64: 2>, scalar_prefetch = 0 : i64, scratch_operands = 0 : i64, tpu.core_type = #tpu.core_type<tc>, window_params = [{transform_indices = @transform_0, window_bounds = array<i64: 96, 128>}, {transform_indices = @transform_1, window_bounds = array<i64: 96, 128>}, {transform_indices = @transform_2, window_bounds = array<i64: 96, 128>}, {transform_indices = @transform_3, window_bounds = array<i64: 96, 128>}]} {
    %c0 = arith.constant 0 : index
    %c0_0 = arith.constant 0 : index
    %0 = vector.load %arg1[%c0, %c0_0] : memref<96x128xbf16, #tpu.memory_space<vmem>>, vector<96x128xbf16>
    %c0_1 = arith.constant 0 : index
    %c0_2 = arith.constant 0 : index
    %1 = vector.load %arg2[%c0_1, %c0_2] : memref<96x128xbf16, #tpu.memory_space<vmem>>, vector<96x128xbf16>
    %2 = arith.maximumf %0, %1 : vector<96x128xbf16>
    %c0_3 = arith.constant 0 : index
    %c0_4 = arith.constant 0 : index
    %3 = vector.load %arg3[%c0_3, %c0_4] : memref<96x128xbf16, #tpu.memory_space<vmem>>, vector<96x128xbf16>
    %4 = arith.maximumf %2, %3 : vector<96x128xbf16>
    %c0_5 = arith.constant 0 : index
    %c0_6 = arith.constant 0 : index
    %5 = vector.load %arg4[%c0_5, %c0_6] : memref<96x128xbf16, #tpu.memory_space<vmem>>, vector<96x128xbf16>
    tpu.vector_store %arg4[%c0_5, %c0_6], %4 {strides = array<i32>} : memref<96x128xbf16, #tpu.memory_space<vmem>>, vector<96x128xbf16>,
    return
  }
  func.func @transform_0(%arg0: i32) -> (i32, i32) {
    %c0_i32 = arith.constant 0 : i32
    %c0_i32_0 = arith.constant 0 : i32
    return %arg0, %c0_i32 : i32, i32
  }
  func.func @transform_1(%arg0: i32) -> (i32, i32) {
    %c0_i32 = arith.constant 0 : i32
    %c0_i32_0 = arith.constant 0 : i32
    return %arg0, %c0_i32 : i32, i32
  }
  func.func @transform_2(%arg0: i32) -> (i32, i32) {
    %c0_i32 = arith.constant 0 : i32
    %c0_i32_0 = arith.constant 0 : i32
    return %arg0, %c0_i32 : i32, i32
  }
  func.func @transform_3(%arg0: i32) -> (i32, i32) {
    %c0_i32 = arith.constant 0 : i32
    %c0_i32_0 = arith.constant 0 : i32
    return %arg0, %c0_i32 : i32, i32
  }
}

module attributes {stable_mosaic.version = 11 : i64} {
  func.func @kernel(%arg0: i32, %arg1: memref<96x128xbf16, #tpu.memory_space<vmem>>, %arg2: memref<128x128xbf16, #tpu.memory_space<vmem>>, %arg3: memref<1x128xf32, #tpu.memory_space<vmem>>, %arg4: memref<96x128xbf16, #tpu.memory_space<vmem>>) attributes {dimension_semantics = [#tpu.dimension_semantics<parallel>], iteration_bounds = array<i64: 2>, scalar_prefetch = 0 : i64, scratch_operands = 0 : i64, tpu.core_type = #tpu.core_type<tc>, window_params = [{transform_indices = @transform_0, window_bounds = array<i64: 96, 128>}, {pipeline_mode = #tpu.pipeline_mode<synchronous>, transform_indices = @transform_1, window_bounds = array<i64: 128, 128>}, {pipeline_mode = #tpu.pipeline_mode<synchronous>, transform_indices = @transform_2, window_bounds = array<i64: 1, 128>}, {transform_indices = @transform_3, window_bounds = array<i64: 96, 128>}]} {
    %c0 = arith.constant 0 : index
    %c0_0 = arith.constant 0 : index
    %0 = vector.load %arg1[%c0, %c0_0] : memref<96x128xbf16, #tpu.memory_space<vmem>>, vector<96x128xbf16>
    %c0_1 = arith.constant 0 : index
    %c0_2 = arith.constant 0 : index
    %1 = vector.load %arg2[%c0_1, %c0_2] : memref<128x128xbf16, #tpu.memory_space<vmem>>, vector<128x128xbf16>
    %cst = arith.constant dense<0.000000e+00> : vector<96x128xf32>
    %2 = tpu.matmul %0, %1, %cst {dimension_numbers = #tpu.dot_dimension_numbers<[1], [0], [0], [1], [0, 0, 1, 1], [], []>} : vector<96x128xbf16>, vector<128x128xbf16>, vector<96x128xf32> -> vector<96x128xf32>
    %c0_3 = arith.constant 0 : index
    %c0_4 = arith.constant 0 : index
    %3 = vector.load %arg3[%c0_3, %c0_4] : memref<1x128xf32, #tpu.memory_space<vmem>>, vector<1x128xf32>
    %4 = vector.broadcast %3 : vector<1x128xf32> to vector<96x128xf32>
    %5 = arith.addf %2, %4 : vector<96x128xf32>
    %cst_5 = arith.constant 0.000000e+00 : f32
    %6 = vector.broadcast %cst_5 : f32 to vector<96x128xf32>
    %7 = arith.maximumf %5, %6 : vector<96x128xf32>
    %8 = arith.truncf %7 : vector<96x128xf32> to vector<96x128xbf16>
    %c0_6 = arith.constant 0 : index
    %c0_7 = arith.constant 0 : index
    %9 = vector.load %arg4[%c0_6, %c0_7] : memref<96x128xbf16, #tpu.memory_space<vmem>>, vector<96x128xbf16>
    tpu.vector_store %arg4[%c0_6, %c0_7], %8 {strides = array<i32>} : memref<96x128xbf16, #tpu.memory_space<vmem>>, vector<96x128xbf16>,
    return
  }
  func.func @transform_0(%arg0: i32) -> (i32, i32) {
    %c0_i32 = arith.constant 0 : i32
    %c0_i32_0 = arith.constant 0 : i32
    return %arg0, %c0_i32 : i32, i32
  }
  func.func @transform_1(%arg0: i32) -> (i32, i32) {
    %c0_i32 = arith.constant 0 : i32
    %c0_i32_0 = arith.constant 0 : i32
    %c0_i32_1 = arith.constant 0 : i32
    return %c0_i32, %c0_i32_0 : i32, i32
  }
  func.func @transform_2(%arg0: i32) -> (i32, i32) {
    %c0_i32 = arith.constant 0 : i32
    %c0_i32_0 = arith.constant 0 : i32
    %c0_i32_1 = arith.constant 0 : i32
    return %c0_i32, %c0_i32_0 : i32, i32
  }
  func.func @transform_3(%arg0: i32) -> (i32, i32) {
    %c0_i32 = arith.constant 0 : i32
    %c0_i32_0 = arith.constant 0 : i32
    return %arg0, %c0_i32 : i32, i32
  }
}

module attributes {stable_mosaic.version = 11 : i64} {
  func.func @kernel(%arg0: i32, %arg1: memref<96x1152xbf16, #tpu.memory_space<vmem>>, %arg2: memref<1152x128xbf16, #tpu.memory_space<vmem>>, %arg3: memref<1x128xf32, #tpu.memory_space<vmem>>, %arg4: memref<96x128xbf16, #tpu.memory_space<vmem>>) attributes {dimension_semantics = [#tpu.dimension_semantics<parallel>], iteration_bounds = array<i64: 2>, scalar_prefetch = 0 : i64, scratch_operands = 0 : i64, tpu.core_type = #tpu.core_type<tc>, window_params = [{transform_indices = @transform_0, window_bounds = array<i64: 96, 1152>}, {pipeline_mode = #tpu.pipeline_mode<synchronous>, transform_indices = @transform_1, window_bounds = array<i64: 1152, 128>}, {pipeline_mode = #tpu.pipeline_mode<synchronous>, transform_indices = @transform_2, window_bounds = array<i64: 1, 128>}, {transform_indices = @transform_3, window_bounds = array<i64: 96, 128>}]} {
    %c0 = arith.constant 0 : index
    %c0_0 = arith.constant 0 : index
    %0 = vector.load %arg1[%c0, %c0_0] : memref<96x1152xbf16, #tpu.memory_space<vmem>>, vector<96x1152xbf16>
    %c0_1 = arith.constant 0 : index
    %c0_2 = arith.constant 0 : index
    %1 = vector.load %arg2[%c0_1, %c0_2] : memref<1152x128xbf16, #tpu.memory_space<vmem>>, vector<1152x128xbf16>
    %cst = arith.constant dense<0.000000e+00> : vector<96x128xf32>
    %2 = tpu.matmul %0, %1, %cst {dimension_numbers = #tpu.dot_dimension_numbers<[1], [0], [0], [1], [0, 0, 1, 1], [], []>} : vector<96x1152xbf16>, vector<1152x128xbf16>, vector<96x128xf32> -> vector<96x128xf32>
    %c0_3 = arith.constant 0 : index
    %c0_4 = arith.constant 0 : index
    %3 = vector.load %arg3[%c0_3, %c0_4] : memref<1x128xf32, #tpu.memory_space<vmem>>, vector<1x128xf32>
    %4 = vector.broadcast %3 : vector<1x128xf32> to vector<96x128xf32>
    %5 = arith.addf %2, %4 : vector<96x128xf32>
    %cst_5 = arith.constant 0.000000e+00 : f32
    %6 = vector.broadcast %cst_5 : f32 to vector<96x128xf32>
    %7 = arith.maximumf %5, %6 : vector<96x128xf32>
    %8 = arith.truncf %7 : vector<96x128xf32> to vector<96x128xbf16>
    %c0_6 = arith.constant 0 : index
    %c0_7 = arith.constant 0 : index
    %9 = vector.load %arg4[%c0_6, %c0_7] : memref<96x128xbf16, #tpu.memory_space<vmem>>, vector<96x128xbf16>
    tpu.vector_store %arg4[%c0_6, %c0_7], %8 {strides = array<i32>} : memref<96x128xbf16, #tpu.memory_space<vmem>>, vector<96x128xbf16>,
    return
  }
  func.func @transform_0(%arg0: i32) -> (i32, i32) {
    %c0_i32 = arith.constant 0 : i32
    %c0_i32_0 = arith.constant 0 : i32
    return %arg0, %c0_i32 : i32, i32
  }
  func.func @transform_1(%arg0: i32) -> (i32, i32) {
    %c0_i32 = arith.constant 0 : i32
    %c0_i32_0 = arith.constant 0 : i32
    %c0_i32_1 = arith.constant 0 : i32
    return %c0_i32, %c0_i32_0 : i32, i32
  }
  func.func @transform_2(%arg0: i32) -> (i32, i32) {
    %c0_i32 = arith.constant 0 : i32
    %c0_i32_0 = arith.constant 0 : i32
    %c0_i32_1 = arith.constant 0 : i32
    return %c0_i32, %c0_i32_0 : i32, i32
  }
  func.func @transform_3(%arg0: i32) -> (i32, i32) {
    %c0_i32 = arith.constant 0 : i32
    %c0_i32_0 = arith.constant 0 : i32
    return %arg0, %c0_i32 : i32, i32
  }
}

module attributes {stable_mosaic.version = 11 : i64} {
  func.func @kernel(%arg0: i32, %arg1: memref<96x128xbf16, #tpu.memory_space<vmem>>, %arg2: memref<128x128xbf16, #tpu.memory_space<vmem>>, %arg3: memref<96x128xbf16, #tpu.memory_space<vmem>>, %arg4: memref<128x128xbf16, #tpu.memory_space<vmem>>, %arg5: memref<1x128xf32, #tpu.memory_space<vmem>>, %arg6: memref<96x128xbf16, #tpu.memory_space<vmem>>) attributes {dimension_semantics = [#tpu.dimension_semantics<parallel>], iteration_bounds = array<i64: 2>, scalar_prefetch = 0 : i64, scratch_operands = 0 : i64, tpu.core_type = #tpu.core_type<tc>, window_params = [{transform_indices = @transform_0, window_bounds = array<i64: 96, 128>}, {pipeline_mode = #tpu.pipeline_mode<synchronous>, transform_indices = @transform_1, window_bounds = array<i64: 128, 128>}, {transform_indices = @transform_2, window_bounds = array<i64: 96, 128>}, {pipeline_mode = #tpu.pipeline_mode<synchronous>, transform_indices = @transform_3, window_bounds = array<i64: 128, 128>}, {pipeline_mode = #tpu.pipeline_mode<synchronous>, transform_indices = @transform_4, window_bounds = array<i64: 1, 128>}, {transform_indices = @transform_5, window_bounds = array<i64: 96, 128>}]} {
    %c0 = arith.constant 0 : index
    %c0_0 = arith.constant 0 : index
    %0 = vector.load %arg1[%c0, %c0_0] : memref<96x128xbf16, #tpu.memory_space<vmem>>, vector<96x128xbf16>
    %c0_1 = arith.constant 0 : index
    %c0_2 = arith.constant 0 : index
    %1 = vector.load %arg2[%c0_1, %c0_2] : memref<128x128xbf16, #tpu.memory_space<vmem>>, vector<128x128xbf16>
    %cst = arith.constant dense<0.000000e+00> : vector<96x128xf32>
    %2 = tpu.matmul %0, %1, %cst {dimension_numbers = #tpu.dot_dimension_numbers<[1], [0], [0], [1], [0, 0, 1, 1], [], []>} : vector<96x128xbf16>, vector<128x128xbf16>, vector<96x128xf32> -> vector<96x128xf32>
    %c0_3 = arith.constant 0 : index
    %c0_4 = arith.constant 0 : index
    %3 = vector.load %arg3[%c0_3, %c0_4] : memref<96x128xbf16, #tpu.memory_space<vmem>>, vector<96x128xbf16>
    %c0_5 = arith.constant 0 : index
    %c0_6 = arith.constant 0 : index
    %4 = vector.load %arg4[%c0_5, %c0_6] : memref<128x128xbf16, #tpu.memory_space<vmem>>, vector<128x128xbf16>
    %cst_7 = arith.constant dense<0.000000e+00> : vector<96x128xf32>
    %5 = tpu.matmul %3, %4, %cst_7 {dimension_numbers = #tpu.dot_dimension_numbers<[1], [0], [0], [1], [0, 0, 1, 1], [], []>} : vector<96x128xbf16>, vector<128x128xbf16>, vector<96x128xf32> -> vector<96x128xf32>
    %6 = arith.addf %2, %5 : vector<96x128xf32>
    %c0_8 = arith.constant 0 : index
    %c0_9 = arith.constant 0 : index
    %7 = vector.load %arg5[%c0_8, %c0_9] : memref<1x128xf32, #tpu.memory_space<vmem>>, vector<1x128xf32>
    %8 = vector.broadcast %7 : vector<1x128xf32> to vector<96x128xf32>
    %9 = arith.addf %6, %8 : vector<96x128xf32>
    %cst_10 = arith.constant 0.000000e+00 : f32
    %10 = vector.broadcast %cst_10 : f32 to vector<96x128xf32>
    %11 = arith.maximumf %9, %10 : vector<96x128xf32>
    %12 = arith.truncf %11 : vector<96x128xf32> to vector<96x128xbf16>
    %c0_11 = arith.constant 0 : index
    %c0_12 = arith.constant 0 : index
    %13 = vector.load %arg6[%c0_11, %c0_12] : memref<96x128xbf16, #tpu.memory_space<vmem>>, vector<96x128xbf16>
    tpu.vector_store %arg6[%c0_11, %c0_12], %12 {strides = array<i32>} : memref<96x128xbf16, #tpu.memory_space<vmem>>, vector<96x128xbf16>,
    return
  }
  func.func @transform_0(%arg0: i32) -> (i32, i32) {
    %c0_i32 = arith.constant 0 : i32
    %c0_i32_0 = arith.constant 0 : i32
    return %arg0, %c0_i32 : i32, i32
  }
  func.func @transform_1(%arg0: i32) -> (i32, i32) {
    %c0_i32 = arith.constant 0 : i32
    %c0_i32_0 = arith.constant 0 : i32
    %c0_i32_1 = arith.constant 0 : i32
    return %c0_i32, %c0_i32_0 : i32, i32
  }
  func.func @transform_2(%arg0: i32) -> (i32, i32) {
    %c0_i32 = arith.constant 0 : i32
    %c0_i32_0 = arith.constant 0 : i32
    return %arg0, %c0_i32 : i32, i32
  }
  func.func @transform_3(%arg0: i32) -> (i32, i32) {
    %c0_i32 = arith.constant 0 : i32
    %c0_i32_0 = arith.constant 0 : i32
    %c0_i32_1 = arith.constant 0 : i32
    return %c0_i32, %c0_i32_0 : i32, i32
  }
  func.func @transform_4(%arg0: i32) -> (i32, i32) {
    %c0_i32 = arith.constant 0 : i32
    %c0_i32_0 = arith.constant 0 : i32
    %c0_i32_1 = arith.constant 0 : i32
    return %c0_i32, %c0_i32_0 : i32, i32
  }
  func.func @transform_5(%arg0: i32) -> (i32, i32) {
    %c0_i32 = arith.constant 0 : i32
    %c0_i32_0 = arith.constant 0 : i32
    return %arg0, %c0_i32 : i32, i32
  }
}

module attributes {stable_mosaic.version = 11 : i64} {
  func.func @kernel(%arg0: i32, %arg1: memref<32x128xbf16, #tpu.memory_space<vmem>>, %arg2: memref<128x128xbf16, #tpu.memory_space<vmem>>, %arg3: memref<32x128xbf16, #tpu.memory_space<vmem>>, %arg4: memref<128x128xbf16, #tpu.memory_space<vmem>>, %arg5: memref<1x128xf32, #tpu.memory_space<vmem>>, %arg6: memref<32x128xbf16, #tpu.memory_space<vmem>>) attributes {dimension_semantics = [#tpu.dimension_semantics<parallel>], iteration_bounds = array<i64: 2>, scalar_prefetch = 0 : i64, scratch_operands = 0 : i64, tpu.core_type = #tpu.core_type<tc>, window_params = [{transform_indices = @transform_0, window_bounds = array<i64: 32, 128>}, {pipeline_mode = #tpu.pipeline_mode<synchronous>, transform_indices = @transform_1, window_bounds = array<i64: 128, 128>}, {transform_indices = @transform_2, window_bounds = array<i64: 32, 128>}, {pipeline_mode = #tpu.pipeline_mode<synchronous>, transform_indices = @transform_3, window_bounds = array<i64: 128, 128>}, {pipeline_mode = #tpu.pipeline_mode<synchronous>, transform_indices = @transform_4, window_bounds = array<i64: 1, 128>}, {transform_indices = @transform_5, window_bounds = array<i64: 32, 128>}]} {
    %c0 = arith.constant 0 : index
    %c0_0 = arith.constant 0 : index
    %0 = vector.load %arg1[%c0, %c0_0] : memref<32x128xbf16, #tpu.memory_space<vmem>>, vector<32x128xbf16>
    %c0_1 = arith.constant 0 : index
    %c0_2 = arith.constant 0 : index
    %1 = vector.load %arg2[%c0_1, %c0_2] : memref<128x128xbf16, #tpu.memory_space<vmem>>, vector<128x128xbf16>
    %cst = arith.constant dense<0.000000e+00> : vector<32x128xf32>
    %2 = tpu.matmul %0, %1, %cst {dimension_numbers = #tpu.dot_dimension_numbers<[1], [0], [0], [1], [0, 0, 1, 1], [], []>} : vector<32x128xbf16>, vector<128x128xbf16>, vector<32x128xf32> -> vector<32x128xf32>
    %c0_3 = arith.constant 0 : index
    %c0_4 = arith.constant 0 : index
    %3 = vector.load %arg3[%c0_3, %c0_4] : memref<32x128xbf16, #tpu.memory_space<vmem>>, vector<32x128xbf16>
    %c0_5 = arith.constant 0 : index
    %c0_6 = arith.constant 0 : index
    %4 = vector.load %arg4[%c0_5, %c0_6] : memref<128x128xbf16, #tpu.memory_space<vmem>>, vector<128x128xbf16>
    %cst_7 = arith.constant dense<0.000000e+00> : vector<32x128xf32>
    %5 = tpu.matmul %3, %4, %cst_7 {dimension_numbers = #tpu.dot_dimension_numbers<[1], [0], [0], [1], [0, 0, 1, 1], [], []>} : vector<32x128xbf16>, vector<128x128xbf16>, vector<32x128xf32> -> vector<32x128xf32>
    %6 = arith.addf %2, %5 : vector<32x128xf32>
    %c0_8 = arith.constant 0 : index
    %c0_9 = arith.constant 0 : index
    %7 = vector.load %arg5[%c0_8, %c0_9] : memref<1x128xf32, #tpu.memory_space<vmem>>, vector<1x128xf32>
    %8 = vector.broadcast %7 : vector<1x128xf32> to vector<32x128xf32>
    %9 = arith.addf %6, %8 : vector<32x128xf32>
    %cst_10 = arith.constant 0.000000e+00 : f32
    %10 = vector.broadcast %cst_10 : f32 to vector<32x128xf32>
    %11 = arith.maximumf %9, %10 : vector<32x128xf32>
    %12 = arith.truncf %11 : vector<32x128xf32> to vector<32x128xbf16>
    %c0_11 = arith.constant 0 : index
    %c0_12 = arith.constant 0 : index
    %13 = vector.load %arg6[%c0_11, %c0_12] : memref<32x128xbf16, #tpu.memory_space<vmem>>, vector<32x128xbf16>
    tpu.vector_store %arg6[%c0_11, %c0_12], %12 {strides = array<i32>} : memref<32x128xbf16, #tpu.memory_space<vmem>>, vector<32x128xbf16>,
    return
  }
  func.func @transform_0(%arg0: i32) -> (i32, i32) {
    %c0_i32 = arith.constant 0 : i32
    %c0_i32_0 = arith.constant 0 : i32
    return %arg0, %c0_i32 : i32, i32
  }
  func.func @transform_1(%arg0: i32) -> (i32, i32) {
    %c0_i32 = arith.constant 0 : i32
    %c0_i32_0 = arith.constant 0 : i32
    %c0_i32_1 = arith.constant 0 : i32
    return %c0_i32, %c0_i32_0 : i32, i32
  }
  func.func @transform_2(%arg0: i32) -> (i32, i32) {
    %c0_i32 = arith.constant 0 : i32
    %c0_i32_0 = arith.constant 0 : i32
    return %arg0, %c0_i32 : i32, i32
  }
  func.func @transform_3(%arg0: i32) -> (i32, i32) {
    %c0_i32 = arith.constant 0 : i32
    %c0_i32_0 = arith.constant 0 : i32
    %c0_i32_1 = arith.constant 0 : i32
    return %c0_i32, %c0_i32_0 : i32, i32
  }
  func.func @transform_4(%arg0: i32) -> (i32, i32) {
    %c0_i32 = arith.constant 0 : i32
    %c0_i32_0 = arith.constant 0 : i32
    %c0_i32_1 = arith.constant 0 : i32
    return %c0_i32, %c0_i32_0 : i32, i32
  }
  func.func @transform_5(%arg0: i32) -> (i32, i32) {
    %c0_i32 = arith.constant 0 : i32
    %c0_i32_0 = arith.constant 0 : i32
    return %arg0, %c0_i32 : i32, i32
  }
}

module attributes {stable_mosaic.version = 11 : i64} {
  func.func @kernel(%arg0: i32, %arg1: memref<32x1152xbf16, #tpu.memory_space<vmem>>, %arg2: memref<1152x128xbf16, #tpu.memory_space<vmem>>, %arg3: memref<1x128xf32, #tpu.memory_space<vmem>>, %arg4: memref<32x128xbf16, #tpu.memory_space<vmem>>) attributes {dimension_semantics = [#tpu.dimension_semantics<parallel>], iteration_bounds = array<i64: 2>, scalar_prefetch = 0 : i64, scratch_operands = 0 : i64, tpu.core_type = #tpu.core_type<tc>, window_params = [{transform_indices = @transform_0, window_bounds = array<i64: 32, 1152>}, {pipeline_mode = #tpu.pipeline_mode<synchronous>, transform_indices = @transform_1, window_bounds = array<i64: 1152, 128>}, {pipeline_mode = #tpu.pipeline_mode<synchronous>, transform_indices = @transform_2, window_bounds = array<i64: 1, 128>}, {transform_indices = @transform_3, window_bounds = array<i64: 32, 128>}]} {
    %c0 = arith.constant 0 : index
    %c0_0 = arith.constant 0 : index
    %0 = vector.load %arg1[%c0, %c0_0] : memref<32x1152xbf16, #tpu.memory_space<vmem>>, vector<32x1152xbf16>
    %c0_1 = arith.constant 0 : index
    %c0_2 = arith.constant 0 : index
    %1 = vector.load %arg2[%c0_1, %c0_2] : memref<1152x128xbf16, #tpu.memory_space<vmem>>, vector<1152x128xbf16>
    %cst = arith.constant dense<0.000000e+00> : vector<32x128xf32>
    %2 = tpu.matmul %0, %1, %cst {dimension_numbers = #tpu.dot_dimension_numbers<[1], [0], [0], [1], [0, 0, 1, 1], [], []>} : vector<32x1152xbf16>, vector<1152x128xbf16>, vector<32x128xf32> -> vector<32x128xf32>
    %c0_3 = arith.constant 0 : index
    %c0_4 = arith.constant 0 : index
    %3 = vector.load %arg3[%c0_3, %c0_4] : memref<1x128xf32, #tpu.memory_space<vmem>>, vector<1x128xf32>
    %4 = vector.broadcast %3 : vector<1x128xf32> to vector<32x128xf32>
    %5 = arith.addf %2, %4 : vector<32x128xf32>
    %cst_5 = arith.constant 0.000000e+00 : f32
    %6 = vector.broadcast %cst_5 : f32 to vector<32x128xf32>
    %7 = arith.maximumf %5, %6 : vector<32x128xf32>
    %8 = arith.truncf %7 : vector<32x128xf32> to vector<32x128xbf16>
    %c0_6 = arith.constant 0 : index
    %c0_7 = arith.constant 0 : index
    %9 = vector.load %arg4[%c0_6, %c0_7] : memref<32x128xbf16, #tpu.memory_space<vmem>>, vector<32x128xbf16>
    tpu.vector_store %arg4[%c0_6, %c0_7], %8 {strides = array<i32>} : memref<32x128xbf16, #tpu.memory_space<vmem>>, vector<32x128xbf16>,
    return
  }
  func.func @transform_0(%arg0: i32) -> (i32, i32) {
    %c0_i32 = arith.constant 0 : i32
    %c0_i32_0 = arith.constant 0 : i32
    return %arg0, %c0_i32 : i32, i32
  }
  func.func @transform_1(%arg0: i32) -> (i32, i32) {
    %c0_i32 = arith.constant 0 : i32
    %c0_i32_0 = arith.constant 0 : i32
    %c0_i32_1 = arith.constant 0 : i32
    return %c0_i32, %c0_i32_0 : i32, i32
  }
  func.func @transform_2(%arg0: i32) -> (i32, i32) {
    %c0_i32 = arith.constant 0 : i32
    %c0_i32_0 = arith.constant 0 : i32
    %c0_i32_1 = arith.constant 0 : i32
    return %c0_i32, %c0_i32_0 : i32, i32
  }
  func.func @transform_3(%arg0: i32) -> (i32, i32) {
    %c0_i32 = arith.constant 0 : i32
    %c0_i32_0 = arith.constant 0 : i32
    return %arg0, %c0_i32 : i32, i32
  }
}

module attributes {stable_mosaic.version = 11 : i64} {
  func.func @kernel(%arg0: i32, %arg1: memref<32x128xbf16, #tpu.memory_space<vmem>>, %arg2: memref<128x128xbf16, #tpu.memory_space<vmem>>, %arg3: memref<1x128xf32, #tpu.memory_space<vmem>>, %arg4: memref<32x128xbf16, #tpu.memory_space<vmem>>) attributes {dimension_semantics = [#tpu.dimension_semantics<parallel>], iteration_bounds = array<i64: 2>, scalar_prefetch = 0 : i64, scratch_operands = 0 : i64, tpu.core_type = #tpu.core_type<tc>, window_params = [{transform_indices = @transform_0, window_bounds = array<i64: 32, 128>}, {pipeline_mode = #tpu.pipeline_mode<synchronous>, transform_indices = @transform_1, window_bounds = array<i64: 128, 128>}, {pipeline_mode = #tpu.pipeline_mode<synchronous>, transform_indices = @transform_2, window_bounds = array<i64: 1, 128>}, {transform_indices = @transform_3, window_bounds = array<i64: 32, 128>}]} {
    %c0 = arith.constant 0 : index
    %c0_0 = arith.constant 0 : index
    %0 = vector.load %arg1[%c0, %c0_0] : memref<32x128xbf16, #tpu.memory_space<vmem>>, vector<32x128xbf16>
    %c0_1 = arith.constant 0 : index
    %c0_2 = arith.constant 0 : index
    %1 = vector.load %arg2[%c0_1, %c0_2] : memref<128x128xbf16, #tpu.memory_space<vmem>>, vector<128x128xbf16>
    %cst = arith.constant dense<0.000000e+00> : vector<32x128xf32>
    %2 = tpu.matmul %0, %1, %cst {dimension_numbers = #tpu.dot_dimension_numbers<[1], [0], [0], [1], [0, 0, 1, 1], [], []>} : vector<32x128xbf16>, vector<128x128xbf16>, vector<32x128xf32> -> vector<32x128xf32>
    %c0_3 = arith.constant 0 : index
    %c0_4 = arith.constant 0 : index
    %3 = vector.load %arg3[%c0_3, %c0_4] : memref<1x128xf32, #tpu.memory_space<vmem>>, vector<1x128xf32>
    %4 = vector.broadcast %3 : vector<1x128xf32> to vector<32x128xf32>
    %5 = arith.addf %2, %4 : vector<32x128xf32>
    %cst_5 = arith.constant 0.000000e+00 : f32
    %6 = vector.broadcast %cst_5 : f32 to vector<32x128xf32>
    %7 = arith.maximumf %5, %6 : vector<32x128xf32>
    %8 = arith.truncf %7 : vector<32x128xf32> to vector<32x128xbf16>
    %c0_6 = arith.constant 0 : index
    %c0_7 = arith.constant 0 : index
    %9 = vector.load %arg4[%c0_6, %c0_7] : memref<32x128xbf16, #tpu.memory_space<vmem>>, vector<32x128xbf16>
    tpu.vector_store %arg4[%c0_6, %c0_7], %8 {strides = array<i32>} : memref<32x128xbf16, #tpu.memory_space<vmem>>, vector<32x128xbf16>,
    return
  }
  func.func @transform_0(%arg0: i32) -> (i32, i32) {
    %c0_i32 = arith.constant 0 : i32
    %c0_i32_0 = arith.constant 0 : i32
    return %arg0, %c0_i32 : i32, i32
  }
  func.func @transform_1(%arg0: i32) -> (i32, i32) {
    %c0_i32 = arith.constant 0 : i32
    %c0_i32_0 = arith.constant 0 : i32
    %c0_i32_1 = arith.constant 0 : i32
    return %c0_i32, %c0_i32_0 : i32, i32
  }
  func.func @transform_2(%arg0: i32) -> (i32, i32) {
    %c0_i32 = arith.constant 0 : i32
    %c0_i32_0 = arith.constant 0 : i32
    %c0_i32_1 = arith.constant 0 : i32
    return %c0_i32, %c0_i32_0 : i32, i32
  }
  func.func @transform_3(%arg0: i32) -> (i32, i32) {
    %c0_i32 = arith.constant 0 : i32
    %c0_i32_0 = arith.constant 0 : i32
    return %arg0, %c0_i32 : i32, i32
  }
}

module attributes {stable_mosaic.version = 11 : i64} {
  func.func @kernel(%arg0: i32, %arg1: memref<16x5xf32, #tpu.memory_space<vmem>>, %arg2: memref<5x1280xf32, #tpu.memory_space<vmem>>, %arg3: memref<16x1280xbf16, #tpu.memory_space<vmem>>) attributes {dimension_semantics = [#tpu.dimension_semantics<parallel>], iteration_bounds = array<i64: 1>, scalar_prefetch = 0 : i64, scratch_operands = 0 : i64, tpu.core_type = #tpu.core_type<tc>, window_params = [{transform_indices = @transform_0, window_bounds = array<i64: 16, 5>}, {pipeline_mode = #tpu.pipeline_mode<synchronous>, transform_indices = @transform_1, window_bounds = array<i64: 5, 1280>}, {transform_indices = @transform_2, window_bounds = array<i64: 16, 1280>}]} {
    %c0 = arith.constant 0 : index
    %c0_0 = arith.constant 0 : index
    %0 = vector.load %arg1[%c0, %c0_0] : memref<16x5xf32, #tpu.memory_space<vmem>>, vector<16x5xf32>
    %c0_1 = arith.constant 0 : index
    %c0_2 = arith.constant 0 : index
    %1 = vector.load %arg2[%c0_1, %c0_2] : memref<5x1280xf32, #tpu.memory_space<vmem>>, vector<5x1280xf32>
    %cst = arith.constant dense<0.000000e+00> : vector<16x1280xf32>
    %2 = tpu.matmul %0, %1, %cst {dimension_numbers = #tpu.dot_dimension_numbers<[1], [0], [0], [1], [0, 0, 1, 1], [], []>} : vector<16x5xf32>, vector<5x1280xf32>, vector<16x1280xf32> -> vector<16x1280xf32>
    %3 = arith.truncf %2 : vector<16x1280xf32> to vector<16x1280xbf16>
    %c0_3 = arith.constant 0 : index
    %c0_4 = arith.constant 0 : index
    %4 = vector.load %arg3[%c0_3, %c0_4] : memref<16x1280xbf16, #tpu.memory_space<vmem>>, vector<16x1280xbf16>
    tpu.vector_store %arg3[%c0_3, %c0_4], %3 {strides = array<i32>} : memref<16x1280xbf16, #tpu.memory_space<vmem>>, vector<16x1280xbf16>,
    return
  }
  func.func @transform_0(%arg0: i32) -> (i32, i32) {
    %c0_i32 = arith.constant 0 : i32
    %c0_i32_0 = arith.constant 0 : i32
    return %arg0, %c0_i32 : i32, i32
  }
  func.func @transform_1(%arg0: i32) -> (i32, i32) {
    %c0_i32 = arith.constant 0 : i32
    %c0_i32_0 = arith.constant 0 : i32
    %c0_i32_1 = arith.constant 0 : i32
    return %c0_i32, %c0_i32_0 : i32, i32
  }
  func.func @transform_2(%arg0: i32) -> (i32, i32) {
    %c0_i32 = arith.constant 0 : i32
    %c0_i32_0 = arith.constant 0 : i32
    return %arg0, %c0_i32 : i32, i32
  }
}

module attributes {stable_mosaic.version = 11 : i64} {
  func.func @kernel(%arg0: i32, %arg1: memref<16x5xf32, #tpu.memory_space<vmem>>, %arg2: memref<5x3072xf32, #tpu.memory_space<vmem>>, %arg3: memref<16x3072xbf16, #tpu.memory_space<vmem>>) attributes {dimension_semantics = [#tpu.dimension_semantics<parallel>], iteration_bounds = array<i64: 1>, scalar_prefetch = 0 : i64, scratch_operands = 0 : i64, tpu.core_type = #tpu.core_type<tc>, window_params = [{transform_indices = @transform_0, window_bounds = array<i64: 16, 5>}, {pipeline_mode = #tpu.pipeline_mode<synchronous>, transform_indices = @transform_1, window_bounds = array<i64: 5, 3072>}, {transform_indices = @transform_2, window_bounds = array<i64: 16, 3072>}]} {
    %c0 = arith.constant 0 : index
    %c0_0 = arith.constant 0 : index
    %0 = vector.load %arg1[%c0, %c0_0] : memref<16x5xf32, #tpu.memory_space<vmem>>, vector<16x5xf32>
    %c0_1 = arith.constant 0 : index
    %c0_2 = arith.constant 0 : index
    %1 = vector.load %arg2[%c0_1, %c0_2] : memref<5x3072xf32, #tpu.memory_space<vmem>>, vector<5x3072xf32>
    %cst = arith.constant dense<0.000000e+00> : vector<16x3072xf32>
    %2 = tpu.matmul %0, %1, %cst {dimension_numbers = #tpu.dot_dimension_numbers<[1], [0], [0], [1], [0, 0, 1, 1], [], []>} : vector<16x5xf32>, vector<5x3072xf32>, vector<16x3072xf32> -> vector<16x3072xf32>
    %3 = arith.truncf %2 : vector<16x3072xf32> to vector<16x3072xbf16>
    %c0_3 = arith.constant 0 : index
    %c0_4 = arith.constant 0 : index
    %4 = vector.load %arg3[%c0_3, %c0_4] : memref<16x3072xbf16, #tpu.memory_space<vmem>>, vector<16x3072xbf16>
    tpu.vector_store %arg3[%c0_3, %c0_4], %3 {strides = array<i32>} : memref<16x3072xbf16, #tpu.memory_space<vmem>>, vector<16x3072xbf16>,
    return
  }
  func.func @transform_0(%arg0: i32) -> (i32, i32) {
    %c0_i32 = arith.constant 0 : i32
    %c0_i32_0 = arith.constant 0 : i32
    return %arg0, %c0_i32 : i32, i32
  }
  func.func @transform_1(%arg0: i32) -> (i32, i32) {
    %c0_i32 = arith.constant 0 : i32
    %c0_i32_0 = arith.constant 0 : i32
    %c0_i32_1 = arith.constant 0 : i32
    return %c0_i32, %c0_i32_0 : i32, i32
  }
  func.func @transform_2(%arg0: i32) -> (i32, i32) {
    %c0_i32 = arith.constant 0 : i32
    %c0_i32_0 = arith.constant 0 : i32
    return %arg0, %c0_i32 : i32, i32
  }
}

module attributes {stable_mosaic.version = 11 : i64} {
  func.func @kernel(%arg0: i32, %arg1: memref<144x128xbf16, #tpu.memory_space<vmem>>, %arg2: memref<128x128xbf16, #tpu.memory_space<vmem>>, %arg3: memref<1x128xf32, #tpu.memory_space<vmem>>, %arg4: memref<144x128xf32, #tpu.memory_space<vmem>>, %arg5: memref<144x128xbf16, #tpu.memory_space<vmem>>) attributes {dimension_semantics = [#tpu.dimension_semantics<parallel>], iteration_bounds = array<i64: 2>, scalar_prefetch = 0 : i64, scratch_operands = 0 : i64, tpu.core_type = #tpu.core_type<tc>, window_params = [{transform_indices = @transform_0, window_bounds = array<i64: 144, 128>}, {pipeline_mode = #tpu.pipeline_mode<synchronous>, transform_indices = @transform_1, window_bounds = array<i64: 128, 128>}, {pipeline_mode = #tpu.pipeline_mode<synchronous>, transform_indices = @transform_2, window_bounds = array<i64: 1, 128>}, {transform_indices = @transform_3, window_bounds = array<i64: 144, 128>}, {transform_indices = @transform_4, window_bounds = array<i64: 144, 128>}]} {
    %c0 = arith.constant 0 : index
    %c0_0 = arith.constant 0 : index
    %0 = vector.load %arg1[%c0, %c0_0] : memref<144x128xbf16, #tpu.memory_space<vmem>>, vector<144x128xbf16>
    %c0_1 = arith.constant 0 : index
    %c0_2 = arith.constant 0 : index
    %1 = vector.load %arg2[%c0_1, %c0_2] : memref<128x128xbf16, #tpu.memory_space<vmem>>, vector<128x128xbf16>
    %cst = arith.constant dense<0.000000e+00> : vector<144x128xf32>
    %2 = tpu.matmul %0, %1, %cst {dimension_numbers = #tpu.dot_dimension_numbers<[1], [0], [0], [1], [0, 0, 1, 1], [], []>} : vector<144x128xbf16>, vector<128x128xbf16>, vector<144x128xf32> -> vector<144x128xf32>
    %c0_3 = arith.constant 0 : index
    %c0_4 = arith.constant 0 : index
    %3 = vector.load %arg3[%c0_3, %c0_4] : memref<1x128xf32, #tpu.memory_space<vmem>>, vector<1x128xf32>
    %4 = vector.broadcast %3 : vector<1x128xf32> to vector<144x128xf32>
    %5 = arith.addf %2, %4 : vector<144x128xf32>
    %cst_5 = arith.constant 0.000000e+00 : f32
    %6 = vector.broadcast %cst_5 : f32 to vector<144x128xf32>
    %7 = arith.maximumf %5, %6 : vector<144x128xf32>
    %c0_6 = arith.constant 0 : index
    %c0_7 = arith.constant 0 : index
    %8 = vector.load %arg4[%c0_6, %c0_7] : memref<144x128xf32, #tpu.memory_space<vmem>>, vector<144x128xf32>
    %9 = arith.mulf %7, %8 : vector<144x128xf32>
    %10 = arith.truncf %9 : vector<144x128xf32> to vector<144x128xbf16>
    %c0_8 = arith.constant 0 : index
    %c0_9 = arith.constant 0 : index
    %11 = vector.load %arg5[%c0_8, %c0_9] : memref<144x128xbf16, #tpu.memory_space<vmem>>, vector<144x128xbf16>
    tpu.vector_store %arg5[%c0_8, %c0_9], %10 {strides = array<i32>} : memref<144x128xbf16, #tpu.memory_space<vmem>>, vector<144x128xbf16>,
    return
  }
  func.func @transform_0(%arg0: i32) -> (i32, i32) {
    %c0_i32 = arith.constant 0 : i32
    %c0_i32_0 = arith.constant 0 : i32
    return %arg0, %c0_i32 : i32, i32
  }
  func.func @transform_1(%arg0: i32) -> (i32, i32) {
    %c0_i32 = arith.constant 0 : i32
    %c0_i32_0 = arith.constant 0 : i32
    %c0_i32_1 = arith.constant 0 : i32
    return %c0_i32, %c0_i32_0 : i32, i32
  }
  func.func @transform_2(%arg0: i32) -> (i32, i32) {
    %c0_i32 = arith.constant 0 : i32
    %c0_i32_0 = arith.constant 0 : i32
    %c0_i32_1 = arith.constant 0 : i32
    return %c0_i32, %c0_i32_0 : i32, i32
  }
  func.func @transform_3(%arg0: i32) -> (i32, i32) {
    %c0_i32 = arith.constant 0 : i32
    %c0_i32_0 = arith.constant 0 : i32
    return %arg0, %c0_i32 : i32, i32
  }
  func.func @transform_4(%arg0: i32) -> (i32, i32) {
    %c0_i32 = arith.constant 0 : i32
    %c0_i32_0 = arith.constant 0 : i32
    return %arg0, %c0_i32 : i32, i32
  }
}

module attributes {stable_mosaic.version = 11 : i64} {
  func.func @kernel(%arg0: i32, %arg1: memref<16x12xbf16, #tpu.memory_space<vmem>>, %arg2: memref<12x3072xbf16, #tpu.memory_space<vmem>>, %arg3: memref<16x3072xbf16, #tpu.memory_space<vmem>>) attributes {dimension_semantics = [#tpu.dimension_semantics<parallel>], iteration_bounds = array<i64: 1>, scalar_prefetch = 0 : i64, scratch_operands = 0 : i64, tpu.core_type = #tpu.core_type<tc>, window_params = [{transform_indices = @transform_0, window_bounds = array<i64: 16, 12>}, {pipeline_mode = #tpu.pipeline_mode<synchronous>, transform_indices = @transform_1, window_bounds = array<i64: 12, 3072>}, {transform_indices = @transform_2, window_bounds = array<i64: 16, 3072>}]} {
    %c0 = arith.constant 0 : index
    %c0_0 = arith.constant 0 : index
    %0 = vector.load %arg1[%c0, %c0_0] : memref<16x12xbf16, #tpu.memory_space<vmem>>, vector<16x12xbf16>
    %c0_1 = arith.constant 0 : index
    %c0_2 = arith.constant 0 : index
    %1 = vector.load %arg2[%c0_1, %c0_2] : memref<12x3072xbf16, #tpu.memory_space<vmem>>, vector<12x3072xbf16>
    %cst = arith.constant dense<0.000000e+00> : vector<16x3072xf32>
    %2 = tpu.matmul %0, %1, %cst {dimension_numbers = #tpu.dot_dimension_numbers<[1], [0], [0], [1], [0, 0, 1, 1], [], []>} : vector<16x12xbf16>, vector<12x3072xbf16>, vector<16x3072xf32> -> vector<16x3072xf32>
    %3 = arith.truncf %2 : vector<16x3072xf32> to vector<16x3072xbf16>
    %c0_3 = arith.constant 0 : index
    %c0_4 = arith.constant 0 : index
    %4 = vector.load %arg3[%c0_3, %c0_4] : memref<16x3072xbf16, #tpu.memory_space<vmem>>, vector<16x3072xbf16>
    tpu.vector_store %arg3[%c0_3, %c0_4], %3 {strides = array<i32>} : memref<16x3072xbf16, #tpu.memory_space<vmem>>, vector<16x3072xbf16>,
    return
  }
  func.func @transform_0(%arg0: i32) -> (i32, i32) {
    %c0_i32 = arith.constant 0 : i32
    %c0_i32_0 = arith.constant 0 : i32
    return %arg0, %c0_i32 : i32, i32
  }
  func.func @transform_1(%arg0: i32) -> (i32, i32) {
    %c0_i32 = arith.constant 0 : i32
    %c0_i32_0 = arith.constant 0 : i32
    %c0_i32_1 = arith.constant 0 : i32
    return %c0_i32, %c0_i32_0 : i32, i32
  }
  func.func @transform_2(%arg0: i32) -> (i32, i32) {
    %c0_i32 = arith.constant 0 : i32
    %c0_i32_0 = arith.constant 0 : i32
    return %arg0, %c0_i32 : i32, i32
  }
}

module attributes {stable_mosaic.version = 11 : i64} {
  func.func @kernel(%arg0: i32, %arg1: memref<16x12xbf16, #tpu.memory_space<vmem>>, %arg2: memref<12x1280xbf16, #tpu.memory_space<vmem>>, %arg3: memref<16x1280xbf16, #tpu.memory_space<vmem>>) attributes {dimension_semantics = [#tpu.dimension_semantics<parallel>], iteration_bounds = array<i64: 1>, scalar_prefetch = 0 : i64, scratch_operands = 0 : i64, tpu.core_type = #tpu.core_type<tc>, window_params = [{transform_indices = @transform_0, window_bounds = array<i64: 16, 12>}, {pipeline_mode = #tpu.pipeline_mode<synchronous>, transform_indices = @transform_1, window_bounds = array<i64: 12, 1280>}, {transform_indices = @transform_2, window_bounds = array<i64: 16, 1280>}]} {
    %c0 = arith.constant 0 : index
    %c0_0 = arith.constant 0 : index
    %0 = vector.load %arg1[%c0, %c0_0] : memref<16x12xbf16, #tpu.memory_space<vmem>>, vector<16x12xbf16>
    %c0_1 = arith.constant 0 : index
    %c0_2 = arith.constant 0 : index
    %1 = vector.load %arg2[%c0_1, %c0_2] : memref<12x1280xbf16, #tpu.memory_space<vmem>>, vector<12x1280xbf16>
    %cst = arith.constant dense<0.000000e+00> : vector<16x1280xf32>
    %2 = tpu.matmul %0, %1, %cst {dimension_numbers = #tpu.dot_dimension_numbers<[1], [0], [0], [1], [0, 0, 1, 1], [], []>} : vector<16x12xbf16>, vector<12x1280xbf16>, vector<16x1280xf32> -> vector<16x1280xf32>
    %3 = arith.truncf %2 : vector<16x1280xf32> to vector<16x1280xbf16>
    %c0_3 = arith.constant 0 : index
    %c0_4 = arith.constant 0 : index
    %4 = vector.load %arg3[%c0_3, %c0_4] : memref<16x1280xbf16, #tpu.memory_space<vmem>>, vector<16x1280xbf16>
    tpu.vector_store %arg3[%c0_3, %c0_4], %3 {strides = array<i32>} : memref<16x1280xbf16, #tpu.memory_space<vmem>>, vector<16x1280xbf16>,
    return
  }
  func.func @transform_0(%arg0: i32) -> (i32, i32) {
    %c0_i32 = arith.constant 0 : i32
    %c0_i32_0 = arith.constant 0 : i32
    return %arg0, %c0_i32 : i32, i32
  }
  func.func @transform_1(%arg0: i32) -> (i32, i32) {
    %c0_i32 = arith.constant 0 : i32
    %c0_i32_0 = arith.constant 0 : i32
    %c0_i32_1 = arith.constant 0 : i32
    return %c0_i32, %c0_i32_0 : i32, i32
  }
  func.func @transform_2(%arg0: i32) -> (i32, i32) {
    %c0_i32 = arith.constant 0 : i32
    %c0_i32_0 = arith.constant 0 : i32
    return %arg0, %c0_i32 : i32, i32
  }
}

module attributes {stable_mosaic.version = 11 : i64} {
  func.func @kernel(%arg0: i32, %arg1: memref<32x5xf32, #tpu.memory_space<vmem>>, %arg2: memref<5x1280xf32, #tpu.memory_space<vmem>>, %arg3: memref<32x1280xbf16, #tpu.memory_space<vmem>>) attributes {dimension_semantics = [#tpu.dimension_semantics<parallel>], iteration_bounds = array<i64: 2>, scalar_prefetch = 0 : i64, scratch_operands = 0 : i64, tpu.core_type = #tpu.core_type<tc>, window_params = [{transform_indices = @transform_0, window_bounds = array<i64: 32, 5>}, {pipeline_mode = #tpu.pipeline_mode<synchronous>, transform_indices = @transform_1, window_bounds = array<i64: 5, 1280>}, {transform_indices = @transform_2, window_bounds = array<i64: 32, 1280>}]} {
    %c0 = arith.constant 0 : index
    %c0_0 = arith.constant 0 : index
    %0 = vector.load %arg1[%c0, %c0_0] : memref<32x5xf32, #tpu.memory_space<vmem>>, vector<32x5xf32>
    %c0_1 = arith.constant 0 : index
    %c0_2 = arith.constant 0 : index
    %1 = vector.load %arg2[%c0_1, %c0_2] : memref<5x1280xf32, #tpu.memory_space<vmem>>, vector<5x1280xf32>
    %cst = arith.constant dense<0.000000e+00> : vector<32x1280xf32>
    %2 = tpu.matmul %0, %1, %cst {dimension_numbers = #tpu.dot_dimension_numbers<[1], [0], [0], [1], [0, 0, 1, 1], [], []>} : vector<32x5xf32>, vector<5x1280xf32>, vector<32x1280xf32> -> vector<32x1280xf32>
    %3 = arith.truncf %2 : vector<32x1280xf32> to vector<32x1280xbf16>
    %c0_3 = arith.constant 0 : index
    %c0_4 = arith.constant 0 : index
    %4 = vector.load %arg3[%c0_3, %c0_4] : memref<32x1280xbf16, #tpu.memory_space<vmem>>, vector<32x1280xbf16>
    tpu.vector_store %arg3[%c0_3, %c0_4], %3 {strides = array<i32>} : memref<32x1280xbf16, #tpu.memory_space<vmem>>, vector<32x1280xbf16>,
    return
  }
  func.func @transform_0(%arg0: i32) -> (i32, i32) {
    %c0_i32 = arith.constant 0 : i32
    %c0_i32_0 = arith.constant 0 : i32
    return %arg0, %c0_i32 : i32, i32
  }
  func.func @transform_1(%arg0: i32) -> (i32, i32) {
    %c0_i32 = arith.constant 0 : i32
    %c0_i32_0 = arith.constant 0 : i32
    %c0_i32_1 = arith.constant 0 : i32
    return %c0_i32, %c0_i32_0 : i32, i32
  }
  func.func @transform_2(%arg0: i32) -> (i32, i32) {
    %c0_i32 = arith.constant 0 : i32
    %c0_i32_0 = arith.constant 0 : i32
    return %arg0, %c0_i32 : i32, i32
  }
}

module attributes {stable_mosaic.version = 11 : i64} {
  func.func @kernel(%arg0: i32, %arg1: memref<32x2304xbf16, #tpu.memory_space<vmem>>, %arg2: memref<2304x128xbf16, #tpu.memory_space<vmem>>, %arg3: memref<1x128xf32, #tpu.memory_space<vmem>>, %arg4: memref<32x128xbf16, #tpu.memory_space<vmem>>) attributes {dimension_semantics = [#tpu.dimension_semantics<parallel>], iteration_bounds = array<i64: 2>, scalar_prefetch = 0 : i64, scratch_operands = 0 : i64, tpu.core_type = #tpu.core_type<tc>, window_params = [{transform_indices = @transform_0, window_bounds = array<i64: 32, 2304>}, {pipeline_mode = #tpu.pipeline_mode<synchronous>, transform_indices = @transform_1, window_bounds = array<i64: 2304, 128>}, {pipeline_mode = #tpu.pipeline_mode<synchronous>, transform_indices = @transform_2, window_bounds = array<i64: 1, 128>}, {transform_indices = @transform_3, window_bounds = array<i64: 32, 128>}]} {
    %c0 = arith.constant 0 : index
    %c0_0 = arith.constant 0 : index
    %0 = vector.load %arg1[%c0, %c0_0] : memref<32x2304xbf16, #tpu.memory_space<vmem>>, vector<32x2304xbf16>
    %c0_1 = arith.constant 0 : index
    %c0_2 = arith.constant 0 : index
    %1 = vector.load %arg2[%c0_1, %c0_2] : memref<2304x128xbf16, #tpu.memory_space<vmem>>, vector<2304x128xbf16>
    %cst = arith.constant dense<0.000000e+00> : vector<32x128xf32>
    %2 = tpu.matmul %0, %1, %cst {dimension_numbers = #tpu.dot_dimension_numbers<[1], [0], [0], [1], [0, 0, 1, 1], [], []>} : vector<32x2304xbf16>, vector<2304x128xbf16>, vector<32x128xf32> -> vector<32x128xf32>
    %c0_3 = arith.constant 0 : index
    %c0_4 = arith.constant 0 : index
    %3 = vector.load %arg3[%c0_3, %c0_4] : memref<1x128xf32, #tpu.memory_space<vmem>>, vector<1x128xf32>
    %4 = vector.broadcast %3 : vector<1x128xf32> to vector<32x128xf32>
    %5 = arith.addf %2, %4 : vector<32x128xf32>
    %cst_5 = arith.constant 0.000000e+00 : f32
    %6 = vector.broadcast %cst_5 : f32 to vector<32x128xf32>
    %7 = arith.maximumf %5, %6 : vector<32x128xf32>
    %8 = arith.truncf %7 : vector<32x128xf32> to vector<32x128xbf16>
    %c0_6 = arith.constant 0 : index
    %c0_7 = arith.constant 0 : index
    %9 = vector.load %arg4[%c0_6, %c0_7] : memref<32x128xbf16, #tpu.memory_space<vmem>>, vector<32x128xbf16>
    tpu.vector_store %arg4[%c0_6, %c0_7], %8 {strides = array<i32>} : memref<32x128xbf16, #tpu.memory_space<vmem>>, vector<32x128xbf16>,
    return
  }
  func.func @transform_0(%arg0: i32) -> (i32, i32) {
    %c0_i32 = arith.constant 0 : i32
    %c0_i32_0 = arith.constant 0 : i32
    return %arg0, %c0_i32 : i32, i32
  }
  func.func @transform_1(%arg0: i32) -> (i32, i32) {
    %c0_i32 = arith.constant 0 : i32
    %c0_i32_0 = arith.constant 0 : i32
    %c0_i32_1 = arith.constant 0 : i32
    return %c0_i32, %c0_i32_0 : i32, i32
  }
  func.func @transform_2(%arg0: i32) -> (i32, i32) {
    %c0_i32 = arith.constant 0 : i32
    %c0_i32_0 = arith.constant 0 : i32
    %c0_i32_1 = arith.constant 0 : i32
    return %c0_i32, %c0_i32_0 : i32, i32
  }
  func.func @transform_3(%arg0: i32) -> (i32, i32) {
    %c0_i32 = arith.constant 0 : i32
    %c0_i32_0 = arith.constant 0 : i32
    return %arg0, %c0_i32 : i32, i32
  }
}

module attributes {stable_mosaic.version = 11 : i64} {
  func.func @kernel(%arg0: i32, %arg1: memref<32x5xf32, #tpu.memory_space<vmem>>, %arg2: memref<5x8448xf32, #tpu.memory_space<vmem>>, %arg3: memref<32x8448xbf16, #tpu.memory_space<vmem>>) attributes {dimension_semantics = [#tpu.dimension_semantics<parallel>], iteration_bounds = array<i64: 2>, scalar_prefetch = 0 : i64, scratch_operands = 0 : i64, tpu.core_type = #tpu.core_type<tc>, window_params = [{transform_indices = @transform_0, window_bounds = array<i64: 32, 5>}, {pipeline_mode = #tpu.pipeline_mode<synchronous>, transform_indices = @transform_1, window_bounds = array<i64: 5, 8448>}, {transform_indices = @transform_2, window_bounds = array<i64: 32, 8448>}]} {
    %c0 = arith.constant 0 : index
    %c0_0 = arith.constant 0 : index
    %0 = vector.load %arg1[%c0, %c0_0] : memref<32x5xf32, #tpu.memory_space<vmem>>, vector<32x5xf32>
    %c0_1 = arith.constant 0 : index
    %c0_2 = arith.constant 0 : index
    %1 = vector.load %arg2[%c0_1, %c0_2] : memref<5x8448xf32, #tpu.memory_space<vmem>>, vector<5x8448xf32>
    %cst = arith.constant dense<0.000000e+00> : vector<32x8448xf32>
    %2 = tpu.matmul %0, %1, %cst {dimension_numbers = #tpu.dot_dimension_numbers<[1], [0], [0], [1], [0, 0, 1, 1], [], []>} : vector<32x5xf32>, vector<5x8448xf32>, vector<32x8448xf32> -> vector<32x8448xf32>
    %3 = arith.truncf %2 : vector<32x8448xf32> to vector<32x8448xbf16>
    %c0_3 = arith.constant 0 : index
    %c0_4 = arith.constant 0 : index
    %4 = vector.load %arg3[%c0_3, %c0_4] : memref<32x8448xbf16, #tpu.memory_space<vmem>>, vector<32x8448xbf16>
    tpu.vector_store %arg3[%c0_3, %c0_4], %3 {strides = array<i32>} : memref<32x8448xbf16, #tpu.memory_space<vmem>>, vector<32x8448xbf16>,
    return
  }
  func.func @transform_0(%arg0: i32) -> (i32, i32) {
    %c0_i32 = arith.constant 0 : i32
    %c0_i32_0 = arith.constant 0 : i32
    return %arg0, %c0_i32 : i32, i32
  }
  func.func @transform_1(%arg0: i32) -> (i32, i32) {
    %c0_i32 = arith.constant 0 : i32
    %c0_i32_0 = arith.constant 0 : i32
    %c0_i32_1 = arith.constant 0 : i32
    return %c0_i32, %c0_i32_0 : i32, i32
  }
  func.func @transform_2(%arg0: i32) -> (i32, i32) {
    %c0_i32 = arith.constant 0 : i32
    %c0_i32_0 = arith.constant 0 : i32
    return %arg0, %c0_i32 : i32, i32
  }
}

module attributes {stable_mosaic.version = 11 : i64} {
  func.func @kernel(%arg0: i32, %arg1: memref<256x128xbf16, #tpu.memory_space<vmem>>, %arg2: memref<128x128xbf16, #tpu.memory_space<vmem>>, %arg3: memref<1x128xf32, #tpu.memory_space<vmem>>, %arg4: memref<256x128xf32, #tpu.memory_space<vmem>>) attributes {dimension_semantics = [#tpu.dimension_semantics<parallel>], iteration_bounds = array<i64: 9>, scalar_prefetch = 0 : i64, scratch_operands = 0 : i64, tpu.core_type = #tpu.core_type<tc>, window_params = [{transform_indices = @transform_0, window_bounds = array<i64: 256, 128>}, {pipeline_mode = #tpu.pipeline_mode<synchronous>, transform_indices = @transform_1, window_bounds = array<i64: 128, 128>}, {pipeline_mode = #tpu.pipeline_mode<synchronous>, transform_indices = @transform_2, window_bounds = array<i64: 1, 128>}, {transform_indices = @transform_3, window_bounds = array<i64: 256, 128>}]} {
    %c0 = arith.constant 0 : index
    %c0_0 = arith.constant 0 : index
    %0 = vector.load %arg1[%c0, %c0_0] : memref<256x128xbf16, #tpu.memory_space<vmem>>, vector<256x128xbf16>
    %c0_1 = arith.constant 0 : index
    %c0_2 = arith.constant 0 : index
    %1 = vector.load %arg2[%c0_1, %c0_2] : memref<128x128xbf16, #tpu.memory_space<vmem>>, vector<128x128xbf16>
    %cst = arith.constant dense<0.000000e+00> : vector<256x128xf32>
    %2 = tpu.matmul %0, %1, %cst {dimension_numbers = #tpu.dot_dimension_numbers<[1], [0], [0], [1], [0, 0, 1, 1], [], []>} : vector<256x128xbf16>, vector<128x128xbf16>, vector<256x128xf32> -> vector<256x128xf32>
    %c0_3 = arith.constant 0 : index
    %c0_4 = arith.constant 0 : index
    %3 = vector.load %arg3[%c0_3, %c0_4] : memref<1x128xf32, #tpu.memory_space<vmem>>, vector<1x128xf32>
    %4 = vector.broadcast %3 : vector<1x128xf32> to vector<256x128xf32>
    %5 = arith.addf %2, %4 : vector<256x128xf32>
    %c0_5 = arith.constant 0 : index
    %c0_6 = arith.constant 0 : index
    %6 = vector.load %arg4[%c0_5, %c0_6] : memref<256x128xf32, #tpu.memory_space<vmem>>, vector<256x128xf32>
    tpu.vector_store %arg4[%c0_5, %c0_6], %5 {strides = array<i32>} : memref<256x128xf32, #tpu.memory_space<vmem>>, vector<256x128xf32>,
    return
  }
  func.func @transform_0(%arg0: i32) -> (i32, i32) {
    %c0_i32 = arith.constant 0 : i32
    %c0_i32_0 = arith.constant 0 : i32
    return %arg0, %c0_i32 : i32, i32
  }
  func.func @transform_1(%arg0: i32) -> (i32, i32) {
    %c0_i32 = arith.constant 0 : i32
    %c0_i32_0 = arith.constant 0 : i32
    %c0_i32_1 = arith.constant 0 : i32
    return %c0_i32, %c0_i32_0 : i32, i32
  }
  func.func @transform_2(%arg0: i32) -> (i32, i32) {
    %c0_i32 = arith.constant 0 : i32
    %c0_i32_0 = arith.constant 0 : i32
    %c0_i32_1 = arith.constant 0 : i32
    return %c0_i32, %c0_i32_0 : i32, i32
  }
  func.func @transform_3(%arg0: i32) -> (i32, i32) {
    %c0_i32 = arith.constant 0 : i32
    %c0_i32_0 = arith.constant 0 : i32
    return %arg0, %c0_i32 : i32, i32
  }
}

</mosaic_0001>

<bundles_post_ra>
// kernel: pspnet_tl_forward.24
= control target key start
LH: loop header
LB: loop body
LE: loop exit
PB: predicated region body
PF: predicated region fallthrough
CT: control target
= control target key end

     0   :  { %s1202_s12 = smov 0   ;;  %s1345_s0 = inlined_call_operand.vmem [shape: bf16[624,256], index: 0, kind: input, shape index: {}]   ;;  %s1346_s1 = inlined_call_operand.vmem [shape: bf16[256,128], index: 1, kind: input, shape index: {}]   ;;  %s1347_s2 = inlined_call_operand.vmem [shape: f32[1,128], index: 2, kind: input, shape index: {}]   ;;  %s1348_s3 = inlined_call_operand.vmem [shape: bf16[624,128], index: 3, kind: output, shape index: {}]  }
   0x1 LB: > { %s818_s13 = sadd.s32 4294967295, %s1180_s12   ;;  %p822_p0 = scmp.ge.s32.totalorder %s1180_s12, 1  ;;  %s1180_s12 = sphi %s1202_s12, %s13_s12  }
   0x2   : > { %p139_p1 = scmp.lt.s32.totalorder %s1180_s12, 4 }
   0x4   : > { %p140_p2 = pnand %p822_p0, %p139_p1 }
   0x5   : > { %v1119_v0 = vld [vmem:[%s1346_s1 + $0x40] sm:$0xff] (!%p140_p2)   ;;  %s164_s16 = smul.u32 (!%p140_p2), 26, %s818_s13  ;;  %v1121_v2 = vld [vmem:[%s1346_s1 + $0x48] sm:$0xff] (!%p140_p2)   ;;  %v1123_v4 = vld [vmem:[%s1346_s1 + $0x50] sm:$0xff] (!%p140_p2)  }
   0x6   : > { %143 = sbr.rel (%p140_p2) target bundleno = 310 (0x136), region = 32  ;;  %v1120_v1 = vld [vmem:[%s1346_s1] sm:$0xff] (!%p140_p2)   ;;  %1001 = vmatprep.subr.bf16.mxu0 (!%p140_p2), %v1119_v0  ;;  %1095 = vmatprep.subr.bf16.mxu1 (!%p140_p2), %v1119_v0  ;;  %v1122_v3 = vld [vmem:[%s1346_s1 + $0x8] sm:$0xff] (!%p140_p2)   ;;  %v1124_v5 = vld [vmem:[%s1346_s1 + $0x10] sm:$0xff] (!%p140_p2)  }
   0x7   : > { %1002 = vmatpush3.bf16.msra.mxu0 (!%p140_p2), %v1120_v1  ;;  %1103 = vmatpush3.bf16.msra.mxu1 (!%p140_p2), %v1120_v1  ;;  %p165_p3 = scmp.lt.s32.totalorder (!%p140_p2), %s164_s16, 77  ;;  %v1125_v6 = vld [vmem:[%s1346_s1 + $0x58] sm:$0xff] (!%p140_p2)   ;;  %v1127_v8 = vld [vmem:[%s1346_s1 + $0x60] sm:$0xff] (!%p140_p2)   ;;  %v1129_v10 = vld [vmem:[%s1346_s1 + $0x68] sm:$0xff] (!%p140_p2)  }
   0x8   : > { %1003 = vmatprep.subr.bf16.mxu0 (!%p140_p2), %v1121_v2  ;;  %1096 = vmatprep.subr.bf16.mxu1 (!%p140_p2), %v1121_v2  ;;  %v1126_v7 = vld [vmem:[%s1346_s1 + $0x18] sm:$0xff] (!%p140_p2)   ;;  %v1128_v9 = vld [vmem:[%s1346_s1 + $0x20] sm:$0xff] (!%p140_p2)   ;;  %v1130_v13 = vld [vmem:[%s1346_s1 + $0x28] sm:$0xff] (!%p140_p2)  }
   0x9   : > { %v1131_v14 = vld [vmem:[%s1346_s1 + $0x70] sm:$0xff] (!%p140_p2)   ;;  %v1133_v16 = vld [vmem:[%s1346_s1 + $0x78] sm:$0xff] (!%p140_p2)   ;;  %v1295_v44 = vld [vmem:[%s1347_s2] ss:$0 sm:$0xff] (!%p140_p2) }
   0xa   : > { %v1132_v15 = vld [vmem:[%s1346_s1 + $0x30] sm:$0xff] (!%p140_p2)   ;;  %v1134_v17 = vld [vmem:[%s1346_s1 + $0x38] sm:$0xff] (!%p140_p2)  }
   0xb   : > { %1004 = vmatpush3.bf16.msra.mxu0 (!%p140_p2), %v1122_v3  ;;  %1104 = vmatpush3.bf16.msra.mxu1 (!%p140_p2), %v1122_v3 }
   0xc   : > { %1005 = vmatprep.subr.bf16.mxu0 (!%p140_p2), %v1123_v4  ;;  %1097 = vmatprep.subr.bf16.mxu1 (!%p140_p2), %v1123_v4 }
   0xd   : > { %s1350_s16 = smov (!%p165_p3, %s164_s16), 77 }
   0xe   : > { %s897_s4 = sshll.u32 %s1350_s16, 3  ;;  %s825_s28 = sshll.u32 %s1350_s16, 2 }
   0xf   : > { %1006 = vmatpush3.bf16.msra.mxu0 %v1124_v5  ;;  %1105 = vmatpush3.bf16.msra.mxu1 %v1124_v5  ;;  %s1243_s9 = scalar_lea.vmem %s1345_s0, %s897_s4  ;;  %s1305_s4 = scalar_lea.vmem %s1348_s3, %s825_s28 }
  0x10   : > { %1007 = vmatprep.subr.bf16.mxu0 %v1125_v6  ;;  %1098 = vmatprep.subr.bf16.mxu1 %v1125_v6  ;;  %v1137_v11 = vld [vmem:[%s1243_s9 + $0x4] ss:$8 sps:$4 sm:$0xff]   ;;  %v1140_v12 = vld [vmem:[%s1243_s9 + $0x74] ss:$8 sps:$4 sm:$0xff]   ;;  %v1135_v18 = vld [vmem:[%s1243_s9] ss:$8 sps:$4 sm:$0xff]  }
  0x11   : > { %501 = vmatprep.mubr.bf16.mxu0 %v1137_v11  ;;  %557 = vmatprep.mubr.bf16.mxu1 %v1140_v12  ;;  %v1138_v19 = vld [vmem:[%s1243_s9 + $0x70] ss:$8 sps:$4 sm:$0xff]   ;;  %v1141_v20 = vld [vmem:[%s1243_s9 + $0x14] ss:$8 sps:$4 sm:$0xff]   ;;  %v1144_v21 = vld [vmem:[%s1243_s9 + $0x84] ss:$8 sps:$4 sm:$0xff]  }
  0x12   : > { %v1143_v22 = vld [vmem:[%s1243_s9 + $0x10] ss:$8 sps:$4 sm:$0xff]   ;;  %v1146_v23 = vld [vmem:[%s1243_s9 + $0x80] ss:$8 sps:$4 sm:$0xff]   ;;  %v1147_v24 = vld [vmem:[%s1243_s9 + $0x24] ss:$8 sps:$4 sm:$0xff]  }
  0x13   : > { %1008 = vmatpush3.bf16.msra.mxu0 %v1126_v7  ;;  %1106 = vmatpush3.bf16.msra.mxu1 %v1126_v7  ;;  %v1150_v25 = vld [vmem:[%s1243_s9 + $0x94] ss:$8 sps:$4 sm:$0xff]   ;;  %v1149_v26 = vld [vmem:[%s1243_s9 + $0x20] ss:$8 sps:$4 sm:$0xff]   ;;  %v1152_v27 = vld [vmem:[%s1243_s9 + $0x90] ss:$8 sps:$4 sm:$0xff]  }
  0x14   : > { %1009 = vmatprep.subr.bf16.mxu0 %v1127_v8  ;;  %1099 = vmatprep.subr.bf16.mxu1 %v1127_v8  ;;  %v1153_v28 = vld [vmem:[%s1243_s9 + $0x34] ss:$8 sps:$4 sm:$0xff]   ;;  %v1156_v29 = vld [vmem:[%s1243_s9 + $0xa4] ss:$8 sps:$4 sm:$0xff]   ;;  %v1155_v30 = vld [vmem:[%s1243_s9 + $0x30] ss:$8 sps:$4 sm:$0xff]  }
  0x15   : > { %v1158_v31 = vld [vmem:[%s1243_s9 + $0xa0] ss:$8 sps:$4 sm:$0xff]   ;;  %v1159_v32 = vld [vmem:[%s1243_s9 + $0x44] ss:$8 sps:$4 sm:$0xff]   ;;  %v1162_v33 = vld [vmem:[%s1243_s9 + $0xb4] ss:$8 sps:$4 sm:$0xff]  }
  0x16   : > { %v1161_v34 = vld [vmem:[%s1243_s9 + $0x40] ss:$8 sps:$4 sm:$0xff]   ;;  %v1164_v35 = vld [vmem:[%s1243_s9 + $0xb0] ss:$8 sps:$4 sm:$0xff]   ;;  %v1165_v36 = vld [vmem:[%s1243_s9 + $0x54] ss:$8 sps:$4 sm:$0xff]  }
  0x17   : > { %1010 = vmatpush3.bf16.msra.mxu0 %v1128_v9  ;;  %1107 = vmatpush3.bf16.msra.mxu1 %v1128_v9  ;;  %v1168_v37 = vld [vmem:[%s1243_s9 + $0xc4] ss:$8 sps:$4 sm:$0xff]   ;;  %v1167_v38 = vld [vmem:[%s1243_s9 + $0x50] ss:$8 sps:$4 sm:$0xff]   ;;  %v1170_v39 = vld [vmem:[%s1243_s9 + $0xc0] ss:$8 sps:$4 sm:$0xff]  }
  0x18   : > { %1011 = vmatprep.subr.bf16.mxu0 %v1129_v10  ;;  %1100 = vmatprep.subr.bf16.mxu1 %v1129_v10  ;;  %v1171_v40 = vld [vmem:[%s1243_s9 + $0x64] ss:$8 sps:$4 sm:$0xff]   ;;  %v1173_v41 = vld [vmem:[%s1243_s9 + $0x60] ss:$8 sps:$4 sm:$0xff]  }
  0x1b   : > { %1012 = vmatpush3.bf16.msra.mxu0 %v1130_v13  ;;  %1108 = vmatpush3.bf16.msra.mxu1 %v1130_v13 }
  0x1c   : > { %1013 = vmatprep.subr.bf16.mxu0 %v1131_v14  ;;  %1101 = vmatprep.subr.bf16.mxu1 %v1131_v14 }
  0x1f   : > { %1014 = vmatpush3.bf16.msra.mxu0 %v1132_v15  ;;  %1109 = vmatpush3.bf16.msra.mxu1 %v1132_v15 }
  0x20   : > { %1015 = vmatprep.subr.bf16.mxu0 %v1133_v16  ;;  %1102 = vmatprep.subr.bf16.mxu1 %v1133_v16 }
  0x23   : > { %1016 = vmatpush3.bf16.msra.mxu0 %v1134_v17  ;;  %1110 = vmatpush3.bf16.msra.mxu1 %v1134_v17 }
  0x26   : > { %502 = vmatmul.mubr.bf16.vlgmr.msra.gmra.mrb[0].mxu0 %v1135_v18  ;;  %558 = vmatmul.mubr.bf16.vlgmr.msra.gmra.mrb[0].mxu1 %v1138_v19 }
  0x27   : > { %509 = vmatprep.mubr.bf16.mxu0 %v1141_v20  ;;  %565 = vmatprep.mubr.bf16.mxu1 %v1144_v21 }
  0x2e   : > { %510 = vmatmul.mubr.bf16.gmra.mrb[4].mxu0 %v1143_v22  ;;  %566 = vmatmul.mubr.bf16.gmra.mrb[4].mxu1 %v1146_v23 }
  0x2f   : > { %517 = vmatprep.mubr.bf16.mxu0 %v1147_v24  ;;  %573 = vmatprep.mubr.bf16.mxu1 %v1150_v25 }
  0x36   : > { %518 = vmatmul.mubr.bf16.gmra.mrb[8].mxu0 %v1149_v26  ;;  %574 = vmatmul.mubr.bf16.gmra.mrb[8].mxu1 %v1152_v27 }
  0x37   : > { %525 = vmatprep.mubr.bf16.mxu0 %v1153_v28  ;;  %581 = vmatprep.mubr.bf16.mxu1 %v1156_v29 }
  0x3e   : > { %526 = vmatmul.mubr.bf16.gmra.mrb[12].mxu0 %v1155_v30  ;;  %582 = vmatmul.mubr.bf16.gmra.mrb[12].mxu1 %v1158_v31 }
  0x3f   : > { %533 = vmatprep.mubr.bf16.mxu0 %v1159_v32  ;;  %589 = vmatprep.mubr.bf16.mxu1 %v1162_v33 }
  0x46   : > { %534 = vmatmul.mubr.bf16.gmra.mrb[16].mxu0 %v1161_v34  ;;  %590 = vmatmul.mubr.bf16.gmra.mrb[16].mxu1 %v1164_v35 }
  0x47   : > { %541 = vmatprep.mubr.bf16.mxu0 %v1165_v36  ;;  %597 = vmatprep.mubr.bf16.mxu1 %v1168_v37 }
  0x4e   : > { %542 = vmatmul.mubr.bf16.gmra.mrb[20].mxu0 %v1167_v38  ;;  %598 = vmatmul.mubr.bf16.gmra.mrb[20].mxu1 %v1170_v39 }
  0x4f   : > { %549 = vmatprep.mubr.bf16.mxu0 %v1171_v40 }
  0x56   : > { %550 = vmatmul.mubr.bf16.gmra.mrb[24].mxu0 %v1173_v41 }
  0xf9   : > { %v1017_v42 = vpop.f32.mrb[0].mxu0  ;;  %v1059_v43 = vpop.f32.mrb[0].mxu1 }
  0xfa   : > { %v1018_v45 = vpop.f32.mrb[1].mxu0  ;;  %v1060_v46 = vpop.f32.mrb[1].mxu1 }
  0xfb   : > { %v1019_v47 = vadd.f32 %v1018_v45, %v1017_v42  ;;  %v1020_v48 = vpop.f32.mrb[2].mxu0  ;;  %v1061_v49 = vadd.f32 %v1060_v46, %v1059_v43  ;;  %v1062_v50 = vpop.f32.mrb[2].mxu1 }
  0xfc   : > { %v1021_v51 = vpop.f32.mrb[3].mxu0  ;;  %v1063_v52 = vpop.f32.mrb[3].mxu1 }
  0xfd   : > { %v504_v53 = vadd.f32 %v1019_v47, %v1295_v44  ;;  %v1022_v54 = vadd.f32 %v1021_v51, %v1020_v48  ;;  %v560_v55 = vadd.f32 %v1061_v49, %v1295_v44  ;;  %v1064_v56 = vadd.f32 %v1063_v52, %v1062_v50 }
  0xff   : > { %v507_v57 = vadd.f32 %v1022_v54, %v1295_v44  ;;  %v620_v58 = vmax.f32 %v560_v55, 0.0  ;;  %v563_v59 = vadd.f32 %v1064_v56, %v1295_v44  ;;  %v606_v60 = vmax.f32 %v504_v53, 0.0 }
 0x101   : > { %v607_v61 = vmax.f32 %v507_v57, 0.0  ;;  %v1023_v62 = vpop.f32.mrb[4].mxu0  ;;  %v621_v63 = vmax.f32 %v563_v59, 0.0  ;;  %v1065_v0 = vpop.f32.mrb[4].mxu1 }
 0x102   : > { %v1024_v1 = vpop.f32.mrb[5].mxu0  ;;  %v1066_v2 = vpop.f32.mrb[5].mxu1 }
 0x103   : > { %v927_v3 = vpack.c.bf16 %v607_v61, %v606_v60  ;;  %v962_v4 = vpack.c.bf16 %v621_v63, %v620_v58  ;;  %v1025_v5 = vadd.f32 %v1024_v1, %v1023_v62  ;;  %v1026_v6 = vpop.f32.mrb[6].mxu0  ;;  %v1067_v7 = vadd.f32 %v1066_v2, %v1065_v0  ;;  %v1068_v8 = vpop.f32.mrb[6].mxu1 }
 0x104   : > { %v1027_v9 = vpop.f32.mrb[7].mxu0  ;;  %v1069_v10 = vpop.f32.mrb[7].mxu1 }
 0x105   : > { %928 = vst [vmem:[%s1305_s4] sm:$0xff] %v927_v3   ;;  %995 = vst [vmem:[%s1305_s4 + $0x38] sm:$0xff] %v962_v4   ;;  %v512_v11 = vadd.f32 %v1025_v5, %v1295_v44  ;;  %v1028_v12 = vadd.f32 %v1027_v9, %v1026_v6  ;;  %v568_v13 = vadd.f32 %v1067_v7, %v1295_v44 }
 0x106   : > { %v1070_v14 = vadd.f32 %v1069_v10, %v1068_v8 }
 0x107   : > { %v515_v15 = vadd.f32 %v1028_v12, %v1295_v44  ;;  %v622_v16 = vmax.f32 %v568_v13, 0.0  ;;  %v608_v18 = vmax.f32 %v512_v11, 0.0 }
 0x108   : > { %v571_v17 = vadd.f32 %v1070_v14, %v1295_v44 }
 0x109   : > { %v609_v19 = vmax.f32 %v515_v15, 0.0  ;;  %v1029_v20 = vpop.f32.mrb[8].mxu0  ;;  %v1071_v22 = vpop.f32.mrb[8].mxu1 }
 0x10a   : > { %v623_v21 = vmax.f32 %v571_v17, 0.0  ;;  %v1030_v23 = vpop.f32.mrb[9].mxu0  ;;  %v1072_v24 = vpop.f32.mrb[9].mxu1 }
 0x10b   : > { %v932_v25 = vpack.c.bf16 %v609_v19, %v608_v18  ;;  %v1031_v27 = vadd.f32 %v1030_v23, %v1029_v20  ;;  %v1032_v28 = vpop.f32.mrb[10].mxu0  ;;  %v1073_v29 = vadd.f32 %v1072_v24, %v1071_v22  ;;  %v1074_v30 = vpop.f32.mrb[10].mxu1 }
 0x10c   : > { %v967_v26 = vpack.c.bf16 %v623_v21, %v622_v16  ;;  %v1033_v31 = vpop.f32.mrb[11].mxu0  ;;  %v1075_v32 = vpop.f32.mrb[11].mxu1 }
 0x10d   : > { %989 = vst [vmem:[%s1305_s4 + $0x8] sm:$0xff] %v932_v25   ;;  %v520_v33 = vadd.f32 %v1031_v27, %v1295_v44  ;;  %v1034_v34 = vadd.f32 %v1033_v31, %v1032_v28  ;;  %v576_v35 = vadd.f32 %v1073_v29, %v1295_v44  ;;  %v1076_v36 = vadd.f32 %v1075_v32, %v1074_v30 }
 0x10e   : > { %996 = vst [vmem:[%s1305_s4 + $0x40] sm:$0xff] %v967_v26  }
 0x10f   : > { %v523_v37 = vadd.f32 %v1034_v34, %v1295_v44  ;;  %v624_v38 = vmax.f32 %v576_v35, 0.0  ;;  %v579_v39 = vadd.f32 %v1076_v36, %v1295_v44  ;;  %v610_v40 = vmax.f32 %v520_v33, 0.0 }
 0x111   : > { %v611_v41 = vmax.f32 %v523_v37, 0.0  ;;  %v1035_v42 = vpop.f32.mrb[12].mxu0  ;;  %v625_v43 = vmax.f32 %v579_v39, 0.0  ;;  %v1077_v45 = vpop.f32.mrb[12].mxu1 }
 0x112   : > { %v1036_v46 = vpop.f32.mrb[13].mxu0  ;;  %v1078_v47 = vpop.f32.mrb[13].mxu1 }
 0x113   : > { %v937_v48 = vpack.c.bf16 %v611_v41, %v610_v40  ;;  %v972_v49 = vpack.c.bf16 %v625_v43, %v624_v38  ;;  %v1037_v50 = vadd.f32 %v1036_v46, %v1035_v42  ;;  %v1038_v51 = vpop.f32.mrb[14].mxu0  ;;  %v1079_v52 = vadd.f32 %v1078_v47, %v1077_v45  ;;  %v1080_v53 = vpop.f32.mrb[14].mxu1 }
 0x114   : > { %v1039_v54 = vpop.f32.mrb[15].mxu0  ;;  %v1081_v55 = vpop.f32.mrb[15].mxu1 }
 0x115   : > { %990 = vst [vmem:[%s1305_s4 + $0x10] sm:$0xff] %v937_v48   ;;  %997 = vst [vmem:[%s1305_s4 + $0x48] sm:$0xff] %v972_v49   ;;  %v528_v56 = vadd.f32 %v1037_v50, %v1295_v44  ;;  %v1040_v57 = vadd.f32 %v1039_v54, %v1038_v51  ;;  %v584_v58 = vadd.f32 %v1079_v52, %v1295_v44 }
 0x116   : > { %v1082_v59 = vadd.f32 %v1081_v55, %v1080_v53 }
 0x117   : > { %v531_v60 = vadd.f32 %v1040_v57, %v1295_v44  ;;  %v626_v61 = vmax.f32 %v584_v58, 0.0  ;;  %v612_v63 = vmax.f32 %v528_v56, 0.0 }
 0x118   : > { %v587_v62 = vadd.f32 %v1082_v59, %v1295_v44 }
 0x119   : > { %v613_v0 = vmax.f32 %v531_v60, 0.0  ;;  %v1041_v1 = vpop.f32.mrb[16].mxu0  ;;  %v1083_v3 = vpop.f32.mrb[16].mxu1 }
 0x11a   : > { %v627_v2 = vmax.f32 %v587_v62, 0.0  ;;  %v1042_v4 = vpop.f32.mrb[17].mxu0  ;;  %v1084_v5 = vpop.f32.mrb[17].mxu1 }
 0x11b   : > { %v942_v6 = vpack.c.bf16 %v613_v0, %v612_v63  ;;  %v1043_v8 = vadd.f32 %v1042_v4, %v1041_v1  ;;  %v1044_v9 = vpop.f32.mrb[18].mxu0  ;;  %v1085_v10 = vadd.f32 %v1084_v5, %v1083_v3  ;;  %v1086_v11 = vpop.f32.mrb[18].mxu1 }
 0x11c   : > { %v977_v7 = vpack.c.bf16 %v627_v2, %v626_v61  ;;  %v1045_v12 = vpop.f32.mrb[19].mxu0  ;;  %v1087_v13 = vpop.f32.mrb[19].mxu1 }
 0x11d   : > { %991 = vst [vmem:[%s1305_s4 + $0x18] sm:$0xff] %v942_v6   ;;  %v536_v14 = vadd.f32 %v1043_v8, %v1295_v44  ;;  %v1046_v15 = vadd.f32 %v1045_v12, %v1044_v9  ;;  %v592_v16 = vadd.f32 %v1085_v10, %v1295_v44  ;;  %v1088_v17 = vadd.f32 %v1087_v13, %v1086_v11 }
 0x11e   : > { %998 = vst [vmem:[%s1305_s4 + $0x50] sm:$0xff] %v977_v7  }
 0x11f   : > { %v539_v18 = vadd.f32 %v1046_v15, %v1295_v44  ;;  %v628_v19 = vmax.f32 %v592_v16, 0.0  ;;  %v595_v20 = vadd.f32 %v1088_v17, %v1295_v44  ;;  %v614_v21 = vmax.f32 %v536_v14, 0.0 }
 0x121   : > { %v615_v22 = vmax.f32 %v539_v18, 0.0  ;;  %v1047_v23 = vpop.f32.mrb[20].mxu0  ;;  %v629_v24 = vmax.f32 %v595_v20, 0.0  ;;  %v1089_v25 = vpop.f32.mrb[20].mxu1 }
 0x122   : > { %v1048_v26 = vpop.f32.mrb[21].mxu0  ;;  %v1090_v27 = vpop.f32.mrb[21].mxu1 }
 0x123   : > { %v947_v28 = vpack.c.bf16 %v615_v22, %v614_v21  ;;  %v982_v29 = vpack.c.bf16 %v629_v24, %v628_v19  ;;  %v1049_v30 = vadd.f32 %v1048_v26, %v1047_v23  ;;  %v1050_v31 = vpop.f32.mrb[22].mxu0  ;;  %v1091_v32 = vadd.f32 %v1090_v27, %v1089_v25  ;;  %v1092_v33 = vpop.f32.mrb[22].mxu1 }
 0x124   : > { %v1051_v34 = vpop.f32.mrb[23].mxu0  ;;  %v1093_v35 = vpop.f32.mrb[23].mxu1 }
 0x125   : > { %992 = vst [vmem:[%s1305_s4 + $0x20] sm:$0xff] %v947_v28   ;;  %999 = vst [vmem:[%s1305_s4 + $0x58] sm:$0xff] %v982_v29   ;;  %v544_v36 = vadd.f32 %v1049_v30, %v1295_v44  ;;  %v1052_v37 = vadd.f32 %v1051_v34, %v1050_v31  ;;  %v600_v38 = vadd.f32 %v1091_v32, %v1295_v44 }
 0x126   : > { %v1094_v39 = vadd.f32 %v1093_v35, %v1092_v33 }
 0x127   : > { %v547_v40 = vadd.f32 %v1052_v37, %v1295_v44  ;;  %v630_v41 = vmax.f32 %v600_v38, 0.0  ;;  %v616_v43 = vmax.f32 %v544_v36, 0.0 }
 0x128   : > { %v603_v42 = vadd.f32 %v1094_v39, %v1295_v44 }
 0x129   : > { %v617_v45 = vmax.f32 %v547_v40, 0.0  ;;  %v1053_v46 = vpop.f32.mrb[24].mxu0 }
 0x12a   : > { %v631_v47 = vmax.f32 %v603_v42, 0.0  ;;  %v1054_v48 = vpop.f32.mrb[25].mxu0 }
 0x12b   : > { %v952_v49 = vpack.c.bf16 %v617_v45, %v616_v43  ;;  %v1055_v51 = vadd.f32 %v1054_v48, %v1053_v46  ;;  %v1056_v52 = vpop.f32.mrb[26].mxu0 }
 0x12c   : > { %v987_v50 = vpack.c.bf16 %v631_v47, %v630_v41  ;;  %v1057_v53 = vpop.f32.mrb[27].mxu0 }
 0x12d   : > { %993 = vst [vmem:[%s1305_s4 + $0x28] sm:$0xff] %v952_v49   ;;  %v552_v54 = vadd.f32 %v1055_v51, %v1295_v44  ;;  %v1058_v55 = vadd.f32 %v1057_v53, %v1056_v52 }
 0x12e   : > { %1000 = vst [vmem:[%s1305_s4 + $0x60] sm:$0xff] %v987_v50  }
 0x12f   : > { %v555_v56 = vadd.f32 %v1058_v55, %v1295_v44  ;;  %v618_v57 = vmax.f32 %v552_v54, 0.0 }
 0x131   : > { %v619_v58 = vmax.f32 %v555_v56, 0.0 }
 0x133   : > { %v957_v59 = vpack.c.bf16 %v619_v58, %v618_v57 }
 0x135   : > { %994 = vst [vmem:[%s1305_s4 + $0x30] sm:$0xff] %v957_v59  }
 0x136 PF: > { %s13_s12 = sadd.s32 1, %s1180_s12  }
 0x137   : > { %p10_p4 = scmp.ge.s32.totalorder %s13_s12, 5  }
 0x139   :  { %12 = sbr.rel (!%p10_p4) target bundleno = 1 (0x1), region = 62 }

// kernel: pspnet_tl_forward.25
= control target key start
LH: loop header
LB: loop body
LE: loop exit
PB: predicated region body
PF: predicated region fallthrough
CT: control target
= control target key end

     0   :  { %s553_s12 = smov 0   ;;  %s661_s0 = inlined_call_operand.vmem [shape: bf16[352,128], index: 0, kind: input, shape index: {}]   ;;  %s662_s1 = inlined_call_operand.vmem [shape: bf16[352,128], index: 1, kind: input, shape index: {}]   ;;  %s663_s2 = inlined_call_operand.vmem [shape: bf16[352,128], index: 2, kind: input, shape index: {}]   ;;  %s664_s3 = inlined_call_operand.vmem [shape: bf16[352,128], index: 3, kind: output, shape index: {}]  }
   0x1 LB: > { %s430_s13 = sadd.s32 4294967295, %s531_s12   ;;  %p434_p0 = scmp.ge.s32.totalorder %s531_s12, 1  ;;  %s531_s12 = sphi %s553_s12, %s13_s12  }
   0x2   : > { %p160_p1 = scmp.lt.s32.totalorder %s531_s12, 3 }
   0x4   : > { %p161_p2 = pnand %p434_p0, %p160_p1 }
   0x5   : > { %s194_s14 = smul.u32 (!%p161_p2), 22, %s430_s13 }
   0x6   : > { %164 = sbr.rel (%p161_p2) target bundleno = 47 (0x2f), region = 32 }
   0x7   : > { %p195_p3 = scmp.lt.s32.totalorder (!%p161_p2), %s194_s14, 43 }
   0xd   : > { %s666_s14 = smov (!%p195_p3, %s194_s14), 43 }
   0xe   : > { %s435_s15 = sshll.u32 %s666_s14, 2 }
   0xf   : > { %s564_s18 = scalar_lea.vmem %s661_s0, %s435_s15  ;;  %s569_s21 = scalar_lea.vmem %s662_s1, %s435_s15 }
  0x10   : > { %s574_s24 = scalar_lea.vmem %s663_s2, %s435_s15  ;;  %v218_v0 = vld [vmem:[%s564_s18] sm:$0xf]  ;;  %v219_v1 = vld [vmem:[%s564_s18 + $0x4] sm:$0xf]  ;;  %v220_v8 = vld [vmem:[%s564_s18 + $0x8] sm:$0xf]  ;;  %s594_s27 = scalar_lea.vmem %s664_s3, %s435_s15 }
  0x11   : > { %v240_v2 = vld [vmem:[%s569_s21] sm:$0xf]  ;;  %v241_v3 = vld [vmem:[%s569_s21 + $0x4] sm:$0xf]  ;;  %v221_v9 = vld [vmem:[%s564_s18 + $0xc] sm:$0xf] }
  0x12   : > { %v262_v4 = vmax.bf16 %v240_v2, %v218_v0  ;;  %v284_v5 = vld [vmem:[%s574_s24] sm:$0xf]  ;;  %v285_v6 = vld [vmem:[%s574_s24 + $0x4] sm:$0xf]  ;;  %v263_v7 = vmax.bf16 %v241_v3, %v219_v1  ;;  %v242_v10 = vld [vmem:[%s569_s21 + $0x8] sm:$0xf] }
  0x13   : > { %v243_v12 = vld [vmem:[%s569_s21 + $0xc] sm:$0xf]  ;;  %v264_v13 = vmax.bf16 %v242_v10, %v220_v8  ;;  %v286_v14 = vld [vmem:[%s574_s24 + $0x8] sm:$0xf]  ;;  %v222_v18 = vld [vmem:[%s564_s18 + $0x10] sm:$0xf] }
  0x14   : > { %v306_v11 = vmax.bf16 %v284_v5, %v262_v4  ;;  %v287_v15 = vld [vmem:[%s574_s24 + $0xc] sm:$0xf]  ;;  %v307_v16 = vmax.bf16 %v285_v6, %v263_v7  ;;  %v265_v17 = vmax.bf16 %v243_v12, %v221_v9  ;;  %v223_v19 = vld [vmem:[%s564_s18 + $0x14] sm:$0xf]  ;;  %v244_v20 = vld [vmem:[%s569_s21 + $0x10] sm:$0xf] }
  0x15   : > { %v308_v21 = vmax.bf16 %v286_v14, %v264_v13  ;;  %v245_v22 = vld [vmem:[%s569_s21 + $0x14] sm:$0xf]  ;;  %v266_v23 = vmax.bf16 %v244_v20, %v222_v18  ;;  %v288_v24 = vld [vmem:[%s574_s24 + $0x10] sm:$0xf]  ;;  %v224_v29 = vld [vmem:[%s564_s18 + $0x18] sm:$0xf] }
  0x16   : > { %v289_v25 = vld [vmem:[%s574_s24 + $0x14] sm:$0xf]  ;;  %v496_v26 = vcombine.low %v306_v11, %v307_v16  ;;  %v309_v27 = vmax.bf16 %v287_v15, %v265_v17  ;;  %v267_v28 = vmax.bf16 %v245_v22, %v223_v19  ;;  %v225_v30 = vld [vmem:[%s564_s18 + $0x1c] sm:$0xf]  ;;  %v246_v31 = vld [vmem:[%s569_s21 + $0x18] sm:$0xf] }
  0x17   : > { %v310_v32 = vmax.bf16 %v288_v24, %v266_v23  ;;  %v247_v33 = vld [vmem:[%s569_s21 + $0x1c] sm:$0xf]  ;;  %v268_v34 = vmax.bf16 %v246_v31, %v224_v29  ;;  %v290_v35 = vld [vmem:[%s574_s24 + $0x18] sm:$0xf]  ;;  %v226_v40 = vld [vmem:[%s564_s18 + $0x20] sm:$0xf] }
  0x18   : > { %v291_v36 = vld [vmem:[%s574_s24 + $0x1c] sm:$0xf]  ;;  %445 = vst [vmem:[%s594_s27] sm:$0xff] %v496_v26   ;;  %v497_v37 = vcombine.low %v308_v21, %v309_v27  ;;  %v311_v38 = vmax.bf16 %v289_v25, %v267_v28  ;;  %v269_v39 = vmax.bf16 %v247_v33, %v225_v30  ;;  %v227_v41 = vld [vmem:[%s564_s18 + $0x24] sm:$0xf]  ;;  %v248_v42 = vld [vmem:[%s569_s21 + $0x20] sm:$0xf] }
  0x19   : > { %v312_v43 = vmax.bf16 %v290_v35, %v268_v34  ;;  %v249_v44 = vld [vmem:[%s569_s21 + $0x24] sm:$0xf]  ;;  %v270_v45 = vmax.bf16 %v248_v42, %v226_v40  ;;  %v292_v46 = vld [vmem:[%s574_s24 + $0x20] sm:$0xf]  ;;  %v228_v51 = vld [vmem:[%s564_s18 + $0x28] sm:$0xf] }
  0x1a   : > { %v293_v47 = vld [vmem:[%s574_s24 + $0x24] sm:$0xf]  ;;  %498 = vst [vmem:[%s594_s27 + $0x8] sm:$0xff] %v497_v37   ;;  %v499_v48 = vcombine.low %v310_v32, %v311_v38  ;;  %v313_v49 = vmax.bf16 %v291_v36, %v269_v39  ;;  %v271_v50 = vmax.bf16 %v249_v44, %v227_v41  ;;  %v229_v52 = vld [vmem:[%s564_s18 + $0x2c] sm:$0xf] }
  0x1b   : > { %v250_v53 = vld [vmem:[%s569_s21 + $0x28] sm:$0xf]  ;;  %v314_v54 = vmax.bf16 %v292_v46, %v270_v45  ;;  %v251_v55 = vld [vmem:[%s569_s21 + $0x2c] sm:$0xf]  ;;  %v230_v62 = vld [vmem:[%s564_s18 + $0x30] sm:$0xf] }
  0x1c   : > { %v272_v56 = vmax.bf16 %v250_v53, %v228_v51  ;;  %v294_v57 = vld [vmem:[%s574_s24 + $0x28] sm:$0xf]  ;;  %v295_v58 = vld [vmem:[%s574_s24 + $0x2c] sm:$0xf]  ;;  %500 = vst [vmem:[%s594_s27 + $0x10] sm:$0xff] %v499_v48   ;;  %v501_v59 = vcombine.low %v312_v43, %v313_v49  ;;  %v315_v60 = vmax.bf16 %v293_v47, %v271_v50  ;;  %v273_v61 = vmax.bf16 %v251_v55, %v229_v52 }
  0x1d   : > { %v231_v63 = vld [vmem:[%s564_s18 + $0x34] sm:$0xf]  ;;  %v252_v0 = vld [vmem:[%s569_s21 + $0x30] sm:$0xf]  ;;  %v232_v9 = vld [vmem:[%s564_s18 + $0x38] sm:$0xf] }
  0x1e   : > { %v316_v1 = vmax.bf16 %v294_v57, %v272_v56  ;;  %v253_v2 = vld [vmem:[%s569_s21 + $0x34] sm:$0xf]  ;;  %v274_v3 = vmax.bf16 %v252_v0, %v230_v62  ;;  %v296_v4 = vld [vmem:[%s574_s24 + $0x30] sm:$0xf]  ;;  %502 = vst [vmem:[%s594_s27 + $0x18] sm:$0xff] %v501_v59   ;;  %v503_v6 = vcombine.low %v314_v54, %v315_v60  ;;  %v317_v7 = vmax.bf16 %v295_v58, %v273_v61 }
  0x1f   : > { %v297_v5 = vld [vmem:[%s574_s24 + $0x34] sm:$0xf]  ;;  %v275_v8 = vmax.bf16 %v253_v2, %v231_v63  ;;  %v233_v10 = vld [vmem:[%s564_s18 + $0x3c] sm:$0xf]  ;;  %v254_v11 = vld [vmem:[%s569_s21 + $0x38] sm:$0xf] }
  0x20   : > { %v318_v12 = vmax.bf16 %v296_v4, %v274_v3  ;;  %v255_v13 = vld [vmem:[%s569_s21 + $0x3c] sm:$0xf]  ;;  %v276_v14 = vmax.bf16 %v254_v11, %v232_v9  ;;  %v298_v15 = vld [vmem:[%s574_s24 + $0x38] sm:$0xf]  ;;  %504 = vst [vmem:[%s594_s27 + $0x20] sm:$0xff] %v503_v6   ;;  %v505_v17 = vcombine.low %v316_v1, %v317_v7 }
  0x21   : > { %v299_v16 = vld [vmem:[%s574_s24 + $0x3c] sm:$0xf]  ;;  %v319_v18 = vmax.bf16 %v297_v5, %v275_v8  ;;  %v277_v19 = vmax.bf16 %v255_v13, %v233_v10  ;;  %v234_v20 = vld [vmem:[%s564_s18 + $0x40] sm:$0xf]  ;;  %v235_v21 = vld [vmem:[%s564_s18 + $0x44] sm:$0xf] }
  0x22   : > { %v256_v22 = vld [vmem:[%s569_s21 + $0x40] sm:$0xf]  ;;  %v320_v23 = vmax.bf16 %v298_v15, %v276_v14  ;;  %v257_v24 = vld [vmem:[%s569_s21 + $0x44] sm:$0xf]  ;;  %506 = vst [vmem:[%s594_s27 + $0x28] sm:$0xff] %v505_v17  }
  0x23   : > { %v278_v25 = vmax.bf16 %v256_v22, %v234_v20  ;;  %v300_v26 = vld [vmem:[%s574_s24 + $0x40] sm:$0xf]  ;;  %v301_v27 = vld [vmem:[%s574_s24 + $0x44] sm:$0xf]  ;;  %v507_v28 = vcombine.low %v318_v12, %v319_v18  ;;  %v321_v29 = vmax.bf16 %v299_v16, %v277_v19  ;;  %v279_v30 = vmax.bf16 %v257_v24, %v235_v21  ;;  %v236_v31 = vld [vmem:[%s564_s18 + $0x48] sm:$0xf] }
  0x24   : > { %v237_v32 = vld [vmem:[%s564_s18 + $0x4c] sm:$0xf]  ;;  %v258_v33 = vld [vmem:[%s569_s21 + $0x48] sm:$0xf]  ;;  %v238_v42 = vld [vmem:[%s564_s18 + $0x50] sm:$0xf] }
  0x25   : > { %v322_v34 = vmax.bf16 %v300_v26, %v278_v25  ;;  %v259_v35 = vld [vmem:[%s569_s21 + $0x4c] sm:$0xf]  ;;  %v280_v36 = vmax.bf16 %v258_v33, %v236_v31  ;;  %v302_v37 = vld [vmem:[%s574_s24 + $0x48] sm:$0xf]  ;;  %508 = vst [vmem:[%s594_s27 + $0x30] sm:$0xff] %v507_v28   ;;  %v509_v39 = vcombine.low %v320_v23, %v321_v29  ;;  %v323_v40 = vmax.bf16 %v301_v27, %v279_v30 }
  0x26   : > { %v303_v38 = vld [vmem:[%s574_s24 + $0x4c] sm:$0xf]  ;;  %v281_v41 = vmax.bf16 %v259_v35, %v237_v32  ;;  %v239_v43 = vld [vmem:[%s564_s18 + $0x54] sm:$0xf]  ;;  %v260_v44 = vld [vmem:[%s569_s21 + $0x50] sm:$0xf] }
  0x27   : > { %v324_v45 = vmax.bf16 %v302_v37, %v280_v36  ;;  %v261_v46 = vld [vmem:[%s569_s21 + $0x54] sm:$0xf]  ;;  %v282_v47 = vmax.bf16 %v260_v44, %v238_v42  ;;  %v304_v48 = vld [vmem:[%s574_s24 + $0x50] sm:$0xf]  ;;  %510 = vst [vmem:[%s594_s27 + $0x38] sm:$0xff] %v509_v39   ;;  %v511_v50 = vcombine.low %v322_v34, %v323_v40 }
  0x28   : > { %v305_v49 = vld [vmem:[%s574_s24 + $0x54] sm:$0xf]  ;;  %v325_v51 = vmax.bf16 %v303_v38, %v281_v41  ;;  %v283_v52 = vmax.bf16 %v261_v46, %v239_v43 }
  0x29   : > { %v326_v53 = vmax.bf16 %v304_v48, %v282_v47  ;;  %512 = vst [vmem:[%s594_s27 + $0x40] sm:$0xff] %v511_v50  }
  0x2a   : > { %v513_v54 = vcombine.low %v324_v45, %v325_v51  ;;  %v327_v55 = vmax.bf16 %v305_v49, %v283_v52 }
  0x2c   : > { %514 = vst [vmem:[%s594_s27 + $0x48] sm:$0xff] %v513_v54   ;;  %v515_v56 = vcombine.low %v326_v53, %v327_v55 }
  0x2e   : > { %516 = vst [vmem:[%s594_s27 + $0x50] sm:$0xff] %v515_v56  }
  0x2f PF: > { %s13_s12 = sadd.s32 1, %s531_s12  }
  0x30   : > { %p10_p4 = scmp.ge.s32.totalorder %s13_s12, 4  }
  0x32   :  { %12 = sbr.rel (!%p10_p4) target bundleno = 1 (0x1), region = 68 }

// kernel: pspnet_tl_forward.26
= control target key start
LH: loop header
LB: loop body
LE: loop exit
PB: predicated region body
PF: predicated region fallthrough
CT: control target
= control target key end

     0   :  { %s458_s12 = smov 0   ;;  %s531_s0 = inlined_call_operand.vmem [shape: bf16[192,128], index: 0, kind: input, shape index: {}]   ;;  %s532_s1 = inlined_call_operand.vmem [shape: bf16[192,128], index: 1, kind: input, shape index: {}]   ;;  %s533_s2 = inlined_call_operand.vmem [shape: bf16[192,128], index: 2, kind: input, shape index: {}]   ;;  %s534_s3 = inlined_call_operand.vmem [shape: bf16[192,128], index: 3, kind: output, shape index: {}]  }
   0x1 LB: > { %s370_s13 = sadd.s32 4294967295, %s436_s12   ;;  %p374_p0 = scmp.ge.s32.totalorder %s436_s12, 1  ;;  %s436_s12 = sphi %s458_s12, %s13_s12  }
   0x2   : > { %p160_p1 = scmp.lt.s32.totalorder %s436_s12, 3 }
   0x4   : > { %p161_p2 = pnand %p374_p0, %p160_p1 }
   0x5   : > { %s194_s14 = smul.u32 (!%p161_p2), 12, %s370_s13 }
   0x6   : > { %164 = sbr.rel (%p161_p2) target bundleno = 35 (0x23), region = 32 }
   0x7   : > { %p195_p3 = scmp.lt.s32.totalorder (!%p161_p2), %s194_s14, 23 }
   0xd   : > { %s536_s14 = smov (!%p195_p3, %s194_s14), 23 }
   0xe   : > { %s375_s15 = sshll.u32 %s536_s14, 2 }
   0xf   : > { %s469_s18 = scalar_lea.vmem %s531_s0, %s375_s15  ;;  %s474_s21 = scalar_lea.vmem %s532_s1, %s375_s15 }
  0x10   : > { %s479_s24 = scalar_lea.vmem %s533_s2, %s375_s15  ;;  %v218_v0 = vld [vmem:[%s469_s18] sm:$0xf]  ;;  %v219_v1 = vld [vmem:[%s469_s18 + $0x4] sm:$0xf]  ;;  %v220_v8 = vld [vmem:[%s469_s18 + $0x8] sm:$0xf]  ;;  %s499_s27 = scalar_lea.vmem %s534_s3, %s375_s15 }
  0x11   : > { %v230_v2 = vld [vmem:[%s474_s21] sm:$0xf]  ;;  %v231_v3 = vld [vmem:[%s474_s21 + $0x4] sm:$0xf]  ;;  %v221_v9 = vld [vmem:[%s469_s18 + $0xc] sm:$0xf] }
  0x12   : > { %v242_v4 = vmax.bf16 %v230_v2, %v218_v0  ;;  %v254_v5 = vld [vmem:[%s479_s24] sm:$0xf]  ;;  %v255_v6 = vld [vmem:[%s479_s24 + $0x4] sm:$0xf]  ;;  %v243_v7 = vmax.bf16 %v231_v3, %v219_v1  ;;  %v232_v10 = vld [vmem:[%s474_s21 + $0x8] sm:$0xf] }
  0x13   : > { %v233_v12 = vld [vmem:[%s474_s21 + $0xc] sm:$0xf]  ;;  %v244_v13 = vmax.bf16 %v232_v10, %v220_v8  ;;  %v256_v14 = vld [vmem:[%s479_s24 + $0x8] sm:$0xf]  ;;  %v222_v18 = vld [vmem:[%s469_s18 + $0x10] sm:$0xf] }
  0x14   : > { %v266_v11 = vmax.bf16 %v254_v5, %v242_v4  ;;  %v257_v15 = vld [vmem:[%s479_s24 + $0xc] sm:$0xf]  ;;  %v267_v16 = vmax.bf16 %v255_v6, %v243_v7  ;;  %v245_v17 = vmax.bf16 %v233_v12, %v221_v9  ;;  %v223_v19 = vld [vmem:[%s469_s18 + $0x14] sm:$0xf]  ;;  %v234_v20 = vld [vmem:[%s474_s21 + $0x10] sm:$0xf] }
  0x15   : > { %v268_v21 = vmax.bf16 %v256_v14, %v244_v13  ;;  %v235_v22 = vld [vmem:[%s474_s21 + $0x14] sm:$0xf]  ;;  %v246_v23 = vmax.bf16 %v234_v20, %v222_v18  ;;  %v258_v24 = vld [vmem:[%s479_s24 + $0x10] sm:$0xf]  ;;  %v224_v29 = vld [vmem:[%s469_s18 + $0x18] sm:$0xf] }
  0x16   : > { %v259_v25 = vld [vmem:[%s479_s24 + $0x14] sm:$0xf]  ;;  %v411_v26 = vcombine.low %v266_v11, %v267_v16  ;;  %v269_v27 = vmax.bf16 %v257_v15, %v245_v17  ;;  %v247_v28 = vmax.bf16 %v235_v22, %v223_v19  ;;  %v225_v30 = vld [vmem:[%s469_s18 + $0x1c] sm:$0xf]  ;;  %v236_v31 = vld [vmem:[%s474_s21 + $0x18] sm:$0xf] }
  0x17   : > { %v270_v32 = vmax.bf16 %v258_v24, %v246_v23  ;;  %v237_v33 = vld [vmem:[%s474_s21 + $0x1c] sm:$0xf]  ;;  %v248_v34 = vmax.bf16 %v236_v31, %v224_v29  ;;  %v260_v35 = vld [vmem:[%s479_s24 + $0x18] sm:$0xf]  ;;  %v226_v40 = vld [vmem:[%s469_s18 + $0x20] sm:$0xf] }
  0x18   : > { %v261_v36 = vld [vmem:[%s479_s24 + $0x1c] sm:$0xf]  ;;  %385 = vst [vmem:[%s499_s27] sm:$0xff] %v411_v26   ;;  %v412_v37 = vcombine.low %v268_v21, %v269_v27  ;;  %v271_v38 = vmax.bf16 %v259_v25, %v247_v28  ;;  %v249_v39 = vmax.bf16 %v237_v33, %v225_v30  ;;  %v227_v41 = vld [vmem:[%s469_s18 + $0x24] sm:$0xf]  ;;  %v238_v42 = vld [vmem:[%s474_s21 + $0x20] sm:$0xf] }
  0x19   : > { %v272_v43 = vmax.bf16 %v260_v35, %v248_v34  ;;  %v239_v44 = vld [vmem:[%s474_s21 + $0x24] sm:$0xf]  ;;  %v250_v45 = vmax.bf16 %v238_v42, %v226_v40  ;;  %v262_v46 = vld [vmem:[%s479_s24 + $0x20] sm:$0xf]  ;;  %v228_v51 = vld [vmem:[%s469_s18 + $0x28] sm:$0xf] }
  0x1a   : > { %v263_v47 = vld [vmem:[%s479_s24 + $0x24] sm:$0xf]  ;;  %413 = vst [vmem:[%s499_s27 + $0x8] sm:$0xff] %v412_v37   ;;  %v414_v48 = vcombine.low %v270_v32, %v271_v38  ;;  %v273_v49 = vmax.bf16 %v261_v36, %v249_v39  ;;  %v251_v50 = vmax.bf16 %v239_v44, %v227_v41  ;;  %v229_v52 = vld [vmem:[%s469_s18 + $0x2c] sm:$0xf] }
  0x1b   : > { %v240_v53 = vld [vmem:[%s474_s21 + $0x28] sm:$0xf]  ;;  %v274_v54 = vmax.bf16 %v262_v46, %v250_v45  ;;  %v241_v55 = vld [vmem:[%s474_s21 + $0x2c] sm:$0xf] }
  0x1c   : > { %v252_v56 = vmax.bf16 %v240_v53, %v228_v51  ;;  %v264_v57 = vld [vmem:[%s479_s24 + $0x28] sm:$0xf]  ;;  %v265_v58 = vld [vmem:[%s479_s24 + $0x2c] sm:$0xf]  ;;  %415 = vst [vmem:[%s499_s27 + $0x10] sm:$0xff] %v414_v48   ;;  %v416_v59 = vcombine.low %v272_v43, %v273_v49  ;;  %v275_v60 = vmax.bf16 %v263_v47, %v251_v50  ;;  %v253_v61 = vmax.bf16 %v241_v55, %v229_v52 }
  0x1e   : > { %v276_v62 = vmax.bf16 %v264_v57, %v252_v56  ;;  %417 = vst [vmem:[%s499_s27 + $0x18] sm:$0xff] %v416_v59   ;;  %v418_v63 = vcombine.low %v274_v54, %v275_v60  ;;  %v277_v0 = vmax.bf16 %v265_v58, %v253_v61 }
  0x20   : > { %419 = vst [vmem:[%s499_s27 + $0x20] sm:$0xff] %v418_v63   ;;  %v420_v1 = vcombine.low %v276_v62, %v277_v0 }
  0x22   : > { %421 = vst [vmem:[%s499_s27 + $0x28] sm:$0xff] %v420_v1  }
  0x23 PF: > { %s13_s12 = sadd.s32 1, %s436_s12  }
  0x24   : > { %p10_p4 = scmp.ge.s32.totalorder %s13_s12, 4  }
  0x26   :  { %12 = sbr.rel (!%p10_p4) target bundleno = 1 (0x1), region = 68 }

// kernel: pspnet_tl_forward.27
= control target key start
LH: loop header
LB: loop body
LE: loop exit
PB: predicated region body
PF: predicated region fallthrough
CT: control target
= control target key end

     0   :  { %s694_s12 = smov 0   ;;  %s753_s0 = inlined_call_operand.vmem [shape: bf16[192,128], index: 0, kind: input, shape index: {}]   ;;  %s754_s1 = inlined_call_operand.vmem [shape: bf16[128,128], index: 1, kind: input, shape index: {}]   ;;  %s755_s2 = inlined_call_operand.vmem [shape: f32[1,128], index: 2, kind: input, shape index: {}]   ;;  %s756_s3 = inlined_call_operand.vmem [shape: bf16[192,128], index: 3, kind: output, shape index: {}]  }
   0x1 LB: > { %s503_s13 = sadd.s32 4294967295, %s672_s12   ;;  %p507_p0 = scmp.ge.s32.totalorder %s672_s12, 1  ;;  %s672_s12 = sphi %s694_s12, %s13_s12  }
   0x2   : > { %p138_p1 = scmp.lt.s32.totalorder %s672_s12, 3 }
   0x4   : > { %p139_p2 = pnand %p507_p0, %p138_p1 }
   0x5   : > { %v652_v0 = vld [vmem:[%s754_s1] sm:$0xff] (!%p139_p2)   ;;  %s162_s16 = smul.u32 (!%p139_p2), 12, %s503_s13  ;;  %v653_v1 = vld [vmem:[%s754_s1 + $0x8] sm:$0xff] (!%p139_p2)   ;;  %v654_v2 = vld [vmem:[%s754_s1 + $0x10] sm:$0xff] (!%p139_p2)  }
   0x6   : > { %142 = sbr.rel (%p139_p2) target bundleno = 268 (0x10c), region = 32  ;;  %628 = vmatprep.subr.bf16.mxu1 (!%p139_p2), %v652_v0  ;;  %600 = vmatprep.subr.bf16.mxu0 (!%p139_p2), %v652_v0  ;;  %v655_v3 = vld [vmem:[%s754_s1 + $0x18] sm:$0xff] (!%p139_p2)   ;;  %v656_v6 = vld [vmem:[%s754_s1 + $0x20] sm:$0xff] (!%p139_p2)   ;;  %v657_v7 = vld [vmem:[%s754_s1 + $0x28] sm:$0xff] (!%p139_p2)  }
   0x7   : > { %p163_p3 = scmp.lt.s32.totalorder (!%p139_p2), %s162_s16, 23  ;;  %636 = vmatpush3.bf16.msra.mxu1 (!%p139_p2), %v652_v0  ;;  %601 = vmatpush3.bf16.msra.mxu0 (!%p139_p2), %v652_v0  ;;  %v658_v8 = vld [vmem:[%s754_s1 + $0x30] sm:$0xff] (!%p139_p2)   ;;  %v659_v9 = vld [vmem:[%s754_s1 + $0x38] sm:$0xff] (!%p139_p2)   ;;  %v510_v14 = vld [vmem:[%s755_s2] ss:$0 sm:$0xff] (!%p139_p2) }
   0x8   : > { %629 = vmatprep.subr.bf16.mxu1 (!%p139_p2), %v653_v1  ;;  %602 = vmatprep.subr.bf16.mxu0 (!%p139_p2), %v653_v1 }
   0xb   : > { %637 = vmatpush3.bf16.msra.mxu1 (!%p139_p2), %v653_v1  ;;  %603 = vmatpush3.bf16.msra.mxu0 (!%p139_p2), %v653_v1 }
   0xc   : > { %630 = vmatprep.subr.bf16.mxu1 (!%p139_p2), %v654_v2  ;;  %604 = vmatprep.subr.bf16.mxu0 (!%p139_p2), %v654_v2 }
   0xd   : > { %s758_s16 = smov (!%p163_p3, %s162_s16), 23 }
   0xe   : > { %s508_s21 = sshll.u32 %s758_s16, 2 }
   0xf   : > { %s722_s26 = scalar_lea.vmem %s753_s0, %s508_s21  ;;  %638 = vmatpush3.bf16.msra.mxu1 %v654_v2  ;;  %605 = vmatpush3.bf16.msra.mxu0 %v654_v2  ;;  %s172_s13 = scalar_lea.vmem %s756_s3, %s508_s21 }
  0x10   : > { %v660_v4 = vld [vmem:[%s722_s26 + $0x10] sm:$0xff]   ;;  %v662_v5 = vld [vmem:[%s722_s26] sm:$0xff]   ;;  %631 = vmatprep.subr.bf16.mxu1 %v655_v3  ;;  %606 = vmatprep.subr.bf16.mxu0 %v655_v3  ;;  %v661_v10 = vld [vmem:[%s722_s26 + $0x18] sm:$0xff]  }
  0x11   : > { %620 = vmatprep.mubr.bf16.mxu1 %v660_v4  ;;  %616 = vmatprep.mubr.bf16.mxu0 %v662_v5  ;;  %v663_v11 = vld [vmem:[%s722_s26 + $0x8] sm:$0xff]   ;;  %v664_v12 = vld [vmem:[%s722_s26 + $0x20] sm:$0xff]  }
  0x12   : > { %v665_v13 = vld [vmem:[%s722_s26 + $0x28] sm:$0xff]  }
  0x13   : > { %639 = vmatpush3.bf16.msra.mxu1 %v655_v3  ;;  %607 = vmatpush3.bf16.msra.mxu0 %v655_v3 }
  0x14   : > { %632 = vmatprep.subr.bf16.mxu1 %v656_v6  ;;  %608 = vmatprep.subr.bf16.mxu0 %v656_v6 }
  0x17   : > { %640 = vmatpush3.bf16.msra.mxu1 %v656_v6  ;;  %609 = vmatpush3.bf16.msra.mxu0 %v656_v6 }
  0x18   : > { %633 = vmatprep.subr.bf16.mxu1 %v657_v7  ;;  %610 = vmatprep.subr.bf16.mxu0 %v657_v7 }
  0x1b   : > { %641 = vmatpush3.bf16.msra.mxu1 %v657_v7  ;;  %611 = vmatpush3.bf16.msra.mxu0 %v657_v7 }
  0x1c   : > { %634 = vmatprep.subr.bf16.mxu1 %v658_v8  ;;  %612 = vmatprep.subr.bf16.mxu0 %v658_v8 }
  0x1f   : > { %642 = vmatpush3.bf16.msra.mxu1 %v658_v8  ;;  %613 = vmatpush3.bf16.msra.mxu0 %v658_v8 }
  0x20   : > { %635 = vmatprep.subr.bf16.mxu1 %v659_v9  ;;  %614 = vmatprep.subr.bf16.mxu0 %v659_v9 }
  0x23   : > { %643 = vmatpush3.bf16.msra.mxu1 %v659_v9  ;;  %615 = vmatpush3.bf16.msra.mxu0 %v659_v9 }
  0x26   : > { %621 = vmatmul.mubr.bf16.vlgmr.msra.gmra.mrb[0].mxu1 %v661_v10  ;;  %617 = vmatmul.mubr.bf16.vlgmr.msra.gmra.mrb[0].mxu0 %v663_v11 }
  0x27   : > { %624 = vmatprep.mubr.bf16.mxu1 %v664_v12 }
  0x2e   : > { %625 = vmatmul.mubr.bf16.gmra.mrb[4].mxu1 %v665_v13 }
  0xf9   : > { %v622_v15 = vpop.f32.mrb[0].mxu1  ;;  %v618_v16 = vpop.f32.mrb[0].mxu0 }
  0xfa   : > { %v353_v17 = vadd.f32 %v622_v15, %v510_v14  ;;  %v344_v18 = vpop.f32.mrb[1].mxu1  ;;  %v337_v19 = vadd.f32 %v618_v16, %v510_v14  ;;  %v328_v20 = vpop.f32.mrb[1].mxu0 }
  0xfb   : > { %v345_v21 = vadd.f32 %v510_v14, %v344_v18  ;;  %v623_v22 = vpop.f32.mrb[2].mxu1  ;;  %v329_v23 = vadd.f32 %v510_v14, %v328_v20  ;;  %v619_v24 = vpop.f32.mrb[2].mxu0 }
  0xfc   : > { %v356_v25 = vadd.f32 %v623_v22, %v510_v14  ;;  %v347_v26 = vpop.f32.mrb[3].mxu1  ;;  %v377_v27 = vmax.f32 %v337_v19, 0.0  ;;  %v340_v28 = vadd.f32 %v619_v24, %v510_v14  ;;  %v331_v29 = vpop.f32.mrb[3].mxu0  ;;  %v381_v33 = vmax.f32 %v353_v17, 0.0 }
  0xfd   : > { %v348_v30 = vadd.f32 %v510_v14, %v347_v26  ;;  %v375_v31 = vmax.f32 %v329_v23, 0.0  ;;  %v332_v32 = vadd.f32 %v510_v14, %v331_v29  ;;  %v379_v36 = vmax.f32 %v345_v21, 0.0 }
  0xfe   : > { %v382_v34 = vmax.f32 %v356_v25, 0.0  ;;  %v378_v35 = vmax.f32 %v340_v28, 0.0 }
  0xff   : > { %v380_v37 = vmax.f32 %v348_v30, 0.0  ;;  %v376_v38 = vmax.f32 %v332_v32, 0.0 }
 0x100   : > { %v569_v39 = vpack.c.bf16 %v382_v34, %v381_v33  ;;  %v559_v40 = vpack.c.bf16 %v378_v35, %v377_v27 }
 0x101   : > { %v564_v41 = vpack.c.bf16 %v380_v37, %v379_v36  ;;  %v554_v42 = vpack.c.bf16 %v376_v38, %v375_v31  ;;  %v626_v43 = vpop.f32.mrb[4].mxu1 }
 0x102   : > { %583 = vst [vmem:[%s172_s13 + $0x18] sm:$0xff] %v569_v39   ;;  %581 = vst [vmem:[%s172_s13 + $0x8] sm:$0xff] %v559_v40   ;;  %v369_v44 = vadd.f32 %v626_v43, %v510_v14  ;;  %v360_v45 = vpop.f32.mrb[5].mxu1 }
 0x103   : > { %582 = vst [vmem:[%s172_s13 + $0x10] sm:$0xff] %v564_v41   ;;  %555 = vst [vmem:[%s172_s13] sm:$0xff] %v554_v42   ;;  %v361_v46 = vadd.f32 %v510_v14, %v360_v45  ;;  %v627_v47 = vpop.f32.mrb[6].mxu1 }
 0x104   : > { %v372_v48 = vadd.f32 %v627_v47, %v510_v14  ;;  %v363_v49 = vpop.f32.mrb[7].mxu1  ;;  %v385_v51 = vmax.f32 %v369_v44, 0.0 }
 0x105   : > { %v364_v50 = vadd.f32 %v510_v14, %v363_v49  ;;  %v383_v53 = vmax.f32 %v361_v46, 0.0 }
 0x106   : > { %v386_v52 = vmax.f32 %v372_v48, 0.0 }
 0x107   : > { %v384_v54 = vmax.f32 %v364_v50, 0.0 }
 0x108   : > { %v579_v55 = vpack.c.bf16 %v386_v52, %v385_v51 }
 0x109   : > { %v574_v56 = vpack.c.bf16 %v384_v54, %v383_v53 }
 0x10a   : > { %585 = vst [vmem:[%s172_s13 + $0x28] sm:$0xff] %v579_v55  }
 0x10b   : > { %584 = vst [vmem:[%s172_s13 + $0x20] sm:$0xff] %v574_v56  }
 0x10c PF: > { %s13_s12 = sadd.s32 1, %s672_s12  }
 0x10d   : > { %p10_p4 = scmp.ge.s32.totalorder %s13_s12, 4  }
 0x10f   :  { %12 = sbr.rel (!%p10_p4) target bundleno = 1 (0x1), region = 62 }

// kernel: pspnet_tl_forward.28
= control target key start
LH: loop header
LB: loop body
LE: loop exit
PB: predicated region body
PF: predicated region fallthrough
CT: control target
= control target key end

     0   :  { %s2278_s12 = smov 0   ;;  %s2641_s0 = inlined_call_operand.vmem [shape: bf16[192,1152], index: 0, kind: input, shape index: {}]   ;;  %s2642_s1 = inlined_call_operand.vmem [shape: bf16[1152,128], index: 1, kind: input, shape index: {}]   ;;  %s2643_s2 = inlined_call_operand.vmem [shape: f32[1,128], index: 2, kind: input, shape index: {}]   ;;  %s2644_s3 = inlined_call_operand.vmem [shape: bf16[192,128], index: 3, kind: output, shape index: {}]  }
   0x1 LB: > { %s1630_s13 = sadd.s32 4294967295, %s2256_s12   ;;  %p1634_p0 = scmp.ge.s32.totalorder %s2256_s12, 1  ;;  %s2256_s12 = sphi %s2278_s12, %s13_s12  }
   0x2   : > { %p139_p1 = scmp.lt.s32.totalorder %s2256_s12, 3 }
   0x4   : > { %p140_p2 = pnand %p1634_p0, %p139_p1 }
   0x5   : > { %v2100_v0 = vld [vmem:[%s2642_s1 + $0x40] sm:$0xff] (!%p140_p2)   ;;  %v2104_v4 = vld [vmem:[%s2642_s1 + $0x48] sm:$0xff] (!%p140_p2)   ;;  %v2108_v8 = vld [vmem:[%s2642_s1 + $0x50] sm:$0xff] (!%p140_p2)   ;;  %s164_s17 = smul.u32 (!%p140_p2), 12, %s1630_s13 }
   0x6   : > { %143 = sbr.rel (%p140_p2) target bundleno = 366 (0x16e), region = 32  ;;  %v2101_v1 = vld [vmem:[%s2642_s1 + $0xc0] sm:$0xff] (!%p140_p2)   ;;  %1825 = vmatprep.subr.bf16.mxu0 (!%p140_p2), %v2100_v0  ;;  %v2105_v5 = vld [vmem:[%s2642_s1 + $0xc8] sm:$0xff] (!%p140_p2)   ;;  %v2109_v9 = vld [vmem:[%s2642_s1 + $0xd0] sm:$0xff] (!%p140_p2)  }
   0x7   : > { %v2102_v2 = vld [vmem:[%s2642_s1] sm:$0xff] (!%p140_p2)   ;;  %1877 = vmatprep.subr.bf16.mxu1 (!%p140_p2), %v2101_v1  ;;  %v2106_v6 = vld [vmem:[%s2642_s1 + $0x8] sm:$0xff] (!%p140_p2)   ;;  %v2110_v10 = vld [vmem:[%s2642_s1 + $0x10] sm:$0xff] (!%p140_p2)   ;;  %p165_p3 = scmp.lt.s32.totalorder (!%p140_p2), %s164_s17, 23 }
   0x8   : > { %v2103_v3 = vld [vmem:[%s2642_s1 + $0x80] sm:$0xff] (!%p140_p2)   ;;  %1826 = vmatpush3.bf16.msra.mxu0 (!%p140_p2), %v2102_v2  ;;  %v2107_v7 = vld [vmem:[%s2642_s1 + $0x88] sm:$0xff] (!%p140_p2)   ;;  %v2111_v11 = vld [vmem:[%s2642_s1 + $0x90] sm:$0xff] (!%p140_p2)  }
   0x9   : > { %1878 = vmatpush3.bf16.msra.mxu1 (!%p140_p2), %v2103_v3  ;;  %1827 = vmatprep.subr.bf16.mxu0 (!%p140_p2), %v2104_v4  ;;  %v2112_v12 = vld [vmem:[%s2642_s1 + $0x58] sm:$0xff] (!%p140_p2)   ;;  %v2116_v16 = vld [vmem:[%s2642_s1 + $0x60] sm:$0xff] (!%p140_p2)   ;;  %v2120_v20 = vld [vmem:[%s2642_s1 + $0x68] sm:$0xff] (!%p140_p2)  }
   0xa   : > { %1879 = vmatprep.subr.bf16.mxu1 (!%p140_p2), %v2105_v5  ;;  %v2113_v13 = vld [vmem:[%s2642_s1 + $0xd8] sm:$0xff] (!%p140_p2)   ;;  %v2117_v17 = vld [vmem:[%s2642_s1 + $0xe0] sm:$0xff] (!%p140_p2)   ;;  %v2121_v21 = vld [vmem:[%s2642_s1 + $0xe8] sm:$0xff] (!%p140_p2)  }
   0xb   : > { %v2114_v14 = vld [vmem:[%s2642_s1 + $0x18] sm:$0xff] (!%p140_p2)   ;;  %v2118_v18 = vld [vmem:[%s2642_s1 + $0x20] sm:$0xff] (!%p140_p2)   ;;  %v2122_v22 = vld [vmem:[%s2642_s1 + $0x28] sm:$0xff] (!%p140_p2)  }
   0xc   : > { %1828 = vmatpush3.bf16.msra.mxu0 (!%p140_p2), %v2106_v6  ;;  %v2115_v15 = vld [vmem:[%s2642_s1 + $0x98] sm:$0xff] (!%p140_p2)   ;;  %v2119_v19 = vld [vmem:[%s2642_s1 + $0xa0] sm:$0xff] (!%p140_p2)   ;;  %v2123_v23 = vld [vmem:[%s2642_s1 + $0xa8] sm:$0xff] (!%p140_p2)  }
   0xd   : > { %1880 = vmatpush3.bf16.msra.mxu1 %v2107_v7  ;;  %1829 = vmatprep.subr.bf16.mxu0 %v2108_v8  ;;  %s2646_s17 = smov (!%p165_p3, %s164_s17), 23  ;;  %v2124_v24 = vld [vmem:[%s2642_s1 + $0x70] sm:$0xff]   ;;  %v2128_v28 = vld [vmem:[%s2642_s1 + $0x78] sm:$0xff]   ;;  %v2138_v36 = vld [vmem:[%s2642_s1 + $0x1c0] sm:$0xff]  }
   0xe   : > { %1881 = vmatprep.subr.bf16.mxu1 %v2109_v9  ;;  %v2125_v25 = vld [vmem:[%s2642_s1 + $0xf0] sm:$0xff]   ;;  %s2091_s16 = smul.u32 36, %s2646_s17  ;;  %v2129_v29 = vld [vmem:[%s2642_s1 + $0xf8] sm:$0xff]   ;;  %v2139_v37 = vld [vmem:[%s2642_s1 + $0x180] sm:$0xff]  }
   0xf   : > { %v2126_v26 = vld [vmem:[%s2642_s1 + $0x30] sm:$0xff]   ;;  %v2130_v30 = vld [vmem:[%s2642_s1 + $0x38] sm:$0xff]   ;;  %v2140_v38 = vld [vmem:[%s2642_s1 + $0x1c8] sm:$0xff]  }
  0x10   : > { %1830 = vmatpush3.bf16.msra.mxu0 %v2110_v10  ;;  %v2127_v27 = vld [vmem:[%s2642_s1 + $0xb0] sm:$0xff]   ;;  %s2384_s27 = scalar_lea.vmem %s2641_s0, %s2091_s16  ;;  %v2131_v31 = vld [vmem:[%s2642_s1 + $0xb8] sm:$0xff]   ;;  %v2145_v41 = vld [vmem:[%s2642_s1 + $0x188] sm:$0xff]  }
  0x11   : > { %1882 = vmatpush3.bf16.msra.mxu1 %v2111_v11  ;;  %1831 = vmatprep.subr.bf16.mxu0 %v2112_v12  ;;  %v2132_v32 = vld [vmem:[%s2384_s27] ss:$36 sps:$4 sm:$0xff]   ;;  %v2135_v34 = vld [vmem:[%s2384_s27 + $0x8] ss:$36 sps:$4 sm:$0xff]   ;;  %v2143_v40 = vld [vmem:[%s2384_s27 + $0x54] ss:$36 sps:$4 sm:$0xff]  }
  0x12   : > { %1883 = vmatprep.subr.bf16.mxu1 %v2113_v13  ;;  %v2134_v33 = vld [vmem:[%s2384_s27 + $0x4] ss:$36 sps:$4 sm:$0xff]   ;;  %v2137_v35 = vld [vmem:[%s2384_s27 + $0xc] ss:$36 sps:$4 sm:$0xff]   ;;  %v2153_v49 = vld [vmem:[%s2384_s27 + $0x94] ss:$36 sps:$4 sm:$0xff]  }
  0x13   : > { %1129 = vmatprep.mubr.bf16.mxu0 %v2134_v33  ;;  %1210 = vmatprep.mubr.bf16.mxu1 %v2137_v35  ;;  %v2141_v39 = vld [vmem:[%s2384_s27 + $0x4c] ss:$36 sps:$4 sm:$0xff]   ;;  %v2148_v44 = vld [vmem:[%s2642_s1 + $0x140] sm:$0xff]   ;;  %v2159_v53 = vld [vmem:[%s2384_s27 + $0x98] ss:$36 sps:$4 sm:$0xff]  }
  0x14   : > { %1832 = vmatpush3.bf16.msra.mxu0 %v2114_v14  ;;  %v2146_v42 = vld [vmem:[%s2384_s27 + $0x48] ss:$36 sps:$4 sm:$0xff]   ;;  %v2147_v43 = vld [vmem:[%s2384_s27 + $0x50] ss:$36 sps:$4 sm:$0xff]   ;;  %v2149_v45 = vld [vmem:[%s2642_s1 + $0x100] sm:$0xff]  }
  0x15   : > { %1884 = vmatpush3.bf16.msra.mxu1 %v2115_v15  ;;  %1833 = vmatprep.subr.bf16.mxu0 %v2116_v16  ;;  %v2150_v46 = vld [vmem:[%s2642_s1 + $0x1d0] sm:$0xff]   ;;  %v2152_v48 = vld [vmem:[%s2642_s1 + $0x148] sm:$0xff]   ;;  %v2155_v50 = vld [vmem:[%s2384_s27 + $0x9c] ss:$36 sps:$4 sm:$0xff]  }
  0x16   : > { %1885 = vmatprep.subr.bf16.mxu1 %v2117_v17  ;;  %v2151_v47 = vld [vmem:[%s2642_s1 + $0x190] sm:$0xff]   ;;  %v2157_v51 = vld [vmem:[%s2642_s1 + $0x108] sm:$0xff]   ;;  %v2160_v54 = vld [vmem:[%s2642_s1 + $0x1d8] sm:$0xff]  }
  0x17   : > { %v2158_v52 = vld [vmem:[%s2384_s27 + $0x90] ss:$36 sps:$4 sm:$0xff]   ;;  %v2161_v55 = vld [vmem:[%s2642_s1 + $0x198] sm:$0xff]   ;;  %v2166_v59 = vld [vmem:[%s2384_s27 + $0xe4] ss:$36 sps:$4 sm:$0xff]  }
  0x18   : > { %1834 = vmatpush3.bf16.msra.mxu0 %v2118_v18  ;;  %v2162_v56 = vld [vmem:[%s2642_s1 + $0x150] sm:$0xff]   ;;  %v2164_v58 = vld [vmem:[%s2384_s27 + $0xdc] ss:$36 sps:$4 sm:$0xff]   ;;  %v2174_v2 = vld [vmem:[%s2642_s1 + $0x1e8] sm:$0xff]  }
  0x19   : > { %1886 = vmatpush3.bf16.msra.mxu1 %v2119_v19  ;;  %1835 = vmatprep.subr.bf16.mxu0 %v2120_v20  ;;  %v2163_v57 = vld [vmem:[%s2642_s1 + $0x110] sm:$0xff]   ;;  %v2168_v60 = vld [vmem:[%s2384_s27 + $0xd8] ss:$36 sps:$4 sm:$0xff]   ;;  %v2169_v61 = vld [vmem:[%s2384_s27 + $0xe0] ss:$36 sps:$4 sm:$0xff]  }
  0x1a   : > { %1887 = vmatprep.subr.bf16.mxu1 %v2121_v21  ;;  %v2170_v62 = vld [vmem:[%s2642_s1 + $0x1e0] sm:$0xff]   ;;  %v2172_v0 = vld [vmem:[%s2642_s1 + $0x158] sm:$0xff]   ;;  %v2177_v4 = vld [vmem:[%s2384_s27 + $0x12c] ss:$36 sps:$4 sm:$0xff]  }
  0x1b   : > { %v2171_v63 = vld [vmem:[%s2642_s1 + $0x1a0] sm:$0xff]   ;;  %v2173_v1 = vld [vmem:[%s2642_s1 + $0x118] sm:$0xff]   ;;  %v2179_v5 = vld [vmem:[%s2642_s1 + $0x1a8] sm:$0xff]  }
  0x1c   : > { %1836 = vmatpush3.bf16.msra.mxu0 %v2122_v22  ;;  %v2175_v3 = vld [vmem:[%s2384_s27 + $0x124] ss:$36 sps:$4 sm:$0xff]   ;;  %v2185_v11 = vld [vmem:[%s2642_s1 + $0x1f0] sm:$0xff]   ;;  %v2196_v20 = vld [vmem:[%s2642_s1 + $0x1f8] sm:$0xff]  }
  0x1d   : > { %1888 = vmatpush3.bf16.msra.mxu1 %v2123_v23  ;;  %1837 = vmatprep.subr.bf16.mxu0 %v2124_v24  ;;  %v2180_v6 = vld [vmem:[%s2384_s27 + $0x120] ss:$36 sps:$4 sm:$0xff]   ;;  %v2181_v7 = vld [vmem:[%s2384_s27 + $0x128] ss:$36 sps:$4 sm:$0xff]   ;;  %v2187_v13 = vld [vmem:[%s2642_s1 + $0x1b0] sm:$0xff]  }
  0x1e   : > { %1889 = vmatprep.subr.bf16.mxu1 %v2125_v25  ;;  %v2182_v8 = vld [vmem:[%s2642_s1 + $0x160] sm:$0xff]   ;;  %v2184_v10 = vld [vmem:[%s2642_s1 + $0x168] sm:$0xff]   ;;  %v2190_v15 = vld [vmem:[%s2384_s27 + $0x174] ss:$36 sps:$4 sm:$0xff]  }
  0x1f   : > { %v2183_v9 = vld [vmem:[%s2642_s1 + $0x120] sm:$0xff]   ;;  %v2186_v12 = vld [vmem:[%s2642_s1 + $0x128] sm:$0xff]   ;;  %v2193_v17 = vld [vmem:[%s2384_s27 + $0x170] ss:$36 sps:$4 sm:$0xff]  }
  0x20   : > { %1838 = vmatpush3.bf16.msra.mxu0 %v2126_v26  ;;  %v2188_v14 = vld [vmem:[%s2384_s27 + $0x16c] ss:$36 sps:$4 sm:$0xff]   ;;  %v2197_v21 = vld [vmem:[%s2642_s1 + $0x1b8] sm:$0xff]   ;;  %v2213_v33 = vld [vmem:[%s2384_s27 + $0x60] ss:$36 sps:$4 sm:$0xff]  }
  0x21   : > { %1890 = vmatpush3.bf16.msra.mxu1 %v2127_v27  ;;  %1839 = vmatprep.subr.bf16.mxu0 %v2128_v28  ;;  %v2192_v16 = vld [vmem:[%s2384_s27 + $0x168] ss:$36 sps:$4 sm:$0xff]   ;;  %v2194_v18 = vld [vmem:[%s2642_s1 + $0x170] sm:$0xff]   ;;  %v2198_v22 = vld [vmem:[%s2642_s1 + $0x178] sm:$0xff]  }
  0x22   : > { %1891 = vmatprep.subr.bf16.mxu1 %v2129_v29  ;;  %v2195_v19 = vld [vmem:[%s2642_s1 + $0x130] sm:$0xff]   ;;  %v2199_v23 = vld [vmem:[%s2642_s1 + $0x138] sm:$0xff]   ;;  %v2206_v28 = vld [vmem:[%s2642_s1 + $0x200] sm:$0xff]  }
  0x23   : > { %v2200_v24 = vld [vmem:[%s2384_s27 + $0x10] ss:$36 sps:$4 sm:$0xff]   ;;  %v2203_v26 = vld [vmem:[%s2384_s27 + $0x18] ss:$36 sps:$4 sm:$0xff]   ;;  %v2207_v29 = vld [vmem:[%s2642_s1 + $0x208] sm:$0xff]  }
  0x24   : > { %1840 = vmatpush3.bf16.msra.mxu0 %v2130_v30  ;;  %v2202_v25 = vld [vmem:[%s2384_s27 + $0x14] ss:$36 sps:$4 sm:$0xff]   ;;  %v2205_v27 = vld [vmem:[%s2384_s27 + $0x1c] ss:$36 sps:$4 sm:$0xff]   ;;  %v2215_v35 = vld [vmem:[%s2384_s27 + $0xa4] ss:$36 sps:$4 sm:$0xff]  }
  0x25   : > { %1892 = vmatpush3.bf16.msra.mxu1 %v2131_v31  ;;  %1929 = vmatprep.subr.bf16.mxu0 %v2148_v44  ;;  %v2208_v30 = vld [vmem:[%s2384_s27 + $0x5c] ss:$36 sps:$4 sm:$0xff]   ;;  %v2210_v31 = vld [vmem:[%s2384_s27 + $0x64] ss:$36 sps:$4 sm:$0xff]  }
  0x26   : > { %1981 = vmatprep.subr.bf16.mxu1 %v2138_v36  ;;  %v2217_v36 = vld [vmem:[%s2384_s27 + $0xac] ss:$36 sps:$4 sm:$0xff]  }
  0x27   : > { %1130 = vmatmul.mubr.bf16.vlgmr.msra.gmra.mrb[0].mxu0 %v2132_v32  ;;  %v2212_v32 = vld [vmem:[%s2384_s27 + $0x58] ss:$36 sps:$4 sm:$0xff]   ;;  %v2226_v44 = vld [vmem:[%s2384_s27 + $0xe8] ss:$36 sps:$4 sm:$0xff]  }
  0x28   : > { %1211 = vmatmul.mubr.bf16.vlgmr.msra.gmra.mrb[0].mxu1 %v2135_v34  ;;  %1137 = vmatprep.mubr.bf16.mxu0 %v2141_v39  ;;  %v2214_v34 = vld [vmem:[%s2642_s1 + $0x210] sm:$0xff]   ;;  %v2228_v39 = vld [vmem:[%s2642_s1 + $0x220] sm:$0xff]  }
  0x29   : > { %1982 = vmatpush3.bf16.msra.mxu1 %v2139_v37  ;;  %1218 = vmatprep.mubr.bf16.mxu1 %v2143_v40  ;;  %v2221_v37 = vld [vmem:[%s2642_s1 + $0x218] sm:$0xff]   ;;  %v2220_v40 = vld [vmem:[%s2384_s27 + $0xa8] ss:$36 sps:$4 sm:$0xff]  }
  0x2a   : > { %1983 = vmatprep.subr.bf16.mxu1 %v2140_v38  ;;  %1930 = vmatpush3.bf16.msra.mxu0 %v2149_v45  ;;  %v2219_v38 = vld [vmem:[%s2384_s27 + $0xa0] ss:$36 sps:$4 sm:$0xff]   ;;  %v2236_v45 = vld [vmem:[%s2642_s1 + $0x230] sm:$0xff]  }
  0x2b   : > { %1931 = vmatprep.subr.bf16.mxu0 %v2152_v48  ;;  %v2232_v48 = vld [vmem:[%s2384_s27 + $0x13c] ss:$36 sps:$4 sm:$0xff]  }
  0x2d   : > { %1984 = vmatpush3.bf16.msra.mxu1 %v2145_v41  ;;  %v2222_v41 = vld [vmem:[%s2384_s27 + $0xec] ss:$36 sps:$4 sm:$0xff]  }
  0x2e   : > { %1985 = vmatprep.subr.bf16.mxu1 %v2150_v46  ;;  %1932 = vmatpush3.bf16.msra.mxu0 %v2157_v51  ;;  %v2227_v46 = vld [vmem:[%s2384_s27 + $0xf0] ss:$36 sps:$4 sm:$0xff]   ;;  %v2235_v51 = vld [vmem:[%s2384_s27 + $0x138] ss:$36 sps:$4 sm:$0xff]  }
  0x2f   : > { %1138 = vmatmul.mubr.bf16.gmra.mrb[4].mxu0 %v2146_v42  ;;  %1933 = vmatprep.subr.bf16.mxu0 %v2162_v56  ;;  %v2224_v42 = vld [vmem:[%s2384_s27 + $0xf4] ss:$36 sps:$4 sm:$0xff]   ;;  %v2244_v56 = vld [vmem:[%s2384_s27 + $0x20] ss:$36 sps:$4 sm:$0xff]  }
  0x30   : > { %1219 = vmatmul.mubr.bf16.gmra.mrb[4].mxu1 %v2147_v43  ;;  %1145 = vmatprep.mubr.bf16.mxu0 %v2153_v49  ;;  %v2229_v43 = vld [vmem:[%s2642_s1 + $0x228] sm:$0xff]   ;;  %v2243_v49 = vld [vmem:[%s2642_s1 + $0x238] sm:$0xff]  }
  0x31   : > { %1986 = vmatpush3.bf16.msra.mxu1 %v2151_v47  ;;  %1226 = vmatprep.mubr.bf16.mxu1 %v2155_v50  ;;  %v2230_v47 = vld [vmem:[%s2384_s27 + $0x134] ss:$36 sps:$4 sm:$0xff]  }
  0x32   : > { %1987 = vmatprep.subr.bf16.mxu1 %v2160_v54  ;;  %1934 = vmatpush3.bf16.msra.mxu0 %v2163_v57  ;;  %v2234_v50 = vld [vmem:[%s2384_s27 + $0x130] ss:$36 sps:$4 sm:$0xff]   ;;  %v2241_v54 = vld [vmem:[%s2384_s27 + $0x178] ss:$36 sps:$4 sm:$0xff]  }
  0x33   : > { %1935 = vmatprep.subr.bf16.mxu0 %v2172_v0  ;;  %v2245_v57 = vld [vmem:[%s2384_s27 + $0xb0] ss:$36 sps:$4 sm:$0xff]   ;;  %v2569_v0 = vld [vmem:[%s2643_s2] ss:$0 sm:$0xff] }
  0x35   : > { %1988 = vmatpush3.bf16.msra.mxu1 %v2161_v55  ;;  %v2242_v55 = vld [vmem:[%s2384_s27 + $0x180] ss:$36 sps:$4 sm:$0xff]  }
  0x36   : > { %1989 = vmatprep.subr.bf16.mxu1 %v2170_v62  ;;  %1936 = vmatpush3.bf16.msra.mxu0 %v2173_v1 }
  0x37   : > { %1146 = vmatmul.mubr.bf16.gmra.mrb[8].mxu0 %v2158_v52  ;;  %1937 = vmatprep.subr.bf16.mxu0 %v2182_v8  ;;  %v2237_v52 = vld [vmem:[%s2384_s27 + $0x17c] ss:$36 sps:$4 sm:$0xff]  }
  0x38   : > { %1227 = vmatmul.mubr.bf16.gmra.mrb[8].mxu1 %v2159_v53  ;;  %1153 = vmatprep.mubr.bf16.mxu0 %v2164_v58  ;;  %v2239_v53 = vld [vmem:[%s2384_s27 + $0x184] ss:$36 sps:$4 sm:$0xff]  }
  0x39   : > { %1234 = vmatprep.mubr.bf16.mxu1 %v2166_v59  ;;  %1990 = vmatpush3.bf16.msra.mxu1 %v2171_v63  ;;  %v2246_v58 = vld [vmem:[%s2384_s27 + $0x68] ss:$36 sps:$4 sm:$0xff]   ;;  %v2247_v59 = vld [vmem:[%s2384_s27 + $0xf8] ss:$36 sps:$4 sm:$0xff]  }
  0x3a   : > { %1991 = vmatprep.subr.bf16.mxu1 %v2174_v2  ;;  %1938 = vmatpush3.bf16.msra.mxu0 %v2183_v9 }
  0x3b   : > { %1939 = vmatprep.subr.bf16.mxu0 %v2184_v10 }
  0x3d   : > { %1992 = vmatpush3.bf16.msra.mxu1 %v2179_v5 }
  0x3e   : > { %1993 = vmatprep.subr.bf16.mxu1 %v2185_v11  ;;  %1940 = vmatpush3.bf16.msra.mxu0 %v2186_v12 }
  0x3f   : > { %1154 = vmatmul.mubr.bf16.gmra.mrb[12].mxu0 %v2168_v60  ;;  %1941 = vmatprep.subr.bf16.mxu0 %v2194_v18  ;;  %v2248_v60 = vld [vmem:[%s2384_s27 + $0x140] ss:$36 sps:$4 sm:$0xff]  }
  0x40   : > { %1235 = vmatmul.mubr.bf16.gmra.mrb[12].mxu1 %v2169_v61  ;;  %1161 = vmatprep.mubr.bf16.mxu0 %v2175_v3  ;;  %v2249_v61 = vld [vmem:[%s2384_s27 + $0x188] ss:$36 sps:$4 sm:$0xff]   ;;  %s1636_s27 = sshll.u32 %s2646_s17, 2 }
  0x41   : > { %1242 = vmatprep.mubr.bf16.mxu1 %v2177_v4  ;;  %1994 = vmatpush3.bf16.msra.mxu1 %v2187_v13  ;;  %s175_s20 = scalar_lea.vmem %s2644_s3, %s1636_s27 }
  0x42   : > { %1942 = vmatpush3.bf16.msra.mxu0 %v2195_v19  ;;  %1995 = vmatprep.subr.bf16.mxu1 %v2196_v20 }
  0x43   : > { %1943 = vmatprep.subr.bf16.mxu0 %v2198_v22 }
  0x45   : > { %1996 = vmatpush3.bf16.msra.mxu1 %v2197_v21 }
  0x46   : > { %1944 = vmatpush3.bf16.msra.mxu0 %v2199_v23  ;;  %2075 = vmatprep.subr.bf16.mxu1 %v2206_v28 }
  0x47   : > { %1162 = vmatmul.mubr.bf16.gmra.mrb[16].mxu0 %v2180_v6  ;;  %2047 = vmatprep.subr.bf16.mxu0 %v2206_v28 }
  0x48   : > { %1243 = vmatmul.mubr.bf16.gmra.mrb[16].mxu1 %v2181_v7  ;;  %1169 = vmatprep.mubr.bf16.mxu0 %v2188_v14 }
  0x49   : > { %1250 = vmatprep.mubr.bf16.mxu1 %v2190_v15 }
  0x4f   : > { %1170 = vmatmul.mubr.bf16.gmra.mrb[20].mxu0 %v2192_v16 }
  0x50   : > { %1251 = vmatmul.mubr.bf16.gmra.mrb[20].mxu1 %v2193_v17  ;;  %1291 = vmatprep.mubr.bf16.mxu0 %v2202_v25 }
  0x51   : > { %1372 = vmatprep.mubr.bf16.mxu1 %v2205_v27 }
  0x57   : > { %1292 = vmatmul.mubr.bf16.vlgmr.msra.gmra.mrb[24].mxu0 %v2200_v24 }
  0x58   : > { %1373 = vmatmul.mubr.bf16.vlgmr.msra.gmra.mrb[24].mxu1 %v2203_v26  ;;  %1299 = vmatprep.mubr.bf16.mxu0 %v2208_v30 }
  0x59   : > { %2083 = vmatpush3.bf16.msra.mxu1 %v2206_v28  ;;  %1380 = vmatprep.mubr.bf16.mxu1 %v2210_v31 }
  0x5a   : > { %2076 = vmatprep.subr.bf16.mxu1 %v2207_v29  ;;  %2048 = vmatpush3.bf16.msra.mxu0 %v2206_v28 }
  0x5b   : > { %2049 = vmatprep.subr.bf16.mxu0 %v2207_v29 }
  0x5d   : > { %2084 = vmatpush3.bf16.msra.mxu1 %v2207_v29 }
  0x5e   : > { %2077 = vmatprep.subr.bf16.mxu1 %v2214_v34  ;;  %2050 = vmatpush3.bf16.msra.mxu0 %v2207_v29 }
  0x5f   : > { %1300 = vmatmul.mubr.bf16.gmra.mrb[28].mxu0 %v2212_v32  ;;  %2051 = vmatprep.subr.bf16.mxu0 %v2214_v34 }
  0x60   : > { %1381 = vmatmul.mubr.bf16.gmra.mrb[28].mxu1 %v2213_v33  ;;  %1307 = vmatprep.mubr.bf16.mxu0 %v2215_v35 }
  0x61   : > { %2085 = vmatpush3.bf16.msra.mxu1 %v2214_v34  ;;  %1388 = vmatprep.mubr.bf16.mxu1 %v2217_v36 }
  0x62   : > { %2078 = vmatprep.subr.bf16.mxu1 %v2221_v37  ;;  %2052 = vmatpush3.bf16.msra.mxu0 %v2214_v34 }
  0x63   : > { %2053 = vmatprep.subr.bf16.mxu0 %v2221_v37 }
  0x65   : > { %2086 = vmatpush3.bf16.msra.mxu1 %v2221_v37 }
  0x66   : > { %2079 = vmatprep.subr.bf16.mxu1 %v2228_v39  ;;  %2054 = vmatpush3.bf16.msra.mxu0 %v2221_v37 }
  0x67   : > { %1308 = vmatmul.mubr.bf16.gmra.mrb[32].mxu0 %v2219_v38  ;;  %2055 = vmatprep.subr.bf16.mxu0 %v2228_v39 }
  0x68   : > { %1389 = vmatmul.mubr.bf16.gmra.mrb[32].mxu1 %v2220_v40  ;;  %1315 = vmatprep.mubr.bf16.mxu0 %v2222_v41 }
  0x69   : > { %1396 = vmatprep.mubr.bf16.mxu1 %v2224_v42  ;;  %2087 = vmatpush3.bf16.msra.mxu1 %v2228_v39 }
  0x6a   : > { %2080 = vmatprep.subr.bf16.mxu1 %v2229_v43  ;;  %2056 = vmatpush3.bf16.msra.mxu0 %v2228_v39 }
  0x6b   : > { %2057 = vmatprep.subr.bf16.mxu0 %v2229_v43 }
  0x6d   : > { %2088 = vmatpush3.bf16.msra.mxu1 %v2229_v43 }
  0x6e   : > { %2081 = vmatprep.subr.bf16.mxu1 %v2236_v45  ;;  %2058 = vmatpush3.bf16.msra.mxu0 %v2229_v43 }
  0x6f   : > { %1316 = vmatmul.mubr.bf16.gmra.mrb[36].mxu0 %v2226_v44  ;;  %2059 = vmatprep.subr.bf16.mxu0 %v2236_v45 }
  0x70   : > { %1397 = vmatmul.mubr.bf16.gmra.mrb[36].mxu1 %v2227_v46  ;;  %1323 = vmatprep.mubr.bf16.mxu0 %v2230_v47 }
  0x71   : > { %1404 = vmatprep.mubr.bf16.mxu1 %v2232_v48  ;;  %2089 = vmatpush3.bf16.msra.mxu1 %v2236_v45 }
  0x72   : > { %2082 = vmatprep.subr.bf16.mxu1 %v2243_v49  ;;  %2060 = vmatpush3.bf16.msra.mxu0 %v2236_v45 }
  0x73   : > { %2061 = vmatprep.subr.bf16.mxu0 %v2243_v49 }
  0x75   : > { %2090 = vmatpush3.bf16.msra.mxu1 %v2243_v49 }
  0x76   : > { %2062 = vmatpush3.bf16.msra.mxu0 %v2243_v49 }
  0x77   : > { %1324 = vmatmul.mubr.bf16.gmra.mrb[40].mxu0 %v2234_v50 }
  0x78   : > { %1405 = vmatmul.mubr.bf16.gmra.mrb[40].mxu1 %v2235_v51  ;;  %1331 = vmatprep.mubr.bf16.mxu0 %v2237_v52 }
  0x79   : > { %1412 = vmatprep.mubr.bf16.mxu1 %v2239_v53 }
  0x7f   : > { %1332 = vmatmul.mubr.bf16.gmra.mrb[44].mxu0 %v2241_v54 }
  0x80   : > { %1413 = vmatmul.mubr.bf16.gmra.mrb[44].mxu1 %v2242_v55  ;;  %2063 = vmatprep.mubr.bf16.mxu0 %v2244_v56 }
  0x81   : > { %2067 = vmatprep.mubr.bf16.mxu1 %v2245_v57 }
  0x87   : > { %2064 = vmatmul.mubr.bf16.vlgmr.msra.gmra.mrb[48].mxu0 %v2246_v58 }
  0x88   : > { %2068 = vmatmul.mubr.bf16.vlgmr.msra.gmra.mrb[48].mxu1 %v2247_v59 }
  0x89   : > { %2071 = vmatprep.mubr.bf16.mxu1 %v2248_v60 }
  0x90   : > { %2072 = vmatmul.mubr.bf16.gmra.mrb[52].mxu1 %v2249_v61 }
  0xfa   : > { %v1841_v62 = vpop.f32.mrb[0].mxu0 }
  0xfb   : > { %v1893_v63 = vpop.f32.mrb[0].mxu1  ;;  %v1842_v1 = vpop.f32.mrb[1].mxu0 }
  0xfc   : > { %v1843_v2 = vadd.f32 %v1842_v1, %v1841_v62  ;;  %v1894_v3 = vpop.f32.mrb[1].mxu1  ;;  %v1844_v4 = vpop.f32.mrb[2].mxu0 }
  0xfd   : > { %v1895_v5 = vadd.f32 %v1894_v3, %v1893_v63  ;;  %v1896_v6 = vpop.f32.mrb[2].mxu1  ;;  %v1845_v7 = vpop.f32.mrb[3].mxu0 }
  0xfe   : > { %v1132_v8 = vadd.f32 %v1843_v2, %v2569_v0  ;;  %v1846_v9 = vadd.f32 %v1845_v7, %v1844_v4  ;;  %v1897_v10 = vpop.f32.mrb[3].mxu1 }
  0xff   : > { %v1898_v11 = vadd.f32 %v1897_v10, %v1896_v6 }
 0x100   : > { %v2572_v12 = vadd.f32 %v1895_v5, %v1132_v8  ;;  %v1135_v13 = vadd.f32 %v1846_v9, %v2569_v0 }
 0x102   : > { %v2575_v14 = vadd.f32 %v1898_v11, %v1135_v13  ;;  %v1847_v15 = vpop.f32.mrb[4].mxu0 }
 0x103   : > { %v1899_v16 = vpop.f32.mrb[4].mxu1  ;;  %v1848_v17 = vpop.f32.mrb[5].mxu0 }
 0x104   : > { %v1849_v18 = vadd.f32 %v1848_v17, %v1847_v15  ;;  %v1900_v19 = vpop.f32.mrb[5].mxu1  ;;  %v1850_v20 = vpop.f32.mrb[6].mxu0 }
 0x105   : > { %v1901_v21 = vadd.f32 %v1900_v19, %v1899_v16  ;;  %v1902_v22 = vpop.f32.mrb[6].mxu1  ;;  %v1851_v23 = vpop.f32.mrb[7].mxu0 }
 0x106   : > { %v1140_v24 = vadd.f32 %v1849_v18, %v2569_v0  ;;  %v1852_v25 = vadd.f32 %v1851_v23, %v1850_v20  ;;  %v1903_v26 = vpop.f32.mrb[7].mxu1 }
 0x107   : > { %v1904_v27 = vadd.f32 %v1903_v26, %v1902_v22 }
 0x108   : > { %v2578_v28 = vadd.f32 %v1901_v21, %v1140_v24  ;;  %v1143_v29 = vadd.f32 %v1852_v25, %v2569_v0 }
 0x10a   : > { %v2581_v30 = vadd.f32 %v1904_v27, %v1143_v29  ;;  %v1853_v31 = vpop.f32.mrb[8].mxu0 }
 0x10b   : > { %v1905_v32 = vpop.f32.mrb[8].mxu1  ;;  %v1854_v33 = vpop.f32.mrb[9].mxu0 }
 0x10c   : > { %v1855_v34 = vadd.f32 %v1854_v33, %v1853_v31  ;;  %v1906_v35 = vpop.f32.mrb[9].mxu1  ;;  %v1856_v36 = vpop.f32.mrb[10].mxu0 }
 0x10d   : > { %v1907_v37 = vadd.f32 %v1906_v35, %v1905_v32  ;;  %v1908_v38 = vpop.f32.mrb[10].mxu1  ;;  %v1857_v39 = vpop.f32.mrb[11].mxu0 }
 0x10e   : > { %v1148_v40 = vadd.f32 %v1855_v34, %v2569_v0  ;;  %v1858_v41 = vadd.f32 %v1857_v39, %v1856_v36  ;;  %v1909_v42 = vpop.f32.mrb[11].mxu1 }
 0x10f   : > { %v1910_v43 = vadd.f32 %v1909_v42, %v1908_v38 }
 0x110   : > { %v2584_v44 = vadd.f32 %v1907_v37, %v1148_v40  ;;  %v1151_v45 = vadd.f32 %v1858_v41, %v2569_v0 }
 0x112   : > { %v2587_v46 = vadd.f32 %v1910_v43, %v1151_v45  ;;  %v1859_v47 = vpop.f32.mrb[12].mxu0 }
 0x113   : > { %v1911_v48 = vpop.f32.mrb[12].mxu1  ;;  %v1860_v49 = vpop.f32.mrb[13].mxu0 }
 0x114   : > { %v1861_v50 = vadd.f32 %v1860_v49, %v1859_v47  ;;  %v1912_v51 = vpop.f32.mrb[13].mxu1  ;;  %v1862_v52 = vpop.f32.mrb[14].mxu0 }
 0x115   : > { %v1913_v53 = vadd.f32 %v1912_v51, %v1911_v48  ;;  %v1914_v54 = vpop.f32.mrb[14].mxu1  ;;  %v1863_v55 = vpop.f32.mrb[15].mxu0 }
 0x116   : > { %v1156_v56 = vadd.f32 %v1861_v50, %v2569_v0  ;;  %v1864_v57 = vadd.f32 %v1863_v55, %v1862_v52  ;;  %v1915_v58 = vpop.f32.mrb[15].mxu1 }
 0x117   : > { %v1916_v59 = vadd.f32 %v1915_v58, %v1914_v54 }
 0x118   : > { %v2590_v60 = vadd.f32 %v1913_v53, %v1156_v56  ;;  %v1159_v61 = vadd.f32 %v1864_v57, %v2569_v0 }
 0x11a   : > { %v2593_v62 = vadd.f32 %v1916_v59, %v1159_v61  ;;  %v1865_v63 = vpop.f32.mrb[16].mxu0 }
 0x11b   : > { %v1917_v1 = vpop.f32.mrb[16].mxu1  ;;  %v1866_v2 = vpop.f32.mrb[17].mxu0 }
 0x11c   : > { %v1867_v3 = vadd.f32 %v1866_v2, %v1865_v63  ;;  %v1918_v4 = vpop.f32.mrb[17].mxu1  ;;  %v1868_v5 = vpop.f32.mrb[18].mxu0 }
 0x11d   : > { %v1919_v6 = vadd.f32 %v1918_v4, %v1917_v1  ;;  %v1920_v7 = vpop.f32.mrb[18].mxu1  ;;  %v1869_v8 = vpop.f32.mrb[19].mxu0 }
 0x11e   : > { %v1164_v9 = vadd.f32 %v1867_v3, %v2569_v0  ;;  %v1870_v10 = vadd.f32 %v1869_v8, %v1868_v5  ;;  %v1921_v11 = vpop.f32.mrb[19].mxu1 }
 0x11f   : > { %v1922_v13 = vadd.f32 %v1921_v11, %v1920_v7 }
 0x120   : > { %v2596_v15 = vadd.f32 %v1919_v6, %v1164_v9  ;;  %v1167_v16 = vadd.f32 %v1870_v10, %v2569_v0 }
 0x122   : > { %v2599_v17 = vadd.f32 %v1922_v13, %v1167_v16  ;;  %v1871_v18 = vpop.f32.mrb[20].mxu0 }
 0x123   : > { %v1923_v19 = vpop.f32.mrb[20].mxu1  ;;  %v1872_v20 = vpop.f32.mrb[21].mxu0 }
 0x124   : > { %v1873_v21 = vadd.f32 %v1872_v20, %v1871_v18  ;;  %v1924_v22 = vpop.f32.mrb[21].mxu1  ;;  %v1874_v23 = vpop.f32.mrb[22].mxu0 }
 0x125   : > { %v1925_v24 = vadd.f32 %v1924_v22, %v1923_v19  ;;  %v1926_v25 = vpop.f32.mrb[22].mxu1  ;;  %v1875_v26 = vpop.f32.mrb[23].mxu0 }
 0x126   : > { %v1172_v27 = vadd.f32 %v1873_v21, %v2569_v0  ;;  %v1876_v29 = vadd.f32 %v1875_v26, %v1874_v23  ;;  %v1927_v31 = vpop.f32.mrb[23].mxu1 }
 0x127   : > { %v1928_v32 = vadd.f32 %v1927_v31, %v1926_v25 }
 0x128   : > { %v2602_v33 = vadd.f32 %v1925_v24, %v1172_v27  ;;  %v1175_v34 = vadd.f32 %v1876_v29, %v2569_v0 }
 0x12a   : > { %v2605_v35 = vadd.f32 %v1928_v32, %v1175_v34  ;;  %v1945_v36 = vpop.f32.mrb[24].mxu0 }
 0x12b   : > { %v1997_v37 = vpop.f32.mrb[24].mxu1  ;;  %v1946_v38 = vpop.f32.mrb[25].mxu0 }
 0x12c   : > { %v1947_v39 = vadd.f32 %v1946_v38, %v1945_v36  ;;  %v1998_v40 = vpop.f32.mrb[25].mxu1  ;;  %v1948_v41 = vpop.f32.mrb[26].mxu0 }
 0x12d   : > { %v1999_v42 = vadd.f32 %v1998_v40, %v1997_v37  ;;  %v2000_v43 = vpop.f32.mrb[26].mxu1  ;;  %v1949_v45 = vpop.f32.mrb[27].mxu0 }
 0x12e   : > { %v1294_v47 = vadd.f32 %v1947_v39, %v2572_v12  ;;  %v1950_v48 = vadd.f32 %v1949_v45, %v1948_v41  ;;  %v2001_v49 = vpop.f32.mrb[27].mxu1 }
 0x12f   : > { %v2002_v50 = vadd.f32 %v2001_v49, %v2000_v43 }
 0x130   : > { %v1297_v51 = vadd.f32 %v1950_v48, %v2575_v14  ;;  %v2609_v52 = vadd.f32 %v1999_v42, %v1294_v47 }
 0x132   : > { %v1951_v0 = vpop.f32.mrb[28].mxu0  ;;  %v2611_v53 = vadd.f32 %v2002_v50, %v1297_v51 }
 0x133   : > { %v2003_v54 = vpop.f32.mrb[28].mxu1  ;;  %v1952_v55 = vpop.f32.mrb[29].mxu0 }
 0x134   : > { %v1953_v56 = vadd.f32 %v1952_v55, %v1951_v0  ;;  %v2004_v57 = vpop.f32.mrb[29].mxu1  ;;  %v1954_v58 = vpop.f32.mrb[30].mxu0 }
 0x135   : > { %v2005_v59 = vadd.f32 %v2004_v57, %v2003_v54  ;;  %v2006_v61 = vpop.f32.mrb[30].mxu1  ;;  %v1955_v63 = vpop.f32.mrb[31].mxu0 }
 0x136   : > { %v1302_v12 = vadd.f32 %v1953_v56, %v2578_v28  ;;  %v1956_v1 = vadd.f32 %v1955_v63, %v1954_v58  ;;  %v2007_v2 = vpop.f32.mrb[31].mxu1 }
 0x137   : > { %v2008_v3 = vadd.f32 %v2007_v2, %v2006_v61 }
 0x138   : > { %v1305_v14 = vadd.f32 %v1956_v1, %v2581_v30  ;;  %v2615_v4 = vadd.f32 %v2005_v59, %v1302_v12 }
 0x13a   : > { %v1957_v5 = vpop.f32.mrb[32].mxu0  ;;  %v2617_v6 = vadd.f32 %v2008_v3, %v1305_v14 }
 0x13b   : > { %v2009_v7 = vpop.f32.mrb[32].mxu1  ;;  %v1958_v8 = vpop.f32.mrb[33].mxu0 }
 0x13c   : > { %v1959_v9 = vadd.f32 %v1958_v8, %v1957_v5  ;;  %v2010_v10 = vpop.f32.mrb[33].mxu1  ;;  %v1960_v11 = vpop.f32.mrb[34].mxu0 }
 0x13d   : > { %v2011_v13 = vadd.f32 %v2010_v10, %v2009_v7  ;;  %v2012_v16 = vpop.f32.mrb[34].mxu1  ;;  %v1961_v18 = vpop.f32.mrb[35].mxu0 }
 0x13e   : > { %v1310_v28 = vadd.f32 %v1959_v9, %v2584_v44  ;;  %v1962_v19 = vadd.f32 %v1961_v18, %v1960_v11  ;;  %v2013_v20 = vpop.f32.mrb[35].mxu1 }
 0x13f   : > { %v2014_v21 = vadd.f32 %v2013_v20, %v2012_v16 }
 0x140   : > { %v1313_v30 = vadd.f32 %v1962_v19, %v2587_v46  ;;  %v1391_v22 = vadd.f32 %v2011_v13, %v1310_v28 }
 0x142   : > { %v1963_v23 = vpop.f32.mrb[36].mxu0  ;;  %v2621_v24 = vadd.f32 %v2014_v21, %v1313_v30 }
 0x143   : > { %v2015_v25 = vpop.f32.mrb[36].mxu1  ;;  %v1964_v26 = vpop.f32.mrb[37].mxu0 }
 0x144   : > { %v1965_v27 = vadd.f32 %v1964_v26, %v1963_v23  ;;  %v2016_v29 = vpop.f32.mrb[37].mxu1  ;;  %v1966_v31 = vpop.f32.mrb[38].mxu0 }
 0x145   : > { %v2017_v32 = vadd.f32 %v2016_v29, %v2015_v25  ;;  %v2018_v34 = vpop.f32.mrb[38].mxu1  ;;  %v1967_v36 = vpop.f32.mrb[39].mxu0 }
 0x146   : > { %v1318_v37 = vadd.f32 %v1965_v27, %v2590_v60  ;;  %v1968_v44 = vadd.f32 %v1967_v36, %v1966_v31  ;;  %v2019_v38 = vpop.f32.mrb[39].mxu1 }
 0x147   : > { %v2020_v39 = vadd.f32 %v2019_v38, %v2018_v34 }
 0x148   : > { %v1321_v40 = vadd.f32 %v1968_v44, %v2593_v62  ;;  %v1399_v46 = vadd.f32 %v2017_v32, %v1318_v37 }
 0x14a   : > { %v1969_v41 = vpop.f32.mrb[40].mxu0  ;;  %v1402_v42 = vadd.f32 %v2020_v39, %v1321_v40 }
 0x14b   : > { %v2021_v43 = vpop.f32.mrb[40].mxu1  ;;  %v1970_v45 = vpop.f32.mrb[41].mxu0 }
 0x14c   : > { %v1971_v47 = vadd.f32 %v1970_v45, %v1969_v41  ;;  %v2022_v48 = vpop.f32.mrb[41].mxu1  ;;  %v1972_v49 = vpop.f32.mrb[42].mxu0 }
 0x14d   : > { %v2023_v50 = vadd.f32 %v2022_v48, %v2021_v43  ;;  %v2024_v51 = vpop.f32.mrb[42].mxu1  ;;  %v1973_v0 = vpop.f32.mrb[43].mxu0 }
 0x14e   : > { %v1326_v54 = vadd.f32 %v1971_v47, %v2596_v15  ;;  %v1974_v55 = vadd.f32 %v1973_v0, %v1972_v49  ;;  %v2025_v60 = vpop.f32.mrb[43].mxu1 }
 0x14f   : > { %v2026_v56 = vadd.f32 %v2025_v60, %v2024_v51 }
 0x150   : > { %v1329_v57 = vadd.f32 %v1974_v55, %v2599_v17  ;;  %v1407_v58 = vadd.f32 %v2023_v50, %v1326_v54 }
 0x152   : > { %v1975_v62 = vpop.f32.mrb[44].mxu0  ;;  %v1410_v59 = vadd.f32 %v2026_v56, %v1329_v57 }
 0x153   : > { %v2027_v61 = vpop.f32.mrb[44].mxu1  ;;  %v1976_v63 = vpop.f32.mrb[45].mxu0 }
 0x154   : > { %v1977_v12 = vadd.f32 %v1976_v63, %v1975_v62  ;;  %v2028_v1 = vpop.f32.mrb[45].mxu1  ;;  %v1978_v2 = vpop.f32.mrb[46].mxu0 }
 0x155   : > { %v2029_v3 = vadd.f32 %v2028_v1, %v2027_v61  ;;  %v2030_v14 = vpop.f32.mrb[46].mxu1  ;;  %v1979_v5 = vpop.f32.mrb[47].mxu0 }
 0x156   : > { %v1334_v7 = vadd.f32 %v1977_v12, %v2602_v33  ;;  %v1980_v15 = vadd.f32 %v1979_v5, %v1978_v2  ;;  %v2031_v8 = vpop.f32.mrb[47].mxu1 }
 0x157   : > { %v2032_v9 = vadd.f32 %v2031_v8, %v2030_v14 }
 0x158   : > { %v1337_v10 = vadd.f32 %v1980_v15, %v2605_v35  ;;  %v1415_v17 = vadd.f32 %v2029_v3, %v1334_v7 }
 0x15a   : > { %v2065_v11 = vpop.f32.mrb[48].mxu0  ;;  %v1418_v13 = vadd.f32 %v2032_v9, %v1337_v10 }
 0x15b   : > { %v1464_v16 = vadd.f32 %v2065_v11, %v2615_v4  ;;  %v2069_v18 = vpop.f32.mrb[48].mxu1  ;;  %v1455_v28 = vpop.f32.mrb[49].mxu0 }
 0x15c   : > { %v1480_v19 = vadd.f32 %v2069_v18, %v1399_v46  ;;  %v1456_v20 = vadd.f32 %v1455_v28, %v2609_v52  ;;  %v1471_v21 = vpop.f32.mrb[49].mxu1  ;;  %v2066_v30 = vpop.f32.mrb[50].mxu0 }
 0x15d   : > { %v1472_v23 = vadd.f32 %v1471_v21, %v1391_v22  ;;  %v1467_v33 = vadd.f32 %v2066_v30, %v2617_v6  ;;  %v2070_v25 = vpop.f32.mrb[50].mxu1  ;;  %v1458_v26 = vpop.f32.mrb[51].mxu0  ;;  %v1504_v31 = vmax.f32 %v1464_v16, 0.0 }
 0x15e   : > { %v1483_v27 = vadd.f32 %v2070_v25, %v1402_v42  ;;  %v1459_v35 = vadd.f32 %v1458_v26, %v2611_v53  ;;  %v1474_v29 = vpop.f32.mrb[51].mxu1  ;;  %v1508_v34 = vmax.f32 %v1480_v19, 0.0  ;;  %v1502_v36 = vmax.f32 %v1456_v20, 0.0 }
 0x15f   : > { %v1505_v32 = vmax.f32 %v1467_v33, 0.0  ;;  %v1475_v4 = vadd.f32 %v1474_v29, %v2621_v24  ;;  %v1506_v37 = vmax.f32 %v1472_v23, 0.0 }
 0x160   : > { %v1509_v52 = vmax.f32 %v1483_v27, 0.0  ;;  %v1503_v22 = vmax.f32 %v1459_v35, 0.0 }
 0x161   : > { %v1798_v6 = vpack.c.bf16 %v1505_v32, %v1504_v31  ;;  %v1507_v44 = vmax.f32 %v1475_v4, 0.0 }
 0x162   : > { %v1808_v38 = vpack.c.bf16 %v1509_v52, %v1508_v34  ;;  %v1793_v39 = vpack.c.bf16 %v1503_v22, %v1502_v36 }
 0x163   : > { %1820 = vst [vmem:[%s175_s20 + $0x8] sm:$0xff] %v1798_v6   ;;  %v1803_v53 = vpack.c.bf16 %v1507_v44, %v1506_v37  ;;  %v2073_v40 = vpop.f32.mrb[52].mxu1 }
 0x164   : > { %1822 = vst [vmem:[%s175_s20 + $0x18] sm:$0xff] %v1808_v38   ;;  %1794 = vst [vmem:[%s175_s20] sm:$0xff] %v1793_v39   ;;  %v1496_v46 = vadd.f32 %v2073_v40, %v1415_v17  ;;  %v1487_v24 = vpop.f32.mrb[53].mxu1 }
 0x165   : > { %1821 = vst [vmem:[%s175_s20 + $0x10] sm:$0xff] %v1803_v53   ;;  %v1488_v41 = vadd.f32 %v1487_v24, %v1407_v58  ;;  %v2074_v42 = vpop.f32.mrb[54].mxu1 }
 0x166   : > { %v1499_v43 = vadd.f32 %v2074_v42, %v1418_v13  ;;  %v1490_v45 = vpop.f32.mrb[55].mxu1  ;;  %v1512_v48 = vmax.f32 %v1496_v46, 0.0 }
 0x167   : > { %v1491_v47 = vadd.f32 %v1490_v45, %v1410_v59  ;;  %v1510_v50 = vmax.f32 %v1488_v41, 0.0 }
 0x168   : > { %v1513_v49 = vmax.f32 %v1499_v43, 0.0 }
 0x169   : > { %v1511_v51 = vmax.f32 %v1491_v47, 0.0 }
 0x16a   : > { %v1818_v0 = vpack.c.bf16 %v1513_v49, %v1512_v48 }
 0x16b   : > { %v1813_v54 = vpack.c.bf16 %v1511_v51, %v1510_v50 }
 0x16c   : > { %1824 = vst [vmem:[%s175_s20 + $0x28] sm:$0xff] %v1818_v0  }
 0x16d   : > { %1823 = vst [vmem:[%s175_s20 + $0x20] sm:$0xff] %v1813_v54  }
 0x16e PF: > { %s13_s12 = sadd.s32 1, %s2256_s12  }
 0x16f   : > { %p10_p4 = scmp.ge.s32.totalorder %s13_s12, 4  }
 0x171   :  { %12 = sbr.rel (!%p10_p4) target bundleno = 1 (0x1), region = 62 }

// kernel: pspnet_tl_forward.29
= control target key start
LH: loop header
LB: loop body
LE: loop exit
PB: predicated region body
PF: predicated region fallthrough
CT: control target
= control target key end

     0   :  { %s1064_s18 = smov 0   ;;  %s1178_s0 = inlined_call_operand.vmem [shape: bf16[192,128], index: 0, kind: input, shape index: {}]   ;;  %s1179_s1 = inlined_call_operand.vmem [shape: bf16[128,128], index: 1, kind: input, shape index: {}]   ;;  %s1180_s2 = inlined_call_operand.vmem [shape: bf16[192,128], index: 2, kind: input, shape index: {}]   ;;  %s1181_s3 = inlined_call_operand.vmem [shape: bf16[128,128], index: 3, kind: input, shape index: {}]   ;;  %s1182_s4 = inlined_call_operand.vmem [shape: f32[1,128], index: 4, kind: input, shape index: {}]   ;;  %s1183_s5 = inlined_call_operand.vmem [shape: bf16[192,128], index: 5, kind: output, shape index: {}]  }
   0x1 LB: > { %s796_s19 = sadd.s32 4294967295, %s1032_s18   ;;  %p800_p0 = scmp.ge.s32.totalorder %s1032_s18, 1  ;;  %s1032_s18 = sphi %s1064_s18, %s15_s18  }
   0x2   : > { %p199_p1 = scmp.lt.s32.totalorder %s1032_s18, 3 }
   0x4   : > { %p200_p2 = pnand %p800_p0, %p199_p1 }
   0x5   : > { %v998_v0 = vld [vmem:[%s1181_s3] sm:$0xff] (!%p200_p2)   ;;  %s232_s22 = smul.u32 (!%p200_p2), 12, %s796_s19  ;;  %v1000_v2 = vld [vmem:[%s1181_s3 + $0x8] sm:$0xff] (!%p200_p2)   ;;  %v1002_v4 = vld [vmem:[%s1181_s3 + $0x10] sm:$0xff] (!%p200_p2)  }
   0x6   : > { %203 = sbr.rel (%p200_p2) target bundleno = 279 (0x117), region = 40  ;;  %v999_v1 = vld [vmem:[%s1179_s1] sm:$0xff] (!%p200_p2)   ;;  %922 = vmatprep.subr.bf16.mxu1 (!%p200_p2), %v998_v0  ;;  %v1001_v3 = vld [vmem:[%s1179_s1 + $0x8] sm:$0xff] (!%p200_p2)   ;;  %v1003_v5 = vld [vmem:[%s1179_s1 + $0x10] sm:$0xff] (!%p200_p2)  }
   0x7   : > { %p233_p3 = scmp.lt.s32.totalorder (!%p200_p2), %s232_s22, 23  ;;  %950 = vmatprep.subr.bf16.mxu0 (!%p200_p2), %v999_v1  ;;  %923 = vmatpush3.bf16.msra.mxu1 (!%p200_p2), %v998_v0  ;;  %v1004_v6 = vld [vmem:[%s1181_s3 + $0x18] sm:$0xff] (!%p200_p2)   ;;  %v1006_v8 = vld [vmem:[%s1181_s3 + $0x20] sm:$0xff] (!%p200_p2)   ;;  %v1008_v10 = vld [vmem:[%s1181_s3 + $0x28] sm:$0xff] (!%p200_p2)  }
   0x8   : > { %951 = vmatpush3.bf16.msra.mxu0 (!%p200_p2), %v999_v1  ;;  %924 = vmatprep.subr.bf16.mxu1 (!%p200_p2), %v1000_v2  ;;  %v1005_v7 = vld [vmem:[%s1179_s1 + $0x18] sm:$0xff] (!%p200_p2)   ;;  %v1007_v9 = vld [vmem:[%s1179_s1 + $0x20] sm:$0xff] (!%p200_p2)   ;;  %v1009_v11 = vld [vmem:[%s1179_s1 + $0x28] sm:$0xff] (!%p200_p2)  }
   0x9   : > { %952 = vmatprep.subr.bf16.mxu0 (!%p200_p2), %v1001_v3  ;;  %v1010_v14 = vld [vmem:[%s1181_s3 + $0x30] sm:$0xff] (!%p200_p2)   ;;  %v1012_v16 = vld [vmem:[%s1181_s3 + $0x38] sm:$0xff] (!%p200_p2)   ;;  %v1149_v30 = vld [vmem:[%s1182_s4] ss:$0 sm:$0xff] (!%p200_p2) }
   0xa   : > { %v1011_v15 = vld [vmem:[%s1179_s1 + $0x30] sm:$0xff] (!%p200_p2)   ;;  %v1013_v17 = vld [vmem:[%s1179_s1 + $0x38] sm:$0xff] (!%p200_p2)  }
   0xb   : > { %925 = vmatpush3.bf16.msra.mxu1 (!%p200_p2), %v1000_v2 }
   0xc   : > { %953 = vmatpush3.bf16.msra.mxu0 (!%p200_p2), %v1001_v3  ;;  %926 = vmatprep.subr.bf16.mxu1 (!%p200_p2), %v1002_v4 }
   0xd   : > { %s1185_s22 = smov (!%p233_p3, %s232_s22), 23  ;;  %954 = vmatprep.subr.bf16.mxu0 %v1003_v5 }
   0xe   : > { %s1096_s12 = sshll.u32 %s1185_s22, 2 }
   0xf   : > { %927 = vmatpush3.bf16.msra.mxu1 %v1002_v4  ;;  %s1108_s20 = scalar_lea.vmem %s1180_s2, %s1096_s12  ;;  %s1117_s25 = scalar_lea.vmem %s1178_s0, %s1096_s12 }
  0x10   : > { %955 = vmatpush3.bf16.msra.mxu0 %v1003_v5  ;;  %928 = vmatprep.subr.bf16.mxu1 %v1004_v6  ;;  %v1014_v12 = vld [vmem:[%s1108_s20] sm:$0xff]   ;;  %v1016_v18 = vld [vmem:[%s1108_s20 + $0x8] sm:$0xff]   ;;  %v1018_v20 = vld [vmem:[%s1108_s20 + $0x10] sm:$0xff]   ;;  %s1159_s16 = scalar_lea.vmem %s1183_s5, %s1096_s12 }
  0x11   : > { %956 = vmatprep.subr.bf16.mxu0 %v1005_v7  ;;  %v1015_v13 = vld [vmem:[%s1117_s25] sm:$0xff]   ;;  %938 = vmatprep.mubr.bf16.mxu1 %v1014_v12  ;;  %v1017_v19 = vld [vmem:[%s1117_s25 + $0x8] sm:$0xff]   ;;  %v1019_v21 = vld [vmem:[%s1117_s25 + $0x10] sm:$0xff]  }
  0x12   : > { %966 = vmatprep.mubr.bf16.mxu0 %v1015_v13  ;;  %v1020_v22 = vld [vmem:[%s1108_s20 + $0x18] sm:$0xff]   ;;  %v1022_v24 = vld [vmem:[%s1108_s20 + $0x20] sm:$0xff]   ;;  %v1024_v26 = vld [vmem:[%s1108_s20 + $0x28] sm:$0xff]  }
  0x13   : > { %929 = vmatpush3.bf16.msra.mxu1 %v1004_v6  ;;  %v1021_v23 = vld [vmem:[%s1117_s25 + $0x18] sm:$0xff]   ;;  %v1023_v25 = vld [vmem:[%s1117_s25 + $0x20] sm:$0xff]   ;;  %v1025_v27 = vld [vmem:[%s1117_s25 + $0x28] sm:$0xff]  }
  0x14   : > { %957 = vmatpush3.bf16.msra.mxu0 %v1005_v7  ;;  %930 = vmatprep.subr.bf16.mxu1 %v1006_v8 }
  0x15   : > { %958 = vmatprep.subr.bf16.mxu0 %v1007_v9 }
  0x17   : > { %931 = vmatpush3.bf16.msra.mxu1 %v1006_v8 }
  0x18   : > { %959 = vmatpush3.bf16.msra.mxu0 %v1007_v9  ;;  %932 = vmatprep.subr.bf16.mxu1 %v1008_v10 }
  0x19   : > { %960 = vmatprep.subr.bf16.mxu0 %v1009_v11 }
  0x1b   : > { %933 = vmatpush3.bf16.msra.mxu1 %v1008_v10 }
  0x1c   : > { %961 = vmatpush3.bf16.msra.mxu0 %v1009_v11  ;;  %934 = vmatprep.subr.bf16.mxu1 %v1010_v14 }
  0x1d   : > { %962 = vmatprep.subr.bf16.mxu0 %v1011_v15 }
  0x1f   : > { %935 = vmatpush3.bf16.msra.mxu1 %v1010_v14 }
  0x20   : > { %963 = vmatpush3.bf16.msra.mxu0 %v1011_v15  ;;  %936 = vmatprep.subr.bf16.mxu1 %v1012_v16 }
  0x21   : > { %964 = vmatprep.subr.bf16.mxu0 %v1013_v17 }
  0x23   : > { %937 = vmatpush3.bf16.msra.mxu1 %v1012_v16 }
  0x24   : > { %965 = vmatpush3.bf16.msra.mxu0 %v1013_v17 }
  0x26   : > { %939 = vmatmul.mubr.bf16.vlgmr.msra.gmra.mrb[0].mxu1 %v1016_v18 }
  0x27   : > { %967 = vmatmul.mubr.bf16.vlgmr.msra.gmra.mrb[0].mxu0 %v1017_v19  ;;  %942 = vmatprep.mubr.bf16.mxu1 %v1018_v20 }
  0x28   : > { %970 = vmatprep.mubr.bf16.mxu0 %v1019_v21 }
  0x2e   : > { %943 = vmatmul.mubr.bf16.gmra.mrb[4].mxu1 %v1020_v22 }
  0x2f   : > { %971 = vmatmul.mubr.bf16.gmra.mrb[4].mxu0 %v1021_v23  ;;  %946 = vmatprep.mubr.bf16.mxu1 %v1022_v24 }
  0x30   : > { %974 = vmatprep.mubr.bf16.mxu0 %v1023_v25 }
  0x36   : > { %947 = vmatmul.mubr.bf16.gmra.mrb[8].mxu1 %v1024_v26 }
  0x37   : > { %975 = vmatmul.mubr.bf16.gmra.mrb[8].mxu0 %v1025_v27 }
  0xf9   : > { %v940_v28 = vpop.f32.mrb[0].mxu1 }
  0xfa   : > { %v968_v29 = vpop.f32.mrb[0].mxu0  ;;  %v425_v31 = vpop.f32.mrb[1].mxu1 }
  0xfb   : > { %v599_v32 = vadd.f32 %v968_v29, %v940_v28  ;;  %v590_v33 = vpop.f32.mrb[1].mxu0  ;;  %v941_v34 = vpop.f32.mrb[2].mxu1 }
  0xfc   : > { %v591_v35 = vadd.f32 %v590_v33, %v425_v31  ;;  %v969_v36 = vpop.f32.mrb[2].mxu0  ;;  %v428_v37 = vpop.f32.mrb[3].mxu1 }
  0xfd   : > { %v646_v38 = vadd.f32 %v1149_v30, %v599_v32  ;;  %v602_v39 = vadd.f32 %v969_v36, %v941_v34  ;;  %v593_v40 = vpop.f32.mrb[3].mxu0 }
  0xfe   : > { %v644_v41 = vadd.f32 %v1149_v30, %v591_v35  ;;  %v594_v42 = vadd.f32 %v593_v40, %v428_v37 }
  0xff   : > { %v647_v43 = vadd.f32 %v1149_v30, %v602_v39  ;;  %v658_v45 = vmax.f32 %v646_v38, 0.0 }
 0x100   : > { %v645_v44 = vadd.f32 %v1149_v30, %v594_v42  ;;  %v656_v48 = vmax.f32 %v644_v41, 0.0 }
 0x101   : > { %v659_v46 = vmax.f32 %v647_v43, 0.0  ;;  %v944_v47 = vpop.f32.mrb[4].mxu1 }
 0x102   : > { %v657_v49 = vmax.f32 %v645_v44, 0.0  ;;  %v972_v50 = vpop.f32.mrb[4].mxu0  ;;  %v441_v51 = vpop.f32.mrb[5].mxu1 }
 0x103   : > { %v867_v52 = vpack.c.bf16 %v659_v46, %v658_v45  ;;  %v615_v53 = vadd.f32 %v972_v50, %v944_v47  ;;  %v606_v54 = vpop.f32.mrb[5].mxu0  ;;  %v945_v55 = vpop.f32.mrb[6].mxu1 }
 0x104   : > { %v862_v56 = vpack.c.bf16 %v657_v49, %v656_v48  ;;  %v607_v57 = vadd.f32 %v606_v54, %v441_v51  ;;  %v973_v58 = vpop.f32.mrb[6].mxu0  ;;  %v444_v59 = vpop.f32.mrb[7].mxu1 }
 0x105   : > { %889 = vst [vmem:[%s1159_s16 + $0x8] sm:$0xff] %v867_v52   ;;  %v650_v60 = vadd.f32 %v1149_v30, %v615_v53  ;;  %v618_v61 = vadd.f32 %v973_v58, %v945_v55  ;;  %v609_v62 = vpop.f32.mrb[7].mxu0 }
 0x106   : > { %863 = vst [vmem:[%s1159_s16] sm:$0xff] %v862_v56   ;;  %v648_v63 = vadd.f32 %v1149_v30, %v607_v57  ;;  %v610_v0 = vadd.f32 %v609_v62, %v444_v59 }
 0x107   : > { %v651_v1 = vadd.f32 %v1149_v30, %v618_v61  ;;  %v662_v3 = vmax.f32 %v650_v60, 0.0 }
 0x108   : > { %v649_v2 = vadd.f32 %v1149_v30, %v610_v0  ;;  %v660_v6 = vmax.f32 %v648_v63, 0.0 }
 0x109   : > { %v663_v4 = vmax.f32 %v651_v1, 0.0  ;;  %v948_v5 = vpop.f32.mrb[8].mxu1 }
 0x10a   : > { %v661_v7 = vmax.f32 %v649_v2, 0.0  ;;  %v976_v8 = vpop.f32.mrb[8].mxu0  ;;  %v457_v9 = vpop.f32.mrb[9].mxu1 }
 0x10b   : > { %v877_v10 = vpack.c.bf16 %v663_v4, %v662_v3  ;;  %v631_v11 = vadd.f32 %v976_v8, %v948_v5  ;;  %v622_v12 = vpop.f32.mrb[9].mxu0  ;;  %v949_v13 = vpop.f32.mrb[10].mxu1 }
 0x10c   : > { %v872_v14 = vpack.c.bf16 %v661_v7, %v660_v6  ;;  %v623_v15 = vadd.f32 %v622_v12, %v457_v9  ;;  %v977_v16 = vpop.f32.mrb[10].mxu0  ;;  %v460_v17 = vpop.f32.mrb[11].mxu1 }
 0x10d   : > { %891 = vst [vmem:[%s1159_s16 + $0x18] sm:$0xff] %v877_v10   ;;  %v654_v18 = vadd.f32 %v1149_v30, %v631_v11  ;;  %v634_v19 = vadd.f32 %v977_v16, %v949_v13  ;;  %v625_v20 = vpop.f32.mrb[11].mxu0 }
 0x10e   : > { %890 = vst [vmem:[%s1159_s16 + $0x10] sm:$0xff] %v872_v14   ;;  %v652_v21 = vadd.f32 %v1149_v30, %v623_v15  ;;  %v626_v22 = vadd.f32 %v625_v20, %v460_v17 }
 0x10f   : > { %v655_v23 = vadd.f32 %v1149_v30, %v634_v19  ;;  %v666_v25 = vmax.f32 %v654_v18, 0.0 }
 0x110   : > { %v653_v24 = vadd.f32 %v1149_v30, %v626_v22  ;;  %v664_v27 = vmax.f32 %v652_v21, 0.0 }
 0x111   : > { %v667_v26 = vmax.f32 %v655_v23, 0.0 }
 0x112   : > { %v665_v28 = vmax.f32 %v653_v24, 0.0 }
 0x113   : > { %v887_v29 = vpack.c.bf16 %v667_v26, %v666_v25 }
 0x114   : > { %v882_v31 = vpack.c.bf16 %v665_v28, %v664_v27 }
 0x115   : > { %893 = vst [vmem:[%s1159_s16 + $0x28] sm:$0xff] %v887_v29  }
 0x116   : > { %892 = vst [vmem:[%s1159_s16 + $0x20] sm:$0xff] %v882_v31  }
 0x117 PF: > { %s15_s18 = sadd.s32 1, %s1032_s18  }
 0x118   : > { %p12_p4 = scmp.ge.s32.totalorder %s15_s18, 4  }
 0x11a   :  { %14 = sbr.rel (!%p12_p4) target bundleno = 1 (0x1), region = 73 }

// kernel: pspnet_tl_forward.32
= control target key start
LH: loop header
LB: loop body
LE: loop exit
PB: predicated region body
PF: predicated region fallthrough
CT: control target
= control target key end

     0   :  { %s795_s18 = smov 0   ;;  %s871_s0 = inlined_call_operand.vmem [shape: bf16[64,128], index: 0, kind: input, shape index: {}]   ;;  %s872_s1 = inlined_call_operand.vmem [shape: bf16[128,128], index: 1, kind: input, shape index: {}]   ;;  %s873_s2 = inlined_call_operand.vmem [shape: bf16[64,128], index: 2, kind: input, shape index: {}]   ;;  %s874_s3 = inlined_call_operand.vmem [shape: bf16[128,128], index: 3, kind: input, shape index: {}]   ;;  %s875_s4 = inlined_call_operand.vmem [shape: f32[1,128], index: 4, kind: input, shape index: {}]   ;;  %s876_s5 = inlined_call_operand.vmem [shape: bf16[64,128], index: 5, kind: output, shape index: {}]  }
   0x1 LB: > { %s612_s19 = sadd.s32 4294967295, %s763_s18   ;;  %p616_p0 = scmp.ge.s32.totalorder %s763_s18, 1  ;;  %s763_s18 = sphi %s795_s18, %s15_s18  }
   0x2   : > { %p199_p1 = scmp.lt.s32.totalorder %s763_s18, 3 }
   0x4   : > { %p200_p2 = pnand %p616_p0, %p199_p1 }
   0x5   : > { %v737_v0 = vld [vmem:[%s874_s3] sm:$0xff] (!%p200_p2)   ;;  %s617_s22 = sshll.u32 (!%p200_p2), %s612_s19, 2  ;;  %v739_v2 = vld [vmem:[%s874_s3 + $0x8] sm:$0xff] (!%p200_p2)   ;;  %v741_v4 = vld [vmem:[%s874_s3 + $0x10] sm:$0xff] (!%p200_p2)  }
   0x6   : > { %203 = sbr.rel (%p200_p2) target bundleno = 263 (0x107), region = 40  ;;  %v738_v1 = vld [vmem:[%s872_s1] sm:$0xff] (!%p200_p2)   ;;  %685 = vmatprep.subr.bf16.mxu1 (!%p200_p2), %v737_v0  ;;  %p233_p3 = scmp.lt.s32.totalorder (!%p200_p2), %s617_s22, 7  ;;  %v740_v3 = vld [vmem:[%s872_s1 + $0x8] sm:$0xff] (!%p200_p2)   ;;  %v742_v5 = vld [vmem:[%s872_s1 + $0x10] sm:$0xff] (!%p200_p2)  }
   0x7   : > { %705 = vmatprep.subr.bf16.mxu0 (!%p200_p2), %v738_v1  ;;  %686 = vmatpush3.bf16.msra.mxu1 (!%p200_p2), %v737_v0  ;;  %v743_v6 = vld [vmem:[%s874_s3 + $0x18] sm:$0xff] (!%p200_p2)   ;;  %v745_v8 = vld [vmem:[%s874_s3 + $0x20] sm:$0xff] (!%p200_p2)   ;;  %v747_v10 = vld [vmem:[%s874_s3 + $0x28] sm:$0xff] (!%p200_p2)  }
   0x8   : > { %706 = vmatpush3.bf16.msra.mxu0 (!%p200_p2), %v738_v1  ;;  %687 = vmatprep.subr.bf16.mxu1 (!%p200_p2), %v739_v2  ;;  %v744_v7 = vld [vmem:[%s872_s1 + $0x18] sm:$0xff] (!%p200_p2)   ;;  %v746_v9 = vld [vmem:[%s872_s1 + $0x20] sm:$0xff] (!%p200_p2)   ;;  %v748_v11 = vld [vmem:[%s872_s1 + $0x28] sm:$0xff] (!%p200_p2)  }
   0x9   : > { %707 = vmatprep.subr.bf16.mxu0 (!%p200_p2), %v740_v3  ;;  %v749_v14 = vld [vmem:[%s874_s3 + $0x30] sm:$0xff] (!%p200_p2)   ;;  %v751_v16 = vld [vmem:[%s874_s3 + $0x38] sm:$0xff] (!%p200_p2)   ;;  %v643_v22 = vld [vmem:[%s875_s4] ss:$0 sm:$0xff] (!%p200_p2) }
   0xa   : > { %v750_v15 = vld [vmem:[%s872_s1 + $0x30] sm:$0xff] (!%p200_p2)   ;;  %v752_v17 = vld [vmem:[%s872_s1 + $0x38] sm:$0xff] (!%p200_p2)  }
   0xb   : > { %688 = vmatpush3.bf16.msra.mxu1 (!%p200_p2), %v739_v2 }
   0xc   : > { %708 = vmatpush3.bf16.msra.mxu0 (!%p200_p2), %v740_v3  ;;  %689 = vmatprep.subr.bf16.mxu1 (!%p200_p2), %v741_v4 }
   0xd   : > { %s878_s22 = smov (!%p233_p3, %s617_s22), 7  ;;  %709 = vmatprep.subr.bf16.mxu0 %v742_v5 }
   0xe   : > { %s827_s12 = sshll.u32 %s878_s22, 2 }
   0xf   : > { %690 = vmatpush3.bf16.msra.mxu1 %v741_v4  ;;  %s242_s20 = scalar_lea.vmem %s873_s2, %s827_s12  ;;  %s236_s25 = scalar_lea.vmem %s871_s0, %s827_s12 }
  0x10   : > { %710 = vmatpush3.bf16.msra.mxu0 %v742_v5  ;;  %691 = vmatprep.subr.bf16.mxu1 %v743_v6  ;;  %v753_v12 = vld [vmem:[%s242_s20] sm:$0xff]   ;;  %v755_v18 = vld [vmem:[%s242_s20 + $0x8] sm:$0xff]   ;;  %s248_s16 = scalar_lea.vmem %s876_s5, %s827_s12 }
  0x11   : > { %711 = vmatprep.subr.bf16.mxu0 %v744_v7  ;;  %v754_v13 = vld [vmem:[%s236_s25] sm:$0xff]   ;;  %701 = vmatprep.mubr.bf16.mxu1 %v753_v12  ;;  %v756_v19 = vld [vmem:[%s236_s25 + $0x8] sm:$0xff]  }
  0x12   : > { %721 = vmatprep.mubr.bf16.mxu0 %v754_v13 }
  0x13   : > { %692 = vmatpush3.bf16.msra.mxu1 %v743_v6 }
  0x14   : > { %712 = vmatpush3.bf16.msra.mxu0 %v744_v7  ;;  %693 = vmatprep.subr.bf16.mxu1 %v745_v8 }
  0x15   : > { %713 = vmatprep.subr.bf16.mxu0 %v746_v9 }
  0x17   : > { %694 = vmatpush3.bf16.msra.mxu1 %v745_v8 }
  0x18   : > { %714 = vmatpush3.bf16.msra.mxu0 %v746_v9  ;;  %695 = vmatprep.subr.bf16.mxu1 %v747_v10 }
  0x19   : > { %715 = vmatprep.subr.bf16.mxu0 %v748_v11 }
  0x1b   : > { %696 = vmatpush3.bf16.msra.mxu1 %v747_v10 }
  0x1c   : > { %716 = vmatpush3.bf16.msra.mxu0 %v748_v11  ;;  %697 = vmatprep.subr.bf16.mxu1 %v749_v14 }
  0x1d   : > { %717 = vmatprep.subr.bf16.mxu0 %v750_v15 }
  0x1f   : > { %698 = vmatpush3.bf16.msra.mxu1 %v749_v14 }
  0x20   : > { %718 = vmatpush3.bf16.msra.mxu0 %v750_v15  ;;  %699 = vmatprep.subr.bf16.mxu1 %v751_v16 }
  0x21   : > { %719 = vmatprep.subr.bf16.mxu0 %v752_v17 }
  0x23   : > { %700 = vmatpush3.bf16.msra.mxu1 %v751_v16 }
  0x24   : > { %720 = vmatpush3.bf16.msra.mxu0 %v752_v17 }
  0x26   : > { %702 = vmatmul.mubr.bf16.vlgmr.msra.gmra.mrb[0].mxu1 %v755_v18 }
  0x27   : > { %722 = vmatmul.mubr.bf16.vlgmr.msra.gmra.mrb[0].mxu0 %v756_v19 }
  0xf9   : > { %v703_v20 = vpop.f32.mrb[0].mxu1 }
  0xfa   : > { %v723_v21 = vpop.f32.mrb[0].mxu0  ;;  %v385_v23 = vpop.f32.mrb[1].mxu1 }
  0xfb   : > { %v503_v24 = vadd.f32 %v723_v21, %v703_v20  ;;  %v494_v25 = vpop.f32.mrb[1].mxu0  ;;  %v704_v26 = vpop.f32.mrb[2].mxu1 }
  0xfc   : > { %v495_v27 = vadd.f32 %v494_v25, %v385_v23  ;;  %v724_v28 = vpop.f32.mrb[2].mxu0  ;;  %v388_v29 = vpop.f32.mrb[3].mxu1 }
  0xfd   : > { %v518_v30 = vadd.f32 %v643_v22, %v503_v24  ;;  %v506_v31 = vadd.f32 %v724_v28, %v704_v26  ;;  %v497_v32 = vpop.f32.mrb[3].mxu0 }
  0xfe   : > { %v516_v33 = vadd.f32 %v643_v22, %v495_v27  ;;  %v498_v34 = vadd.f32 %v497_v32, %v388_v29 }
  0xff   : > { %v519_v35 = vadd.f32 %v643_v22, %v506_v31  ;;  %v522_v37 = vmax.f32 %v518_v30, 0.0 }
 0x100   : > { %v517_v36 = vadd.f32 %v643_v22, %v498_v34  ;;  %v520_v39 = vmax.f32 %v516_v33, 0.0 }
 0x101   : > { %v523_v38 = vmax.f32 %v519_v35, 0.0 }
 0x102   : > { %v521_v40 = vmax.f32 %v517_v36, 0.0 }
 0x103   : > { %v662_v41 = vpack.c.bf16 %v523_v38, %v522_v37 }
 0x104   : > { %v657_v42 = vpack.c.bf16 %v521_v40, %v520_v39 }
 0x105   : > { %664 = vst [vmem:[%s248_s16 + $0x8] sm:$0xff] %v662_v41  }
 0x106   : > { %658 = vst [vmem:[%s248_s16] sm:$0xff] %v657_v42  }
 0x107 PF: > { %s15_s18 = sadd.s32 1, %s763_s18  }
 0x108   : > { %p12_p4 = scmp.ge.s32.totalorder %s15_s18, 4  }
 0x10a   :  { %14 = sbr.rel (!%p12_p4) target bundleno = 1 (0x1), region = 73 }

// kernel: pspnet_tl_forward.33
= control target key start
LH: loop header
LB: loop body
LE: loop exit
PB: predicated region body
PF: predicated region fallthrough
CT: control target
= control target key end

     0   :  { %s508_s12 = smov 0   ;;  %s559_s0 = inlined_call_operand.vmem [shape: bf16[64,128], index: 0, kind: input, shape index: {}]   ;;  %s560_s1 = inlined_call_operand.vmem [shape: bf16[128,128], index: 1, kind: input, shape index: {}]   ;;  %s561_s2 = inlined_call_operand.vmem [shape: f32[1,128], index: 2, kind: input, shape index: {}]   ;;  %s562_s3 = inlined_call_operand.vmem [shape: bf16[64,128], index: 3, kind: output, shape index: {}]  }
   0x1 LB: > { %s391_s13 = sadd.s32 4294967295, %s486_s12   ;;  %p395_p0 = scmp.ge.s32.totalorder %s486_s12, 1  ;;  %s486_s12 = sphi %s508_s12, %s13_s12  }
   0x2   : > { %p138_p1 = scmp.lt.s32.totalorder %s486_s12, 3 }
   0x4   : > { %p139_p2 = pnand %p395_p0, %p138_p1 }
   0x5   : > { %v470_v0 = vld [vmem:[%s560_s1] sm:$0xff] (!%p139_p2)   ;;  %s396_s16 = sshll.u32 (!%p139_p2), %s391_s13, 2  ;;  %v471_v1 = vld [vmem:[%s560_s1 + $0x8] sm:$0xff] (!%p139_p2)   ;;  %v472_v2 = vld [vmem:[%s560_s1 + $0x10] sm:$0xff] (!%p139_p2)  }
   0x6   : > { %142 = sbr.rel (%p139_p2) target bundleno = 260 (0x104), region = 32  ;;  %p163_p3 = scmp.lt.s32.totalorder (!%p139_p2), %s396_s16, 7  ;;  %442 = vmatprep.subr.bf16.mxu0 (!%p139_p2), %v470_v0  ;;  %v473_v3 = vld [vmem:[%s560_s1 + $0x18] sm:$0xff] (!%p139_p2)   ;;  %v474_v5 = vld [vmem:[%s560_s1 + $0x20] sm:$0xff] (!%p139_p2)   ;;  %v475_v6 = vld [vmem:[%s560_s1 + $0x28] sm:$0xff] (!%p139_p2)  }
   0x7   : > { %443 = vmatpush3.bf16.msra.mxu0 (!%p139_p2), %v470_v0  ;;  %v476_v7 = vld [vmem:[%s560_s1 + $0x30] sm:$0xff] (!%p139_p2)   ;;  %v477_v8 = vld [vmem:[%s560_s1 + $0x38] sm:$0xff] (!%p139_p2)   ;;  %v400_v10 = vld [vmem:[%s561_s2] ss:$0 sm:$0xff] (!%p139_p2) }
   0x8   : > { %444 = vmatprep.subr.bf16.mxu0 (!%p139_p2), %v471_v1 }
   0xb   : > { %445 = vmatpush3.bf16.msra.mxu0 (!%p139_p2), %v471_v1 }
   0xc   : > { %446 = vmatprep.subr.bf16.mxu0 (!%p139_p2), %v472_v2 }
   0xd   : > { %s564_s16 = smov (!%p163_p3, %s396_s16), 7 }
   0xe   : > { %s397_s21 = sshll.u32 %s564_s16, 2 }
   0xf   : > { %s166_s24 = scalar_lea.vmem %s559_s0, %s397_s21  ;;  %447 = vmatpush3.bf16.msra.mxu0 %v472_v2  ;;  %s172_s13 = scalar_lea.vmem %s562_s3, %s397_s21 }
  0x10   : > { %v478_v4 = vld [vmem:[%s166_s24] sm:$0xff]   ;;  %448 = vmatprep.subr.bf16.mxu0 %v473_v3  ;;  %v479_v9 = vld [vmem:[%s166_s24 + $0x8] sm:$0xff]  }
  0x11   : > { %458 = vmatprep.mubr.bf16.mxu0 %v478_v4 }
  0x13   : > { %449 = vmatpush3.bf16.msra.mxu0 %v473_v3 }
  0x14   : > { %450 = vmatprep.subr.bf16.mxu0 %v474_v5 }
  0x17   : > { %451 = vmatpush3.bf16.msra.mxu0 %v474_v5 }
  0x18   : > { %452 = vmatprep.subr.bf16.mxu0 %v475_v6 }
  0x1b   : > { %453 = vmatpush3.bf16.msra.mxu0 %v475_v6 }
  0x1c   : > { %454 = vmatprep.subr.bf16.mxu0 %v476_v7 }
  0x1f   : > { %455 = vmatpush3.bf16.msra.mxu0 %v476_v7 }
  0x20   : > { %456 = vmatprep.subr.bf16.mxu0 %v477_v8 }
  0x23   : > { %457 = vmatpush3.bf16.msra.mxu0 %v477_v8 }
  0x26   : > { %459 = vmatmul.mubr.bf16.vlgmr.msra.gmra.mrb[0].mxu0 %v479_v9 }
  0xf9   : > { %v460_v11 = vpop.f32.mrb[0].mxu0 }
  0xfa   : > { %v305_v12 = vadd.f32 %v460_v11, %v400_v10  ;;  %v296_v13 = vpop.f32.mrb[1].mxu0 }
  0xfb   : > { %v297_v14 = vadd.f32 %v400_v10, %v296_v13  ;;  %v461_v15 = vpop.f32.mrb[2].mxu0 }
  0xfc   : > { %v308_v16 = vadd.f32 %v461_v15, %v400_v10  ;;  %v299_v17 = vpop.f32.mrb[3].mxu0  ;;  %v313_v19 = vmax.f32 %v305_v12, 0.0 }
  0xfd   : > { %v300_v18 = vadd.f32 %v400_v10, %v299_v17  ;;  %v311_v21 = vmax.f32 %v297_v14, 0.0 }
  0xfe   : > { %v314_v20 = vmax.f32 %v308_v16, 0.0 }
  0xff   : > { %v312_v22 = vmax.f32 %v300_v18, 0.0 }
 0x100   : > { %v429_v23 = vpack.c.bf16 %v314_v20, %v313_v19 }
 0x101   : > { %v424_v24 = vpack.c.bf16 %v312_v22, %v311_v21 }
 0x102   : > { %431 = vst [vmem:[%s172_s13 + $0x8] sm:$0xff] %v429_v23  }
 0x103   : > { %425 = vst [vmem:[%s172_s13] sm:$0xff] %v424_v24  }
 0x104 PF: > { %s13_s12 = sadd.s32 1, %s486_s12  }
 0x105   : > { %p10_p4 = scmp.ge.s32.totalorder %s13_s12, 4  }
 0x107   :  { %12 = sbr.rel (!%p10_p4) target bundleno = 1 (0x1), region = 62 }

// kernel: pspnet_tl_forward.31
= control target key start
LH: loop header
LB: loop body
LE: loop exit
PB: predicated region body
PF: predicated region fallthrough
CT: control target
= control target key end

     0   :  { %s1596_s12 = smov 0   ;;  %s1858_s0 = inlined_call_operand.vmem [shape: bf16[64,1152], index: 0, kind: input, shape index: {}]   ;;  %s1859_s1 = inlined_call_operand.vmem [shape: bf16[1152,128], index: 1, kind: input, shape index: {}]   ;;  %s1860_s2 = inlined_call_operand.vmem [shape: f32[1,128], index: 2, kind: input, shape index: {}]   ;;  %s1861_s3 = inlined_call_operand.vmem [shape: bf16[64,128], index: 3, kind: output, shape index: {}]  }
   0x1 LB: > { %s1198_s13 = sadd.s32 4294967295, %s1574_s12   ;;  %p1202_p0 = scmp.ge.s32.totalorder %s1574_s12, 1  ;;  %s1574_s12 = sphi %s1596_s12, %s13_s12  }
   0x2   : > { %p139_p1 = scmp.lt.s32.totalorder %s1574_s12, 3 }
   0x4   : > { %p140_p2 = pnand %p1202_p0, %p139_p1 }
   0x5   : > { %v1470_v0 = vld [vmem:[%s1859_s1 + $0x40] sm:$0xff] (!%p140_p2)   ;;  %v1474_v4 = vld [vmem:[%s1859_s1 + $0x48] sm:$0xff] (!%p140_p2)   ;;  %v1478_v8 = vld [vmem:[%s1859_s1 + $0x50] sm:$0xff] (!%p140_p2)   ;;  %s1203_s17 = sshll.u32 (!%p140_p2), %s1198_s13, 2 }
   0x6   : > { %143 = sbr.rel (%p140_p2) target bundleno = 324 (0x144), region = 32  ;;  %v1471_v1 = vld [vmem:[%s1859_s1] sm:$0xff] (!%p140_p2)   ;;  %1319 = vmatprep.subr.bf16.mxu0 (!%p140_p2), %v1470_v0  ;;  %v1475_v5 = vld [vmem:[%s1859_s1 + $0x8] sm:$0xff] (!%p140_p2)   ;;  %v1479_v9 = vld [vmem:[%s1859_s1 + $0x10] sm:$0xff] (!%p140_p2)   ;;  %p165_p3 = scmp.lt.s32.totalorder (!%p140_p2), %s1203_s17, 7 }
   0x7   : > { %v1472_v2 = vld [vmem:[%s1859_s1 + $0xc0] sm:$0xff] (!%p140_p2)   ;;  %1320 = vmatpush3.bf16.msra.mxu0 (!%p140_p2), %v1471_v1  ;;  %v1476_v6 = vld [vmem:[%s1859_s1 + $0xc8] sm:$0xff] (!%p140_p2)   ;;  %v1480_v10 = vld [vmem:[%s1859_s1 + $0xd0] sm:$0xff] (!%p140_p2)  }
   0x8   : > { %v1473_v3 = vld [vmem:[%s1859_s1 + $0x80] sm:$0xff] (!%p140_p2)   ;;  %1347 = vmatprep.subr.bf16.mxu1 (!%p140_p2), %v1472_v2  ;;  %1321 = vmatprep.subr.bf16.mxu0 (!%p140_p2), %v1474_v4  ;;  %v1477_v7 = vld [vmem:[%s1859_s1 + $0x88] sm:$0xff] (!%p140_p2)   ;;  %v1481_v11 = vld [vmem:[%s1859_s1 + $0x90] sm:$0xff] (!%p140_p2)  }
   0x9   : > { %1348 = vmatpush3.bf16.msra.mxu1 (!%p140_p2), %v1473_v3  ;;  %v1482_v12 = vld [vmem:[%s1859_s1 + $0x58] sm:$0xff] (!%p140_p2)   ;;  %v1486_v16 = vld [vmem:[%s1859_s1 + $0x60] sm:$0xff] (!%p140_p2)   ;;  %v1490_v20 = vld [vmem:[%s1859_s1 + $0x68] sm:$0xff] (!%p140_p2)  }
   0xa   : > { %1349 = vmatprep.subr.bf16.mxu1 (!%p140_p2), %v1476_v6  ;;  %v1483_v13 = vld [vmem:[%s1859_s1 + $0x18] sm:$0xff] (!%p140_p2)   ;;  %v1487_v17 = vld [vmem:[%s1859_s1 + $0x20] sm:$0xff] (!%p140_p2)   ;;  %v1491_v21 = vld [vmem:[%s1859_s1 + $0x28] sm:$0xff] (!%p140_p2)  }
   0xb   : > { %1322 = vmatpush3.bf16.msra.mxu0 (!%p140_p2), %v1475_v5  ;;  %v1484_v14 = vld [vmem:[%s1859_s1 + $0xd8] sm:$0xff] (!%p140_p2)   ;;  %v1488_v18 = vld [vmem:[%s1859_s1 + $0xe0] sm:$0xff] (!%p140_p2)   ;;  %v1492_v22 = vld [vmem:[%s1859_s1 + $0xe8] sm:$0xff] (!%p140_p2)  }
   0xc   : > { %1323 = vmatprep.subr.bf16.mxu0 (!%p140_p2), %v1478_v8  ;;  %v1485_v15 = vld [vmem:[%s1859_s1 + $0x98] sm:$0xff] (!%p140_p2)   ;;  %v1489_v19 = vld [vmem:[%s1859_s1 + $0xa0] sm:$0xff] (!%p140_p2)   ;;  %v1493_v23 = vld [vmem:[%s1859_s1 + $0xa8] sm:$0xff] (!%p140_p2)  }
   0xd   : > { %1350 = vmatpush3.bf16.msra.mxu1 %v1477_v7  ;;  %s1863_s17 = smov (!%p165_p3, %s1203_s17), 7  ;;  %v1494_v24 = vld [vmem:[%s1859_s1 + $0x70] sm:$0xff]   ;;  %v1498_v28 = vld [vmem:[%s1859_s1 + $0x78] sm:$0xff]   ;;  %v1505_v34 = vld [vmem:[%s1859_s1 + $0x140] sm:$0xff]  }
   0xe   : > { %1351 = vmatprep.subr.bf16.mxu1 %v1480_v10  ;;  %s1461_s14 = smul.u32 36, %s1863_s17  ;;  %v1495_v25 = vld [vmem:[%s1859_s1 + $0x30] sm:$0xff]   ;;  %v1499_v29 = vld [vmem:[%s1859_s1 + $0x38] sm:$0xff]   ;;  %v1509_v37 = vld [vmem:[%s1859_s1 + $0x100] sm:$0xff]  }
   0xf   : > { %1324 = vmatpush3.bf16.msra.mxu0 %v1479_v9  ;;  %v1496_v26 = vld [vmem:[%s1859_s1 + $0xf0] sm:$0xff]   ;;  %v1500_v30 = vld [vmem:[%s1859_s1 + $0xf8] sm:$0xff]   ;;  %v1510_v38 = vld [vmem:[%s1859_s1 + $0x1c0] sm:$0xff]  }
  0x10   : > { %1325 = vmatprep.subr.bf16.mxu0 %v1482_v12  ;;  %v1497_v27 = vld [vmem:[%s1859_s1 + $0xb0] sm:$0xff]   ;;  %s1699_s13 = scalar_lea.vmem %s1858_s0, %s1461_s14  ;;  %v1504_v33 = vld [vmem:[%s1859_s1 + $0xb8] sm:$0xff]   ;;  %v1511_v39 = vld [vmem:[%s1859_s1 + $0x180] sm:$0xff]  }
  0x11   : > { %1352 = vmatpush3.bf16.msra.mxu1 %v1481_v11  ;;  %v1501_v31 = vld [vmem:[%s1699_s13] ss:$36 sps:$4 sm:$0xff]   ;;  %v1506_v35 = vld [vmem:[%s1699_s13 + $0x8] ss:$36 sps:$4 sm:$0xff]   ;;  %v1516_v44 = vld [vmem:[%s1859_s1 + $0x150] sm:$0xff]  }
  0x12   : > { %1353 = vmatprep.subr.bf16.mxu1 %v1484_v14  ;;  %v1503_v32 = vld [vmem:[%s1699_s13 + $0x4] ss:$36 sps:$4 sm:$0xff]   ;;  %v1508_v36 = vld [vmem:[%s1699_s13 + $0xc] ss:$36 sps:$4 sm:$0xff]   ;;  %v1520_v48 = vld [vmem:[%s1859_s1 + $0x158] sm:$0xff]  }
  0x13   : > { %1326 = vmatpush3.bf16.msra.mxu0 %v1483_v13  ;;  %905 = vmatprep.mubr.bf16.mxu0 %v1503_v32  ;;  %v1512_v40 = vld [vmem:[%s1859_s1 + $0x148] sm:$0xff]   ;;  %v1517_v45 = vld [vmem:[%s1859_s1 + $0x110] sm:$0xff]   ;;  %v1521_v49 = vld [vmem:[%s1859_s1 + $0x118] sm:$0xff]  }
  0x14   : > { %1327 = vmatprep.subr.bf16.mxu0 %v1486_v16  ;;  %954 = vmatprep.mubr.bf16.mxu1 %v1508_v36  ;;  %v1513_v41 = vld [vmem:[%s1859_s1 + $0x108] sm:$0xff]   ;;  %v1518_v46 = vld [vmem:[%s1859_s1 + $0x1d0] sm:$0xff]   ;;  %v1522_v50 = vld [vmem:[%s1859_s1 + $0x1d8] sm:$0xff]  }
  0x15   : > { %1354 = vmatpush3.bf16.msra.mxu1 %v1485_v15  ;;  %v1514_v42 = vld [vmem:[%s1859_s1 + $0x1c8] sm:$0xff]   ;;  %v1519_v47 = vld [vmem:[%s1859_s1 + $0x190] sm:$0xff]   ;;  %v1523_v51 = vld [vmem:[%s1859_s1 + $0x198] sm:$0xff]  }
  0x16   : > { %1355 = vmatprep.subr.bf16.mxu1 %v1488_v18  ;;  %v1515_v43 = vld [vmem:[%s1859_s1 + $0x188] sm:$0xff]   ;;  %v1524_v52 = vld [vmem:[%s1859_s1 + $0x160] sm:$0xff]   ;;  %v1534_v61 = vld [vmem:[%s1699_s13 + $0x54] ss:$36 sps:$4 sm:$0xff]  }
  0x17   : > { %1328 = vmatpush3.bf16.msra.mxu0 %v1487_v17  ;;  %v1525_v53 = vld [vmem:[%s1859_s1 + $0x120] sm:$0xff]   ;;  %v1528_v56 = vld [vmem:[%s1859_s1 + $0x168] sm:$0xff]   ;;  %v1537_v63 = vld [vmem:[%s1699_s13 + $0x50] ss:$36 sps:$4 sm:$0xff]  }
  0x18   : > { %1329 = vmatprep.subr.bf16.mxu0 %v1490_v20  ;;  %v1526_v54 = vld [vmem:[%s1859_s1 + $0x1e0] sm:$0xff]   ;;  %v1529_v57 = vld [vmem:[%s1699_s13 + $0x4c] ss:$36 sps:$4 sm:$0xff]   ;;  %v1542_v4 = vld [vmem:[%s1859_s1 + $0x178] sm:$0xff]  }
  0x19   : > { %1356 = vmatpush3.bf16.msra.mxu1 %v1489_v19  ;;  %v1527_v55 = vld [vmem:[%s1859_s1 + $0x1a0] sm:$0xff]   ;;  %v1531_v58 = vld [vmem:[%s1859_s1 + $0x128] sm:$0xff]   ;;  %v1538_v0 = vld [vmem:[%s1859_s1 + $0x170] sm:$0xff]  }
  0x1a   : > { %1357 = vmatprep.subr.bf16.mxu1 %v1492_v22  ;;  %v1532_v59 = vld [vmem:[%s1699_s13 + $0x48] ss:$36 sps:$4 sm:$0xff]   ;;  %v1539_v1 = vld [vmem:[%s1859_s1 + $0x130] sm:$0xff]   ;;  %v1543_v5 = vld [vmem:[%s1859_s1 + $0x138] sm:$0xff]  }
  0x1b   : > { %1330 = vmatpush3.bf16.msra.mxu0 %v1491_v21  ;;  %v1533_v60 = vld [vmem:[%s1859_s1 + $0x1e8] sm:$0xff]   ;;  %v1540_v2 = vld [vmem:[%s1859_s1 + $0x1f0] sm:$0xff]   ;;  %v1544_v6 = vld [vmem:[%s1859_s1 + $0x1f8] sm:$0xff]  }
  0x1c   : > { %1331 = vmatprep.subr.bf16.mxu0 %v1494_v24  ;;  %v1536_v62 = vld [vmem:[%s1859_s1 + $0x1a8] sm:$0xff]   ;;  %v1541_v3 = vld [vmem:[%s1859_s1 + $0x1b0] sm:$0xff]   ;;  %v1548_v9 = vld [vmem:[%s1859_s1 + $0x1b8] sm:$0xff]  }
  0x1d   : > { %1358 = vmatpush3.bf16.msra.mxu1 %v1493_v23  ;;  %v1545_v7 = vld [vmem:[%s1699_s13 + $0x10] ss:$36 sps:$4 sm:$0xff]   ;;  %v1549_v10 = vld [vmem:[%s1859_s1 + $0x200] sm:$0xff]   ;;  %v1550_v11 = vld [vmem:[%s1699_s13 + $0x18] ss:$36 sps:$4 sm:$0xff]  }
  0x1e   : > { %1359 = vmatprep.subr.bf16.mxu1 %v1496_v26  ;;  %v1547_v8 = vld [vmem:[%s1699_s13 + $0x14] ss:$36 sps:$4 sm:$0xff]   ;;  %v1552_v12 = vld [vmem:[%s1699_s13 + $0x1c] ss:$36 sps:$4 sm:$0xff]   ;;  %v1553_v13 = vld [vmem:[%s1859_s1 + $0x208] sm:$0xff]  }
  0x1f   : > { %1332 = vmatpush3.bf16.msra.mxu0 %v1495_v25  ;;  %v1554_v14 = vld [vmem:[%s1699_s13 + $0x5c] ss:$36 sps:$4 sm:$0xff]   ;;  %v1557_v16 = vld [vmem:[%s1859_s1 + $0x210] sm:$0xff]   ;;  %v1558_v17 = vld [vmem:[%s1699_s13 + $0x64] ss:$36 sps:$4 sm:$0xff]  }
  0x20   : > { %1333 = vmatprep.subr.bf16.mxu0 %v1498_v28  ;;  %v1556_v15 = vld [vmem:[%s1699_s13 + $0x58] ss:$36 sps:$4 sm:$0xff]   ;;  %v1560_v18 = vld [vmem:[%s1699_s13 + $0x60] ss:$36 sps:$4 sm:$0xff]   ;;  %v1563_v22 = vld [vmem:[%s1859_s1 + $0x228] sm:$0xff]  }
  0x21   : > { %1360 = vmatpush3.bf16.msra.mxu1 %v1497_v27  ;;  %v1561_v19 = vld [vmem:[%s1859_s1 + $0x218] sm:$0xff]   ;;  %v1562_v20 = vld [vmem:[%s1859_s1 + $0x220] sm:$0xff]   ;;  %v1564_v23 = vld [vmem:[%s1859_s1 + $0x230] sm:$0xff]  }
  0x22   : > { %1361 = vmatprep.subr.bf16.mxu1 %v1500_v30  ;;  %v1566_v21 = vld [vmem:[%s1699_s13 + $0x20] ss:$36 sps:$4 sm:$0xff]   ;;  %v1565_v24 = vld [vmem:[%s1859_s1 + $0x238] sm:$0xff]   ;;  %v1567_v25 = vld [vmem:[%s1699_s13 + $0x68] ss:$36 sps:$4 sm:$0xff]   ;;  %s1206_s13 = sshll.u32 %s1863_s17, 2 }
  0x23   : > { %1334 = vmatpush3.bf16.msra.mxu0 %v1499_v29  ;;  %v1207_v27 = vld [vmem:[%s1860_s2] ss:$0 sm:$0xff]  ;;  %s175_s20 = scalar_lea.vmem %s1861_s3, %s1206_s13 }
  0x24   : > { %1375 = vmatprep.subr.bf16.mxu0 %v1505_v34 }
  0x25   : > { %1362 = vmatpush3.bf16.msra.mxu1 %v1504_v33 }
  0x26   : > { %906 = vmatmul.mubr.bf16.vlgmr.msra.gmra.mrb[0].mxu0 %v1501_v31  ;;  %1403 = vmatprep.subr.bf16.mxu1 %v1510_v38 }
  0x27   : > { %1376 = vmatpush3.bf16.msra.mxu0 %v1509_v37  ;;  %913 = vmatprep.mubr.bf16.mxu0 %v1529_v57 }
  0x28   : > { %955 = vmatmul.mubr.bf16.vlgmr.msra.gmra.mrb[0].mxu1 %v1506_v35  ;;  %1377 = vmatprep.subr.bf16.mxu0 %v1512_v40 }
  0x29   : > { %1404 = vmatpush3.bf16.msra.mxu1 %v1511_v39  ;;  %962 = vmatprep.mubr.bf16.mxu1 %v1534_v61 }
  0x2a   : > { %1405 = vmatprep.subr.bf16.mxu1 %v1514_v42 }
  0x2b   : > { %1378 = vmatpush3.bf16.msra.mxu0 %v1513_v41 }
  0x2c   : > { %1379 = vmatprep.subr.bf16.mxu0 %v1516_v44 }
  0x2d   : > { %1406 = vmatpush3.bf16.msra.mxu1 %v1515_v43 }
  0x2e   : > { %1407 = vmatprep.subr.bf16.mxu1 %v1518_v46  ;;  %914 = vmatmul.mubr.bf16.gmra.mrb[4].mxu0 %v1532_v59 }
  0x2f   : > { %1380 = vmatpush3.bf16.msra.mxu0 %v1517_v45  ;;  %1003 = vmatprep.mubr.bf16.mxu0 %v1547_v8 }
  0x30   : > { %1381 = vmatprep.subr.bf16.mxu0 %v1520_v48  ;;  %963 = vmatmul.mubr.bf16.gmra.mrb[4].mxu1 %v1537_v63 }
  0x31   : > { %1408 = vmatpush3.bf16.msra.mxu1 %v1519_v47  ;;  %1052 = vmatprep.mubr.bf16.mxu1 %v1552_v12 }
  0x32   : > { %1409 = vmatprep.subr.bf16.mxu1 %v1522_v50 }
  0x33   : > { %1382 = vmatpush3.bf16.msra.mxu0 %v1521_v49 }
  0x34   : > { %1383 = vmatprep.subr.bf16.mxu0 %v1524_v52 }
  0x35   : > { %1410 = vmatpush3.bf16.msra.mxu1 %v1523_v51 }
  0x36   : > { %1411 = vmatprep.subr.bf16.mxu1 %v1526_v54 }
  0x37   : > { %1384 = vmatpush3.bf16.msra.mxu0 %v1525_v53 }
  0x38   : > { %1385 = vmatprep.subr.bf16.mxu0 %v1528_v56 }
  0x39   : > { %1412 = vmatpush3.bf16.msra.mxu1 %v1527_v55 }
  0x3a   : > { %1413 = vmatprep.subr.bf16.mxu1 %v1533_v60 }
  0x3b   : > { %1386 = vmatpush3.bf16.msra.mxu0 %v1531_v58 }
  0x3c   : > { %1387 = vmatprep.subr.bf16.mxu0 %v1538_v0 }
  0x3d   : > { %1414 = vmatpush3.bf16.msra.mxu1 %v1536_v62 }
  0x3e   : > { %1415 = vmatprep.subr.bf16.mxu1 %v1540_v2 }
  0x3f   : > { %1388 = vmatpush3.bf16.msra.mxu0 %v1539_v1 }
  0x40   : > { %1389 = vmatprep.subr.bf16.mxu0 %v1542_v4 }
  0x41   : > { %1416 = vmatpush3.bf16.msra.mxu1 %v1541_v3 }
  0x42   : > { %1417 = vmatprep.subr.bf16.mxu1 %v1544_v6 }
  0x43   : > { %1390 = vmatpush3.bf16.msra.mxu0 %v1543_v5 }
  0x44   : > { %1441 = vmatprep.subr.bf16.mxu0 %v1549_v10 }
  0x45   : > { %1418 = vmatpush3.bf16.msra.mxu1 %v1548_v9 }
  0x46   : > { %1004 = vmatmul.mubr.bf16.vlgmr.msra.gmra.mrb[8].mxu0 %v1545_v7 }
  0x47   : > { %1442 = vmatpush3.bf16.msra.mxu0 %v1549_v10  ;;  %1011 = vmatprep.mubr.bf16.mxu0 %v1554_v14 }
  0x48   : > { %1053 = vmatmul.mubr.bf16.vlgmr.msra.gmra.mrb[8].mxu1 %v1550_v11  ;;  %1443 = vmatprep.subr.bf16.mxu0 %v1553_v13 }
  0x49   : > { %1060 = vmatprep.mubr.bf16.mxu1 %v1558_v17 }
  0x4b   : > { %1444 = vmatpush3.bf16.msra.mxu0 %v1553_v13 }
  0x4c   : > { %1445 = vmatprep.subr.bf16.mxu0 %v1557_v16 }
  0x4e   : > { %1012 = vmatmul.mubr.bf16.gmra.mrb[12].mxu0 %v1556_v15 }
  0x4f   : > { %1446 = vmatpush3.bf16.msra.mxu0 %v1557_v16  ;;  %1457 = vmatprep.mubr.bf16.mxu0 %v1566_v21 }
  0x50   : > { %1061 = vmatmul.mubr.bf16.gmra.mrb[12].mxu1 %v1560_v18  ;;  %1447 = vmatprep.subr.bf16.mxu0 %v1561_v19 }
  0x53   : > { %1448 = vmatpush3.bf16.msra.mxu0 %v1561_v19 }
  0x54   : > { %1449 = vmatprep.subr.bf16.mxu0 %v1562_v20 }
  0x57   : > { %1450 = vmatpush3.bf16.msra.mxu0 %v1562_v20 }
  0x58   : > { %1451 = vmatprep.subr.bf16.mxu0 %v1563_v22 }
  0x5b   : > { %1452 = vmatpush3.bf16.msra.mxu0 %v1563_v22 }
  0x5c   : > { %1453 = vmatprep.subr.bf16.mxu0 %v1564_v23 }
  0x5f   : > { %1454 = vmatpush3.bf16.msra.mxu0 %v1564_v23 }
  0x60   : > { %1455 = vmatprep.subr.bf16.mxu0 %v1565_v24 }
  0x63   : > { %1456 = vmatpush3.bf16.msra.mxu0 %v1565_v24 }
  0x66   : > { %1458 = vmatmul.mubr.bf16.vlgmr.msra.gmra.mrb[16].mxu0 %v1567_v25 }
  0xf9   : > { %v1335_v26 = vpop.f32.mrb[0].mxu0 }
  0xfa   : > { %v1336_v28 = vpop.f32.mrb[1].mxu0 }
  0xfb   : > { %v1337_v29 = vadd.f32 %v1336_v28, %v1335_v26  ;;  %v1338_v30 = vpop.f32.mrb[2].mxu0  ;;  %v1363_v31 = vpop.f32.mrb[0].mxu1 }
  0xfc   : > { %v1339_v32 = vpop.f32.mrb[3].mxu0  ;;  %v1364_v35 = vpop.f32.mrb[1].mxu1 }
  0xfd   : > { %v908_v33 = vadd.f32 %v1337_v29, %v1207_v27  ;;  %v1340_v34 = vadd.f32 %v1339_v32, %v1338_v30  ;;  %v1365_v36 = vadd.f32 %v1364_v35, %v1363_v31  ;;  %v1366_v37 = vpop.f32.mrb[2].mxu1 }
  0xfe   : > { %v1367_v39 = vpop.f32.mrb[3].mxu1 }
  0xff   : > { %v911_v38 = vadd.f32 %v1340_v34, %v1207_v27  ;;  %v957_v40 = vadd.f32 %v1365_v36, %v908_v33  ;;  %v1368_v41 = vadd.f32 %v1367_v39, %v1366_v37 }
 0x101   : > { %v960_v42 = vadd.f32 %v1368_v41, %v911_v38  ;;  %v1341_v43 = vpop.f32.mrb[4].mxu0 }
 0x102   : > { %v1342_v44 = vpop.f32.mrb[5].mxu0 }
 0x103   : > { %v1343_v45 = vadd.f32 %v1342_v44, %v1341_v43  ;;  %v1344_v46 = vpop.f32.mrb[6].mxu0  ;;  %v1369_v47 = vpop.f32.mrb[4].mxu1 }
 0x104   : > { %v1345_v48 = vpop.f32.mrb[7].mxu0  ;;  %v1370_v51 = vpop.f32.mrb[5].mxu1 }
 0x105   : > { %v916_v49 = vadd.f32 %v1343_v45, %v1207_v27  ;;  %v1346_v50 = vadd.f32 %v1345_v48, %v1344_v46  ;;  %v1371_v52 = vadd.f32 %v1370_v51, %v1369_v47  ;;  %v1372_v53 = vpop.f32.mrb[6].mxu1 }
 0x106   : > { %v1373_v55 = vpop.f32.mrb[7].mxu1 }
 0x107   : > { %v919_v54 = vadd.f32 %v1346_v50, %v1207_v27  ;;  %v965_v56 = vadd.f32 %v1371_v52, %v916_v49  ;;  %v1374_v57 = vadd.f32 %v1373_v55, %v1372_v53 }
 0x109   : > { %v968_v58 = vadd.f32 %v1374_v57, %v919_v54 }
 0x119   : > { %v1391_v59 = vpop.f32.mrb[8].mxu0 }
 0x11a   : > { %v1392_v60 = vpop.f32.mrb[9].mxu0 }
 0x11b   : > { %v1393_v61 = vadd.f32 %v1392_v60, %v1391_v59  ;;  %v1394_v62 = vpop.f32.mrb[10].mxu0  ;;  %v1419_v63 = vpop.f32.mrb[8].mxu1 }
 0x11c   : > { %v1395_v0 = vpop.f32.mrb[11].mxu0  ;;  %v1420_v3 = vpop.f32.mrb[9].mxu1 }
 0x11d   : > { %v1006_v1 = vadd.f32 %v1393_v61, %v957_v40  ;;  %v1396_v2 = vadd.f32 %v1395_v0, %v1394_v62  ;;  %v1421_v4 = vadd.f32 %v1420_v3, %v1419_v63  ;;  %v1422_v5 = vpop.f32.mrb[10].mxu1 }
 0x11e   : > { %v1423_v7 = vpop.f32.mrb[11].mxu1 }
 0x11f   : > { %v1009_v6 = vadd.f32 %v1396_v2, %v960_v42  ;;  %v1424_v8 = vadd.f32 %v1423_v7, %v1422_v5  ;;  %v1055_v9 = vadd.f32 %v1421_v4, %v1006_v1 }
 0x121   : > { %v1397_v10 = vpop.f32.mrb[12].mxu0  ;;  %v1058_v12 = vadd.f32 %v1424_v8, %v1009_v6 }
 0x122   : > { %v1398_v11 = vpop.f32.mrb[13].mxu0 }
 0x123   : > { %v1399_v13 = vadd.f32 %v1398_v11, %v1397_v10  ;;  %v1400_v14 = vpop.f32.mrb[14].mxu0  ;;  %v1425_v15 = vpop.f32.mrb[12].mxu1 }
 0x124   : > { %v1401_v16 = vpop.f32.mrb[15].mxu0  ;;  %v1426_v19 = vpop.f32.mrb[13].mxu1 }
 0x125   : > { %v1014_v17 = vadd.f32 %v1399_v13, %v965_v56  ;;  %v1402_v18 = vadd.f32 %v1401_v16, %v1400_v14  ;;  %v1427_v20 = vadd.f32 %v1426_v19, %v1425_v15  ;;  %v1428_v21 = vpop.f32.mrb[14].mxu1 }
 0x126   : > { %v1429_v23 = vpop.f32.mrb[15].mxu1 }
 0x127   : > { %v1017_v22 = vadd.f32 %v1402_v18, %v968_v58  ;;  %v1430_v24 = vadd.f32 %v1429_v23, %v1428_v21  ;;  %v1063_v25 = vadd.f32 %v1427_v20, %v1014_v17 }
 0x129   : > { %v1066_v26 = vadd.f32 %v1430_v24, %v1017_v22 }
 0x139   : > { %v1459_v27 = vpop.f32.mrb[16].mxu0 }
 0x13a   : > { %v1112_v28 = vadd.f32 %v1459_v27, %v1063_v25  ;;  %v1103_v29 = vpop.f32.mrb[17].mxu0 }
 0x13b   : > { %v1104_v30 = vadd.f32 %v1103_v29, %v1055_v9  ;;  %v1460_v31 = vpop.f32.mrb[18].mxu0 }
 0x13c   : > { %v1115_v32 = vadd.f32 %v1460_v31, %v1066_v26  ;;  %v1106_v33 = vpop.f32.mrb[19].mxu0  ;;  %v1120_v35 = vmax.f32 %v1112_v28, 0.0 }
 0x13d   : > { %v1107_v34 = vadd.f32 %v1106_v33, %v1058_v12  ;;  %v1118_v37 = vmax.f32 %v1104_v30, 0.0 }
 0x13e   : > { %v1121_v36 = vmax.f32 %v1115_v32, 0.0 }
 0x13f   : > { %v1119_v38 = vmax.f32 %v1107_v34, 0.0 }
 0x140   : > { %v1316_v39 = vpack.c.bf16 %v1121_v36, %v1120_v35 }
 0x141   : > { %v1311_v40 = vpack.c.bf16 %v1119_v38, %v1118_v37 }
 0x142   : > { %1318 = vst [vmem:[%s175_s20 + $0x8] sm:$0xff] %v1316_v39  }
 0x143   : > { %1312 = vst [vmem:[%s175_s20] sm:$0xff] %v1311_v40  }
 0x144 PF: > { %s13_s12 = sadd.s32 1, %s1574_s12  }
 0x145   : > { %p10_p4 = scmp.ge.s32.totalorder %s13_s12, 4  }
 0x147   :  { %12 = sbr.rel (!%p10_p4) target bundleno = 1 (0x1), region = 62 }

// kernel: pspnet_tl_forward.39
= control target key start
LH: loop header
LB: loop body
LE: loop exit
PB: predicated region body
PF: predicated region fallthrough
CT: control target
= control target key end

     0   :  { %vm30_vm0 = vcmask 1044480   ;;  %v563_v2 = vmov 0.0   ;;  %vm23_vm1 = vcmask 39936   ;;  %s667_s1 = inlined_call_operand.vmem [shape: f32[5,1280], index: 1, kind: input, shape index: {}]   ;;  %s668_s0 = inlined_call_operand.vmem [shape: f32[16,5], index: 0, kind: input, shape index: {}]   ;;  %s669_s2 = inlined_call_operand.vmem [shape: bf16[16,1280], index: 2, kind: output, shape index: {}]  }
   0x1   :  { %v14_v0 = vld [vmem:[%s667_s1 + $0x8] sm:$0x1f]  ;;  %v13_v1 = vld [vmem:[%s667_s1] sm:$0x1f]  ;;  %125 = vmatprep.mubr.f32.mxu0 %v563_v2  ;;  %131 = vmatprep.mubr.f32.mxu1 %v563_v2  ;;  %v16_v5 = vld [vmem:[%s667_s1 + $0x18] sm:$0x1f] }
   0x2   :  { %v11_v3 = vld [vmem:[%s668_s0] sm:$0xff]  ;;  %520 = vmatprep.subr.msk.mxu0 %vm30_vm0, %v14_v0  ;;  %560 = vmatprep.subr.msk.mxu1 %vm30_vm0, %v14_v0  ;;  %v12_v4 = vld [vmem:[%s668_s0 + $0x8] sm:$0xff]  ;;  %v15_v7 = vld [vmem:[%s667_s1 + $0x10] sm:$0x1f] }
   0x3   :  { %v18_v6 = vld [vmem:[%s667_s1 + $0x28] sm:$0x1f]  ;;  %521 = vmatpush1.msk.msra.mxu0 %vm30_vm0, %v13_v1  ;;  %561 = vmatpush1.msk.msra.mxu1 %vm30_vm0, %v13_v1  ;;  %v17_v8 = vld [vmem:[%s667_s1 + $0x20] sm:$0x1f]  ;;  %v20_v9 = vld [vmem:[%s667_s1 + $0x38] sm:$0x1f] }
   0x4   :  { %522 = vmatmul.mubr.msk.f32.vlgmr.msra.gmra.mrb[0].mxu0 %vm23_vm1, %v11_v3  ;;  %523 = vmatmul.mubr.msk.f32.vlgmr.msra.gmra.mrb[0].mxu1 %vm23_vm1, %v12_v4  ;;  %v22_v10 = vld [vmem:[%s667_s1 + $0x48] sm:$0x1f]  ;;  %v19_v11 = vld [vmem:[%s667_s1 + $0x30] sm:$0x1f]  ;;  %v21_v12 = vld [vmem:[%s667_s1 + $0x40] sm:$0x1f] }
   0x5   :  { %524 = vmatprep.subr.msk.mxu1 %vm30_vm0, %v16_v5  ;;  %528 = vmatprep.subr.msk.mxu0 %vm30_vm0, %v18_v6 }
   0x6   :  { %525 = vmatpush1.msk.msra.mxu1 %vm30_vm0, %v15_v7  ;;  %529 = vmatpush1.msk.msra.mxu0 %vm30_vm0, %v17_v8 }
   0x7   :  { %202 = vmatprep.mubr.f32.mxu1 %v563_v2  ;;  %279 = vmatprep.mubr.f32.mxu0 %v563_v2 }
   0x8   :  { %526 = vmatmul.mubr.msk.f32.vlgmr.msra.gmra.mrb[2].mxu1 %vm23_vm1, %v11_v3  ;;  %530 = vmatmul.mubr.msk.f32.vlgmr.msra.gmra.mrb[2].mxu0 %vm23_vm1, %v11_v3 }
   0x9   :  { %532 = vmatprep.subr.msk.mxu1 %vm30_vm0, %v20_v9  ;;  %536 = vmatprep.subr.msk.mxu0 %vm30_vm0, %v22_v10 }
   0xa   :  { %533 = vmatpush1.msk.msra.mxu1 %vm30_vm0, %v19_v11  ;;  %537 = vmatpush1.msk.msra.mxu0 %vm30_vm0, %v21_v12 }
   0xb   :  { %208 = vmatprep.mubr.f32.mxu1 %v563_v2  ;;  %285 = vmatprep.mubr.f32.mxu0 %v563_v2 }
   0xc   :  { %527 = vmatmul.mubr.msk.f32.gmra.mrb[4].mxu1 %vm23_vm1, %v12_v4  ;;  %531 = vmatmul.mubr.msk.f32.gmra.mrb[4].mxu0 %vm23_vm1, %v12_v4 }
   0xd   :  { %356 = vmatprep.mubr.f32.mxu1 %v563_v2  ;;  %433 = vmatprep.mubr.f32.mxu0 %v563_v2 }
  0x10   :  { %534 = vmatmul.mubr.msk.f32.vlgmr.msra.gmra.mrb[6].mxu1 %vm23_vm1, %v11_v3  ;;  %538 = vmatmul.mubr.msk.f32.vlgmr.msra.gmra.mrb[6].mxu0 %vm23_vm1, %v11_v3 }
  0x11   :  { %362 = vmatprep.mubr.f32.mxu1 %v563_v2  ;;  %439 = vmatprep.mubr.f32.mxu0 %v563_v2 }
  0x14   :  { %535 = vmatmul.mubr.msk.f32.gmra.mrb[8].mxu1 %vm23_vm1, %v12_v4  ;;  %539 = vmatmul.mubr.msk.f32.gmra.mrb[8].mxu0 %vm23_vm1, %v12_v4 }
  0xd7   :  { %v127_v13 = vpop.f32.mrb[0].mxu0  ;;  %v133_v14 = vpop.f32.mrb[0].mxu1 }
  0xd8   :  { %v129_v15 = vpop.f32.mrb[1].mxu0  ;;  %v135_v16 = vpop.f32.mrb[1].mxu1 }
  0xd9   :  { %v550_v17 = vpack.c.bf16 %v129_v15, %v127_v13  ;;  %v555_v18 = vpack.c.bf16 %v135_v16, %v133_v14 }
  0xdb   :  { %506 = vst [vmem:[%s669_s2] sm:$0xff] %v550_v17  ;;  %511 = vst [vmem:[%s669_s2 + $0x28] sm:$0xff] %v555_v18  ;;  %v204_v19 = vpop.f32.mrb[2].mxu1  ;;  %v281_v20 = vpop.f32.mrb[2].mxu0 }
  0xdc   :  { %v206_v21 = vpop.f32.mrb[3].mxu1  ;;  %v283_v22 = vpop.f32.mrb[3].mxu0 }
  0xdd   :  { %v551_v23 = vpack.c.bf16 %v206_v21, %v204_v19  ;;  %v552_v24 = vpack.c.bf16 %v283_v22, %v281_v20 }
  0xdf   :  { %507 = vst [vmem:[%s669_s2 + $0x8] sm:$0xff] %v551_v23  ;;  %508 = vst [vmem:[%s669_s2 + $0x10] sm:$0xff] %v552_v24  ;;  %v210_v25 = vpop.f32.mrb[4].mxu1  ;;  %v287_v26 = vpop.f32.mrb[4].mxu0 }
  0xe0   :  { %v212_v27 = vpop.f32.mrb[5].mxu1  ;;  %v289_v28 = vpop.f32.mrb[5].mxu0 }
  0xe1   :  { %v556_v29 = vpack.c.bf16 %v212_v27, %v210_v25  ;;  %v557_v30 = vpack.c.bf16 %v289_v28, %v287_v26 }
  0xe3   :  { %512 = vst [vmem:[%s669_s2 + $0x30] sm:$0xff] %v556_v29  ;;  %513 = vst [vmem:[%s669_s2 + $0x38] sm:$0xff] %v557_v30  ;;  %v358_v31 = vpop.f32.mrb[6].mxu1  ;;  %v435_v32 = vpop.f32.mrb[6].mxu0 }
  0xe4   :  { %v360_v33 = vpop.f32.mrb[7].mxu1  ;;  %v437_v34 = vpop.f32.mrb[7].mxu0 }
  0xe5   :  { %v553_v35 = vpack.c.bf16 %v360_v33, %v358_v31  ;;  %v554_v36 = vpack.c.bf16 %v437_v34, %v435_v32 }
  0xe7   :  { %509 = vst [vmem:[%s669_s2 + $0x18] sm:$0xff] %v553_v35  ;;  %510 = vst [vmem:[%s669_s2 + $0x20] sm:$0xff] %v554_v36  ;;  %v364_v37 = vpop.f32.mrb[8].mxu1  ;;  %v441_v38 = vpop.f32.mrb[8].mxu0 }
  0xe8   :  { %v366_v39 = vpop.f32.mrb[9].mxu1  ;;  %v443_v40 = vpop.f32.mrb[9].mxu0 }
  0xe9   :  { %v558_v41 = vpack.c.bf16 %v366_v39, %v364_v37  ;;  %v559_v42 = vpack.c.bf16 %v443_v40, %v441_v38 }
  0xeb   :  { %514 = vst [vmem:[%s669_s2 + $0x40] sm:$0xff] %v558_v41  ;;  %515 = vst [vmem:[%s669_s2 + $0x48] sm:$0xff] %v559_v42 }

// kernel: pspnet_tl_forward.40
= control target key start
LH: loop header
LB: loop body
LE: loop exit
PB: predicated region body
PF: predicated region fallthrough
CT: control target
= control target key end

     0   :  { %vm44_vm0 = vcmask 1044480   ;;  %vm37_vm1 = vcmask 39936   ;;  %v1310_v3 = vmov 0.0   ;;  %s1576_s1 = inlined_call_operand.vmem [shape: f32[5,3072], index: 1, kind: input, shape index: {}]   ;;  %s1577_s0 = inlined_call_operand.vmem [shape: f32[16,5], index: 0, kind: input, shape index: {}]   ;;  %s1578_s2 = inlined_call_operand.vmem [shape: bf16[16,3072], index: 2, kind: output, shape index: {}]  }
   0x1   :  { %v14_v0 = vld [vmem:[%s1576_s1 + $0x8] sm:$0x1f]  ;;  %v16_v1 = vld [vmem:[%s1576_s1 + $0x18] sm:$0x1f]  ;;  %v13_v2 = vld [vmem:[%s1576_s1] sm:$0x1f]  ;;  %181 = vmatprep.mubr.f32.mxu0 %v1310_v3  ;;  %258 = vmatprep.mubr.f32.mxu1 %v1310_v3 }
   0x2   :  { %1213 = vmatprep.subr.msk.mxu0 %vm44_vm0, %v14_v0  ;;  %1217 = vmatprep.subr.msk.mxu1 %vm44_vm0, %v16_v1  ;;  %v15_v4 = vld [vmem:[%s1576_s1 + $0x10] sm:$0x1f]  ;;  %v1345_v5 = vld [vmem:[%s1577_s0] sm:$0xff]  ;;  %v18_v6 = vld [vmem:[%s1576_s1 + $0x28] sm:$0x1f] }
   0x3   :  { %1214 = vmatpush1.msk.msra.mxu0 %vm44_vm0, %v13_v2  ;;  %1218 = vmatpush1.msk.msra.mxu1 %vm44_vm0, %v15_v4  ;;  %v20_v7 = vld [vmem:[%s1576_s1 + $0x38] sm:$0x1f]  ;;  %v17_v8 = vld [vmem:[%s1576_s1 + $0x20] sm:$0x1f]  ;;  %v19_v9 = vld [vmem:[%s1576_s1 + $0x30] sm:$0x1f] }
   0x4   :  { %1215 = vmatmul.mubr.msk.f32.vlgmr.msra.gmra.mrb[0].mxu0 %vm37_vm1, %v1345_v5  ;;  %1219 = vmatmul.mubr.msk.f32.vlgmr.msra.gmra.mrb[0].mxu1 %vm37_vm1, %v1345_v5  ;;  %v1370_v10 = vld [vmem:[%s1577_s0 + $0x8] sm:$0xff]  ;;  %v24_v12 = vld [vmem:[%s1576_s1 + $0x58] sm:$0x1f]  ;;  %v21_v13 = vld [vmem:[%s1576_s1 + $0x40] sm:$0x1f] }
   0x5   :  { %1221 = vmatprep.subr.msk.mxu0 %vm44_vm0, %v18_v6  ;;  %1225 = vmatprep.subr.msk.mxu1 %vm44_vm0, %v20_v7  ;;  %v22_v11 = vld [vmem:[%s1576_s1 + $0x48] sm:$0x1f]  ;;  %v23_v14 = vld [vmem:[%s1576_s1 + $0x50] sm:$0x1f]  ;;  %v28_v16 = vld [vmem:[%s1576_s1 + $0x78] sm:$0x1f] }
   0x6   :  { %1222 = vmatpush1.msk.msra.mxu0 %vm44_vm0, %v17_v8  ;;  %1226 = vmatpush1.msk.msra.mxu1 %vm44_vm0, %v19_v9  ;;  %v26_v15 = vld [vmem:[%s1576_s1 + $0x68] sm:$0x1f]  ;;  %v25_v17 = vld [vmem:[%s1576_s1 + $0x60] sm:$0x1f]  ;;  %v27_v18 = vld [vmem:[%s1576_s1 + $0x70] sm:$0x1f] }
   0x7   :  { %187 = vmatprep.mubr.f32.mxu0 %v1310_v3  ;;  %264 = vmatprep.mubr.f32.mxu1 %v1310_v3  ;;  %v30_v19 = vld [vmem:[%s1576_s1 + $0x88] sm:$0x1f]  ;;  %v32_v20 = vld [vmem:[%s1576_s1 + $0x98] sm:$0x1f]  ;;  %v29_v21 = vld [vmem:[%s1576_s1 + $0x80] sm:$0x1f] }
   0x8   :  { %1216 = vmatmul.mubr.msk.f32.gmra.mrb[2].mxu0 %vm37_vm1, %v1370_v10  ;;  %1220 = vmatmul.mubr.msk.f32.gmra.mrb[2].mxu1 %vm37_vm1, %v1370_v10  ;;  %v31_v22 = vld [vmem:[%s1576_s1 + $0x90] sm:$0x1f]  ;;  %v34_v23 = vld [vmem:[%s1576_s1 + $0xa8] sm:$0x1f]  ;;  %v36_v24 = vld [vmem:[%s1576_s1 + $0xb8] sm:$0x1f] }
   0x9   :  { %335 = vmatprep.mubr.f32.mxu0 %v1310_v3  ;;  %412 = vmatprep.mubr.f32.mxu1 %v1310_v3  ;;  %v33_v25 = vld [vmem:[%s1576_s1 + $0xa0] sm:$0x1f]  ;;  %v35_v26 = vld [vmem:[%s1576_s1 + $0xb0] sm:$0x1f] }
   0xa   :  { %1229 = vmatprep.subr.msk.mxu0 %vm44_vm0, %v22_v11  ;;  %1233 = vmatprep.subr.msk.mxu1 %vm44_vm0, %v24_v12 }
   0xc   :  { %1223 = vmatmul.mubr.msk.f32.vlgmr.msra.gmra.mrb[4].mxu0 %vm37_vm1, %v1345_v5  ;;  %1227 = vmatmul.mubr.msk.f32.vlgmr.msra.gmra.mrb[4].mxu1 %vm37_vm1, %v1345_v5 }
   0xd   :  { %1230 = vmatpush1.msk.msra.mxu0 %vm44_vm0, %v21_v13  ;;  %1234 = vmatpush1.msk.msra.mxu1 %vm44_vm0, %v23_v14 }
   0xe   :  { %341 = vmatprep.mubr.f32.mxu0 %v1310_v3  ;;  %418 = vmatprep.mubr.f32.mxu1 %v1310_v3 }
   0xf   :  { %1237 = vmatprep.subr.msk.mxu0 %vm44_vm0, %v26_v15  ;;  %1241 = vmatprep.subr.msk.mxu1 %vm44_vm0, %v28_v16 }
  0x10   :  { %1224 = vmatmul.mubr.msk.f32.gmra.mrb[6].mxu0 %vm37_vm1, %v1370_v10  ;;  %1228 = vmatmul.mubr.msk.f32.gmra.mrb[6].mxu1 %vm37_vm1, %v1370_v10 }
  0x11   :  { %489 = vmatprep.mubr.f32.mxu0 %v1310_v3  ;;  %566 = vmatprep.mubr.f32.mxu1 %v1310_v3 }
  0x14   :  { %1231 = vmatmul.mubr.msk.f32.vlgmr.msra.gmra.mrb[8].mxu0 %vm37_vm1, %v1345_v5  ;;  %1235 = vmatmul.mubr.msk.f32.vlgmr.msra.gmra.mrb[8].mxu1 %vm37_vm1, %v1345_v5 }
  0x15   :  { %1238 = vmatpush1.msk.msra.mxu0 %vm44_vm0, %v25_v17  ;;  %1242 = vmatpush1.msk.msra.mxu1 %vm44_vm0, %v27_v18 }
  0x16   :  { %495 = vmatprep.mubr.f32.mxu0 %v1310_v3  ;;  %572 = vmatprep.mubr.f32.mxu1 %v1310_v3 }
  0x17   :  { %1245 = vmatprep.subr.msk.mxu0 %vm44_vm0, %v30_v19  ;;  %1249 = vmatprep.subr.msk.mxu1 %vm44_vm0, %v32_v20 }
  0x18   :  { %1232 = vmatmul.mubr.msk.f32.gmra.mrb[10].mxu0 %vm37_vm1, %v1370_v10  ;;  %1236 = vmatmul.mubr.msk.f32.gmra.mrb[10].mxu1 %vm37_vm1, %v1370_v10 }
  0x19   :  { %643 = vmatprep.mubr.f32.mxu0 %v1310_v3  ;;  %720 = vmatprep.mubr.f32.mxu1 %v1310_v3 }
  0x1c   :  { %1239 = vmatmul.mubr.msk.f32.vlgmr.msra.gmra.mrb[12].mxu0 %vm37_vm1, %v1345_v5  ;;  %1243 = vmatmul.mubr.msk.f32.vlgmr.msra.gmra.mrb[12].mxu1 %vm37_vm1, %v1345_v5 }
  0x1d   :  { %1246 = vmatpush1.msk.msra.mxu0 %vm44_vm0, %v29_v21  ;;  %1250 = vmatpush1.msk.msra.mxu1 %vm44_vm0, %v31_v22 }
  0x1e   :  { %649 = vmatprep.mubr.f32.mxu0 %v1310_v3  ;;  %726 = vmatprep.mubr.f32.mxu1 %v1310_v3 }
  0x1f   :  { %1253 = vmatprep.subr.msk.mxu0 %vm44_vm0, %v34_v23  ;;  %1257 = vmatprep.subr.msk.mxu1 %vm44_vm0, %v36_v24 }
  0x20   :  { %1240 = vmatmul.mubr.msk.f32.gmra.mrb[14].mxu0 %vm37_vm1, %v1370_v10  ;;  %1244 = vmatmul.mubr.msk.f32.gmra.mrb[14].mxu1 %vm37_vm1, %v1370_v10 }
  0x21   :  { %797 = vmatprep.mubr.f32.mxu0 %v1310_v3  ;;  %874 = vmatprep.mubr.f32.mxu1 %v1310_v3 }
  0x24   :  { %1247 = vmatmul.mubr.msk.f32.vlgmr.msra.gmra.mrb[16].mxu0 %vm37_vm1, %v1345_v5  ;;  %1251 = vmatmul.mubr.msk.f32.vlgmr.msra.gmra.mrb[16].mxu1 %vm37_vm1, %v1345_v5 }
  0x25   :  { %1254 = vmatpush1.msk.msra.mxu0 %vm44_vm0, %v33_v25  ;;  %1258 = vmatpush1.msk.msra.mxu1 %vm44_vm0, %v35_v26 }
  0x26   :  { %803 = vmatprep.mubr.f32.mxu0 %v1310_v3  ;;  %880 = vmatprep.mubr.f32.mxu1 %v1310_v3 }
  0x28   :  { %1248 = vmatmul.mubr.msk.f32.gmra.mrb[18].mxu0 %vm37_vm1, %v1370_v10  ;;  %1252 = vmatmul.mubr.msk.f32.gmra.mrb[18].mxu1 %vm37_vm1, %v1370_v10 }
  0x29   :  { %951 = vmatprep.mubr.f32.mxu0 %v1310_v3  ;;  %1028 = vmatprep.mubr.f32.mxu1 %v1310_v3 }
  0x2c   :  { %1255 = vmatmul.mubr.msk.f32.vlgmr.msra.gmra.mrb[20].mxu0 %vm37_vm1, %v1345_v5  ;;  %1259 = vmatmul.mubr.msk.f32.vlgmr.msra.gmra.mrb[20].mxu1 %vm37_vm1, %v1345_v5 }
  0x2d   :  { %957 = vmatprep.mubr.f32.mxu0 %v1310_v3  ;;  %1034 = vmatprep.mubr.f32.mxu1 %v1310_v3 }
  0x30   :  { %1256 = vmatmul.mubr.msk.f32.gmra.mrb[22].mxu0 %vm37_vm1, %v1370_v10  ;;  %1260 = vmatmul.mubr.msk.f32.gmra.mrb[22].mxu1 %vm37_vm1, %v1370_v10 }
  0xd7   :  { %v183_v27 = vpop.f32.mrb[0].mxu0  ;;  %v260_v28 = vpop.f32.mrb[0].mxu1 }
  0xd8   :  { %v185_v29 = vpop.f32.mrb[1].mxu0  ;;  %v262_v30 = vpop.f32.mrb[1].mxu1 }
  0xd9   :  { %v1285_v31 = vpack.c.bf16 %v185_v29, %v183_v27  ;;  %v1286_v32 = vpack.c.bf16 %v262_v30, %v260_v28 }
  0xdb   :  { %1185 = vst [vmem:[%s1578_s2] sm:$0xff] %v1285_v31  ;;  %1186 = vst [vmem:[%s1578_s2 + $0x8] sm:$0xff] %v1286_v32  ;;  %v189_v33 = vpop.f32.mrb[2].mxu0  ;;  %v266_v34 = vpop.f32.mrb[2].mxu1 }
  0xdc   :  { %v191_v35 = vpop.f32.mrb[3].mxu0  ;;  %v268_v36 = vpop.f32.mrb[3].mxu1 }
  0xdd   :  { %v1297_v37 = vpack.c.bf16 %v191_v35, %v189_v33  ;;  %v1298_v38 = vpack.c.bf16 %v268_v36, %v266_v34 }
  0xdf   :  { %1197 = vst [vmem:[%s1578_s2 + $0x60] sm:$0xff] %v1297_v37  ;;  %1198 = vst [vmem:[%s1578_s2 + $0x68] sm:$0xff] %v1298_v38  ;;  %v337_v39 = vpop.f32.mrb[4].mxu0  ;;  %v414_v40 = vpop.f32.mrb[4].mxu1 }
  0xe0   :  { %v339_v41 = vpop.f32.mrb[5].mxu0  ;;  %v416_v42 = vpop.f32.mrb[5].mxu1 }
  0xe1   :  { %v1287_v43 = vpack.c.bf16 %v339_v41, %v337_v39  ;;  %v1288_v44 = vpack.c.bf16 %v416_v42, %v414_v40 }
  0xe3   :  { %1187 = vst [vmem:[%s1578_s2 + $0x10] sm:$0xff] %v1287_v43  ;;  %1188 = vst [vmem:[%s1578_s2 + $0x18] sm:$0xff] %v1288_v44  ;;  %v343_v45 = vpop.f32.mrb[6].mxu0  ;;  %v420_v46 = vpop.f32.mrb[6].mxu1 }
  0xe4   :  { %v345_v47 = vpop.f32.mrb[7].mxu0  ;;  %v422_v48 = vpop.f32.mrb[7].mxu1 }
  0xe5   :  { %v1299_v49 = vpack.c.bf16 %v345_v47, %v343_v45  ;;  %v1300_v50 = vpack.c.bf16 %v422_v48, %v420_v46 }
  0xe7   :  { %1199 = vst [vmem:[%s1578_s2 + $0x70] sm:$0xff] %v1299_v49  ;;  %1200 = vst [vmem:[%s1578_s2 + $0x78] sm:$0xff] %v1300_v50  ;;  %v491_v51 = vpop.f32.mrb[8].mxu0  ;;  %v568_v52 = vpop.f32.mrb[8].mxu1 }
  0xe8   :  { %v493_v53 = vpop.f32.mrb[9].mxu0  ;;  %v570_v54 = vpop.f32.mrb[9].mxu1 }
  0xe9   :  { %v1289_v55 = vpack.c.bf16 %v493_v53, %v491_v51  ;;  %v1290_v56 = vpack.c.bf16 %v570_v54, %v568_v52 }
  0xeb   :  { %1189 = vst [vmem:[%s1578_s2 + $0x20] sm:$0xff] %v1289_v55  ;;  %1190 = vst [vmem:[%s1578_s2 + $0x28] sm:$0xff] %v1290_v56  ;;  %v497_v57 = vpop.f32.mrb[10].mxu0  ;;  %v574_v58 = vpop.f32.mrb[10].mxu1 }
  0xec   :  { %v499_v59 = vpop.f32.mrb[11].mxu0  ;;  %v576_v60 = vpop.f32.mrb[11].mxu1 }
  0xed   :  { %v1301_v61 = vpack.c.bf16 %v499_v59, %v497_v57  ;;  %v1302_v62 = vpack.c.bf16 %v576_v60, %v574_v58 }
  0xef   :  { %1201 = vst [vmem:[%s1578_s2 + $0x80] sm:$0xff] %v1301_v61  ;;  %1202 = vst [vmem:[%s1578_s2 + $0x88] sm:$0xff] %v1302_v62  ;;  %v645_v63 = vpop.f32.mrb[12].mxu0  ;;  %v722_v0 = vpop.f32.mrb[12].mxu1 }
  0xf0   :  { %v647_v1 = vpop.f32.mrb[13].mxu0  ;;  %v724_v2 = vpop.f32.mrb[13].mxu1 }
  0xf1   :  { %v1291_v3 = vpack.c.bf16 %v647_v1, %v645_v63  ;;  %v1292_v4 = vpack.c.bf16 %v724_v2, %v722_v0 }
  0xf3   :  { %1191 = vst [vmem:[%s1578_s2 + $0x30] sm:$0xff] %v1291_v3  ;;  %1192 = vst [vmem:[%s1578_s2 + $0x38] sm:$0xff] %v1292_v4  ;;  %v651_v5 = vpop.f32.mrb[14].mxu0  ;;  %v728_v6 = vpop.f32.mrb[14].mxu1 }
  0xf4   :  { %v653_v7 = vpop.f32.mrb[15].mxu0  ;;  %v730_v8 = vpop.f32.mrb[15].mxu1 }
  0xf5   :  { %v1303_v9 = vpack.c.bf16 %v653_v7, %v651_v5  ;;  %v1304_v10 = vpack.c.bf16 %v730_v8, %v728_v6 }
  0xf7   :  { %1203 = vst [vmem:[%s1578_s2 + $0x90] sm:$0xff] %v1303_v9  ;;  %1204 = vst [vmem:[%s1578_s2 + $0x98] sm:$0xff] %v1304_v10  ;;  %v799_v11 = vpop.f32.mrb[16].mxu0  ;;  %v876_v12 = vpop.f32.mrb[16].mxu1 }
  0xf8   :  { %v801_v13 = vpop.f32.mrb[17].mxu0  ;;  %v878_v14 = vpop.f32.mrb[17].mxu1 }
  0xf9   :  { %v1293_v15 = vpack.c.bf16 %v801_v13, %v799_v11  ;;  %v1294_v16 = vpack.c.bf16 %v878_v14, %v876_v12 }
  0xfb   :  { %1193 = vst [vmem:[%s1578_s2 + $0x40] sm:$0xff] %v1293_v15  ;;  %1194 = vst [vmem:[%s1578_s2 + $0x48] sm:$0xff] %v1294_v16  ;;  %v805_v17 = vpop.f32.mrb[18].mxu0  ;;  %v882_v18 = vpop.f32.mrb[18].mxu1 }
  0xfc   :  { %v807_v19 = vpop.f32.mrb[19].mxu0  ;;  %v884_v20 = vpop.f32.mrb[19].mxu1 }
  0xfd   :  { %v1305_v21 = vpack.c.bf16 %v807_v19, %v805_v17  ;;  %v1306_v22 = vpack.c.bf16 %v884_v20, %v882_v18 }
  0xff   :  { %1205 = vst [vmem:[%s1578_s2 + $0xa0] sm:$0xff] %v1305_v21  ;;  %1206 = vst [vmem:[%s1578_s2 + $0xa8] sm:$0xff] %v1306_v22  ;;  %v953_v23 = vpop.f32.mrb[20].mxu0  ;;  %v1030_v24 = vpop.f32.mrb[20].mxu1 }
 0x100   :  { %v955_v25 = vpop.f32.mrb[21].mxu0  ;;  %v1032_v26 = vpop.f32.mrb[21].mxu1 }
 0x101   :  { %v1295_v27 = vpack.c.bf16 %v955_v25, %v953_v23  ;;  %v1296_v28 = vpack.c.bf16 %v1032_v26, %v1030_v24 }
 0x103   :  { %1195 = vst [vmem:[%s1578_s2 + $0x50] sm:$0xff] %v1295_v27  ;;  %1196 = vst [vmem:[%s1578_s2 + $0x58] sm:$0xff] %v1296_v28  ;;  %v959_v29 = vpop.f32.mrb[22].mxu0  ;;  %v1036_v30 = vpop.f32.mrb[22].mxu1 }
 0x104   :  { %v961_v31 = vpop.f32.mrb[23].mxu0  ;;  %v1038_v32 = vpop.f32.mrb[23].mxu1 }
 0x105   :  { %v1307_v33 = vpack.c.bf16 %v961_v31, %v959_v29  ;;  %v1308_v34 = vpack.c.bf16 %v1038_v32, %v1036_v30 }
 0x107   :  { %1207 = vst [vmem:[%s1578_s2 + $0xb0] sm:$0xff] %v1307_v33  ;;  %1208 = vst [vmem:[%s1578_s2 + $0xb8] sm:$0xff] %v1308_v34 }

// kernel: pspnet_tl_forward.41
= control target key start
LH: loop header
LB: loop body
LE: loop exit
PB: predicated region body
PF: predicated region fallthrough
CT: control target
= control target key end

     0   :  { %s948_s15 = smov 0   ;;  %s1099_s0 = inlined_call_operand.vmem [shape: bf16[288,128], index: 0, kind: input, shape index: {}]   ;;  %s1100_s1 = inlined_call_operand.vmem [shape: bf16[128,128], index: 1, kind: input, shape index: {}]   ;;  %s1101_s2 = inlined_call_operand.vmem [shape: f32[1,128], index: 2, kind: input, shape index: {}]   ;;  %s1102_s3 = inlined_call_operand.vmem [shape: f32[288,128], index: 3, kind: input, shape index: {}]   ;;  %s1103_s4 = inlined_call_operand.vmem [shape: bf16[288,128], index: 4, kind: output, shape index: {}]  }
   0x1 LB: > { %s684_s16 = sadd.s32 4294967295, %s919_s15   ;;  %p688_p0 = scmp.ge.s32.totalorder %s919_s15, 1  ;;  %s919_s15 = sphi %s948_s15, %s14_s15  }
   0x2   : > { %p174_p1 = scmp.lt.s32.totalorder %s919_s15, 3 }
   0x4   : > { %p175_p2 = pnand %p688_p0, %p174_p1 }
   0x5   : > { %v896_v0 = vld [vmem:[%s1100_s1] sm:$0xff] (!%p175_p2)   ;;  %v921_v1 = vmov (!%p175_p2), 0.0   ;;  %v897_v2 = vld [vmem:[%s1100_s1 + $0x8] sm:$0xff] (!%p175_p2)   ;;  %s205_s21 = smul.u32 (!%p175_p2), 18, %s684_s16  ;;  %vm922_vm0 = vmmov (!%p175_p2), 0   ;;  %v898_v3 = vld [vmem:[%s1100_s1 + $0x10] sm:$0xff] (!%p175_p2)  }
   0x6   : > { %178 = sbr.rel (%p175_p2) target bundleno = 293 (0x125), region = 36  ;;  %818 = vmatprep.subr.bf16.mxu0 (!%p175_p2), %v921_v1  ;;  %870 = vmatprep.subr.bf16.mxu1 (!%p175_p2), %v921_v1  ;;  %v899_v4 = vld [vmem:[%s1100_s1 + $0x18] sm:$0xff] (!%p175_p2)   ;;  %v900_v5 = vld [vmem:[%s1100_s1 + $0x20] sm:$0xff] (!%p175_p2)   ;;  %v901_v6 = vld [vmem:[%s1100_s1 + $0x28] sm:$0xff] (!%p175_p2)  }
   0x7   : > { %819 = vmatpush3.bf16.msra.mxu0 (!%p175_p2), %v896_v0  ;;  %878 = vmatpush3.bf16.msra.mxu1 (!%p175_p2), %v896_v0  ;;  %p206_p3 = scmp.lt.s32.totalorder (!%p175_p2), %s205_s21, 35  ;;  %v902_v7 = vld [vmem:[%s1100_s1 + $0x30] sm:$0xff] (!%p175_p2)   ;;  %v903_v8 = vld [vmem:[%s1100_s1 + $0x38] sm:$0xff] (!%p175_p2)   ;;  %v1037_v18 = vld [vmem:[%s1101_s2] ss:$0 sm:$0xff] (!%p175_p2) }
   0x8   : > { %820 = vmatprep.subr.bf16.mxu0 (!%p175_p2), %v921_v1  ;;  %871 = vmatprep.subr.bf16.mxu1 (!%p175_p2), %v921_v1 }
   0x9   : > { %834 = vmatprep.mubr.msk.bf16.mxu0 (!%p175_p2), %vm922_vm0, %v921_v1  ;;  %854 = vmatprep.mubr.msk.bf16.mxu1 (!%p175_p2), %vm922_vm0, %v921_v1 }
   0xb   : > { %821 = vmatpush3.bf16.msra.mxu0 (!%p175_p2), %v897_v2  ;;  %879 = vmatpush3.bf16.msra.mxu1 (!%p175_p2), %v897_v2 }
   0xc   : > { %822 = vmatprep.subr.bf16.mxu0 (!%p175_p2), %v921_v1  ;;  %872 = vmatprep.subr.bf16.mxu1 (!%p175_p2), %v921_v1 }
   0xd   : > { %s1105_s21 = smov (!%p206_p3, %s205_s21), 35 }
   0xe   : > { %s689_s24 = sshll.u32 %s1105_s21, 2  ;;  %s690_s12 = sshll.u32 %s1105_s21, 3 }
   0xf   : > { %s983_s27 = scalar_lea.vmem %s1099_s0, %s689_s24  ;;  %823 = vmatpush3.bf16.msra.mxu0 %v898_v3  ;;  %880 = vmatpush3.bf16.msra.mxu1 %v898_v3  ;;  %s1042_s18 = scalar_lea.vmem %s1102_s3, %s690_s12 }
  0x10   : > { %824 = vmatprep.subr.bf16.mxu0 %v921_v1  ;;  %873 = vmatprep.subr.bf16.mxu1 %v921_v1  ;;  %v904_v9 = vld [vmem:[%s983_s27] sm:$0xff]   ;;  %v905_v10 = vld [vmem:[%s983_s27 + $0x28] sm:$0xff]   ;;  %v907_v12 = vld [vmem:[%s983_s27 + $0x30] sm:$0xff]   ;;  %s1057_s22 = scalar_lea.vmem %s1103_s4, %s689_s24 }
  0x11   : > { %v906_v11 = vld [vmem:[%s983_s27 + $0x8] sm:$0xff]   ;;  %v908_v13 = vld [vmem:[%s983_s27 + $0x10] sm:$0xff]   ;;  %v909_v14 = vld [vmem:[%s983_s27 + $0x38] sm:$0xff]  }
  0x12   : > { %v910_v15 = vld [vmem:[%s983_s27 + $0x18] sm:$0xff]   ;;  %v911_v16 = vld [vmem:[%s983_s27 + $0x40] sm:$0xff]   ;;  %v500_v27 = vld [vmem:[%s1042_s18 + $0x50] sm:$0xff] }
  0x13   : > { %825 = vmatpush3.bf16.msra.mxu0 %v899_v4  ;;  %881 = vmatpush3.bf16.msra.mxu1 %v899_v4  ;;  %v912_v17 = vld [vmem:[%s983_s27 + $0x20] sm:$0xff]   ;;  %v491_v35 = vld [vmem:[%s1042_s18 + $0x8] sm:$0xff]  ;;  %v501_v36 = vld [vmem:[%s1042_s18 + $0x58] sm:$0xff] }
  0x14   : > { %826 = vmatprep.subr.bf16.mxu0 %v921_v1  ;;  %874 = vmatprep.subr.bf16.mxu1 %v921_v1  ;;  %v490_v25 = vld [vmem:[%s1042_s18] sm:$0xff]  ;;  %v492_v51 = vld [vmem:[%s1042_s18 + $0x10] sm:$0xff]  ;;  %v493_v61 = vld [vmem:[%s1042_s18 + $0x18] sm:$0xff] }
  0x15   : > { %v502_v53 = vld [vmem:[%s1042_s18 + $0x60] sm:$0xff]  ;;  %v503_v62 = vld [vmem:[%s1042_s18 + $0x68] sm:$0xff] }
  0x17   : > { %827 = vmatpush3.bf16.msra.mxu0 %v900_v5  ;;  %882 = vmatpush3.bf16.msra.mxu1 %v900_v5 }
  0x18   : > { %828 = vmatprep.subr.bf16.mxu0 %v921_v1  ;;  %875 = vmatprep.subr.bf16.mxu1 %v921_v1 }
  0x1b   : > { %829 = vmatpush3.bf16.msra.mxu0 %v901_v6  ;;  %883 = vmatpush3.bf16.msra.mxu1 %v901_v6 }
  0x1c   : > { %830 = vmatprep.subr.bf16.mxu0 %v921_v1  ;;  %876 = vmatprep.subr.bf16.mxu1 %v921_v1 }
  0x1f   : > { %831 = vmatpush3.bf16.msra.mxu0 %v902_v7  ;;  %884 = vmatpush3.bf16.msra.mxu1 %v902_v7 }
  0x20   : > { %832 = vmatprep.subr.bf16.mxu0 %v921_v1  ;;  %877 = vmatprep.subr.bf16.mxu1 %v921_v1 }
  0x23   : > { %833 = vmatpush3.bf16.msra.mxu0 %v903_v8  ;;  %885 = vmatpush3.bf16.msra.mxu1 %v903_v8 }
  0x26   : > { %835 = vmatmul.mubr.bf16.vlgmr.msra.gmra.mrb[0].mxu0 %v904_v9  ;;  %855 = vmatmul.mubr.bf16.vlgmr.msra.gmra.mrb[0].mxu1 %v905_v10 }
  0x27   : > { %838 = vmatprep.mubr.msk.bf16.mxu0 %vm922_vm0, %v921_v1  ;;  %858 = vmatprep.mubr.msk.bf16.mxu1 %vm922_vm0, %v921_v1 }
  0x2e   : > { %839 = vmatmul.mubr.bf16.gmra.mrb[4].mxu0 %v906_v11  ;;  %859 = vmatmul.mubr.bf16.gmra.mrb[4].mxu1 %v907_v12 }
  0x2f   : > { %842 = vmatprep.mubr.msk.bf16.mxu0 %vm922_vm0, %v921_v1  ;;  %862 = vmatprep.mubr.msk.bf16.mxu1 %vm922_vm0, %v921_v1 }
  0x36   : > { %843 = vmatmul.mubr.bf16.gmra.mrb[8].mxu0 %v908_v13  ;;  %863 = vmatmul.mubr.bf16.gmra.mrb[8].mxu1 %v909_v14  ;;  %v494_v13 = vld [vmem:[%s1042_s18 + $0x20] sm:$0xff] }
  0x37   : > { %846 = vmatprep.mubr.msk.bf16.mxu0 %vm922_vm0, %v921_v1  ;;  %866 = vmatprep.mubr.msk.bf16.mxu1 %vm922_vm0, %v921_v1 }
  0x3e   : > { %847 = vmatmul.mubr.bf16.gmra.mrb[12].mxu0 %v910_v15  ;;  %867 = vmatmul.mubr.bf16.gmra.mrb[12].mxu1 %v911_v16  ;;  %v504_v15 = vld [vmem:[%s1042_s18 + $0x70] sm:$0xff] }
  0x3f   : > { %850 = vmatprep.mubr.msk.bf16.mxu0 %vm922_vm0, %v921_v1 }
  0x46   : > { %851 = vmatmul.mubr.bf16.gmra.mrb[16].mxu0 %v912_v17 }
  0xf9   : > { %v401_v19 = vpop.f32.mrb[0].mxu0  ;;  %v441_v20 = vpop.f32.mrb[0].mxu1 }
  0xfa   : > { %v402_v21 = vadd.f32 %v1037_v18, %v401_v19  ;;  %v836_v22 = vpop.f32.mrb[1].mxu0  ;;  %v442_v23 = vadd.f32 %v1037_v18, %v441_v20  ;;  %v856_v24 = vpop.f32.mrb[1].mxu1 }
  0xfb   : > { %v404_v26 = vpop.f32.mrb[2].mxu0  ;;  %v444_v28 = vpop.f32.mrb[2].mxu1  ;;  %v495_v24 = vld [vmem:[%s1042_s18 + $0x28] sm:$0xff] }
  0xfc   : > { %v472_v29 = vmax.f32 %v402_v21, 0.0  ;;  %v405_v30 = vadd.f32 %v1037_v18, %v404_v26  ;;  %v837_v31 = vpop.f32.mrb[3].mxu0  ;;  %v482_v32 = vmax.f32 %v442_v23, 0.0  ;;  %v445_v33 = vadd.f32 %v1037_v18, %v444_v28  ;;  %v857_v34 = vpop.f32.mrb[3].mxu1 }
  0xfe   : > { %v508_v37 = vmul.f32 %v490_v25, %v472_v29  ;;  %v473_v38 = vmax.f32 %v405_v30, 0.0  ;;  %v518_v39 = vmul.f32 %v500_v27, %v482_v32  ;;  %v483_v40 = vmax.f32 %v445_v33, 0.0  ;;  %v505_v25 = vld [vmem:[%s1042_s18 + $0x78] sm:$0xff] }
 0x100   : > { %v509_v41 = vmul.f32 %v491_v35, %v473_v38  ;;  %v519_v42 = vmul.f32 %v501_v36, %v483_v40  ;;  %v496_v40 = vld [vmem:[%s1042_s18 + $0x30] sm:$0xff] }
 0x101   : > { %v409_v43 = vpop.f32.mrb[4].mxu0  ;;  %v449_v44 = vpop.f32.mrb[4].mxu1 }
 0x102   : > { %v751_v45 = vpack.c.bf16 %v509_v41, %v508_v37  ;;  %v776_v46 = vpack.c.bf16 %v519_v42, %v518_v39  ;;  %v410_v47 = vadd.f32 %v1037_v18, %v409_v43  ;;  %v840_v48 = vpop.f32.mrb[5].mxu0  ;;  %v450_v49 = vadd.f32 %v1037_v18, %v449_v44  ;;  %v860_v50 = vpop.f32.mrb[5].mxu1  ;;  %v506_v42 = vld [vmem:[%s1042_s18 + $0x80] sm:$0xff] }
 0x103   : > { %v412_v52 = vpop.f32.mrb[6].mxu0  ;;  %v452_v54 = vpop.f32.mrb[6].mxu1  ;;  %v497_v50 = vld [vmem:[%s1042_s18 + $0x38] sm:$0xff] }
 0x104   : > { %752 = vst [vmem:[%s1057_s22] sm:$0xff] %v751_v45   ;;  %797 = vst [vmem:[%s1057_s22 + $0x28] sm:$0xff] %v776_v46   ;;  %v474_v55 = vmax.f32 %v410_v47, 0.0  ;;  %v413_v56 = vadd.f32 %v1037_v18, %v412_v52  ;;  %v841_v57 = vpop.f32.mrb[7].mxu0  ;;  %v484_v58 = vmax.f32 %v450_v49, 0.0  ;;  %v453_v59 = vadd.f32 %v1037_v18, %v452_v54  ;;  %v861_v60 = vpop.f32.mrb[7].mxu1 }
 0x106   : > { %v510_v63 = vmul.f32 %v492_v51, %v474_v55  ;;  %v475_v0 = vmax.f32 %v413_v56, 0.0  ;;  %v520_v1 = vmul.f32 %v502_v53, %v484_v58  ;;  %v485_v2 = vmax.f32 %v453_v59, 0.0  ;;  %v507_v51 = vld [vmem:[%s1042_s18 + $0x88] sm:$0xff] }
 0x108   : > { %v511_v3 = vmul.f32 %v493_v61, %v475_v0  ;;  %v521_v4 = vmul.f32 %v503_v62, %v485_v2 }
 0x109   : > { %v417_v5 = vpop.f32.mrb[8].mxu0  ;;  %v457_v6 = vpop.f32.mrb[8].mxu1 }
 0x10a   : > { %v756_v7 = vpack.c.bf16 %v511_v3, %v510_v63  ;;  %v781_v8 = vpack.c.bf16 %v521_v4, %v520_v1  ;;  %v418_v9 = vadd.f32 %v1037_v18, %v417_v5  ;;  %v844_v10 = vpop.f32.mrb[9].mxu0  ;;  %v458_v11 = vadd.f32 %v1037_v18, %v457_v6  ;;  %v864_v12 = vpop.f32.mrb[9].mxu1  ;;  %v498_v63 = vld [vmem:[%s1042_s18 + $0x40] sm:$0xff]  ;;  %v499_v4 = vld [vmem:[%s1042_s18 + $0x48] sm:$0xff] }
 0x10b   : > { %v420_v14 = vpop.f32.mrb[10].mxu0  ;;  %v460_v16 = vpop.f32.mrb[10].mxu1 }
 0x10c   : > { %793 = vst [vmem:[%s1057_s22 + $0x8] sm:$0xff] %v756_v7   ;;  %798 = vst [vmem:[%s1057_s22 + $0x30] sm:$0xff] %v781_v8   ;;  %v476_v17 = vmax.f32 %v418_v9, 0.0  ;;  %v421_v19 = vadd.f32 %v1037_v18, %v420_v14  ;;  %v845_v20 = vpop.f32.mrb[11].mxu0  ;;  %v486_v21 = vmax.f32 %v458_v11, 0.0  ;;  %v461_v22 = vadd.f32 %v1037_v18, %v460_v16  ;;  %v865_v23 = vpop.f32.mrb[11].mxu1 }
 0x10e   : > { %v512_v26 = vmul.f32 %v494_v13, %v476_v17  ;;  %v477_v27 = vmax.f32 %v421_v19, 0.0  ;;  %v522_v28 = vmul.f32 %v504_v15, %v486_v21  ;;  %v487_v29 = vmax.f32 %v461_v22, 0.0 }
 0x110   : > { %v513_v30 = vmul.f32 %v495_v24, %v477_v27  ;;  %v523_v31 = vmul.f32 %v505_v25, %v487_v29 }
 0x111   : > { %v425_v32 = vpop.f32.mrb[12].mxu0  ;;  %v465_v33 = vpop.f32.mrb[12].mxu1 }
 0x112   : > { %v761_v34 = vpack.c.bf16 %v513_v30, %v512_v26  ;;  %v786_v35 = vpack.c.bf16 %v523_v31, %v522_v28  ;;  %v426_v36 = vadd.f32 %v1037_v18, %v425_v32  ;;  %v848_v37 = vpop.f32.mrb[13].mxu0  ;;  %v466_v38 = vadd.f32 %v1037_v18, %v465_v33  ;;  %v868_v39 = vpop.f32.mrb[13].mxu1 }
 0x113   : > { %v428_v41 = vpop.f32.mrb[14].mxu0  ;;  %v468_v43 = vpop.f32.mrb[14].mxu1 }
 0x114   : > { %794 = vst [vmem:[%s1057_s22 + $0x10] sm:$0xff] %v761_v34   ;;  %799 = vst [vmem:[%s1057_s22 + $0x38] sm:$0xff] %v786_v35   ;;  %v478_v44 = vmax.f32 %v426_v36, 0.0  ;;  %v429_v45 = vadd.f32 %v1037_v18, %v428_v41  ;;  %v849_v46 = vpop.f32.mrb[15].mxu0  ;;  %v488_v47 = vmax.f32 %v466_v38, 0.0  ;;  %v469_v48 = vadd.f32 %v1037_v18, %v468_v43  ;;  %v869_v49 = vpop.f32.mrb[15].mxu1 }
 0x116   : > { %v514_v52 = vmul.f32 %v496_v40, %v478_v44  ;;  %v479_v53 = vmax.f32 %v429_v45, 0.0  ;;  %v524_v54 = vmul.f32 %v506_v42, %v488_v47  ;;  %v489_v55 = vmax.f32 %v469_v48, 0.0 }
 0x118   : > { %v515_v56 = vmul.f32 %v497_v50, %v479_v53  ;;  %v525_v57 = vmul.f32 %v507_v51, %v489_v55 }
 0x119   : > { %v433_v58 = vpop.f32.mrb[16].mxu0 }
 0x11a   : > { %v766_v59 = vpack.c.bf16 %v515_v56, %v514_v52  ;;  %v791_v60 = vpack.c.bf16 %v525_v57, %v524_v54  ;;  %v434_v61 = vadd.f32 %v1037_v18, %v433_v58  ;;  %v852_v62 = vpop.f32.mrb[17].mxu0 }
 0x11b   : > { %v436_v0 = vpop.f32.mrb[18].mxu0 }
 0x11c   : > { %795 = vst [vmem:[%s1057_s22 + $0x18] sm:$0xff] %v766_v59   ;;  %800 = vst [vmem:[%s1057_s22 + $0x40] sm:$0xff] %v791_v60   ;;  %v480_v1 = vmax.f32 %v434_v61, 0.0  ;;  %v437_v2 = vadd.f32 %v1037_v18, %v436_v0  ;;  %v853_v3 = vpop.f32.mrb[19].mxu0 }
 0x11e   : > { %v516_v5 = vmul.f32 %v498_v63, %v480_v1  ;;  %v481_v6 = vmax.f32 %v437_v2, 0.0 }
 0x120   : > { %v517_v7 = vmul.f32 %v499_v4, %v481_v6 }
 0x122   : > { %v771_v8 = vpack.c.bf16 %v517_v7, %v516_v5 }
 0x124   : > { %796 = vst [vmem:[%s1057_s22 + $0x20] sm:$0xff] %v771_v8  }
 0x125 PF: > { %s14_s15 = sadd.s32 1, %s919_s15  }
 0x126   : > { %p11_p4 = scmp.ge.s32.totalorder %s14_s15, 4  }
 0x128   :  { %13 = sbr.rel (!%p11_p4) target bundleno = 1 (0x1), region = 69 }

// kernel: pspnet_tl_forward.42
= control target key start
LH: loop header
LB: loop body
LE: loop exit
PB: predicated region body
PF: predicated region fallthrough
CT: control target
= control target key end

     0   :  { %vm143_vm0 = vcmask 1045504   ;;  %v1003_v3 = vmov 0   ;;  %vm139_vm1 = vcmask 97280   ;;  %s1228_s1 = inlined_call_operand.vmem [shape: bf16[12,3072], index: 1, kind: input, shape index: {}]   ;;  %s1229_s0 = inlined_call_operand.vmem [shape: bf16[16,12], index: 0, kind: input, shape index: {}]   ;;  %s1230_s2 = inlined_call_operand.vmem [shape: bf16[16,3072], index: 2, kind: output, shape index: {}]  }
   0x1   :  { %v14_v0 = vld [vmem:[%s1228_s1] sm:$0xff]  ;;  %v15_v2 = vld [vmem:[%s1228_s1 + $0x8] sm:$0xff]  ;;  %248 = vmatprep.mubr.bf16.mxu0 %v1003_v3  ;;  %291 = vmatprep.mubr.bf16.mxu1 %v1003_v3  ;;  %v16_v10 = vld [vmem:[%s1228_s1 + $0x10] sm:$0xff] }
   0x2   :  { %v26_v1 = vld [vmem:[%s1228_s1 + $0x60] sm:$0x33]  ;;  %v27_v5 = vld [vmem:[%s1228_s1 + $0x68] sm:$0x33]  ;;  %v28_v11 = vld [vmem:[%s1228_s1 + $0x70] sm:$0x33] }
   0x3   :  { %v906_v4 = vcombine.high %v14_v0, %v26_v1  ;;  %v905_v6 = vcombine.low %v14_v0, %v26_v1  ;;  %v908_v7 = vcombine.high %v15_v2, %v27_v5  ;;  %v907_v8 = vcombine.low %v15_v2, %v27_v5  ;;  %v1036_v9 = vld [vmem:[%s1229_s0] sm:$0xff]   ;;  %v17_v14 = vld [vmem:[%s1228_s1 + $0x18] sm:$0xff]  ;;  %v19_v22 = vld [vmem:[%s1228_s1 + $0x28] sm:$0xff] }
   0x4   :  { %v910_v13 = vcombine.high %v16_v10, %v28_v11  ;;  %v29_v15 = vld [vmem:[%s1228_s1 + $0x78] sm:$0x33]  ;;  %v909_v16 = vcombine.low %v16_v10, %v28_v11  ;;  %v18_v17 = vld [vmem:[%s1228_s1 + $0x20] sm:$0xff]  ;;  %v31_v23 = vld [vmem:[%s1228_s1 + $0x88] sm:$0x33] }
   0x5   :  { %929 = vmatprep.subr.msk.bf16.mxu0 %vm143_vm0, %v906_v4  ;;  %v145_v12 = vsel %vm143_vm0, %v905_v6, 0  ;;  %931 = vmatprep.subr.msk.bf16.mxu1 %vm143_vm0, %v908_v7  ;;  %v151_v18 = vsel %vm143_vm0, %v907_v8, 0  ;;  %v912_v19 = vcombine.high %v17_v14, %v29_v15  ;;  %v911_v20 = vcombine.low %v17_v14, %v29_v15  ;;  %v30_v21 = vld [vmem:[%s1228_s1 + $0x80] sm:$0x33]  ;;  %v20_v30 = vld [vmem:[%s1228_s1 + $0x30] sm:$0xff]  ;;  %v21_v32 = vld [vmem:[%s1228_s1 + $0x38] sm:$0xff] }
   0x6   :  { %217 = vmatpush1.bf16.msra.mxu0 %v145_v12  ;;  %260 = vmatpush1.bf16.msra.mxu1 %v151_v18  ;;  %v157_v24 = vsel %vm143_vm0, %v909_v16, 0  ;;  %v914_v26 = vcombine.high %v18_v17, %v30_v21  ;;  %v916_v27 = vcombine.high %v19_v22, %v31_v23  ;;  %v913_v28 = vcombine.low %v18_v17, %v30_v21  ;;  %v32_v31 = vld [vmem:[%s1228_s1 + $0x90] sm:$0x33]  ;;  %v33_v33 = vld [vmem:[%s1228_s1 + $0x98] sm:$0x33]  ;;  %v22_v40 = vld [vmem:[%s1228_s1 + $0x40] sm:$0xff] }
   0x7   :  { %933 = vmatprep.subr.msk.bf16.mxu0 %vm143_vm0, %v910_v13  ;;  %935 = vmatprep.subr.msk.bf16.mxu1 %vm143_vm0, %v912_v19  ;;  %v163_v25 = vsel %vm143_vm0, %v911_v20, 0  ;;  %v915_v29 = vcombine.low %v19_v22, %v31_v23  ;;  %v918_v36 = vcombine.high %v20_v30, %v32_v31  ;;  %v920_v37 = vcombine.high %v21_v32, %v33_v33  ;;  %v34_v41 = vld [vmem:[%s1228_s1 + $0xa0] sm:$0x33]  ;;  %v23_v42 = vld [vmem:[%s1228_s1 + $0x48] sm:$0xff]  ;;  %v24_v50 = vld [vmem:[%s1228_s1 + $0x50] sm:$0xff] }
   0x8   :  { %v169_v34 = vsel %vm143_vm0, %v913_v28, 0  ;;  %v917_v38 = vcombine.low %v20_v30, %v32_v31  ;;  %v919_v39 = vcombine.low %v21_v32, %v33_v33  ;;  %v35_v43 = vld [vmem:[%s1228_s1 + $0xa8] sm:$0x33]  ;;  %v922_v46 = vcombine.high %v22_v40, %v34_v41  ;;  %v36_v51 = vld [vmem:[%s1228_s1 + $0xb0] sm:$0x33]  ;;  %v25_v52 = vld [vmem:[%s1228_s1 + $0x58] sm:$0xff] }
   0x9   :  { %930 = vmatmul.mubr.msk.bf16.vlgmr.msra.gmra.mrb[0].mxu0 %vm139_vm1, %v1036_v9  ;;  %932 = vmatmul.mubr.msk.bf16.vlgmr.msra.gmra.mrb[0].mxu1 %vm139_vm1, %v1036_v9  ;;  %v175_v35 = vsel %vm143_vm0, %v915_v29, 0  ;;  %v924_v47 = vcombine.high %v23_v42, %v35_v43  ;;  %v921_v48 = vcombine.low %v22_v40, %v34_v41  ;;  %v923_v49 = vcombine.low %v23_v42, %v35_v43  ;;  %v37_v53 = vld [vmem:[%s1228_s1 + $0xb8] sm:$0x33] }
   0xa   :  { %303 = vmatpush1.bf16.msra.mxu0 %v157_v24  ;;  %346 = vmatpush1.bf16.msra.mxu1 %v163_v25  ;;  %v181_v44 = vsel %vm143_vm0, %v917_v38, 0  ;;  %v187_v45 = vsel %vm143_vm0, %v919_v39, 0  ;;  %v926_v56 = vcombine.high %v24_v50, %v36_v51  ;;  %v928_v57 = vcombine.high %v25_v52, %v37_v53 }
   0xb   :  { %334 = vmatprep.mubr.bf16.mxu0 %v1003_v3  ;;  %377 = vmatprep.mubr.bf16.mxu1 %v1003_v3  ;;  %v193_v54 = vsel %vm143_vm0, %v921_v48, 0  ;;  %v199_v55 = vsel %vm143_vm0, %v923_v49, 0  ;;  %v925_v58 = vcombine.low %v24_v50, %v36_v51  ;;  %v927_v59 = vcombine.low %v25_v52, %v37_v53 }
   0xc   :  { %937 = vmatprep.subr.msk.bf16.mxu0 %vm143_vm0, %v914_v26  ;;  %939 = vmatprep.subr.msk.bf16.mxu1 %vm143_vm0, %v916_v27 }
   0xd   :  { %v205_v60 = vsel %vm143_vm0, %v925_v58, 0  ;;  %v211_v61 = vsel %vm143_vm0, %v927_v59, 0 }
  0x11   :  { %934 = vmatmul.mubr.msk.bf16.vlgmr.msra.gmra.mrb[4].mxu0 %vm139_vm1, %v1036_v9  ;;  %936 = vmatmul.mubr.msk.bf16.vlgmr.msra.gmra.mrb[4].mxu1 %vm139_vm1, %v1036_v9 }
  0x12   :  { %389 = vmatpush1.bf16.msra.mxu0 %v169_v34  ;;  %432 = vmatpush1.bf16.msra.mxu1 %v175_v35 }
  0x13   :  { %420 = vmatprep.mubr.bf16.mxu0 %v1003_v3  ;;  %463 = vmatprep.mubr.bf16.mxu1 %v1003_v3 }
  0x14   :  { %941 = vmatprep.subr.msk.bf16.mxu0 %vm143_vm0, %v918_v36  ;;  %943 = vmatprep.subr.msk.bf16.mxu1 %vm143_vm0, %v920_v37 }
  0x19   :  { %938 = vmatmul.mubr.msk.bf16.vlgmr.msra.gmra.mrb[8].mxu0 %vm139_vm1, %v1036_v9  ;;  %940 = vmatmul.mubr.msk.bf16.vlgmr.msra.gmra.mrb[8].mxu1 %vm139_vm1, %v1036_v9 }
  0x1a   :  { %475 = vmatpush1.bf16.msra.mxu0 %v181_v44  ;;  %518 = vmatpush1.bf16.msra.mxu1 %v187_v45 }
  0x1b   :  { %506 = vmatprep.mubr.bf16.mxu0 %v1003_v3  ;;  %549 = vmatprep.mubr.bf16.mxu1 %v1003_v3 }
  0x1c   :  { %945 = vmatprep.subr.msk.bf16.mxu0 %vm143_vm0, %v922_v46  ;;  %947 = vmatprep.subr.msk.bf16.mxu1 %vm143_vm0, %v924_v47 }
  0x21   :  { %942 = vmatmul.mubr.msk.bf16.vlgmr.msra.gmra.mrb[12].mxu0 %vm139_vm1, %v1036_v9  ;;  %944 = vmatmul.mubr.msk.bf16.vlgmr.msra.gmra.mrb[12].mxu1 %vm139_vm1, %v1036_v9 }
  0x22   :  { %561 = vmatpush1.bf16.msra.mxu0 %v193_v54  ;;  %604 = vmatpush1.bf16.msra.mxu1 %v199_v55 }
  0x23   :  { %592 = vmatprep.mubr.bf16.mxu0 %v1003_v3  ;;  %635 = vmatprep.mubr.bf16.mxu1 %v1003_v3 }
  0x24   :  { %949 = vmatprep.subr.msk.bf16.mxu0 %vm143_vm0, %v926_v56  ;;  %951 = vmatprep.subr.msk.bf16.mxu1 %vm143_vm0, %v928_v57 }
  0x29   :  { %946 = vmatmul.mubr.msk.bf16.vlgmr.msra.gmra.mrb[16].mxu0 %vm139_vm1, %v1036_v9  ;;  %948 = vmatmul.mubr.msk.bf16.vlgmr.msra.gmra.mrb[16].mxu1 %vm139_vm1, %v1036_v9 }
  0x2a   :  { %647 = vmatpush1.bf16.msra.mxu0 %v205_v60  ;;  %690 = vmatpush1.bf16.msra.mxu1 %v211_v61 }
  0x2b   :  { %678 = vmatprep.mubr.bf16.mxu0 %v1003_v3  ;;  %721 = vmatprep.mubr.bf16.mxu1 %v1003_v3 }
  0x31   :  { %950 = vmatmul.mubr.msk.bf16.vlgmr.msra.gmra.mrb[20].mxu0 %vm139_vm1, %v1036_v9  ;;  %952 = vmatmul.mubr.msk.bf16.vlgmr.msra.gmra.mrb[20].mxu1 %vm139_vm1, %v1036_v9 }
  0xdc   :  { %v250_v62 = vpop.f32.mrb[0].mxu0  ;;  %v293_v63 = vpop.f32.mrb[0].mxu1 }
  0xdd   :  { %v252_v0 = vpop.f32.mrb[1].mxu0  ;;  %v295_v2 = vpop.f32.mrb[1].mxu1 }
  0xde   :  { %v977_v1 = vpack.c.bf16 %v252_v0, %v250_v62  ;;  %v254_v4 = vpop.f32.mrb[2].mxu0  ;;  %v978_v5 = vpack.c.bf16 %v295_v2, %v293_v63  ;;  %v297_v6 = vpop.f32.mrb[2].mxu1 }
  0xdf   :  { %v256_v7 = vpop.f32.mrb[3].mxu0  ;;  %v299_v8 = vpop.f32.mrb[3].mxu1 }
  0xe0   :  { %876 = vst [vmem:[%s1230_s2] sm:$0xff] %v977_v1  ;;  %v989_v3 = vpack.c.bf16 %v256_v7, %v254_v4  ;;  %877 = vst [vmem:[%s1230_s2 + $0x8] sm:$0xff] %v978_v5  ;;  %v990_v9 = vpack.c.bf16 %v299_v8, %v297_v6 }
  0xe2   :  { %888 = vst [vmem:[%s1230_s2 + $0x60] sm:$0xff] %v989_v3  ;;  %889 = vst [vmem:[%s1230_s2 + $0x68] sm:$0xff] %v990_v9 }
  0xe4   :  { %v336_v10 = vpop.f32.mrb[4].mxu0  ;;  %v379_v11 = vpop.f32.mrb[4].mxu1 }
  0xe5   :  { %v338_v12 = vpop.f32.mrb[5].mxu0  ;;  %v381_v14 = vpop.f32.mrb[5].mxu1 }
  0xe6   :  { %v979_v13 = vpack.c.bf16 %v338_v12, %v336_v10  ;;  %v340_v15 = vpop.f32.mrb[6].mxu0  ;;  %v980_v16 = vpack.c.bf16 %v381_v14, %v379_v11  ;;  %v383_v17 = vpop.f32.mrb[6].mxu1 }
  0xe7   :  { %v342_v18 = vpop.f32.mrb[7].mxu0  ;;  %v385_v20 = vpop.f32.mrb[7].mxu1 }
  0xe8   :  { %878 = vst [vmem:[%s1230_s2 + $0x10] sm:$0xff] %v979_v13  ;;  %v991_v19 = vpack.c.bf16 %v342_v18, %v340_v15  ;;  %879 = vst [vmem:[%s1230_s2 + $0x18] sm:$0xff] %v980_v16  ;;  %v992_v21 = vpack.c.bf16 %v385_v20, %v383_v17 }
  0xea   :  { %890 = vst [vmem:[%s1230_s2 + $0x70] sm:$0xff] %v991_v19  ;;  %891 = vst [vmem:[%s1230_s2 + $0x78] sm:$0xff] %v992_v21 }
  0xec   :  { %v422_v22 = vpop.f32.mrb[8].mxu0  ;;  %v465_v23 = vpop.f32.mrb[8].mxu1 }
  0xed   :  { %v424_v24 = vpop.f32.mrb[9].mxu0  ;;  %v467_v26 = vpop.f32.mrb[9].mxu1 }
  0xee   :  { %v981_v25 = vpack.c.bf16 %v424_v24, %v422_v22  ;;  %v426_v27 = vpop.f32.mrb[10].mxu0  ;;  %v982_v28 = vpack.c.bf16 %v467_v26, %v465_v23  ;;  %v469_v29 = vpop.f32.mrb[10].mxu1 }
  0xef   :  { %v428_v30 = vpop.f32.mrb[11].mxu0  ;;  %v471_v32 = vpop.f32.mrb[11].mxu1 }
  0xf0   :  { %880 = vst [vmem:[%s1230_s2 + $0x20] sm:$0xff] %v981_v25  ;;  %v993_v31 = vpack.c.bf16 %v428_v30, %v426_v27  ;;  %881 = vst [vmem:[%s1230_s2 + $0x28] sm:$0xff] %v982_v28  ;;  %v994_v33 = vpack.c.bf16 %v471_v32, %v469_v29 }
  0xf2   :  { %892 = vst [vmem:[%s1230_s2 + $0x80] sm:$0xff] %v993_v31  ;;  %893 = vst [vmem:[%s1230_s2 + $0x88] sm:$0xff] %v994_v33 }
  0xf4   :  { %v508_v34 = vpop.f32.mrb[12].mxu0  ;;  %v551_v35 = vpop.f32.mrb[12].mxu1 }
  0xf5   :  { %v510_v36 = vpop.f32.mrb[13].mxu0  ;;  %v553_v38 = vpop.f32.mrb[13].mxu1 }
  0xf6   :  { %v983_v37 = vpack.c.bf16 %v510_v36, %v508_v34  ;;  %v512_v39 = vpop.f32.mrb[14].mxu0  ;;  %v984_v40 = vpack.c.bf16 %v553_v38, %v551_v35  ;;  %v555_v41 = vpop.f32.mrb[14].mxu1 }
  0xf7   :  { %v514_v42 = vpop.f32.mrb[15].mxu0  ;;  %v557_v44 = vpop.f32.mrb[15].mxu1 }
  0xf8   :  { %882 = vst [vmem:[%s1230_s2 + $0x30] sm:$0xff] %v983_v37  ;;  %v995_v43 = vpack.c.bf16 %v514_v42, %v512_v39  ;;  %883 = vst [vmem:[%s1230_s2 + $0x38] sm:$0xff] %v984_v40  ;;  %v996_v45 = vpack.c.bf16 %v557_v44, %v555_v41 }
  0xfa   :  { %894 = vst [vmem:[%s1230_s2 + $0x90] sm:$0xff] %v995_v43  ;;  %895 = vst [vmem:[%s1230_s2 + $0x98] sm:$0xff] %v996_v45 }
  0xfc   :  { %v594_v46 = vpop.f32.mrb[16].mxu0  ;;  %v637_v47 = vpop.f32.mrb[16].mxu1 }
  0xfd   :  { %v596_v48 = vpop.f32.mrb[17].mxu0  ;;  %v639_v50 = vpop.f32.mrb[17].mxu1 }
  0xfe   :  { %v985_v49 = vpack.c.bf16 %v596_v48, %v594_v46  ;;  %v598_v51 = vpop.f32.mrb[18].mxu0  ;;  %v986_v52 = vpack.c.bf16 %v639_v50, %v637_v47  ;;  %v641_v53 = vpop.f32.mrb[18].mxu1 }
  0xff   :  { %v600_v54 = vpop.f32.mrb[19].mxu0  ;;  %v643_v56 = vpop.f32.mrb[19].mxu1 }
 0x100   :  { %884 = vst [vmem:[%s1230_s2 + $0x40] sm:$0xff] %v985_v49  ;;  %v997_v55 = vpack.c.bf16 %v600_v54, %v598_v51  ;;  %885 = vst [vmem:[%s1230_s2 + $0x48] sm:$0xff] %v986_v52  ;;  %v998_v57 = vpack.c.bf16 %v643_v56, %v641_v53 }
 0x102   :  { %896 = vst [vmem:[%s1230_s2 + $0xa0] sm:$0xff] %v997_v55  ;;  %897 = vst [vmem:[%s1230_s2 + $0xa8] sm:$0xff] %v998_v57 }
 0x104   :  { %v680_v58 = vpop.f32.mrb[20].mxu0  ;;  %v723_v59 = vpop.f32.mrb[20].mxu1 }
 0x105   :  { %v682_v60 = vpop.f32.mrb[21].mxu0  ;;  %v725_v62 = vpop.f32.mrb[21].mxu1 }
 0x106   :  { %v987_v61 = vpack.c.bf16 %v682_v60, %v680_v58  ;;  %v684_v63 = vpop.f32.mrb[22].mxu0  ;;  %v988_v0 = vpack.c.bf16 %v725_v62, %v723_v59  ;;  %v727_v1 = vpop.f32.mrb[22].mxu1 }
 0x107   :  { %v686_v2 = vpop.f32.mrb[23].mxu0  ;;  %v729_v5 = vpop.f32.mrb[23].mxu1 }
 0x108   :  { %886 = vst [vmem:[%s1230_s2 + $0x50] sm:$0xff] %v987_v61  ;;  %v999_v4 = vpack.c.bf16 %v686_v2, %v684_v63  ;;  %887 = vst [vmem:[%s1230_s2 + $0x58] sm:$0xff] %v988_v0  ;;  %v1000_v6 = vpack.c.bf16 %v729_v5, %v727_v1 }
 0x10a   :  { %898 = vst [vmem:[%s1230_s2 + $0xb0] sm:$0xff] %v999_v4  ;;  %899 = vst [vmem:[%s1230_s2 + $0xb8] sm:$0xff] %v1000_v6 }

// kernel: pspnet_tl_forward.43
= control target key start
LH: loop header
LB: loop body
LE: loop exit
PB: predicated region body
PF: predicated region fallthrough
CT: control target
= control target key end

     0   :  { %vm73_vm0 = vcmask 1045504   ;;  %v451_v1 = vmov 0   ;;  %vm69_vm1 = vcmask 97280   ;;  %s545_s1 = inlined_call_operand.vmem [shape: bf16[12,1280], index: 1, kind: input, shape index: {}]   ;;  %s546_s0 = inlined_call_operand.vmem [shape: bf16[16,12], index: 0, kind: input, shape index: {}]   ;;  %s547_s2 = inlined_call_operand.vmem [shape: bf16[16,1280], index: 2, kind: output, shape index: {}]  }
   0x1   :  { %v435_v0 = vld [vmem:[%s545_s1 + $0x4] ss:$40 sps:$4 sm:$0x3f]   ;;  %136 = vmatprep.mubr.bf16.mxu0 %v451_v1  ;;  %179 = vmatprep.mubr.bf16.mxu1 %v451_v1  ;;  %v437_v2 = vld [vmem:[%s545_s1] ss:$40 sps:$4 sm:$0x3f]  }
   0x2   :  { %v438_v3 = vld [vmem:[%s546_s0] sm:$0xff]   ;;  %404 = vmatprep.subr.msk.bf16.mxu0 %vm73_vm0, %v435_v0  ;;  %v75_v4 = vsel %vm73_vm0, %v437_v2, 0  ;;  %v439_v5 = vld [vmem:[%s545_s1 + $0x14] ss:$40 sps:$4 sm:$0x3f]  }
   0x3   :  { %105 = vmatpush1.bf16.msra.mxu0 %v75_v4  ;;  %v441_v6 = vld [vmem:[%s545_s1 + $0x10] ss:$40 sps:$4 sm:$0x3f]   ;;  %v442_v7 = vld [vmem:[%s545_s1 + $0xc] ss:$40 sps:$4 sm:$0x3f]  }
   0x4   :  { %408 = vmatprep.subr.msk.bf16.mxu0 %vm73_vm0, %v439_v5  ;;  %v444_v8 = vld [vmem:[%s545_s1 + $0x8] ss:$40 sps:$4 sm:$0x3f]   ;;  %v87_v9 = vsel %vm73_vm0, %v441_v6, 0  ;;  %406 = vmatprep.subr.msk.bf16.mxu1 %vm73_vm0, %v442_v7 }
   0x5   :  { %v445_v10 = vld [vmem:[%s545_s1 + $0x1c] ss:$40 sps:$4 sm:$0x3f]   ;;  %v81_v11 = vsel %vm73_vm0, %v444_v8, 0 }
   0x6   :  { %405 = vmatmul.mubr.msk.bf16.vlgmr.msra.gmra.mrb[0].mxu0 %vm69_vm1, %v438_v3  ;;  %v447_v12 = vld [vmem:[%s545_s1 + $0x24] ss:$40 sps:$4 sm:$0x3f]   ;;  %148 = vmatpush1.bf16.msra.mxu1 %v81_v11  ;;  %v449_v13 = vld [vmem:[%s545_s1 + $0x18] ss:$40 sps:$4 sm:$0x3f]  }
   0x7   :  { %191 = vmatpush1.bf16.msra.mxu0 %v87_v9  ;;  %222 = vmatprep.mubr.bf16.mxu0 %v451_v1  ;;  %v450_v14 = vld [vmem:[%s545_s1 + $0x20] ss:$40 sps:$4 sm:$0x3f]   ;;  %v93_v15 = vsel %vm73_vm0, %v449_v13, 0 }
   0x8   :  { %410 = vmatprep.subr.msk.bf16.mxu1 %vm73_vm0, %v445_v10  ;;  %412 = vmatprep.subr.msk.bf16.mxu0 %vm73_vm0, %v447_v12  ;;  %v99_v16 = vsel %vm73_vm0, %v450_v14, 0 }
   0x9   :  { %407 = vmatmul.mubr.msk.bf16.vlgmr.msra.gmra.mrb[0].mxu1 %vm69_vm1, %v438_v3 }
   0xa   :  { %234 = vmatpush1.bf16.msra.mxu1 %v93_v15  ;;  %265 = vmatprep.mubr.bf16.mxu1 %v451_v1 }
   0xe   :  { %409 = vmatmul.mubr.msk.bf16.vlgmr.msra.gmra.mrb[4].mxu0 %vm69_vm1, %v438_v3 }
   0xf   :  { %277 = vmatpush1.bf16.msra.mxu0 %v99_v16  ;;  %308 = vmatprep.mubr.bf16.mxu0 %v451_v1 }
  0x11   :  { %411 = vmatmul.mubr.msk.bf16.vlgmr.msra.gmra.mrb[4].mxu1 %vm69_vm1, %v438_v3 }
  0x16   :  { %413 = vmatmul.mubr.msk.bf16.vlgmr.msra.gmra.mrb[8].mxu0 %vm69_vm1, %v438_v3 }
  0xd9   :  { %v138_v17 = vpop.f32.mrb[0].mxu0 }
  0xda   :  { %v140_v18 = vpop.f32.mrb[1].mxu0 }
  0xdb   :  { %v424_v19 = vpack.c.bf16 %v140_v18, %v138_v17  ;;  %v142_v20 = vpop.f32.mrb[2].mxu0 }
  0xdc   :  { %v144_v21 = vpop.f32.mrb[3].mxu0  ;;  %v181_v23 = vpop.f32.mrb[0].mxu1 }
  0xdd   :  { %379 = vst [vmem:[%s547_s2] sm:$0xff] %v424_v19  ;;  %v429_v22 = vpack.c.bf16 %v144_v21, %v142_v20  ;;  %v183_v24 = vpop.f32.mrb[1].mxu1 }
  0xde   :  { %v425_v25 = vpack.c.bf16 %v183_v24, %v181_v23  ;;  %v185_v26 = vpop.f32.mrb[2].mxu1 }
  0xdf   :  { %384 = vst [vmem:[%s547_s2 + $0x28] sm:$0xff] %v429_v22  ;;  %v187_v27 = vpop.f32.mrb[3].mxu1 }
  0xe0   :  { %380 = vst [vmem:[%s547_s2 + $0x8] sm:$0xff] %v425_v25  ;;  %v430_v29 = vpack.c.bf16 %v187_v27, %v185_v26 }
  0xe1   :  { %v224_v28 = vpop.f32.mrb[4].mxu0 }
  0xe2   :  { %v226_v30 = vpop.f32.mrb[5].mxu0  ;;  %385 = vst [vmem:[%s547_s2 + $0x30] sm:$0xff] %v430_v29 }
  0xe3   :  { %v426_v31 = vpack.c.bf16 %v226_v30, %v224_v28  ;;  %v228_v32 = vpop.f32.mrb[6].mxu0 }
  0xe4   :  { %v230_v33 = vpop.f32.mrb[7].mxu0  ;;  %v267_v35 = vpop.f32.mrb[4].mxu1 }
  0xe5   :  { %381 = vst [vmem:[%s547_s2 + $0x10] sm:$0xff] %v426_v31  ;;  %v431_v34 = vpack.c.bf16 %v230_v33, %v228_v32  ;;  %v269_v36 = vpop.f32.mrb[5].mxu1 }
  0xe6   :  { %v427_v37 = vpack.c.bf16 %v269_v36, %v267_v35  ;;  %v271_v38 = vpop.f32.mrb[6].mxu1 }
  0xe7   :  { %386 = vst [vmem:[%s547_s2 + $0x38] sm:$0xff] %v431_v34  ;;  %v273_v39 = vpop.f32.mrb[7].mxu1 }
  0xe8   :  { %382 = vst [vmem:[%s547_s2 + $0x18] sm:$0xff] %v427_v37  ;;  %v432_v41 = vpack.c.bf16 %v273_v39, %v271_v38 }
  0xe9   :  { %v310_v40 = vpop.f32.mrb[8].mxu0 }
  0xea   :  { %v312_v42 = vpop.f32.mrb[9].mxu0  ;;  %387 = vst [vmem:[%s547_s2 + $0x40] sm:$0xff] %v432_v41 }
  0xeb   :  { %v428_v43 = vpack.c.bf16 %v312_v42, %v310_v40  ;;  %v314_v44 = vpop.f32.mrb[10].mxu0 }
  0xec   :  { %v316_v45 = vpop.f32.mrb[11].mxu0 }
  0xed   :  { %383 = vst [vmem:[%s547_s2 + $0x20] sm:$0xff] %v428_v43  ;;  %v433_v46 = vpack.c.bf16 %v316_v45, %v314_v44 }
  0xef   :  { %388 = vst [vmem:[%s547_s2 + $0x48] sm:$0xff] %v433_v46 }

// kernel: pspnet_tl_forward.45
= control target key start
LH: loop header
LB: loop body
LE: loop exit
PB: predicated region body
PF: predicated region fallthrough
CT: control target
= control target key end

     0   :  { %s967_s9 = smov 0   ;;  %s1072_s0 = inlined_call_operand.vmem [shape: f32[64,5], index: 0, kind: input, shape index: {}]   ;;  %s1073_s1 = inlined_call_operand.vmem [shape: f32[5,1280], index: 1, kind: input, shape index: {}]   ;;  %s1074_s2 = inlined_call_operand.vmem [shape: bf16[64,1280], index: 2, kind: output, shape index: {}]  }
   0x1 LB: > { %s850_s10 = sadd.s32 4294967295, %s949_s9   ;;  %p854_p0 = scmp.ge.s32.totalorder %s949_s9, 1  ;;  %s949_s9 = sphi %s967_s9, %s12_s9  }
   0x2   : > { %p113_p1 = scmp.lt.s32.totalorder %s949_s9, 3 }
   0x4   : > { %p114_p2 = pnand %p854_p0, %p113_p1 }
   0x5   : > { %v154_v0 = vld [vmem:[%s1073_s1 + $0x8] sm:$0x1f] (!%p114_p2)  ;;  %vm176_vm0 = vcmask (!%p114_p2), 1044480   ;;  %v153_v1 = vld [vmem:[%s1073_s1] sm:$0x1f] (!%p114_p2)  ;;  %s855_s19 = sshll.u32 (!%p114_p2), %s850_s10, 2 }
   0x6   : > { %117 = sbr.rel (%p114_p2) target bundleno = 269 (0x10d), region = 28  ;;  %859 = vmatprep.subr.msk.mxu0 (!%p114_p2), %vm176_vm0, %v154_v0  ;;  %931 = vmatprep.subr.msk.mxu1 (!%p114_p2), %vm176_vm0, %v154_v0  ;;  %v156_v2 = vld [vmem:[%s1073_s1 + $0x18] sm:$0x1f] (!%p114_p2)  ;;  %v158_v3 = vld [vmem:[%s1073_s1 + $0x28] sm:$0x1f] (!%p114_p2)  ;;  %p137_p3 = scmp.lt.s32.totalorder (!%p114_p2), %s855_s19, 7 }
   0x7   : > { %860 = vmatpush1.msk.msra.mxu0 (!%p114_p2), %vm176_vm0, %v153_v1  ;;  %932 = vmatpush1.msk.msra.mxu1 (!%p114_p2), %vm176_vm0, %v153_v1  ;;  %v951_v4 = vmov (!%p114_p2), 0.0   ;;  %vm163_vm1 = vcmask (!%p114_p2), 39936   ;;  %v155_v5 = vld [vmem:[%s1073_s1 + $0x10] sm:$0x1f] (!%p114_p2)  ;;  %v157_v6 = vld [vmem:[%s1073_s1 + $0x20] sm:$0x1f] (!%p114_p2) }
   0x8   : > { %271 = vmatprep.mubr.f32.mxu0 (!%p114_p2), %v951_v4  ;;  %283 = vmatprep.mubr.f32.mxu1 (!%p114_p2), %v951_v4  ;;  %v160_v9 = vld [vmem:[%s1073_s1 + $0x38] sm:$0x1f] (!%p114_p2)  ;;  %v162_v10 = vld [vmem:[%s1073_s1 + $0x48] sm:$0x1f] (!%p114_p2)  ;;  %v159_v13 = vld [vmem:[%s1073_s1 + $0x30] sm:$0x1f] (!%p114_p2) }
   0x9   : > { %865 = vmatprep.subr.msk.mxu1 (!%p114_p2), %vm176_vm0, %v156_v2  ;;  %871 = vmatprep.subr.msk.mxu0 (!%p114_p2), %vm176_vm0, %v158_v3  ;;  %v161_v14 = vld [vmem:[%s1073_s1 + $0x40] sm:$0x1f] (!%p114_p2) }
   0xd   : > { %s1076_s19 = smov (!%p137_p3, %s855_s19), 7 }
   0xe   : > { %s856_s20 = sshll.u32 %s1076_s19, 3  ;;  %s933_s8 = smul.u32 40, %s1076_s19 }
   0xf   : > { %s140_s23 = scalar_lea.vmem %s1072_s0, %s856_s20 }
  0x10   : > { %v149_v7 = vld [vmem:[%s140_s23] sm:$0xff]  ;;  %v151_v8 = vld [vmem:[%s140_s23 + $0x10] sm:$0xff]  ;;  %v150_v11 = vld [vmem:[%s140_s23 + $0x8] sm:$0xff]  ;;  %s1047_s12 = scalar_lea.vmem %s1074_s2, %s933_s8 }
  0x11   : > { %861 = vmatmul.mubr.msk.f32.vlgmr.msra.gmra.mrb[0].mxu0 %vm163_vm1, %v149_v7  ;;  %863 = vmatmul.mubr.msk.f32.vlgmr.msra.gmra.mrb[0].mxu1 %vm163_vm1, %v151_v8  ;;  %v152_v12 = vld [vmem:[%s140_s23 + $0x18] sm:$0xff] }
  0x12   : > { %866 = vmatpush1.msk.msra.mxu1 %vm176_vm0, %v155_v5  ;;  %872 = vmatpush1.msk.msra.mxu0 %vm176_vm0, %v157_v6 }
  0x13   : > { %277 = vmatprep.mubr.f32.mxu0 %v951_v4  ;;  %289 = vmatprep.mubr.f32.mxu1 %v951_v4 }
  0x14   : > { %877 = vmatprep.subr.msk.mxu1 %vm176_vm0, %v160_v9  ;;  %883 = vmatprep.subr.msk.mxu0 %vm176_vm0, %v162_v10 }
  0x15   : > { %862 = vmatmul.mubr.msk.f32.gmra.mrb[2].mxu0 %vm163_vm1, %v150_v11  ;;  %864 = vmatmul.mubr.msk.f32.gmra.mrb[2].mxu1 %vm163_vm1, %v152_v12 }
  0x16   : > { %360 = vmatprep.mubr.f32.mxu1 %v951_v4  ;;  %449 = vmatprep.mubr.f32.mxu0 %v951_v4 }
  0x19   : > { %867 = vmatmul.mubr.msk.f32.vlgmr.msra.gmra.mrb[4].mxu1 %vm163_vm1, %v149_v7  ;;  %873 = vmatmul.mubr.msk.f32.vlgmr.msra.gmra.mrb[4].mxu0 %vm163_vm1, %v149_v7 }
  0x1a   : > { %878 = vmatpush1.msk.msra.mxu1 %vm176_vm0, %v159_v13  ;;  %884 = vmatpush1.msk.msra.mxu0 %vm176_vm0, %v161_v14 }
  0x1b   : > { %366 = vmatprep.mubr.f32.mxu1 %v951_v4  ;;  %455 = vmatprep.mubr.f32.mxu0 %v951_v4 }
  0x1d   : > { %868 = vmatmul.mubr.msk.f32.gmra.mrb[6].mxu1 %vm163_vm1, %v150_v11  ;;  %874 = vmatmul.mubr.msk.f32.gmra.mrb[6].mxu0 %vm163_vm1, %v150_v11 }
  0x1e   : > { %372 = vmatprep.mubr.f32.mxu1 %v951_v4  ;;  %461 = vmatprep.mubr.f32.mxu0 %v951_v4 }
  0x21   : > { %869 = vmatmul.mubr.msk.f32.gmra.mrb[8].mxu1 %vm163_vm1, %v151_v8  ;;  %875 = vmatmul.mubr.msk.f32.gmra.mrb[8].mxu0 %vm163_vm1, %v151_v8 }
  0x22   : > { %378 = vmatprep.mubr.f32.mxu1 %v951_v4  ;;  %467 = vmatprep.mubr.f32.mxu0 %v951_v4 }
  0x25   : > { %870 = vmatmul.mubr.msk.f32.gmra.mrb[10].mxu1 %vm163_vm1, %v152_v12  ;;  %876 = vmatmul.mubr.msk.f32.gmra.mrb[10].mxu0 %vm163_vm1, %v152_v12 }
  0x26   : > { %538 = vmatprep.mubr.f32.mxu1 %v951_v4  ;;  %627 = vmatprep.mubr.f32.mxu0 %v951_v4 }
  0x29   : > { %879 = vmatmul.mubr.msk.f32.vlgmr.msra.gmra.mrb[12].mxu1 %vm163_vm1, %v149_v7  ;;  %885 = vmatmul.mubr.msk.f32.vlgmr.msra.gmra.mrb[12].mxu0 %vm163_vm1, %v149_v7 }
  0x2a   : > { %544 = vmatprep.mubr.f32.mxu1 %v951_v4  ;;  %633 = vmatprep.mubr.f32.mxu0 %v951_v4 }
  0x2d   : > { %880 = vmatmul.mubr.msk.f32.gmra.mrb[14].mxu1 %vm163_vm1, %v150_v11  ;;  %886 = vmatmul.mubr.msk.f32.gmra.mrb[14].mxu0 %vm163_vm1, %v150_v11 }
  0x2e   : > { %550 = vmatprep.mubr.f32.mxu1 %v951_v4  ;;  %639 = vmatprep.mubr.f32.mxu0 %v951_v4 }
  0x31   : > { %881 = vmatmul.mubr.msk.f32.gmra.mrb[16].mxu1 %vm163_vm1, %v151_v8  ;;  %887 = vmatmul.mubr.msk.f32.gmra.mrb[16].mxu0 %vm163_vm1, %v151_v8 }
  0x32   : > { %556 = vmatprep.mubr.f32.mxu1 %v951_v4  ;;  %645 = vmatprep.mubr.f32.mxu0 %v951_v4 }
  0x35   : > { %882 = vmatmul.mubr.msk.f32.gmra.mrb[18].mxu1 %vm163_vm1, %v152_v12  ;;  %888 = vmatmul.mubr.msk.f32.gmra.mrb[18].mxu0 %vm163_vm1, %v152_v12 }
  0xe4   : > { %v273_v15 = vpop.f32.mrb[0].mxu0  ;;  %v285_v16 = vpop.f32.mrb[0].mxu1 }
  0xe5   : > { %v275_v17 = vpop.f32.mrb[1].mxu0  ;;  %v287_v18 = vpop.f32.mrb[1].mxu1 }
  0xe6   : > { %v911_v19 = vpack.c.bf16 %v275_v17, %v273_v15  ;;  %v921_v20 = vpack.c.bf16 %v287_v18, %v285_v16 }
  0xe8   : > { %772 = vst [vmem:[%s1047_s12] sm:$0xff] %v911_v19  ;;  %v279_v21 = vpop.f32.mrb[2].mxu0  ;;  %v291_v22 = vpop.f32.mrb[2].mxu1  ;;  %782 = vst [vmem:[%s1047_s12 + $0x50] sm:$0xff] %v921_v20 }
  0xe9   : > { %v281_v23 = vpop.f32.mrb[3].mxu0  ;;  %v293_v24 = vpop.f32.mrb[3].mxu1 }
  0xea   : > { %v916_v25 = vpack.c.bf16 %v281_v23, %v279_v21  ;;  %v926_v26 = vpack.c.bf16 %v293_v24, %v291_v22 }
  0xec   : > { %777 = vst [vmem:[%s1047_s12 + $0x28] sm:$0xff] %v916_v25  ;;  %v362_v27 = vpop.f32.mrb[4].mxu1  ;;  %v451_v28 = vpop.f32.mrb[4].mxu0  ;;  %787 = vst [vmem:[%s1047_s12 + $0x78] sm:$0xff] %v926_v26 }
  0xed   : > { %v364_v29 = vpop.f32.mrb[5].mxu1  ;;  %v453_v30 = vpop.f32.mrb[5].mxu0 }
  0xee   : > { %v912_v31 = vpack.c.bf16 %v364_v29, %v362_v27  ;;  %v913_v32 = vpack.c.bf16 %v453_v30, %v451_v28 }
  0xf0   : > { %773 = vst [vmem:[%s1047_s12 + $0x8] sm:$0xff] %v912_v31  ;;  %774 = vst [vmem:[%s1047_s12 + $0x10] sm:$0xff] %v913_v32  ;;  %v368_v33 = vpop.f32.mrb[6].mxu1  ;;  %v457_v34 = vpop.f32.mrb[6].mxu0 }
  0xf1   : > { %v370_v35 = vpop.f32.mrb[7].mxu1  ;;  %v459_v36 = vpop.f32.mrb[7].mxu0 }
  0xf2   : > { %v917_v37 = vpack.c.bf16 %v370_v35, %v368_v33  ;;  %v918_v38 = vpack.c.bf16 %v459_v36, %v457_v34 }
  0xf4   : > { %778 = vst [vmem:[%s1047_s12 + $0x30] sm:$0xff] %v917_v37  ;;  %779 = vst [vmem:[%s1047_s12 + $0x38] sm:$0xff] %v918_v38  ;;  %v374_v39 = vpop.f32.mrb[8].mxu1  ;;  %v463_v40 = vpop.f32.mrb[8].mxu0 }
  0xf5   : > { %v376_v41 = vpop.f32.mrb[9].mxu1  ;;  %v465_v42 = vpop.f32.mrb[9].mxu0 }
  0xf6   : > { %v922_v43 = vpack.c.bf16 %v376_v41, %v374_v39  ;;  %v923_v44 = vpack.c.bf16 %v465_v42, %v463_v40 }
  0xf8   : > { %783 = vst [vmem:[%s1047_s12 + $0x58] sm:$0xff] %v922_v43  ;;  %784 = vst [vmem:[%s1047_s12 + $0x60] sm:$0xff] %v923_v44  ;;  %v380_v45 = vpop.f32.mrb[10].mxu1  ;;  %v469_v46 = vpop.f32.mrb[10].mxu0 }
  0xf9   : > { %v382_v47 = vpop.f32.mrb[11].mxu1  ;;  %v471_v48 = vpop.f32.mrb[11].mxu0 }
  0xfa   : > { %v927_v49 = vpack.c.bf16 %v382_v47, %v380_v45  ;;  %v928_v50 = vpack.c.bf16 %v471_v48, %v469_v46 }
  0xfc   : > { %788 = vst [vmem:[%s1047_s12 + $0x80] sm:$0xff] %v927_v49  ;;  %789 = vst [vmem:[%s1047_s12 + $0x88] sm:$0xff] %v928_v50  ;;  %v540_v51 = vpop.f32.mrb[12].mxu1  ;;  %v629_v52 = vpop.f32.mrb[12].mxu0 }
  0xfd   : > { %v542_v53 = vpop.f32.mrb[13].mxu1  ;;  %v631_v54 = vpop.f32.mrb[13].mxu0 }
  0xfe   : > { %v914_v55 = vpack.c.bf16 %v542_v53, %v540_v51  ;;  %v915_v56 = vpack.c.bf16 %v631_v54, %v629_v52 }
 0x100   : > { %775 = vst [vmem:[%s1047_s12 + $0x18] sm:$0xff] %v914_v55  ;;  %776 = vst [vmem:[%s1047_s12 + $0x20] sm:$0xff] %v915_v56  ;;  %v546_v57 = vpop.f32.mrb[14].mxu1  ;;  %v635_v58 = vpop.f32.mrb[14].mxu0 }
 0x101   : > { %v548_v59 = vpop.f32.mrb[15].mxu1  ;;  %v637_v60 = vpop.f32.mrb[15].mxu0 }
 0x102   : > { %v919_v61 = vpack.c.bf16 %v548_v59, %v546_v57  ;;  %v920_v62 = vpack.c.bf16 %v637_v60, %v635_v58 }
 0x104   : > { %780 = vst [vmem:[%s1047_s12 + $0x40] sm:$0xff] %v919_v61  ;;  %781 = vst [vmem:[%s1047_s12 + $0x48] sm:$0xff] %v920_v62  ;;  %v552_v63 = vpop.f32.mrb[16].mxu1  ;;  %v641_v0 = vpop.f32.mrb[16].mxu0 }
 0x105   : > { %v554_v1 = vpop.f32.mrb[17].mxu1  ;;  %v643_v2 = vpop.f32.mrb[17].mxu0 }
 0x106   : > { %v924_v3 = vpack.c.bf16 %v554_v1, %v552_v63  ;;  %v925_v4 = vpack.c.bf16 %v643_v2, %v641_v0 }
 0x108   : > { %785 = vst [vmem:[%s1047_s12 + $0x68] sm:$0xff] %v924_v3  ;;  %786 = vst [vmem:[%s1047_s12 + $0x70] sm:$0xff] %v925_v4  ;;  %v558_v5 = vpop.f32.mrb[18].mxu1  ;;  %v647_v6 = vpop.f32.mrb[18].mxu0 }
 0x109   : > { %v560_v7 = vpop.f32.mrb[19].mxu1  ;;  %v649_v8 = vpop.f32.mrb[19].mxu0 }
 0x10a   : > { %v929_v9 = vpack.c.bf16 %v560_v7, %v558_v5  ;;  %v930_v10 = vpack.c.bf16 %v649_v8, %v647_v6 }
 0x10c   : > { %790 = vst [vmem:[%s1047_s12 + $0x90] sm:$0xff] %v929_v9  ;;  %791 = vst [vmem:[%s1047_s12 + $0x98] sm:$0xff] %v930_v10 }
 0x10d PF: > { %s12_s9 = sadd.s32 1, %s949_s9  }
 0x10e   : > { %p9_p4 = scmp.ge.s32.totalorder %s12_s9, 4  }
 0x110   :  { %11 = sbr.rel (!%p9_p4) target bundleno = 1 (0x1), region = 58 }

// kernel: pspnet_tl_forward.44
= control target key start
LH: loop header
LB: loop body
LE: loop exit
PB: predicated region body
PF: predicated region fallthrough
CT: control target
= control target key end

     0   :  { %s2788_s12 = smov 0   ;;  %s3284_s0 = inlined_call_operand.vmem [shape: bf16[64,2304], index: 0, kind: input, shape index: {}]   ;;  %s3285_s1 = inlined_call_operand.vmem [shape: bf16[2304,128], index: 1, kind: input, shape index: {}]   ;;  %s3286_s2 = inlined_call_operand.vmem [shape: f32[1,128], index: 2, kind: input, shape index: {}]   ;;  %s3287_s3 = inlined_call_operand.vmem [shape: bf16[64,128], index: 3, kind: output, shape index: {}]  }
   0x1 LB: > { %s2074_s13 = sadd.s32 4294967295, %s2766_s12   ;;  %p2078_p0 = scmp.ge.s32.totalorder %s2766_s12, 1  ;;  %s2766_s12 = sphi %s2788_s12, %s13_s12  }
   0x2   : > { %p139_p1 = scmp.lt.s32.totalorder %s2766_s12, 3 }
   0x4   : > { %p140_p2 = pnand %p2078_p0, %p139_p1 }
   0x5   : > { %v2562_v0 = vld [vmem:[%s3285_s1 + $0x40] sm:$0xff] (!%p140_p2)   ;;  %v2566_v4 = vld [vmem:[%s3285_s1 + $0x48] sm:$0xff] (!%p140_p2)   ;;  %v2570_v8 = vld [vmem:[%s3285_s1 + $0x50] sm:$0xff] (!%p140_p2)   ;;  %s2079_s19 = sshll.u32 (!%p140_p2), %s2074_s13, 2 }
   0x6   : > { %143 = sbr.rel (%p140_p2) target bundleno = 392 (0x188), region = 32  ;;  %v2563_v1 = vld [vmem:[%s3285_s1 + $0xc0] sm:$0xff] (!%p140_p2)   ;;  %2285 = vmatprep.subr.bf16.mxu0 (!%p140_p2), %v2562_v0  ;;  %v2567_v5 = vld [vmem:[%s3285_s1 + $0xc8] sm:$0xff] (!%p140_p2)   ;;  %v2571_v9 = vld [vmem:[%s3285_s1 + $0xd0] sm:$0xff] (!%p140_p2)   ;;  %p165_p3 = scmp.lt.s32.totalorder (!%p140_p2), %s2079_s19, 7 }
   0x7   : > { %v2564_v2 = vld [vmem:[%s3285_s1] sm:$0xff] (!%p140_p2)   ;;  %2313 = vmatprep.subr.bf16.mxu1 (!%p140_p2), %v2563_v1  ;;  %v2568_v6 = vld [vmem:[%s3285_s1 + $0x8] sm:$0xff] (!%p140_p2)   ;;  %v2572_v10 = vld [vmem:[%s3285_s1 + $0x10] sm:$0xff] (!%p140_p2)  }
   0x8   : > { %v2565_v3 = vld [vmem:[%s3285_s1 + $0x80] sm:$0xff] (!%p140_p2)   ;;  %2286 = vmatpush3.bf16.msra.mxu0 (!%p140_p2), %v2564_v2  ;;  %v2569_v7 = vld [vmem:[%s3285_s1 + $0x88] sm:$0xff] (!%p140_p2)   ;;  %v2573_v11 = vld [vmem:[%s3285_s1 + $0x90] sm:$0xff] (!%p140_p2)  }
   0x9   : > { %2314 = vmatpush3.bf16.msra.mxu1 (!%p140_p2), %v2565_v3  ;;  %2287 = vmatprep.subr.bf16.mxu0 (!%p140_p2), %v2566_v4  ;;  %v2574_v12 = vld [vmem:[%s3285_s1 + $0x58] sm:$0xff] (!%p140_p2)   ;;  %v2578_v16 = vld [vmem:[%s3285_s1 + $0x60] sm:$0xff] (!%p140_p2)   ;;  %v2582_v20 = vld [vmem:[%s3285_s1 + $0x68] sm:$0xff] (!%p140_p2)  }
   0xa   : > { %2315 = vmatprep.subr.bf16.mxu1 (!%p140_p2), %v2567_v5  ;;  %v2575_v13 = vld [vmem:[%s3285_s1 + $0xd8] sm:$0xff] (!%p140_p2)   ;;  %v2579_v17 = vld [vmem:[%s3285_s1 + $0xe0] sm:$0xff] (!%p140_p2)   ;;  %v2583_v21 = vld [vmem:[%s3285_s1 + $0xe8] sm:$0xff] (!%p140_p2)  }
   0xb   : > { %v2576_v14 = vld [vmem:[%s3285_s1 + $0x18] sm:$0xff] (!%p140_p2)   ;;  %v2580_v18 = vld [vmem:[%s3285_s1 + $0x20] sm:$0xff] (!%p140_p2)   ;;  %v2584_v22 = vld [vmem:[%s3285_s1 + $0x28] sm:$0xff] (!%p140_p2)  }
   0xc   : > { %2288 = vmatpush3.bf16.msra.mxu0 (!%p140_p2), %v2568_v6  ;;  %v2577_v15 = vld [vmem:[%s3285_s1 + $0x98] sm:$0xff] (!%p140_p2)   ;;  %v2581_v19 = vld [vmem:[%s3285_s1 + $0xa0] sm:$0xff] (!%p140_p2)   ;;  %v2585_v23 = vld [vmem:[%s3285_s1 + $0xa8] sm:$0xff] (!%p140_p2)  }
   0xd   : > { %2316 = vmatpush3.bf16.msra.mxu1 %v2569_v7  ;;  %2289 = vmatprep.subr.bf16.mxu0 %v2570_v8  ;;  %s3289_s19 = smov (!%p165_p3, %s2079_s19), 7  ;;  %v2586_v24 = vld [vmem:[%s3285_s1 + $0x70] sm:$0xff]   ;;  %v2590_v28 = vld [vmem:[%s3285_s1 + $0x78] sm:$0xff]   ;;  %v2600_v36 = vld [vmem:[%s3285_s1 + $0x140] sm:$0xff]  }
   0xe   : > { %2317 = vmatprep.subr.bf16.mxu1 %v2571_v9  ;;  %v2587_v25 = vld [vmem:[%s3285_s1 + $0xf0] sm:$0xff]   ;;  %s2553_s16 = smul.u32 72, %s3289_s19  ;;  %v2591_v29 = vld [vmem:[%s3285_s1 + $0xf8] sm:$0xff]   ;;  %v2601_v37 = vld [vmem:[%s3285_s1 + $0x1c0] sm:$0xff]  }
   0xf   : > { %v2588_v26 = vld [vmem:[%s3285_s1 + $0x30] sm:$0xff]   ;;  %v2592_v30 = vld [vmem:[%s3285_s1 + $0x38] sm:$0xff]   ;;  %v2602_v38 = vld [vmem:[%s3285_s1 + $0x100] sm:$0xff]  }
  0x10   : > { %2290 = vmatpush3.bf16.msra.mxu0 %v2572_v10  ;;  %v2589_v27 = vld [vmem:[%s3285_s1 + $0xb0] sm:$0xff]   ;;  %s2894_s13 = scalar_lea.vmem %s3284_s0, %s2553_s16  ;;  %v2593_v31 = vld [vmem:[%s3285_s1 + $0xb8] sm:$0xff]   ;;  %v2603_v39 = vld [vmem:[%s3285_s1 + $0x180] sm:$0xff]  }
  0x11   : > { %2318 = vmatpush3.bf16.msra.mxu1 %v2573_v11  ;;  %2291 = vmatprep.subr.bf16.mxu0 %v2574_v12  ;;  %v2594_v32 = vld [vmem:[%s2894_s13] ss:$72 sps:$4 sm:$0xff]   ;;  %v2596_v33 = vld [vmem:[%s2894_s13 + $0x4] ss:$72 sps:$4 sm:$0xff]   ;;  %v2608_v44 = vld [vmem:[%s3285_s1 + $0x150] sm:$0xff]  }
  0x12   : > { %2319 = vmatprep.subr.bf16.mxu1 %v2575_v13  ;;  %v2597_v34 = vld [vmem:[%s2894_s13 + $0x8] ss:$72 sps:$4 sm:$0xff]   ;;  %v2599_v35 = vld [vmem:[%s2894_s13 + $0xc] ss:$72 sps:$4 sm:$0xff]   ;;  %1585 = vmatprep.mubr.bf16.mxu0 %v2596_v33  ;;  %v2612_v48 = vld [vmem:[%s3285_s1 + $0x158] sm:$0xff]  }
  0x13   : > { %1634 = vmatprep.mubr.bf16.mxu1 %v2599_v35  ;;  %v2604_v40 = vld [vmem:[%s3285_s1 + $0x148] sm:$0xff]   ;;  %v2609_v45 = vld [vmem:[%s3285_s1 + $0x1d0] sm:$0xff]   ;;  %v2613_v49 = vld [vmem:[%s3285_s1 + $0x1d8] sm:$0xff]  }
  0x14   : > { %2292 = vmatpush3.bf16.msra.mxu0 %v2576_v14  ;;  %v2605_v41 = vld [vmem:[%s3285_s1 + $0x1c8] sm:$0xff]   ;;  %v2610_v46 = vld [vmem:[%s3285_s1 + $0x110] sm:$0xff]   ;;  %v2614_v50 = vld [vmem:[%s3285_s1 + $0x118] sm:$0xff]  }
  0x15   : > { %2320 = vmatpush3.bf16.msra.mxu1 %v2577_v15  ;;  %2293 = vmatprep.subr.bf16.mxu0 %v2578_v16  ;;  %v2606_v42 = vld [vmem:[%s3285_s1 + $0x108] sm:$0xff]   ;;  %v2611_v47 = vld [vmem:[%s3285_s1 + $0x190] sm:$0xff]   ;;  %v2615_v51 = vld [vmem:[%s3285_s1 + $0x198] sm:$0xff]  }
  0x16   : > { %2321 = vmatprep.subr.bf16.mxu1 %v2579_v17  ;;  %v2607_v43 = vld [vmem:[%s3285_s1 + $0x188] sm:$0xff]   ;;  %v2616_v52 = vld [vmem:[%s3285_s1 + $0x160] sm:$0xff]   ;;  %v2620_v56 = vld [vmem:[%s2894_s13 + $0x94] ss:$72 sps:$4 sm:$0xff]  }
  0x17   : > { %v2617_v53 = vld [vmem:[%s3285_s1 + $0x1e0] sm:$0xff]   ;;  %v2622_v57 = vld [vmem:[%s3285_s1 + $0x168] sm:$0xff]   ;;  %v2624_v59 = vld [vmem:[%s2894_s13 + $0x90] ss:$72 sps:$4 sm:$0xff]  }
  0x18   : > { %2294 = vmatpush3.bf16.msra.mxu0 %v2580_v18  ;;  %v2618_v54 = vld [vmem:[%s3285_s1 + $0x120] sm:$0xff]   ;;  %v2623_v58 = vld [vmem:[%s3285_s1 + $0x1e8] sm:$0xff]   ;;  %v2630_v0 = vld [vmem:[%s3285_s1 + $0x170] sm:$0xff]  }
  0x19   : > { %2322 = vmatpush3.bf16.msra.mxu1 %v2581_v19  ;;  %2295 = vmatprep.subr.bf16.mxu0 %v2582_v20  ;;  %v2619_v55 = vld [vmem:[%s3285_s1 + $0x1a0] sm:$0xff]   ;;  %v2625_v60 = vld [vmem:[%s3285_s1 + $0x128] sm:$0xff]   ;;  %v2631_v1 = vld [vmem:[%s3285_s1 + $0x1f0] sm:$0xff]  }
  0x1a   : > { %2323 = vmatprep.subr.bf16.mxu1 %v2583_v21  ;;  %v2626_v61 = vld [vmem:[%s3285_s1 + $0x1a8] sm:$0xff]   ;;  %v2627_v62 = vld [vmem:[%s2894_s13 + $0x9c] ss:$72 sps:$4 sm:$0xff]   ;;  %v2629_v63 = vld [vmem:[%s2894_s13 + $0x98] ss:$72 sps:$4 sm:$0xff]  }
  0x1b   : > { %v2632_v2 = vld [vmem:[%s3285_s1 + $0x130] sm:$0xff]   ;;  %v2634_v4 = vld [vmem:[%s3285_s1 + $0x178] sm:$0xff]   ;;  %v2644_v12 = vld [vmem:[%s3285_s1 + $0x240] sm:$0xff]  }
  0x1c   : > { %2296 = vmatpush3.bf16.msra.mxu0 %v2584_v22  ;;  %v2633_v3 = vld [vmem:[%s3285_s1 + $0x1b0] sm:$0xff]   ;;  %v2635_v5 = vld [vmem:[%s3285_s1 + $0x1f8] sm:$0xff]   ;;  %v2645_v13 = vld [vmem:[%s3285_s1 + $0x2c0] sm:$0xff]  }
  0x1d   : > { %2324 = vmatpush3.bf16.msra.mxu1 %v2585_v23  ;;  %2297 = vmatprep.subr.bf16.mxu0 %v2586_v24  ;;  %v2636_v6 = vld [vmem:[%s3285_s1 + $0x138] sm:$0xff]   ;;  %v2646_v14 = vld [vmem:[%s3285_s1 + $0x200] sm:$0xff]   ;;  %v2648_v16 = vld [vmem:[%s3285_s1 + $0x248] sm:$0xff]  }
  0x1e   : > { %2325 = vmatprep.subr.bf16.mxu1 %v2587_v25  ;;  %v2637_v7 = vld [vmem:[%s3285_s1 + $0x1b8] sm:$0xff]   ;;  %v2647_v15 = vld [vmem:[%s3285_s1 + $0x280] sm:$0xff]   ;;  %v2649_v17 = vld [vmem:[%s3285_s1 + $0x2c8] sm:$0xff]  }
  0x1f   : > { %v2638_v8 = vld [vmem:[%s2894_s13 + $0x10] ss:$72 sps:$4 sm:$0xff]   ;;  %v2640_v9 = vld [vmem:[%s2894_s13 + $0x14] ss:$72 sps:$4 sm:$0xff]   ;;  %v2650_v18 = vld [vmem:[%s3285_s1 + $0x208] sm:$0xff]  }
  0x20   : > { %2298 = vmatpush3.bf16.msra.mxu0 %v2588_v26  ;;  %v2641_v10 = vld [vmem:[%s2894_s13 + $0x18] ss:$72 sps:$4 sm:$0xff]   ;;  %v2643_v11 = vld [vmem:[%s2894_s13 + $0x1c] ss:$72 sps:$4 sm:$0xff]   ;;  %v2651_v19 = vld [vmem:[%s3285_s1 + $0x288] sm:$0xff]  }
  0x21   : > { %2326 = vmatpush3.bf16.msra.mxu1 %v2589_v27  ;;  %2299 = vmatprep.subr.bf16.mxu0 %v2590_v28  ;;  %v2652_v20 = vld [vmem:[%s2894_s13 + $0xa4] ss:$72 sps:$4 sm:$0xff]   ;;  %v2654_v21 = vld [vmem:[%s2894_s13 + $0xa0] ss:$72 sps:$4 sm:$0xff]   ;;  %v2655_v22 = vld [vmem:[%s3285_s1 + $0x250] sm:$0xff]  }
  0x22   : > { %2327 = vmatprep.subr.bf16.mxu1 %v2591_v29  ;;  %v2656_v23 = vld [vmem:[%s3285_s1 + $0x2d0] sm:$0xff]   ;;  %v2662_v28 = vld [vmem:[%s3285_s1 + $0x258] sm:$0xff]   ;;  %v2667_v33 = vld [vmem:[%s3285_s1 + $0x2e0] sm:$0xff]  }
  0x23   : > { %v2657_v24 = vld [vmem:[%s2894_s13 + $0xac] ss:$72 sps:$4 sm:$0xff]   ;;  %v2661_v27 = vld [vmem:[%s2894_s13 + $0xa8] ss:$72 sps:$4 sm:$0xff]   ;;  %v2663_v29 = vld [vmem:[%s3285_s1 + $0x2d8] sm:$0xff]  }
  0x24   : > { %2300 = vmatpush3.bf16.msra.mxu0 %v2592_v30  ;;  %v2659_v25 = vld [vmem:[%s3285_s1 + $0x210] sm:$0xff]   ;;  %v2664_v30 = vld [vmem:[%s3285_s1 + $0x218] sm:$0xff]   ;;  %v2669_v35 = vld [vmem:[%s3285_s1 + $0x2a0] sm:$0xff]  }
  0x25   : > { %2328 = vmatpush3.bf16.msra.mxu1 %v2593_v31  ;;  %2341 = vmatprep.subr.bf16.mxu0 %v2600_v36  ;;  %v2660_v26 = vld [vmem:[%s3285_s1 + $0x290] sm:$0xff]   ;;  %v2665_v31 = vld [vmem:[%s3285_s1 + $0x298] sm:$0xff]   ;;  %v2670_v36 = vld [vmem:[%s3285_s1 + $0x268] sm:$0xff]  }
  0x26   : > { %2369 = vmatprep.subr.bf16.mxu1 %v2601_v37  ;;  %v2671_v37 = vld [vmem:[%s3285_s1 + $0x2e8] sm:$0xff]  }
  0x27   : > { %1586 = vmatmul.mubr.bf16.vlgmr.msra.gmra.mrb[0].mxu0 %v2594_v32  ;;  %v2666_v32 = vld [vmem:[%s3285_s1 + $0x260] sm:$0xff]  }
  0x28   : > { %1635 = vmatmul.mubr.bf16.vlgmr.msra.gmra.mrb[0].mxu1 %v2597_v34  ;;  %2342 = vmatpush3.bf16.msra.mxu0 %v2602_v38  ;;  %v2668_v34 = vld [vmem:[%s3285_s1 + $0x220] sm:$0xff]   ;;  %v2672_v38 = vld [vmem:[%s3285_s1 + $0x228] sm:$0xff]  }
  0x29   : > { %2370 = vmatpush3.bf16.msra.mxu1 %v2603_v39  ;;  %2343 = vmatprep.subr.bf16.mxu0 %v2604_v40  ;;  %v2673_v39 = vld [vmem:[%s3285_s1 + $0x2a8] sm:$0xff]   ;;  %v2674_v40 = vld [vmem:[%s3285_s1 + $0x270] sm:$0xff]  }
  0x2a   : > { %2371 = vmatprep.subr.bf16.mxu1 %v2605_v41  ;;  %1593 = vmatprep.mubr.bf16.mxu0 %v2620_v56  ;;  %v2675_v41 = vld [vmem:[%s3285_s1 + $0x2f0] sm:$0xff]   ;;  %v2692_v56 = vld [vmem:[%s3285_s1 + $0x348] sm:$0xff]  }
  0x2b   : > { %1642 = vmatprep.mubr.bf16.mxu1 %v2627_v62  ;;  %v2699_v62 = vld [vmem:[%s3285_s1 + $0x350] sm:$0xff]  }
  0x2c   : > { %2344 = vmatpush3.bf16.msra.mxu0 %v2606_v42  ;;  %v2676_v42 = vld [vmem:[%s3285_s1 + $0x230] sm:$0xff]  }
  0x2d   : > { %2372 = vmatpush3.bf16.msra.mxu1 %v2607_v43  ;;  %2345 = vmatprep.subr.bf16.mxu0 %v2608_v44  ;;  %v2677_v43 = vld [vmem:[%s3285_s1 + $0x2b0] sm:$0xff]   ;;  %v2678_v44 = vld [vmem:[%s3285_s1 + $0x278] sm:$0xff]  }
  0x2e   : > { %2373 = vmatprep.subr.bf16.mxu1 %v2609_v45  ;;  %v2679_v45 = vld [vmem:[%s3285_s1 + $0x2f8] sm:$0xff]  }
  0x2f   : > { %1594 = vmatmul.mubr.bf16.gmra.mrb[4].mxu0 %v2624_v59  ;;  %v2695_v59 = vld [vmem:[%s3285_s1 + $0x388] sm:$0xff]  }
  0x30   : > { %2346 = vmatpush3.bf16.msra.mxu0 %v2610_v46  ;;  %1643 = vmatmul.mubr.bf16.gmra.mrb[4].mxu1 %v2629_v63  ;;  %v2680_v46 = vld [vmem:[%s3285_s1 + $0x238] sm:$0xff]   ;;  %v2700_v63 = vld [vmem:[%s3285_s1 + $0x3d0] sm:$0xff]  }
  0x31   : > { %2374 = vmatpush3.bf16.msra.mxu1 %v2611_v47  ;;  %2347 = vmatprep.subr.bf16.mxu0 %v2612_v48  ;;  %v2681_v47 = vld [vmem:[%s3285_s1 + $0x2b8] sm:$0xff]   ;;  %v2682_v48 = vld [vmem:[%s2894_s13 + $0x20] ss:$72 sps:$4 sm:$0xff]  }
  0x32   : > { %2375 = vmatprep.subr.bf16.mxu1 %v2613_v49  ;;  %1683 = vmatprep.mubr.bf16.mxu0 %v2640_v9  ;;  %v2684_v49 = vld [vmem:[%s2894_s13 + $0x24] ss:$72 sps:$4 sm:$0xff]  }
  0x33   : > { %1732 = vmatprep.mubr.bf16.mxu1 %v2643_v11  ;;  %v2711_v9 = vld [vmem:[%s3285_s1 + $0x3e0] sm:$0xff]  }
  0x34   : > { %2348 = vmatpush3.bf16.msra.mxu0 %v2614_v50  ;;  %v2685_v50 = vld [vmem:[%s2894_s13 + $0x28] ss:$72 sps:$4 sm:$0xff]   ;;  %v2713_v11 = vld [vmem:[%s3285_s1 + $0x3a0] sm:$0xff]  }
  0x35   : > { %2376 = vmatpush3.bf16.msra.mxu1 %v2615_v51  ;;  %2349 = vmatprep.subr.bf16.mxu0 %v2616_v52  ;;  %v2687_v51 = vld [vmem:[%s2894_s13 + $0x2c] ss:$72 sps:$4 sm:$0xff]   ;;  %v2688_v52 = vld [vmem:[%s3285_s1 + $0x340] sm:$0xff]  }
  0x36   : > { %2377 = vmatprep.subr.bf16.mxu1 %v2617_v53  ;;  %v2689_v53 = vld [vmem:[%s3285_s1 + $0x3c0] sm:$0xff]  }
  0x38   : > { %2350 = vmatpush3.bf16.msra.mxu0 %v2618_v54  ;;  %v2690_v54 = vld [vmem:[%s3285_s1 + $0x300] sm:$0xff]  }
  0x39   : > { %2378 = vmatpush3.bf16.msra.mxu1 %v2619_v55  ;;  %2351 = vmatprep.subr.bf16.mxu0 %v2622_v57  ;;  %v2691_v55 = vld [vmem:[%s3285_s1 + $0x380] sm:$0xff]   ;;  %v2693_v57 = vld [vmem:[%s3285_s1 + $0x3c8] sm:$0xff]  }
  0x3a   : > { %2379 = vmatprep.subr.bf16.mxu1 %v2623_v58  ;;  %v2694_v58 = vld [vmem:[%s3285_s1 + $0x308] sm:$0xff]  }
  0x3c   : > { %2352 = vmatpush3.bf16.msra.mxu0 %v2625_v60  ;;  %v2696_v60 = vld [vmem:[%s2894_s13 + $0xb4] ss:$72 sps:$4 sm:$0xff]  }
  0x3d   : > { %2380 = vmatpush3.bf16.msra.mxu1 %v2626_v61  ;;  %2353 = vmatprep.subr.bf16.mxu0 %v2630_v0  ;;  %v2698_v61 = vld [vmem:[%s2894_s13 + $0xb0] ss:$72 sps:$4 sm:$0xff]   ;;  %v2701_v0 = vld [vmem:[%s2894_s13 + $0xbc] ss:$72 sps:$4 sm:$0xff]  }
  0x3e   : > { %2381 = vmatprep.subr.bf16.mxu1 %v2631_v1  ;;  %v2703_v1 = vld [vmem:[%s3285_s1 + $0x310] sm:$0xff]  }
  0x40   : > { %2354 = vmatpush3.bf16.msra.mxu0 %v2632_v2  ;;  %v2704_v2 = vld [vmem:[%s3285_s1 + $0x390] sm:$0xff]  }
  0x41   : > { %2382 = vmatpush3.bf16.msra.mxu1 %v2633_v3  ;;  %2355 = vmatprep.subr.bf16.mxu0 %v2634_v4  ;;  %v2705_v3 = vld [vmem:[%s2894_s13 + $0xb8] ss:$72 sps:$4 sm:$0xff]  }
  0x42   : > { %2383 = vmatprep.subr.bf16.mxu1 %v2635_v5  ;;  %v2706_v4 = vld [vmem:[%s3285_s1 + $0x358] sm:$0xff]  }
  0x43   : > { %v2707_v5 = vld [vmem:[%s3285_s1 + $0x3d8] sm:$0xff]  }
  0x44   : > { %2356 = vmatpush3.bf16.msra.mxu0 %v2636_v6  ;;  %v2708_v6 = vld [vmem:[%s3285_s1 + $0x318] sm:$0xff]  }
  0x45   : > { %2384 = vmatpush3.bf16.msra.mxu1 %v2637_v7  ;;  %2397 = vmatprep.subr.bf16.mxu0 %v2644_v12  ;;  %v2709_v7 = vld [vmem:[%s3285_s1 + $0x398] sm:$0xff]   ;;  %v2714_v12 = vld [vmem:[%s3285_s1 + $0x368] sm:$0xff]  }
  0x46   : > { %2425 = vmatprep.subr.bf16.mxu1 %v2645_v13  ;;  %v2715_v13 = vld [vmem:[%s3285_s1 + $0x3e8] sm:$0xff]  }
  0x47   : > { %1684 = vmatmul.mubr.bf16.vlgmr.msra.gmra.mrb[8].mxu0 %v2638_v8  ;;  %v2710_v8 = vld [vmem:[%s3285_s1 + $0x360] sm:$0xff]  }
  0x48   : > { %1733 = vmatmul.mubr.bf16.vlgmr.msra.gmra.mrb[8].mxu1 %v2641_v10  ;;  %2398 = vmatpush3.bf16.msra.mxu0 %v2646_v14  ;;  %v2712_v10 = vld [vmem:[%s3285_s1 + $0x320] sm:$0xff]   ;;  %v2716_v14 = vld [vmem:[%s3285_s1 + $0x328] sm:$0xff]  }
  0x49   : > { %2426 = vmatpush3.bf16.msra.mxu1 %v2647_v15  ;;  %2399 = vmatprep.subr.bf16.mxu0 %v2648_v16  ;;  %v2717_v15 = vld [vmem:[%s3285_s1 + $0x3a8] sm:$0xff]   ;;  %v2718_v16 = vld [vmem:[%s3285_s1 + $0x370] sm:$0xff]  }
  0x4a   : > { %2427 = vmatprep.subr.bf16.mxu1 %v2649_v17  ;;  %1691 = vmatprep.mubr.bf16.mxu0 %v2652_v20  ;;  %v2719_v17 = vld [vmem:[%s3285_s1 + $0x3f0] sm:$0xff]   ;;  %v2722_v20 = vld [vmem:[%s3285_s1 + $0x378] sm:$0xff]  }
  0x4b   : > { %1740 = vmatprep.mubr.bf16.mxu1 %v2657_v24  ;;  %v2726_v24 = vld [vmem:[%s2894_s13 + $0x30] ss:$72 sps:$4 sm:$0xff]  }
  0x4c   : > { %2400 = vmatpush3.bf16.msra.mxu0 %v2650_v18  ;;  %v2720_v18 = vld [vmem:[%s3285_s1 + $0x330] sm:$0xff]  }
  0x4d   : > { %2428 = vmatpush3.bf16.msra.mxu1 %v2651_v19  ;;  %2401 = vmatprep.subr.bf16.mxu0 %v2655_v22  ;;  %v2721_v19 = vld [vmem:[%s3285_s1 + $0x3b0] sm:$0xff]   ;;  %v2724_v22 = vld [vmem:[%s3285_s1 + $0x338] sm:$0xff]  }
  0x4e   : > { %2429 = vmatprep.subr.bf16.mxu1 %v2656_v23  ;;  %v2725_v23 = vld [vmem:[%s3285_s1 + $0x3b8] sm:$0xff]  }
  0x4f   : > { %1692 = vmatmul.mubr.bf16.gmra.mrb[12].mxu0 %v2654_v21  ;;  %v2723_v21 = vld [vmem:[%s3285_s1 + $0x3f8] sm:$0xff]  }
  0x50   : > { %2402 = vmatpush3.bf16.msra.mxu0 %v2659_v25  ;;  %1741 = vmatmul.mubr.bf16.gmra.mrb[12].mxu1 %v2661_v27  ;;  %v2728_v25 = vld [vmem:[%s2894_s13 + $0x34] ss:$72 sps:$4 sm:$0xff]  }
  0x51   : > { %2430 = vmatpush3.bf16.msra.mxu1 %v2660_v26  ;;  %2403 = vmatprep.subr.bf16.mxu0 %v2662_v28  ;;  %v2729_v26 = vld [vmem:[%s2894_s13 + $0x38] ss:$72 sps:$4 sm:$0xff]   ;;  %v2731_v27 = vld [vmem:[%s2894_s13 + $0x3c] ss:$72 sps:$4 sm:$0xff]  }
  0x52   : > { %2431 = vmatprep.subr.bf16.mxu1 %v2663_v29  ;;  %1781 = vmatprep.mubr.bf16.mxu0 %v2684_v49  ;;  %v2732_v28 = vld [vmem:[%s3285_s1 + $0x440] sm:$0xff]   ;;  %v2753_v49 = vld [vmem:[%s3285_s1 + $0x438] sm:$0xff]  }
  0x53   : > { %1830 = vmatprep.mubr.bf16.mxu1 %v2687_v51  ;;  %v2733_v29 = vld [vmem:[%s3285_s1 + $0x400] sm:$0xff]   ;;  %v2757_v51 = vld [vmem:[%s2894_s13 + $0xd0] ss:$72 sps:$4 sm:$0xff]  }
  0x54   : > { %2404 = vmatpush3.bf16.msra.mxu0 %v2664_v30  ;;  %v2734_v30 = vld [vmem:[%s3285_s1 + $0x448] sm:$0xff]  }
  0x55   : > { %2432 = vmatpush3.bf16.msra.mxu1 %v2665_v31  ;;  %2405 = vmatprep.subr.bf16.mxu0 %v2666_v32  ;;  %v2735_v31 = vld [vmem:[%s3285_s1 + $0x408] sm:$0xff]  }
  0x56   : > { %2433 = vmatprep.subr.bf16.mxu1 %v2667_v33  ;;  %v2736_v32 = vld [vmem:[%s2894_s13 + $0xc4] ss:$72 sps:$4 sm:$0xff]   ;;  %v2738_v33 = vld [vmem:[%s2894_s13 + $0xc0] ss:$72 sps:$4 sm:$0xff]  }
  0x58   : > { %2406 = vmatpush3.bf16.msra.mxu0 %v2668_v34  ;;  %v2739_v34 = vld [vmem:[%s3285_s1 + $0x450] sm:$0xff]  }
  0x59   : > { %2434 = vmatpush3.bf16.msra.mxu1 %v2669_v35  ;;  %2407 = vmatprep.subr.bf16.mxu0 %v2670_v36  ;;  %v2740_v35 = vld [vmem:[%s2894_s13 + $0xcc] ss:$72 sps:$4 sm:$0xff]  }
  0x5a   : > { %2435 = vmatprep.subr.bf16.mxu1 %v2671_v37  ;;  %v2742_v36 = vld [vmem:[%s3285_s1 + $0x410] sm:$0xff]  }
  0x5b   : > { %v2743_v37 = vld [vmem:[%s2894_s13 + $0xc8] ss:$72 sps:$4 sm:$0xff]  }
  0x5c   : > { %2408 = vmatpush3.bf16.msra.mxu0 %v2672_v38  ;;  %v2744_v38 = vld [vmem:[%s3285_s1 + $0x458] sm:$0xff]  }
  0x5d   : > { %2436 = vmatpush3.bf16.msra.mxu1 %v2673_v39  ;;  %2409 = vmatprep.subr.bf16.mxu0 %v2674_v40  ;;  %v2745_v39 = vld [vmem:[%s3285_s1 + $0x418] sm:$0xff]   ;;  %v2746_v40 = vld [vmem:[%s3285_s1 + $0x460] sm:$0xff]  }
  0x5e   : > { %2437 = vmatprep.subr.bf16.mxu1 %v2675_v41  ;;  %v2747_v41 = vld [vmem:[%s3285_s1 + $0x420] sm:$0xff]  }
  0x60   : > { %2410 = vmatpush3.bf16.msra.mxu0 %v2676_v42  ;;  %v2748_v42 = vld [vmem:[%s3285_s1 + $0x468] sm:$0xff]  }
  0x61   : > { %2438 = vmatpush3.bf16.msra.mxu1 %v2677_v43  ;;  %2411 = vmatprep.subr.bf16.mxu0 %v2678_v44  ;;  %v2749_v43 = vld [vmem:[%s3285_s1 + $0x428] sm:$0xff]  }
  0x62   : > { %2439 = vmatprep.subr.bf16.mxu1 %v2679_v45  ;;  %v2756_v44 = vld [vmem:[%s2894_s13 + $0x44] ss:$72 sps:$4 sm:$0xff]   ;;  %v2750_v45 = vld [vmem:[%s3285_s1 + $0x470] sm:$0xff]  }
  0x64   : > { %2412 = vmatpush3.bf16.msra.mxu0 %v2680_v46  ;;  %v2759_v46 = vld [vmem:[%s2894_s13 + $0xd4] ss:$72 sps:$4 sm:$0xff]  }
  0x65   : > { %2440 = vmatpush3.bf16.msra.mxu1 %v2681_v47  ;;  %2453 = vmatprep.subr.bf16.mxu0 %v2688_v52  ;;  %v2751_v47 = vld [vmem:[%s3285_s1 + $0x430] sm:$0xff]  }
  0x66   : > { %2481 = vmatprep.subr.bf16.mxu1 %v2689_v53 }
  0x67   : > { %1782 = vmatmul.mubr.bf16.vlgmr.msra.gmra.mrb[16].mxu0 %v2682_v48  ;;  %v2752_v48 = vld [vmem:[%s3285_s1 + $0x478] sm:$0xff]  }
  0x68   : > { %1831 = vmatmul.mubr.bf16.vlgmr.msra.gmra.mrb[16].mxu1 %v2685_v50  ;;  %2454 = vmatpush3.bf16.msra.mxu0 %v2690_v54  ;;  %v2754_v50 = vld [vmem:[%s2894_s13 + $0x40] ss:$72 sps:$4 sm:$0xff]   ;;  %s2082_s13 = sshll.u32 %s3289_s19, 2 }
  0x69   : > { %2482 = vmatpush3.bf16.msra.mxu1 %v2691_v55  ;;  %2455 = vmatprep.subr.bf16.mxu0 %v2692_v56  ;;  %v2083_v54 = vld [vmem:[%s3286_s2] ss:$0 sm:$0xff]  ;;  %s175_s20 = scalar_lea.vmem %s3287_s3, %s2082_s13 }
  0x6a   : > { %2483 = vmatprep.subr.bf16.mxu1 %v2693_v57  ;;  %1789 = vmatprep.mubr.bf16.mxu0 %v2696_v60 }
  0x6b   : > { %1838 = vmatprep.mubr.bf16.mxu1 %v2701_v0 }
  0x6c   : > { %2456 = vmatpush3.bf16.msra.mxu0 %v2694_v58 }
  0x6d   : > { %2484 = vmatpush3.bf16.msra.mxu1 %v2695_v59  ;;  %2457 = vmatprep.subr.bf16.mxu0 %v2699_v62 }
  0x6e   : > { %2485 = vmatprep.subr.bf16.mxu1 %v2700_v63 }
  0x6f   : > { %1790 = vmatmul.mubr.bf16.gmra.mrb[20].mxu0 %v2698_v61 }
  0x70   : > { %2458 = vmatpush3.bf16.msra.mxu0 %v2703_v1  ;;  %1839 = vmatmul.mubr.bf16.gmra.mrb[20].mxu1 %v2705_v3 }
  0x71   : > { %2486 = vmatpush3.bf16.msra.mxu1 %v2704_v2  ;;  %2459 = vmatprep.subr.bf16.mxu0 %v2706_v4 }
  0x72   : > { %2487 = vmatprep.subr.bf16.mxu1 %v2707_v5  ;;  %1879 = vmatprep.mubr.bf16.mxu0 %v2728_v25 }
  0x73   : > { %1928 = vmatprep.mubr.bf16.mxu1 %v2731_v27 }
  0x74   : > { %2460 = vmatpush3.bf16.msra.mxu0 %v2708_v6 }
  0x75   : > { %2488 = vmatpush3.bf16.msra.mxu1 %v2709_v7  ;;  %2461 = vmatprep.subr.bf16.mxu0 %v2710_v8 }
  0x76   : > { %2489 = vmatprep.subr.bf16.mxu1 %v2711_v9 }
  0x78   : > { %2462 = vmatpush3.bf16.msra.mxu0 %v2712_v10 }
  0x79   : > { %2490 = vmatpush3.bf16.msra.mxu1 %v2713_v11  ;;  %2463 = vmatprep.subr.bf16.mxu0 %v2714_v12 }
  0x7a   : > { %2491 = vmatprep.subr.bf16.mxu1 %v2715_v13 }
  0x7c   : > { %2464 = vmatpush3.bf16.msra.mxu0 %v2716_v14 }
  0x7d   : > { %2492 = vmatpush3.bf16.msra.mxu1 %v2717_v15  ;;  %2465 = vmatprep.subr.bf16.mxu0 %v2718_v16 }
  0x7e   : > { %2493 = vmatprep.subr.bf16.mxu1 %v2719_v17 }
  0x80   : > { %2466 = vmatpush3.bf16.msra.mxu0 %v2720_v18 }
  0x81   : > { %2494 = vmatpush3.bf16.msra.mxu1 %v2721_v19  ;;  %2467 = vmatprep.subr.bf16.mxu0 %v2722_v20 }
  0x82   : > { %2495 = vmatprep.subr.bf16.mxu1 %v2723_v21 }
  0x84   : > { %2468 = vmatpush3.bf16.msra.mxu0 %v2724_v22 }
  0x85   : > { %2496 = vmatpush3.bf16.msra.mxu1 %v2725_v23  ;;  %2509 = vmatprep.subr.bf16.mxu0 %v2732_v28 }
  0x86   : > { %2537 = vmatprep.subr.bf16.mxu1 %v2732_v28 }
  0x87   : > { %1880 = vmatmul.mubr.bf16.vlgmr.msra.gmra.mrb[24].mxu0 %v2726_v24 }
  0x88   : > { %1929 = vmatmul.mubr.bf16.vlgmr.msra.gmra.mrb[24].mxu1 %v2729_v26  ;;  %2510 = vmatpush3.bf16.msra.mxu0 %v2733_v29 }
  0x89   : > { %2545 = vmatpush3.bf16.msra.mxu1 %v2733_v29  ;;  %2511 = vmatprep.subr.bf16.mxu0 %v2734_v30 }
  0x8a   : > { %2538 = vmatprep.subr.bf16.mxu1 %v2734_v30  ;;  %1887 = vmatprep.mubr.bf16.mxu0 %v2736_v32 }
  0x8b   : > { %1936 = vmatprep.mubr.bf16.mxu1 %v2740_v35 }
  0x8c   : > { %2512 = vmatpush3.bf16.msra.mxu0 %v2735_v31 }
  0x8d   : > { %2546 = vmatpush3.bf16.msra.mxu1 %v2735_v31  ;;  %2513 = vmatprep.subr.bf16.mxu0 %v2739_v34 }
  0x8e   : > { %2539 = vmatprep.subr.bf16.mxu1 %v2739_v34 }
  0x8f   : > { %1888 = vmatmul.mubr.bf16.gmra.mrb[28].mxu0 %v2738_v33 }
  0x90   : > { %2514 = vmatpush3.bf16.msra.mxu0 %v2742_v36  ;;  %1937 = vmatmul.mubr.bf16.gmra.mrb[28].mxu1 %v2743_v37 }
  0x91   : > { %2547 = vmatpush3.bf16.msra.mxu1 %v2742_v36  ;;  %2515 = vmatprep.subr.bf16.mxu0 %v2744_v38 }
  0x92   : > { %2540 = vmatprep.subr.bf16.mxu1 %v2744_v38  ;;  %1977 = vmatprep.mubr.bf16.mxu0 %v2756_v44 }
  0x93   : > { %1985 = vmatprep.mubr.bf16.mxu1 %v2759_v46 }
  0x94   : > { %2516 = vmatpush3.bf16.msra.mxu0 %v2745_v39 }
  0x95   : > { %2548 = vmatpush3.bf16.msra.mxu1 %v2745_v39  ;;  %2517 = vmatprep.subr.bf16.mxu0 %v2746_v40 }
  0x96   : > { %2541 = vmatprep.subr.bf16.mxu1 %v2746_v40 }
  0x98   : > { %2518 = vmatpush3.bf16.msra.mxu0 %v2747_v41 }
  0x99   : > { %2549 = vmatpush3.bf16.msra.mxu1 %v2747_v41  ;;  %2519 = vmatprep.subr.bf16.mxu0 %v2748_v42 }
  0x9a   : > { %2542 = vmatprep.subr.bf16.mxu1 %v2748_v42 }
  0x9c   : > { %2520 = vmatpush3.bf16.msra.mxu0 %v2749_v43 }
  0x9d   : > { %2550 = vmatpush3.bf16.msra.mxu1 %v2749_v43  ;;  %2521 = vmatprep.subr.bf16.mxu0 %v2750_v45 }
  0x9e   : > { %2543 = vmatprep.subr.bf16.mxu1 %v2750_v45 }
  0xa0   : > { %2522 = vmatpush3.bf16.msra.mxu0 %v2751_v47 }
  0xa1   : > { %2551 = vmatpush3.bf16.msra.mxu1 %v2751_v47  ;;  %2523 = vmatprep.subr.bf16.mxu0 %v2752_v48 }
  0xa2   : > { %2544 = vmatprep.subr.bf16.mxu1 %v2752_v48 }
  0xa4   : > { %2524 = vmatpush3.bf16.msra.mxu0 %v2753_v49 }
  0xa5   : > { %2552 = vmatpush3.bf16.msra.mxu1 %v2753_v49 }
  0xa7   : > { %1978 = vmatmul.mubr.bf16.vlgmr.msra.gmra.mrb[32].mxu0 %v2754_v50 }
  0xa8   : > { %1986 = vmatmul.mubr.bf16.vlgmr.msra.gmra.mrb[32].mxu1 %v2757_v51 }
  0xfa   : > { %v2301_v52 = vpop.f32.mrb[0].mxu0 }
  0xfb   : > { %v2329_v53 = vpop.f32.mrb[0].mxu1  ;;  %v2302_v55 = vpop.f32.mrb[1].mxu0 }
  0xfc   : > { %v2303_v56 = vadd.f32 %v2302_v55, %v2301_v52  ;;  %v2330_v57 = vpop.f32.mrb[1].mxu1  ;;  %v2304_v58 = vpop.f32.mrb[2].mxu0 }
  0xfd   : > { %v2331_v59 = vadd.f32 %v2330_v57, %v2329_v53  ;;  %v2332_v60 = vpop.f32.mrb[2].mxu1  ;;  %v2305_v61 = vpop.f32.mrb[3].mxu0 }
  0xfe   : > { %v1588_v62 = vadd.f32 %v2303_v56, %v2083_v54  ;;  %v2306_v63 = vadd.f32 %v2305_v61, %v2304_v58  ;;  %v2333_v0 = vpop.f32.mrb[3].mxu1 }
  0xff   : > { %v2334_v1 = vadd.f32 %v2333_v0, %v2332_v60 }
 0x100   : > { %v1637_v2 = vadd.f32 %v2331_v59, %v1588_v62  ;;  %v1591_v3 = vadd.f32 %v2306_v63, %v2083_v54 }
 0x102   : > { %v1640_v4 = vadd.f32 %v2334_v1, %v1591_v3  ;;  %v2307_v5 = vpop.f32.mrb[4].mxu0 }
 0x103   : > { %v2308_v6 = vpop.f32.mrb[5].mxu0  ;;  %v2335_v11 = vpop.f32.mrb[4].mxu1 }
 0x104   : > { %v2309_v7 = vadd.f32 %v2308_v6, %v2307_v5  ;;  %v2310_v8 = vpop.f32.mrb[6].mxu0  ;;  %v2336_v13 = vpop.f32.mrb[5].mxu1 }
 0x105   : > { %v2311_v9 = vpop.f32.mrb[7].mxu0  ;;  %v2337_v15 = vadd.f32 %v2336_v13, %v2335_v11  ;;  %v2338_v16 = vpop.f32.mrb[6].mxu1 }
 0x106   : > { %v1596_v10 = vadd.f32 %v2309_v7, %v2083_v54  ;;  %v2312_v12 = vadd.f32 %v2311_v9, %v2310_v8  ;;  %v2339_v17 = vpop.f32.mrb[7].mxu1 }
 0x107   : > { %v2340_v19 = vadd.f32 %v2339_v17, %v2338_v16 }
 0x108   : > { %v1599_v14 = vadd.f32 %v2312_v12, %v2083_v54  ;;  %v1645_v18 = vadd.f32 %v2337_v15, %v1596_v10 }
 0x10a   : > { %v1648_v20 = vadd.f32 %v2340_v19, %v1599_v14 }
 0x11a   : > { %v2357_v21 = vpop.f32.mrb[8].mxu0 }
 0x11b   : > { %v2385_v22 = vpop.f32.mrb[8].mxu1  ;;  %v2358_v23 = vpop.f32.mrb[9].mxu0 }
 0x11c   : > { %v2359_v24 = vadd.f32 %v2358_v23, %v2357_v21  ;;  %v2386_v25 = vpop.f32.mrb[9].mxu1  ;;  %v2360_v26 = vpop.f32.mrb[10].mxu0 }
 0x11d   : > { %v2387_v27 = vadd.f32 %v2386_v25, %v2385_v22  ;;  %v2388_v28 = vpop.f32.mrb[10].mxu1  ;;  %v2361_v29 = vpop.f32.mrb[11].mxu0 }
 0x11e   : > { %v1686_v30 = vadd.f32 %v2359_v24, %v1637_v2  ;;  %v2362_v31 = vadd.f32 %v2361_v29, %v2360_v26  ;;  %v2389_v32 = vpop.f32.mrb[11].mxu1 }
 0x11f   : > { %v2390_v33 = vadd.f32 %v2389_v32, %v2388_v28 }
 0x120   : > { %v1735_v34 = vadd.f32 %v2387_v27, %v1686_v30  ;;  %v1689_v35 = vadd.f32 %v2362_v31, %v1640_v4 }
 0x122   : > { %v1738_v36 = vadd.f32 %v2390_v33, %v1689_v35  ;;  %v2363_v37 = vpop.f32.mrb[12].mxu0 }
 0x123   : > { %v2364_v38 = vpop.f32.mrb[13].mxu0  ;;  %v2391_v44 = vpop.f32.mrb[12].mxu1 }
 0x124   : > { %v2365_v39 = vadd.f32 %v2364_v38, %v2363_v37  ;;  %v2366_v40 = vpop.f32.mrb[14].mxu0  ;;  %v2392_v46 = vpop.f32.mrb[13].mxu1 }
 0x125   : > { %v2367_v41 = vpop.f32.mrb[15].mxu0  ;;  %v2393_v47 = vadd.f32 %v2392_v46, %v2391_v44  ;;  %v2394_v48 = vpop.f32.mrb[14].mxu1 }
 0x126   : > { %v1694_v42 = vadd.f32 %v2365_v39, %v1645_v18  ;;  %v2368_v43 = vadd.f32 %v2367_v41, %v2366_v40  ;;  %v2395_v49 = vpop.f32.mrb[15].mxu1 }
 0x127   : > { %v2396_v51 = vadd.f32 %v2395_v49, %v2394_v48 }
 0x128   : > { %v1697_v45 = vadd.f32 %v2368_v43, %v1648_v20  ;;  %v1743_v50 = vadd.f32 %v2393_v47, %v1694_v42 }
 0x12a   : > { %v1746_v52 = vadd.f32 %v2396_v51, %v1697_v45 }
 0x13a   : > { %v2413_v53 = vpop.f32.mrb[16].mxu0 }
 0x13b   : > { %v2414_v54 = vpop.f32.mrb[17].mxu0  ;;  %v2441_v55 = vpop.f32.mrb[16].mxu1 }
 0x13c   : > { %v2415_v56 = vadd.f32 %v2414_v54, %v2413_v53  ;;  %v2416_v57 = vpop.f32.mrb[18].mxu0  ;;  %v2442_v58 = vpop.f32.mrb[17].mxu1 }
 0x13d   : > { %v2417_v59 = vpop.f32.mrb[19].mxu0  ;;  %v2443_v61 = vadd.f32 %v2442_v58, %v2441_v55  ;;  %v2444_v62 = vpop.f32.mrb[18].mxu1 }
 0x13e   : > { %v1784_v60 = vadd.f32 %v2415_v56, %v1735_v34  ;;  %v2418_v63 = vadd.f32 %v2417_v59, %v2416_v57  ;;  %v2445_v0 = vpop.f32.mrb[19].mxu1 }
 0x13f   : > { %v2446_v3 = vadd.f32 %v2445_v0, %v2444_v62 }
 0x140   : > { %v1833_v1 = vadd.f32 %v2443_v61, %v1784_v60  ;;  %v1787_v2 = vadd.f32 %v2418_v63, %v1738_v36 }
 0x142   : > { %v1836_v4 = vadd.f32 %v2446_v3, %v1787_v2  ;;  %v2419_v5 = vpop.f32.mrb[20].mxu0 }
 0x143   : > { %v2420_v6 = vpop.f32.mrb[21].mxu0  ;;  %v2447_v12 = vpop.f32.mrb[20].mxu1 }
 0x144   : > { %v2421_v7 = vadd.f32 %v2420_v6, %v2419_v5  ;;  %v2422_v8 = vpop.f32.mrb[22].mxu0  ;;  %v2448_v14 = vpop.f32.mrb[21].mxu1 }
 0x145   : > { %v2423_v9 = vpop.f32.mrb[23].mxu0  ;;  %v2449_v15 = vadd.f32 %v2448_v14, %v2447_v12  ;;  %v2450_v16 = vpop.f32.mrb[22].mxu1 }
 0x146   : > { %v1792_v10 = vadd.f32 %v2421_v7, %v1743_v50  ;;  %v2424_v11 = vadd.f32 %v2423_v9, %v2422_v8  ;;  %v2451_v17 = vpop.f32.mrb[23].mxu1 }
 0x147   : > { %v2452_v19 = vadd.f32 %v2451_v17, %v2450_v16 }
 0x148   : > { %v1795_v13 = vadd.f32 %v2424_v11, %v1746_v52  ;;  %v1841_v18 = vadd.f32 %v2449_v15, %v1792_v10 }
 0x14a   : > { %v1844_v20 = vadd.f32 %v2452_v19, %v1795_v13 }
 0x15a   : > { %v2469_v21 = vpop.f32.mrb[24].mxu0 }
 0x15b   : > { %v2497_v22 = vpop.f32.mrb[24].mxu1  ;;  %v2470_v23 = vpop.f32.mrb[25].mxu0 }
 0x15c   : > { %v2471_v24 = vadd.f32 %v2470_v23, %v2469_v21  ;;  %v2498_v25 = vpop.f32.mrb[25].mxu1  ;;  %v2472_v26 = vpop.f32.mrb[26].mxu0 }
 0x15d   : > { %v2499_v27 = vadd.f32 %v2498_v25, %v2497_v22  ;;  %v2500_v28 = vpop.f32.mrb[26].mxu1  ;;  %v2473_v29 = vpop.f32.mrb[27].mxu0 }
 0x15e   : > { %v1882_v30 = vadd.f32 %v2471_v24, %v1833_v1  ;;  %v2474_v31 = vadd.f32 %v2473_v29, %v2472_v26  ;;  %v2501_v32 = vpop.f32.mrb[27].mxu1 }
 0x15f   : > { %v2502_v33 = vadd.f32 %v2501_v32, %v2500_v28 }
 0x160   : > { %v1931_v34 = vadd.f32 %v2499_v27, %v1882_v30  ;;  %v1885_v35 = vadd.f32 %v2474_v31, %v1836_v4 }
 0x162   : > { %v1934_v36 = vadd.f32 %v2502_v33, %v1885_v35  ;;  %v2475_v37 = vpop.f32.mrb[28].mxu0 }
 0x163   : > { %v2476_v38 = vpop.f32.mrb[29].mxu0  ;;  %v2503_v41 = vpop.f32.mrb[28].mxu1 }
 0x164   : > { %v2477_v39 = vadd.f32 %v2476_v38, %v2475_v37  ;;  %v2478_v40 = vpop.f32.mrb[30].mxu0  ;;  %v2504_v43 = vpop.f32.mrb[29].mxu1 }
 0x165   : > { %v2479_v42 = vpop.f32.mrb[31].mxu0  ;;  %v2505_v46 = vadd.f32 %v2504_v43, %v2503_v41  ;;  %v2506_v47 = vpop.f32.mrb[30].mxu1 }
 0x166   : > { %v1890_v44 = vadd.f32 %v2477_v39, %v1841_v18  ;;  %v2480_v45 = vadd.f32 %v2479_v42, %v2478_v40  ;;  %v2507_v48 = vpop.f32.mrb[31].mxu1 }
 0x167   : > { %v2508_v51 = vadd.f32 %v2507_v48, %v2506_v47 }
 0x168   : > { %v1893_v49 = vadd.f32 %v2480_v45, %v1844_v20  ;;  %v1939_v50 = vadd.f32 %v2505_v46, %v1890_v44 }
 0x16a   : > { %v1942_v52 = vadd.f32 %v2508_v51, %v1893_v49 }
 0x17a   : > { %v2525_v53 = vpop.f32.mrb[32].mxu0 }
 0x17b   : > { %v2531_v54 = vpop.f32.mrb[32].mxu1  ;;  %v2526_v55 = vpop.f32.mrb[33].mxu0 }
 0x17c   : > { %v2527_v56 = vadd.f32 %v2526_v55, %v2525_v53  ;;  %v2532_v57 = vpop.f32.mrb[33].mxu1  ;;  %v2528_v58 = vpop.f32.mrb[34].mxu0 }
 0x17d   : > { %v2533_v59 = vadd.f32 %v2532_v57, %v2531_v54  ;;  %v2534_v60 = vpop.f32.mrb[34].mxu1  ;;  %v2529_v61 = vpop.f32.mrb[35].mxu0 }
 0x17e   : > { %v1980_v62 = vadd.f32 %v2527_v56, %v1931_v34  ;;  %v2530_v63 = vadd.f32 %v2529_v61, %v2528_v58  ;;  %v2535_v0 = vpop.f32.mrb[35].mxu1 }
 0x17f   : > { %v1988_v1 = vadd.f32 %v2533_v59, %v1939_v50  ;;  %v2536_v2 = vadd.f32 %v2535_v0, %v2534_v60 }
 0x180   : > { %v1983_v3 = vadd.f32 %v2530_v63, %v1934_v36  ;;  %v1994_v5 = vmax.f32 %v1980_v62, 0.0 }
 0x181   : > { %v1991_v4 = vadd.f32 %v2536_v2, %v1942_v52  ;;  %v1996_v7 = vmax.f32 %v1988_v1, 0.0 }
 0x182   : > { %v1995_v6 = vmax.f32 %v1983_v3, 0.0 }
 0x183   : > { %v1997_v8 = vmax.f32 %v1991_v4, 0.0 }
 0x184   : > { %v2277_v9 = vpack.c.bf16 %v1995_v6, %v1994_v5 }
 0x185   : > { %v2282_v10 = vpack.c.bf16 %v1997_v8, %v1996_v7 }
 0x186   : > { %2278 = vst [vmem:[%s175_s20] sm:$0xff] %v2277_v9  }
 0x187   : > { %2284 = vst [vmem:[%s175_s20 + $0x8] sm:$0xff] %v2282_v10  }
 0x188 PF: > { %s13_s12 = sadd.s32 1, %s2766_s12  }
 0x189   : > { %p10_p4 = scmp.ge.s32.totalorder %s13_s12, 4  }
 0x18b   :  { %12 = sbr.rel (!%p10_p4) target bundleno = 1 (0x1), region = 62 }

// kernel: pspnet_tl_forward.46
= control target key start
LH: loop header
LB: loop body
LE: loop exit
PB: predicated region body
PF: predicated region fallthrough
CT: control target
= control target key end

     0   :  { %s4859_s9 = smov 0   ;;  %s5684_s0 = inlined_call_operand.vmem [shape: f32[64,5], index: 0, kind: input, shape index: {}]   ;;  %s5685_s1 = inlined_call_operand.vmem [shape: f32[5,8448], index: 1, kind: input, shape index: {}]   ;;  %s5686_s2 = inlined_call_operand.vmem [shape: bf16[64,8448], index: 2, kind: output, shape index: {}]  }
   0x1 LB: > { %s4350_s10 = sadd.s32 4294967295, %s4841_s9   ;;  %p4354_p0 = scmp.ge.s32.totalorder %s4841_s9, 1  ;;  %s4841_s9 = sphi %s4859_s9, %s12_s9  }
   0x2   : > { %p113_p1 = scmp.lt.s32.totalorder %s4841_s9, 3 }
   0x4   : > { %p114_p2 = pnand %p4354_p0, %p113_p1 }
   0x5   : > { %v154_v0 = vld [vmem:[%s5685_s1 + $0x8] sm:$0x1f] (!%p114_p2)  ;;  %vm232_vm0 = vcmask (!%p114_p2), 1044480   ;;  %v153_v1 = vld [vmem:[%s5685_s1] sm:$0x1f] (!%p114_p2)  ;;  %s4355_s19 = sshll.u32 (!%p114_p2), %s4350_s10, 2 }
   0x6   : > { %117 = sbr.rel (%p114_p2) target bundleno = 493 (0x1ed), region = 28  ;;  %4359 = vmatprep.subr.msk.mxu0 (!%p114_p2), %vm232_vm0, %v154_v0  ;;  %4823 = vmatprep.subr.msk.mxu1 (!%p114_p2), %vm232_vm0, %v154_v0  ;;  %v156_v2 = vld [vmem:[%s5685_s1 + $0x18] sm:$0x1f] (!%p114_p2)  ;;  %v158_v3 = vld [vmem:[%s5685_s1 + $0x28] sm:$0x1f] (!%p114_p2)  ;;  %p137_p3 = scmp.lt.s32.totalorder (!%p114_p2), %s4355_s19, 7 }
   0x7   : > { %4360 = vmatpush1.msk.msra.mxu0 (!%p114_p2), %vm232_vm0, %v153_v1  ;;  %4824 = vmatpush1.msk.msra.mxu1 (!%p114_p2), %vm232_vm0, %v153_v1  ;;  %v4843_v4 = vmov (!%p114_p2), 0.0   ;;  %vm219_vm1 = vcmask (!%p114_p2), 39936   ;;  %v155_v5 = vld [vmem:[%s5685_s1 + $0x10] sm:$0x1f] (!%p114_p2)  ;;  %v157_v6 = vld [vmem:[%s5685_s1 + $0x20] sm:$0x1f] (!%p114_p2) }
   0x8   : > { %495 = vmatprep.mubr.f32.mxu0 (!%p114_p2), %v4843_v4  ;;  %507 = vmatprep.mubr.f32.mxu1 (!%p114_p2), %v4843_v4  ;;  %v160_v9 = vld [vmem:[%s5685_s1 + $0x38] sm:$0x1f] (!%p114_p2)  ;;  %v162_v10 = vld [vmem:[%s5685_s1 + $0x48] sm:$0x1f] (!%p114_p2)  ;;  %v159_v13 = vld [vmem:[%s5685_s1 + $0x30] sm:$0x1f] (!%p114_p2) }
   0x9   : > { %4365 = vmatprep.subr.msk.mxu1 (!%p114_p2), %vm232_vm0, %v156_v2  ;;  %4371 = vmatprep.subr.msk.mxu0 (!%p114_p2), %vm232_vm0, %v158_v3  ;;  %v161_v14 = vld [vmem:[%s5685_s1 + $0x40] sm:$0x1f] (!%p114_p2)  ;;  %v164_v15 = vld [vmem:[%s5685_s1 + $0x58] sm:$0x1f] (!%p114_p2)  ;;  %v166_v16 = vld [vmem:[%s5685_s1 + $0x68] sm:$0x1f] (!%p114_p2) }
   0xa   : > { %v163_v17 = vld [vmem:[%s5685_s1 + $0x50] sm:$0x1f] (!%p114_p2)  ;;  %v165_v18 = vld [vmem:[%s5685_s1 + $0x60] sm:$0x1f] (!%p114_p2)  ;;  %v168_v19 = vld [vmem:[%s5685_s1 + $0x78] sm:$0x1f] (!%p114_p2) }
   0xb   : > { %v170_v20 = vld [vmem:[%s5685_s1 + $0x88] sm:$0x1f] (!%p114_p2)  ;;  %v167_v21 = vld [vmem:[%s5685_s1 + $0x70] sm:$0x1f] (!%p114_p2)  ;;  %v169_v22 = vld [vmem:[%s5685_s1 + $0x80] sm:$0x1f] (!%p114_p2) }
   0xc   : > { %v172_v23 = vld [vmem:[%s5685_s1 + $0x98] sm:$0x1f] (!%p114_p2)  ;;  %v174_v24 = vld [vmem:[%s5685_s1 + $0xa8] sm:$0x1f] (!%p114_p2)  ;;  %v171_v25 = vld [vmem:[%s5685_s1 + $0x90] sm:$0x1f] (!%p114_p2) }
   0xd   : > { %s5688_s19 = smov (!%p137_p3, %s4355_s19), 7  ;;  %v173_v26 = vld [vmem:[%s5685_s1 + $0xa0] sm:$0x1f]  ;;  %v176_v27 = vld [vmem:[%s5685_s1 + $0xb8] sm:$0x1f] }
   0xe   : > { %s4356_s20 = sshll.u32 %s5688_s19, 3  ;;  %v178_v28 = vld [vmem:[%s5685_s1 + $0xc8] sm:$0x1f]  ;;  %v175_v29 = vld [vmem:[%s5685_s1 + $0xb0] sm:$0x1f]  ;;  %s4825_s4 = smul.u32 264, %s5688_s19 }
   0xf   : > { %s140_s23 = scalar_lea.vmem %s5684_s0, %s4356_s20  ;;  %v177_v30 = vld [vmem:[%s5685_s1 + $0xc0] sm:$0x1f]  ;;  %v180_v31 = vld [vmem:[%s5685_s1 + $0xd8] sm:$0x1f]  ;;  %v182_v32 = vld [vmem:[%s5685_s1 + $0xe8] sm:$0x1f] }
  0x10   : > { %v4899_v7 = vld [vmem:[%s140_s23] sm:$0xff]  ;;  %v4901_v8 = vld [vmem:[%s140_s23 + $0x10] sm:$0xff]  ;;  %v4915_v11 = vld [vmem:[%s140_s23 + $0x8] sm:$0xff]  ;;  %s5447_s7 = scalar_lea.vmem %s5686_s2, %s4825_s4 }
  0x11   : > { %4361 = vmatmul.mubr.msk.f32.vlgmr.msra.gmra.mrb[0].mxu0 %vm219_vm1, %v4899_v7  ;;  %4363 = vmatmul.mubr.msk.f32.vlgmr.msra.gmra.mrb[0].mxu1 %vm219_vm1, %v4901_v8  ;;  %v4917_v12 = vld [vmem:[%s140_s23 + $0x18] sm:$0xff]  ;;  %v179_v33 = vld [vmem:[%s5685_s1 + $0xd0] sm:$0x1f]  ;;  %v181_v34 = vld [vmem:[%s5685_s1 + $0xe0] sm:$0x1f] }
  0x12   : > { %4366 = vmatpush1.msk.msra.mxu1 %vm232_vm0, %v155_v5  ;;  %4372 = vmatpush1.msk.msra.mxu0 %vm232_vm0, %v157_v6  ;;  %v184_v35 = vld [vmem:[%s5685_s1 + $0xf8] sm:$0x1f]  ;;  %v186_v36 = vld [vmem:[%s5685_s1 + $0x108] sm:$0x1f]  ;;  %v183_v37 = vld [vmem:[%s5685_s1 + $0xf0] sm:$0x1f] }
  0x13   : > { %501 = vmatprep.mubr.f32.mxu0 %v4843_v4  ;;  %513 = vmatprep.mubr.f32.mxu1 %v4843_v4  ;;  %v185_v38 = vld [vmem:[%s5685_s1 + $0x100] sm:$0x1f]  ;;  %v188_v39 = vld [vmem:[%s5685_s1 + $0x118] sm:$0x1f]  ;;  %v190_v40 = vld [vmem:[%s5685_s1 + $0x128] sm:$0x1f] }
  0x14   : > { %4377 = vmatprep.subr.msk.mxu1 %vm232_vm0, %v160_v9  ;;  %4383 = vmatprep.subr.msk.mxu0 %vm232_vm0, %v162_v10  ;;  %v187_v41 = vld [vmem:[%s5685_s1 + $0x110] sm:$0x1f]  ;;  %v189_v42 = vld [vmem:[%s5685_s1 + $0x120] sm:$0x1f]  ;;  %v192_v43 = vld [vmem:[%s5685_s1 + $0x138] sm:$0x1f] }
  0x15   : > { %4362 = vmatmul.mubr.msk.f32.gmra.mrb[2].mxu0 %vm219_vm1, %v4915_v11  ;;  %4364 = vmatmul.mubr.msk.f32.gmra.mrb[2].mxu1 %vm219_vm1, %v4917_v12  ;;  %v194_v44 = vld [vmem:[%s5685_s1 + $0x148] sm:$0x1f]  ;;  %v191_v45 = vld [vmem:[%s5685_s1 + $0x130] sm:$0x1f]  ;;  %v193_v46 = vld [vmem:[%s5685_s1 + $0x140] sm:$0x1f] }
  0x16   : > { %584 = vmatprep.mubr.f32.mxu1 %v4843_v4  ;;  %673 = vmatprep.mubr.f32.mxu0 %v4843_v4  ;;  %v196_v47 = vld [vmem:[%s5685_s1 + $0x158] sm:$0x1f]  ;;  %v198_v48 = vld [vmem:[%s5685_s1 + $0x168] sm:$0x1f]  ;;  %v195_v49 = vld [vmem:[%s5685_s1 + $0x150] sm:$0x1f] }
  0x17   : > { %v197_v50 = vld [vmem:[%s5685_s1 + $0x160] sm:$0x1f]  ;;  %v200_v51 = vld [vmem:[%s5685_s1 + $0x178] sm:$0x1f]  ;;  %v202_v52 = vld [vmem:[%s5685_s1 + $0x188] sm:$0x1f] }
  0x18   : > { %v199_v53 = vld [vmem:[%s5685_s1 + $0x170] sm:$0x1f]  ;;  %v201_v54 = vld [vmem:[%s5685_s1 + $0x180] sm:$0x1f]  ;;  %v204_v55 = vld [vmem:[%s5685_s1 + $0x198] sm:$0x1f] }
  0x19   : > { %4367 = vmatmul.mubr.msk.f32.vlgmr.msra.gmra.mrb[4].mxu1 %vm219_vm1, %v4899_v7  ;;  %4373 = vmatmul.mubr.msk.f32.vlgmr.msra.gmra.mrb[4].mxu0 %vm219_vm1, %v4899_v7  ;;  %v206_v56 = vld [vmem:[%s5685_s1 + $0x1a8] sm:$0x1f]  ;;  %v203_v57 = vld [vmem:[%s5685_s1 + $0x190] sm:$0x1f]  ;;  %v205_v58 = vld [vmem:[%s5685_s1 + $0x1a0] sm:$0x1f] }
  0x1a   : > { %4378 = vmatpush1.msk.msra.mxu1 %vm232_vm0, %v159_v13  ;;  %4384 = vmatpush1.msk.msra.mxu0 %vm232_vm0, %v161_v14  ;;  %v208_v59 = vld [vmem:[%s5685_s1 + $0x1b8] sm:$0x1f]  ;;  %v210_v60 = vld [vmem:[%s5685_s1 + $0x1c8] sm:$0x1f]  ;;  %v207_v61 = vld [vmem:[%s5685_s1 + $0x1b0] sm:$0x1f] }
  0x1b   : > { %590 = vmatprep.mubr.f32.mxu1 %v4843_v4  ;;  %679 = vmatprep.mubr.f32.mxu0 %v4843_v4  ;;  %v209_v62 = vld [vmem:[%s5685_s1 + $0x1c0] sm:$0x1f]  ;;  %v212_v63 = vld [vmem:[%s5685_s1 + $0x1d8] sm:$0x1f]  ;;  %v214_v0 = vld [vmem:[%s5685_s1 + $0x1e8] sm:$0x1f] }
  0x1c   : > { %4389 = vmatprep.subr.msk.mxu1 %vm232_vm0, %v164_v15  ;;  %4395 = vmatprep.subr.msk.mxu0 %vm232_vm0, %v166_v16  ;;  %v211_v10 = vld [vmem:[%s5685_s1 + $0x1d0] sm:$0x1f]  ;;  %v213_v13 = vld [vmem:[%s5685_s1 + $0x1e0] sm:$0x1f] }
  0x1d   : > { %4368 = vmatmul.mubr.msk.f32.gmra.mrb[6].mxu1 %vm219_vm1, %v4915_v11  ;;  %4374 = vmatmul.mubr.msk.f32.gmra.mrb[6].mxu0 %vm219_vm1, %v4915_v11 }
  0x1e   : > { %596 = vmatprep.mubr.f32.mxu1 %v4843_v4  ;;  %685 = vmatprep.mubr.f32.mxu0 %v4843_v4 }
  0x21   : > { %4369 = vmatmul.mubr.msk.f32.gmra.mrb[8].mxu1 %vm219_vm1, %v4901_v8  ;;  %4375 = vmatmul.mubr.msk.f32.gmra.mrb[8].mxu0 %vm219_vm1, %v4901_v8 }
  0x22   : > { %602 = vmatprep.mubr.f32.mxu1 %v4843_v4  ;;  %691 = vmatprep.mubr.f32.mxu0 %v4843_v4 }
  0x25   : > { %4370 = vmatmul.mubr.msk.f32.gmra.mrb[10].mxu1 %vm219_vm1, %v4917_v12  ;;  %4376 = vmatmul.mubr.msk.f32.gmra.mrb[10].mxu0 %vm219_vm1, %v4917_v12 }
  0x26   : > { %762 = vmatprep.mubr.f32.mxu1 %v4843_v4  ;;  %851 = vmatprep.mubr.f32.mxu0 %v4843_v4 }
  0x29   : > { %4379 = vmatmul.mubr.msk.f32.vlgmr.msra.gmra.mrb[12].mxu1 %vm219_vm1, %v4899_v7  ;;  %4385 = vmatmul.mubr.msk.f32.vlgmr.msra.gmra.mrb[12].mxu0 %vm219_vm1, %v4899_v7 }
  0x2a   : > { %4390 = vmatpush1.msk.msra.mxu1 %vm232_vm0, %v163_v17  ;;  %4396 = vmatpush1.msk.msra.mxu0 %vm232_vm0, %v165_v18  ;;  %v216_v18 = vld [vmem:[%s5685_s1 + $0x1f8] sm:$0x1f] }
  0x2b   : > { %768 = vmatprep.mubr.f32.mxu1 %v4843_v4  ;;  %857 = vmatprep.mubr.f32.mxu0 %v4843_v4 }
  0x2c   : > { %4401 = vmatprep.subr.msk.mxu1 %vm232_vm0, %v168_v19  ;;  %4407 = vmatprep.subr.msk.mxu0 %vm232_vm0, %v170_v20  ;;  %v218_v19 = vld [vmem:[%s5685_s1 + $0x208] sm:$0x1f] }
  0x2d   : > { %4380 = vmatmul.mubr.msk.f32.gmra.mrb[14].mxu1 %vm219_vm1, %v4915_v11  ;;  %4386 = vmatmul.mubr.msk.f32.gmra.mrb[14].mxu0 %vm219_vm1, %v4915_v11 }
  0x2e   : > { %774 = vmatprep.mubr.f32.mxu1 %v4843_v4  ;;  %863 = vmatprep.mubr.f32.mxu0 %v4843_v4 }
  0x31   : > { %4381 = vmatmul.mubr.msk.f32.gmra.mrb[16].mxu1 %vm219_vm1, %v4901_v8  ;;  %4387 = vmatmul.mubr.msk.f32.gmra.mrb[16].mxu0 %vm219_vm1, %v4901_v8 }
  0x32   : > { %780 = vmatprep.mubr.f32.mxu1 %v4843_v4  ;;  %869 = vmatprep.mubr.f32.mxu0 %v4843_v4 }
  0x35   : > { %4382 = vmatmul.mubr.msk.f32.gmra.mrb[18].mxu1 %vm219_vm1, %v4917_v12  ;;  %4388 = vmatmul.mubr.msk.f32.gmra.mrb[18].mxu0 %vm219_vm1, %v4917_v12 }
  0x36   : > { %940 = vmatprep.mubr.f32.mxu1 %v4843_v4  ;;  %1029 = vmatprep.mubr.f32.mxu0 %v4843_v4 }
  0x39   : > { %4391 = vmatmul.mubr.msk.f32.vlgmr.msra.gmra.mrb[20].mxu1 %vm219_vm1, %v4899_v7  ;;  %4397 = vmatmul.mubr.msk.f32.vlgmr.msra.gmra.mrb[20].mxu0 %vm219_vm1, %v4899_v7 }
  0x3a   : > { %4402 = vmatpush1.msk.msra.mxu1 %vm232_vm0, %v167_v21  ;;  %4408 = vmatpush1.msk.msra.mxu0 %vm232_vm0, %v169_v22 }
  0x3b   : > { %946 = vmatprep.mubr.f32.mxu1 %v4843_v4  ;;  %1035 = vmatprep.mubr.f32.mxu0 %v4843_v4 }
  0x3c   : > { %4413 = vmatprep.subr.msk.mxu1 %vm232_vm0, %v172_v23  ;;  %4419 = vmatprep.subr.msk.mxu0 %vm232_vm0, %v174_v24 }
  0x3d   : > { %4392 = vmatmul.mubr.msk.f32.gmra.mrb[22].mxu1 %vm219_vm1, %v4915_v11  ;;  %4398 = vmatmul.mubr.msk.f32.gmra.mrb[22].mxu0 %vm219_vm1, %v4915_v11 }
  0x3e   : > { %952 = vmatprep.mubr.f32.mxu1 %v4843_v4  ;;  %1041 = vmatprep.mubr.f32.mxu0 %v4843_v4 }
  0x41   : > { %4393 = vmatmul.mubr.msk.f32.gmra.mrb[24].mxu1 %vm219_vm1, %v4901_v8  ;;  %4399 = vmatmul.mubr.msk.f32.gmra.mrb[24].mxu0 %vm219_vm1, %v4901_v8 }
  0x42   : > { %958 = vmatprep.mubr.f32.mxu1 %v4843_v4  ;;  %1047 = vmatprep.mubr.f32.mxu0 %v4843_v4 }
  0x45   : > { %4394 = vmatmul.mubr.msk.f32.gmra.mrb[26].mxu1 %vm219_vm1, %v4917_v12  ;;  %4400 = vmatmul.mubr.msk.f32.gmra.mrb[26].mxu0 %vm219_vm1, %v4917_v12 }
  0x46   : > { %1118 = vmatprep.mubr.f32.mxu1 %v4843_v4  ;;  %1207 = vmatprep.mubr.f32.mxu0 %v4843_v4 }
  0x49   : > { %4403 = vmatmul.mubr.msk.f32.vlgmr.msra.gmra.mrb[28].mxu1 %vm219_vm1, %v4899_v7  ;;  %4409 = vmatmul.mubr.msk.f32.vlgmr.msra.gmra.mrb[28].mxu0 %vm219_vm1, %v4899_v7 }
  0x4a   : > { %4414 = vmatpush1.msk.msra.mxu1 %vm232_vm0, %v171_v25  ;;  %4420 = vmatpush1.msk.msra.mxu0 %vm232_vm0, %v173_v26 }
  0x4b   : > { %1124 = vmatprep.mubr.f32.mxu1 %v4843_v4  ;;  %1213 = vmatprep.mubr.f32.mxu0 %v4843_v4 }
  0x4c   : > { %4425 = vmatprep.subr.msk.mxu1 %vm232_vm0, %v176_v27  ;;  %4431 = vmatprep.subr.msk.mxu0 %vm232_vm0, %v178_v28 }
  0x4d   : > { %4404 = vmatmul.mubr.msk.f32.gmra.mrb[30].mxu1 %vm219_vm1, %v4915_v11  ;;  %4410 = vmatmul.mubr.msk.f32.gmra.mrb[30].mxu0 %vm219_vm1, %v4915_v11 }
  0x4e   : > { %1130 = vmatprep.mubr.f32.mxu1 %v4843_v4  ;;  %1219 = vmatprep.mubr.f32.mxu0 %v4843_v4 }
  0x51   : > { %4405 = vmatmul.mubr.msk.f32.gmra.mrb[32].mxu1 %vm219_vm1, %v4901_v8  ;;  %4411 = vmatmul.mubr.msk.f32.gmra.mrb[32].mxu0 %vm219_vm1, %v4901_v8 }
  0x52   : > { %1136 = vmatprep.mubr.f32.mxu1 %v4843_v4  ;;  %1225 = vmatprep.mubr.f32.mxu0 %v4843_v4 }
  0x55   : > { %4406 = vmatmul.mubr.msk.f32.gmra.mrb[34].mxu1 %vm219_vm1, %v4917_v12  ;;  %4412 = vmatmul.mubr.msk.f32.gmra.mrb[34].mxu0 %vm219_vm1, %v4917_v12 }
  0x56   : > { %1296 = vmatprep.mubr.f32.mxu1 %v4843_v4  ;;  %1385 = vmatprep.mubr.f32.mxu0 %v4843_v4 }
  0x59   : > { %4415 = vmatmul.mubr.msk.f32.vlgmr.msra.gmra.mrb[36].mxu1 %vm219_vm1, %v4899_v7  ;;  %4421 = vmatmul.mubr.msk.f32.vlgmr.msra.gmra.mrb[36].mxu0 %vm219_vm1, %v4899_v7 }
  0x5a   : > { %4426 = vmatpush1.msk.msra.mxu1 %vm232_vm0, %v175_v29  ;;  %4432 = vmatpush1.msk.msra.mxu0 %vm232_vm0, %v177_v30 }
  0x5b   : > { %1302 = vmatprep.mubr.f32.mxu1 %v4843_v4  ;;  %1391 = vmatprep.mubr.f32.mxu0 %v4843_v4 }
  0x5c   : > { %4437 = vmatprep.subr.msk.mxu1 %vm232_vm0, %v180_v31  ;;  %4443 = vmatprep.subr.msk.mxu0 %vm232_vm0, %v182_v32 }
  0x5d   : > { %4416 = vmatmul.mubr.msk.f32.gmra.mrb[38].mxu1 %vm219_vm1, %v4915_v11  ;;  %4422 = vmatmul.mubr.msk.f32.gmra.mrb[38].mxu0 %vm219_vm1, %v4915_v11 }
  0x5e   : > { %1308 = vmatprep.mubr.f32.mxu1 %v4843_v4  ;;  %1397 = vmatprep.mubr.f32.mxu0 %v4843_v4 }
  0x61   : > { %4417 = vmatmul.mubr.msk.f32.gmra.mrb[40].mxu1 %vm219_vm1, %v4901_v8  ;;  %4423 = vmatmul.mubr.msk.f32.gmra.mrb[40].mxu0 %vm219_vm1, %v4901_v8 }
  0x62   : > { %1314 = vmatprep.mubr.f32.mxu1 %v4843_v4  ;;  %1403 = vmatprep.mubr.f32.mxu0 %v4843_v4 }
  0x65   : > { %4418 = vmatmul.mubr.msk.f32.gmra.mrb[42].mxu1 %vm219_vm1, %v4917_v12  ;;  %4424 = vmatmul.mubr.msk.f32.gmra.mrb[42].mxu0 %vm219_vm1, %v4917_v12 }
  0x66   : > { %1474 = vmatprep.mubr.f32.mxu1 %v4843_v4  ;;  %1563 = vmatprep.mubr.f32.mxu0 %v4843_v4 }
  0x69   : > { %4427 = vmatmul.mubr.msk.f32.vlgmr.msra.gmra.mrb[44].mxu1 %vm219_vm1, %v4899_v7  ;;  %4433 = vmatmul.mubr.msk.f32.vlgmr.msra.gmra.mrb[44].mxu0 %vm219_vm1, %v4899_v7 }
  0x6a   : > { %4438 = vmatpush1.msk.msra.mxu1 %vm232_vm0, %v179_v33  ;;  %4444 = vmatpush1.msk.msra.mxu0 %vm232_vm0, %v181_v34 }
  0x6b   : > { %1480 = vmatprep.mubr.f32.mxu1 %v4843_v4  ;;  %1569 = vmatprep.mubr.f32.mxu0 %v4843_v4 }
  0x6c   : > { %4449 = vmatprep.subr.msk.mxu1 %vm232_vm0, %v184_v35  ;;  %4455 = vmatprep.subr.msk.mxu0 %vm232_vm0, %v186_v36 }
  0x6d   : > { %4428 = vmatmul.mubr.msk.f32.gmra.mrb[46].mxu1 %vm219_vm1, %v4915_v11  ;;  %4434 = vmatmul.mubr.msk.f32.gmra.mrb[46].mxu0 %vm219_vm1, %v4915_v11 }
  0x6e   : > { %1486 = vmatprep.mubr.f32.mxu1 %v4843_v4  ;;  %1575 = vmatprep.mubr.f32.mxu0 %v4843_v4 }
  0x71   : > { %4429 = vmatmul.mubr.msk.f32.gmra.mrb[48].mxu1 %vm219_vm1, %v4901_v8  ;;  %4435 = vmatmul.mubr.msk.f32.gmra.mrb[48].mxu0 %vm219_vm1, %v4901_v8 }
  0x72   : > { %1492 = vmatprep.mubr.f32.mxu1 %v4843_v4  ;;  %1581 = vmatprep.mubr.f32.mxu0 %v4843_v4 }
  0x75   : > { %4430 = vmatmul.mubr.msk.f32.gmra.mrb[50].mxu1 %vm219_vm1, %v4917_v12  ;;  %4436 = vmatmul.mubr.msk.f32.gmra.mrb[50].mxu0 %vm219_vm1, %v4917_v12 }
  0x76   : > { %1652 = vmatprep.mubr.f32.mxu1 %v4843_v4  ;;  %1741 = vmatprep.mubr.f32.mxu0 %v4843_v4 }
  0x79   : > { %4439 = vmatmul.mubr.msk.f32.vlgmr.msra.gmra.mrb[52].mxu1 %vm219_vm1, %v4899_v7  ;;  %4445 = vmatmul.mubr.msk.f32.vlgmr.msra.gmra.mrb[52].mxu0 %vm219_vm1, %v4899_v7 }
  0x7a   : > { %4450 = vmatpush1.msk.msra.mxu1 %vm232_vm0, %v183_v37  ;;  %4456 = vmatpush1.msk.msra.mxu0 %vm232_vm0, %v185_v38 }
  0x7b   : > { %1658 = vmatprep.mubr.f32.mxu1 %v4843_v4  ;;  %1747 = vmatprep.mubr.f32.mxu0 %v4843_v4 }
  0x7c   : > { %4461 = vmatprep.subr.msk.mxu1 %vm232_vm0, %v188_v39  ;;  %4467 = vmatprep.subr.msk.mxu0 %vm232_vm0, %v190_v40  ;;  %v215_v40 = vld [vmem:[%s5685_s1 + $0x1f0] sm:$0x1f] }
  0x7d   : > { %4440 = vmatmul.mubr.msk.f32.gmra.mrb[54].mxu1 %vm219_vm1, %v4915_v11  ;;  %4446 = vmatmul.mubr.msk.f32.gmra.mrb[54].mxu0 %vm219_vm1, %v4915_v11 }
  0x7e   : > { %1664 = vmatprep.mubr.f32.mxu1 %v4843_v4  ;;  %1753 = vmatprep.mubr.f32.mxu0 %v4843_v4 }
  0x81   : > { %4441 = vmatmul.mubr.msk.f32.gmra.mrb[56].mxu1 %vm219_vm1, %v4901_v8  ;;  %4447 = vmatmul.mubr.msk.f32.gmra.mrb[56].mxu0 %vm219_vm1, %v4901_v8 }
  0x82   : > { %1670 = vmatprep.mubr.f32.mxu1 %v4843_v4  ;;  %1759 = vmatprep.mubr.f32.mxu0 %v4843_v4 }
  0x85   : > { %4442 = vmatmul.mubr.msk.f32.gmra.mrb[58].mxu1 %vm219_vm1, %v4917_v12  ;;  %4448 = vmatmul.mubr.msk.f32.gmra.mrb[58].mxu0 %vm219_vm1, %v4917_v12 }
  0x86   : > { %1830 = vmatprep.mubr.f32.mxu1 %v4843_v4  ;;  %1919 = vmatprep.mubr.f32.mxu0 %v4843_v4 }
  0x89   : > { %4451 = vmatmul.mubr.msk.f32.vlgmr.msra.gmra.mrb[60].mxu1 %vm219_vm1, %v4899_v7  ;;  %4457 = vmatmul.mubr.msk.f32.vlgmr.msra.gmra.mrb[60].mxu0 %vm219_vm1, %v4899_v7 }
  0x8a   : > { %4462 = vmatpush1.msk.msra.mxu1 %vm232_vm0, %v187_v41  ;;  %4468 = vmatpush1.msk.msra.mxu0 %vm232_vm0, %v189_v42  ;;  %v217_v41 = vld [vmem:[%s5685_s1 + $0x200] sm:$0x1f] }
  0x8b   : > { %1836 = vmatprep.mubr.f32.mxu1 %v4843_v4  ;;  %1925 = vmatprep.mubr.f32.mxu0 %v4843_v4 }
  0x8c   : > { %4473 = vmatprep.subr.msk.mxu1 %vm232_vm0, %v192_v43  ;;  %4479 = vmatprep.subr.msk.mxu0 %vm232_vm0, %v194_v44 }
  0x8d   : > { %4452 = vmatmul.mubr.msk.f32.gmra.mrb[62].mxu1 %vm219_vm1, %v4915_v11  ;;  %4458 = vmatmul.mubr.msk.f32.gmra.mrb[62].mxu0 %vm219_vm1, %v4915_v11 }
  0x8e   : > { %1842 = vmatprep.mubr.f32.mxu1 %v4843_v4  ;;  %1931 = vmatprep.mubr.f32.mxu0 %v4843_v4 }
  0x91   : > { %4453 = vmatmul.mubr.msk.f32.gmra.mrb[64].mxu1 %vm219_vm1, %v4901_v8  ;;  %4459 = vmatmul.mubr.msk.f32.gmra.mrb[64].mxu0 %vm219_vm1, %v4901_v8 }
  0x92   : > { %1848 = vmatprep.mubr.f32.mxu1 %v4843_v4  ;;  %1937 = vmatprep.mubr.f32.mxu0 %v4843_v4 }
  0x95   : > { %4454 = vmatmul.mubr.msk.f32.gmra.mrb[66].mxu1 %vm219_vm1, %v4917_v12  ;;  %4460 = vmatmul.mubr.msk.f32.gmra.mrb[66].mxu0 %vm219_vm1, %v4917_v12 }
  0x96   : > { %2008 = vmatprep.mubr.f32.mxu1 %v4843_v4  ;;  %2097 = vmatprep.mubr.f32.mxu0 %v4843_v4 }
  0x99   : > { %4463 = vmatmul.mubr.msk.f32.vlgmr.msra.gmra.mrb[68].mxu1 %vm219_vm1, %v4899_v7  ;;  %4469 = vmatmul.mubr.msk.f32.vlgmr.msra.gmra.mrb[68].mxu0 %vm219_vm1, %v4899_v7 }
  0x9a   : > { %4474 = vmatpush1.msk.msra.mxu1 %vm232_vm0, %v191_v45  ;;  %4480 = vmatpush1.msk.msra.mxu0 %vm232_vm0, %v193_v46 }
  0x9b   : > { %2014 = vmatprep.mubr.f32.mxu1 %v4843_v4  ;;  %2103 = vmatprep.mubr.f32.mxu0 %v4843_v4 }
  0x9c   : > { %4485 = vmatprep.subr.msk.mxu1 %vm232_vm0, %v196_v47  ;;  %4491 = vmatprep.subr.msk.mxu0 %vm232_vm0, %v198_v48 }
  0x9d   : > { %4464 = vmatmul.mubr.msk.f32.gmra.mrb[70].mxu1 %vm219_vm1, %v4915_v11  ;;  %4470 = vmatmul.mubr.msk.f32.gmra.mrb[70].mxu0 %vm219_vm1, %v4915_v11 }
  0x9e   : > { %2020 = vmatprep.mubr.f32.mxu1 %v4843_v4  ;;  %2109 = vmatprep.mubr.f32.mxu0 %v4843_v4 }
  0xa1   : > { %4465 = vmatmul.mubr.msk.f32.gmra.mrb[72].mxu1 %vm219_vm1, %v4901_v8  ;;  %4471 = vmatmul.mubr.msk.f32.gmra.mrb[72].mxu0 %vm219_vm1, %v4901_v8 }
  0xa2   : > { %2026 = vmatprep.mubr.f32.mxu1 %v4843_v4  ;;  %2115 = vmatprep.mubr.f32.mxu0 %v4843_v4 }
  0xa5   : > { %4466 = vmatmul.mubr.msk.f32.gmra.mrb[74].mxu1 %vm219_vm1, %v4917_v12  ;;  %4472 = vmatmul.mubr.msk.f32.gmra.mrb[74].mxu0 %vm219_vm1, %v4917_v12 }
  0xa6   : > { %2186 = vmatprep.mubr.f32.mxu1 %v4843_v4  ;;  %2275 = vmatprep.mubr.f32.mxu0 %v4843_v4 }
  0xa9   : > { %4475 = vmatmul.mubr.msk.f32.vlgmr.msra.gmra.mrb[76].mxu1 %vm219_vm1, %v4899_v7  ;;  %4481 = vmatmul.mubr.msk.f32.vlgmr.msra.gmra.mrb[76].mxu0 %vm219_vm1, %v4899_v7 }
  0xaa   : > { %4486 = vmatpush1.msk.msra.mxu1 %vm232_vm0, %v195_v49  ;;  %4492 = vmatpush1.msk.msra.mxu0 %vm232_vm0, %v197_v50 }
  0xab   : > { %2192 = vmatprep.mubr.f32.mxu1 %v4843_v4  ;;  %2281 = vmatprep.mubr.f32.mxu0 %v4843_v4 }
  0xac   : > { %4497 = vmatprep.subr.msk.mxu1 %vm232_vm0, %v200_v51  ;;  %4503 = vmatprep.subr.msk.mxu0 %vm232_vm0, %v202_v52 }
  0xad   : > { %4476 = vmatmul.mubr.msk.f32.gmra.mrb[78].mxu1 %vm219_vm1, %v4915_v11  ;;  %4482 = vmatmul.mubr.msk.f32.gmra.mrb[78].mxu0 %vm219_vm1, %v4915_v11 }
  0xae   : > { %2198 = vmatprep.mubr.f32.mxu1 %v4843_v4  ;;  %2287 = vmatprep.mubr.f32.mxu0 %v4843_v4 }
  0xb1   : > { %4477 = vmatmul.mubr.msk.f32.gmra.mrb[80].mxu1 %vm219_vm1, %v4901_v8  ;;  %4483 = vmatmul.mubr.msk.f32.gmra.mrb[80].mxu0 %vm219_vm1, %v4901_v8 }
  0xb2   : > { %2204 = vmatprep.mubr.f32.mxu1 %v4843_v4  ;;  %2293 = vmatprep.mubr.f32.mxu0 %v4843_v4 }
  0xb5   : > { %4478 = vmatmul.mubr.msk.f32.gmra.mrb[82].mxu1 %vm219_vm1, %v4917_v12  ;;  %4484 = vmatmul.mubr.msk.f32.gmra.mrb[82].mxu0 %vm219_vm1, %v4917_v12 }
  0xb6   : > { %2364 = vmatprep.mubr.f32.mxu1 %v4843_v4  ;;  %2453 = vmatprep.mubr.f32.mxu0 %v4843_v4 }
  0xb9   : > { %4487 = vmatmul.mubr.msk.f32.vlgmr.msra.gmra.mrb[84].mxu1 %vm219_vm1, %v4899_v7  ;;  %4493 = vmatmul.mubr.msk.f32.vlgmr.msra.gmra.mrb[84].mxu0 %vm219_vm1, %v4899_v7 }
  0xba   : > { %4498 = vmatpush1.msk.msra.mxu1 %vm232_vm0, %v199_v53  ;;  %4504 = vmatpush1.msk.msra.mxu0 %vm232_vm0, %v201_v54 }
  0xbb   : > { %2370 = vmatprep.mubr.f32.mxu1 %v4843_v4  ;;  %2459 = vmatprep.mubr.f32.mxu0 %v4843_v4 }
  0xbc   : > { %4509 = vmatprep.subr.msk.mxu1 %vm232_vm0, %v204_v55  ;;  %4515 = vmatprep.subr.msk.mxu0 %vm232_vm0, %v206_v56 }
  0xbd   : > { %4488 = vmatmul.mubr.msk.f32.gmra.mrb[86].mxu1 %vm219_vm1, %v4915_v11  ;;  %4494 = vmatmul.mubr.msk.f32.gmra.mrb[86].mxu0 %vm219_vm1, %v4915_v11 }
  0xbe   : > { %2376 = vmatprep.mubr.f32.mxu1 %v4843_v4  ;;  %2465 = vmatprep.mubr.f32.mxu0 %v4843_v4 }
  0xc1   : > { %4489 = vmatmul.mubr.msk.f32.gmra.mrb[88].mxu1 %vm219_vm1, %v4901_v8  ;;  %4495 = vmatmul.mubr.msk.f32.gmra.mrb[88].mxu0 %vm219_vm1, %v4901_v8 }
  0xc2   : > { %2382 = vmatprep.mubr.f32.mxu1 %v4843_v4  ;;  %2471 = vmatprep.mubr.f32.mxu0 %v4843_v4 }
  0xc5   : > { %4490 = vmatmul.mubr.msk.f32.gmra.mrb[90].mxu1 %vm219_vm1, %v4917_v12  ;;  %4496 = vmatmul.mubr.msk.f32.gmra.mrb[90].mxu0 %vm219_vm1, %v4917_v12 }
  0xc6   : > { %2542 = vmatprep.mubr.f32.mxu1 %v4843_v4  ;;  %2631 = vmatprep.mubr.f32.mxu0 %v4843_v4 }
  0xc9   : > { %4499 = vmatmul.mubr.msk.f32.vlgmr.msra.gmra.mrb[92].mxu1 %vm219_vm1, %v4899_v7  ;;  %4505 = vmatmul.mubr.msk.f32.vlgmr.msra.gmra.mrb[92].mxu0 %vm219_vm1, %v4899_v7 }
  0xca   : > { %4510 = vmatpush1.msk.msra.mxu1 %vm232_vm0, %v203_v57  ;;  %4516 = vmatpush1.msk.msra.mxu0 %vm232_vm0, %v205_v58 }
  0xcb   : > { %2548 = vmatprep.mubr.f32.mxu1 %v4843_v4  ;;  %2637 = vmatprep.mubr.f32.mxu0 %v4843_v4 }
  0xcc   : > { %4521 = vmatprep.subr.msk.mxu1 %vm232_vm0, %v208_v59  ;;  %4527 = vmatprep.subr.msk.mxu0 %vm232_vm0, %v210_v60 }
  0xcd   : > { %4500 = vmatmul.mubr.msk.f32.gmra.mrb[94].mxu1 %vm219_vm1, %v4915_v11  ;;  %4506 = vmatmul.mubr.msk.f32.gmra.mrb[94].mxu0 %vm219_vm1, %v4915_v11 }
  0xce   : > { %2554 = vmatprep.mubr.f32.mxu1 %v4843_v4  ;;  %2643 = vmatprep.mubr.f32.mxu0 %v4843_v4 }
  0xd1   : > { %4501 = vmatmul.mubr.msk.f32.gmra.mrb[96].mxu1 %vm219_vm1, %v4901_v8  ;;  %4507 = vmatmul.mubr.msk.f32.gmra.mrb[96].mxu0 %vm219_vm1, %v4901_v8 }
  0xd2   : > { %2560 = vmatprep.mubr.f32.mxu1 %v4843_v4  ;;  %2649 = vmatprep.mubr.f32.mxu0 %v4843_v4 }
  0xd5   : > { %4502 = vmatmul.mubr.msk.f32.gmra.mrb[98].mxu1 %vm219_vm1, %v4917_v12  ;;  %4508 = vmatmul.mubr.msk.f32.gmra.mrb[98].mxu0 %vm219_vm1, %v4917_v12 }
  0xd6   : > { %2720 = vmatprep.mubr.f32.mxu1 %v4843_v4  ;;  %2809 = vmatprep.mubr.f32.mxu0 %v4843_v4 }
  0xd9   : > { %4511 = vmatmul.mubr.msk.f32.vlgmr.msra.gmra.mrb[100].mxu1 %vm219_vm1, %v4899_v7  ;;  %4517 = vmatmul.mubr.msk.f32.vlgmr.msra.gmra.mrb[100].mxu0 %vm219_vm1, %v4899_v7 }
  0xda   : > { %4522 = vmatpush1.msk.msra.mxu1 %vm232_vm0, %v207_v61  ;;  %4528 = vmatpush1.msk.msra.mxu0 %vm232_vm0, %v209_v62 }
  0xdb   : > { %2726 = vmatprep.mubr.f32.mxu1 %v4843_v4  ;;  %2815 = vmatprep.mubr.f32.mxu0 %v4843_v4 }
  0xdc   : > { %4533 = vmatprep.subr.msk.mxu1 %vm232_vm0, %v212_v63  ;;  %4539 = vmatprep.subr.msk.mxu0 %vm232_vm0, %v214_v0 }
  0xdd   : > { %4512 = vmatmul.mubr.msk.f32.gmra.mrb[102].mxu1 %vm219_vm1, %v4915_v11  ;;  %4518 = vmatmul.mubr.msk.f32.gmra.mrb[102].mxu0 %vm219_vm1, %v4915_v11 }
  0xde   : > { %2732 = vmatprep.mubr.f32.mxu1 %v4843_v4  ;;  %2821 = vmatprep.mubr.f32.mxu0 %v4843_v4 }
  0xe1   : > { %4513 = vmatmul.mubr.msk.f32.gmra.mrb[104].mxu1 %vm219_vm1, %v4901_v8  ;;  %4519 = vmatmul.mubr.msk.f32.gmra.mrb[104].mxu0 %vm219_vm1, %v4901_v8 }
  0xe2   : > { %2738 = vmatprep.mubr.f32.mxu1 %v4843_v4  ;;  %2827 = vmatprep.mubr.f32.mxu0 %v4843_v4 }
  0xe4   : > { %v497_v1 = vpop.f32.mrb[0].mxu0  ;;  %v509_v2 = vpop.f32.mrb[0].mxu1 }
  0xe5   : > { %v499_v3 = vpop.f32.mrb[1].mxu0  ;;  %v511_v5 = vpop.f32.mrb[1].mxu1  ;;  %4514 = vmatmul.mubr.msk.f32.gmra.mrb[106].mxu1 %vm219_vm1, %v4917_v12  ;;  %4520 = vmatmul.mubr.msk.f32.gmra.mrb[106].mxu0 %vm219_vm1, %v4917_v12 }
  0xe6   : > { %v4691_v6 = vpack.c.bf16 %v499_v3, %v497_v1  ;;  %v4757_v9 = vpack.c.bf16 %v511_v5, %v509_v2  ;;  %2898 = vmatprep.mubr.f32.mxu1 %v4843_v4  ;;  %2987 = vmatprep.mubr.f32.mxu0 %v4843_v4 }
  0xe8   : > { %4160 = vst [vmem:[%s5447_s7] sm:$0xff] %v4691_v6  ;;  %v503_v14 = vpop.f32.mrb[2].mxu0  ;;  %v515_v15 = vpop.f32.mrb[2].mxu1  ;;  %4226 = vst [vmem:[%s5447_s7 + $0x210] sm:$0xff] %v4757_v9 }
  0xe9   : > { %v505_v16 = vpop.f32.mrb[3].mxu0  ;;  %v517_v17 = vpop.f32.mrb[3].mxu1  ;;  %4523 = vmatmul.mubr.msk.f32.vlgmr.msra.gmra.mrb[108].mxu1 %vm219_vm1, %v4899_v7  ;;  %4529 = vmatmul.mubr.msk.f32.vlgmr.msra.gmra.mrb[108].mxu0 %vm219_vm1, %v4899_v7 }
  0xea   : > { %v4724_v20 = vpack.c.bf16 %v505_v16, %v503_v14  ;;  %v4790_v21 = vpack.c.bf16 %v517_v17, %v515_v15  ;;  %4534 = vmatpush1.msk.msra.mxu1 %vm232_vm0, %v211_v10  ;;  %4540 = vmatpush1.msk.msra.mxu0 %vm232_vm0, %v213_v13 }
  0xeb   : > { %2904 = vmatprep.mubr.f32.mxu1 %v4843_v4  ;;  %2993 = vmatprep.mubr.f32.mxu0 %v4843_v4 }
  0xec   : > { %4193 = vst [vmem:[%s5447_s7 + $0x108] sm:$0xff] %v4724_v20  ;;  %v586_v22 = vpop.f32.mrb[4].mxu1  ;;  %v675_v23 = vpop.f32.mrb[4].mxu0  ;;  %4545 = vmatprep.subr.msk.mxu1 %vm232_vm0, %v216_v18  ;;  %4551 = vmatprep.subr.msk.mxu0 %vm232_vm0, %v218_v19  ;;  %4259 = vst [vmem:[%s5447_s7 + $0x318] sm:$0xff] %v4790_v21 }
  0xed   : > { %v588_v24 = vpop.f32.mrb[5].mxu1  ;;  %v677_v25 = vpop.f32.mrb[5].mxu0  ;;  %4524 = vmatmul.mubr.msk.f32.gmra.mrb[110].mxu1 %vm219_vm1, %v4915_v11  ;;  %4530 = vmatmul.mubr.msk.f32.gmra.mrb[110].mxu0 %vm219_vm1, %v4915_v11 }
  0xee   : > { %v4692_v26 = vpack.c.bf16 %v588_v24, %v586_v22  ;;  %v4693_v27 = vpack.c.bf16 %v677_v25, %v675_v23  ;;  %2910 = vmatprep.mubr.f32.mxu1 %v4843_v4  ;;  %2999 = vmatprep.mubr.f32.mxu0 %v4843_v4 }
  0xf0   : > { %4161 = vst [vmem:[%s5447_s7 + $0x8] sm:$0xff] %v4692_v26  ;;  %4162 = vst [vmem:[%s5447_s7 + $0x10] sm:$0xff] %v4693_v27  ;;  %v592_v28 = vpop.f32.mrb[6].mxu1  ;;  %v681_v29 = vpop.f32.mrb[6].mxu0 }
  0xf1   : > { %v594_v30 = vpop.f32.mrb[7].mxu1  ;;  %v683_v31 = vpop.f32.mrb[7].mxu0  ;;  %4525 = vmatmul.mubr.msk.f32.gmra.mrb[112].mxu1 %vm219_vm1, %v4901_v8  ;;  %4531 = vmatmul.mubr.msk.f32.gmra.mrb[112].mxu0 %vm219_vm1, %v4901_v8 }
  0xf2   : > { %v4725_v32 = vpack.c.bf16 %v594_v30, %v592_v28  ;;  %v4726_v33 = vpack.c.bf16 %v683_v31, %v681_v29  ;;  %2916 = vmatprep.mubr.f32.mxu1 %v4843_v4  ;;  %3005 = vmatprep.mubr.f32.mxu0 %v4843_v4 }
  0xf4   : > { %4194 = vst [vmem:[%s5447_s7 + $0x110] sm:$0xff] %v4725_v32  ;;  %4195 = vst [vmem:[%s5447_s7 + $0x118] sm:$0xff] %v4726_v33  ;;  %v598_v34 = vpop.f32.mrb[8].mxu1  ;;  %v687_v35 = vpop.f32.mrb[8].mxu0 }
  0xf5   : > { %v600_v36 = vpop.f32.mrb[9].mxu1  ;;  %v689_v37 = vpop.f32.mrb[9].mxu0  ;;  %4526 = vmatmul.mubr.msk.f32.gmra.mrb[114].mxu1 %vm219_vm1, %v4917_v12  ;;  %4532 = vmatmul.mubr.msk.f32.gmra.mrb[114].mxu0 %vm219_vm1, %v4917_v12 }
  0xf6   : > { %v4758_v38 = vpack.c.bf16 %v600_v36, %v598_v34  ;;  %v4759_v39 = vpack.c.bf16 %v689_v37, %v687_v35  ;;  %3076 = vmatprep.mubr.f32.mxu1 %v4843_v4  ;;  %3165 = vmatprep.mubr.f32.mxu0 %v4843_v4 }
  0xf8   : > { %4227 = vst [vmem:[%s5447_s7 + $0x218] sm:$0xff] %v4758_v38  ;;  %4228 = vst [vmem:[%s5447_s7 + $0x220] sm:$0xff] %v4759_v39  ;;  %v604_v42 = vpop.f32.mrb[10].mxu1  ;;  %v693_v43 = vpop.f32.mrb[10].mxu0 }
  0xf9   : > { %v606_v44 = vpop.f32.mrb[11].mxu1  ;;  %v695_v45 = vpop.f32.mrb[11].mxu0  ;;  %4535 = vmatmul.mubr.msk.f32.vlgmr.msra.gmra.mrb[116].mxu1 %vm219_vm1, %v4899_v7  ;;  %4541 = vmatmul.mubr.msk.f32.vlgmr.msra.gmra.mrb[116].mxu0 %vm219_vm1, %v4899_v7 }
  0xfa   : > { %v4791_v46 = vpack.c.bf16 %v606_v44, %v604_v42  ;;  %v4792_v47 = vpack.c.bf16 %v695_v45, %v693_v43  ;;  %4546 = vmatpush1.msk.msra.mxu1 %vm232_vm0, %v215_v40  ;;  %4552 = vmatpush1.msk.msra.mxu0 %vm232_vm0, %v217_v41 }
  0xfb   : > { %3082 = vmatprep.mubr.f32.mxu1 %v4843_v4  ;;  %3171 = vmatprep.mubr.f32.mxu0 %v4843_v4 }
  0xfc   : > { %4260 = vst [vmem:[%s5447_s7 + $0x320] sm:$0xff] %v4791_v46  ;;  %4261 = vst [vmem:[%s5447_s7 + $0x328] sm:$0xff] %v4792_v47  ;;  %v764_v48 = vpop.f32.mrb[12].mxu1  ;;  %v853_v49 = vpop.f32.mrb[12].mxu0 }
  0xfd   : > { %v766_v50 = vpop.f32.mrb[13].mxu1  ;;  %v855_v51 = vpop.f32.mrb[13].mxu0  ;;  %4536 = vmatmul.mubr.msk.f32.gmra.mrb[118].mxu1 %vm219_vm1, %v4915_v11  ;;  %4542 = vmatmul.mubr.msk.f32.gmra.mrb[118].mxu0 %vm219_vm1, %v4915_v11 }
  0xfe   : > { %v4694_v52 = vpack.c.bf16 %v766_v50, %v764_v48  ;;  %v4695_v53 = vpack.c.bf16 %v855_v51, %v853_v49  ;;  %3088 = vmatprep.mubr.f32.mxu1 %v4843_v4  ;;  %3177 = vmatprep.mubr.f32.mxu0 %v4843_v4 }
 0x100   : > { %4163 = vst [vmem:[%s5447_s7 + $0x18] sm:$0xff] %v4694_v52  ;;  %4164 = vst [vmem:[%s5447_s7 + $0x20] sm:$0xff] %v4695_v53  ;;  %v770_v54 = vpop.f32.mrb[14].mxu1  ;;  %v859_v55 = vpop.f32.mrb[14].mxu0 }
 0x101   : > { %v772_v56 = vpop.f32.mrb[15].mxu1  ;;  %v861_v57 = vpop.f32.mrb[15].mxu0  ;;  %4537 = vmatmul.mubr.msk.f32.gmra.mrb[120].mxu1 %vm219_vm1, %v4901_v8  ;;  %4543 = vmatmul.mubr.msk.f32.gmra.mrb[120].mxu0 %vm219_vm1, %v4901_v8 }
 0x102   : > { %v4727_v58 = vpack.c.bf16 %v772_v56, %v770_v54  ;;  %v4728_v59 = vpack.c.bf16 %v861_v57, %v859_v55  ;;  %3094 = vmatprep.mubr.f32.mxu1 %v4843_v4  ;;  %3183 = vmatprep.mubr.f32.mxu0 %v4843_v4 }
 0x104   : > { %4196 = vst [vmem:[%s5447_s7 + $0x120] sm:$0xff] %v4727_v58  ;;  %4197 = vst [vmem:[%s5447_s7 + $0x128] sm:$0xff] %v4728_v59  ;;  %v776_v60 = vpop.f32.mrb[16].mxu1  ;;  %v865_v61 = vpop.f32.mrb[16].mxu0 }
 0x105   : > { %v778_v62 = vpop.f32.mrb[17].mxu1  ;;  %v867_v63 = vpop.f32.mrb[17].mxu0  ;;  %4538 = vmatmul.mubr.msk.f32.gmra.mrb[122].mxu1 %vm219_vm1, %v4917_v12  ;;  %4544 = vmatmul.mubr.msk.f32.gmra.mrb[122].mxu0 %vm219_vm1, %v4917_v12 }
 0x106   : > { %v4760_v0 = vpack.c.bf16 %v778_v62, %v776_v60  ;;  %v4761_v1 = vpack.c.bf16 %v867_v63, %v865_v61  ;;  %3254 = vmatprep.mubr.f32.mxu1 %v4843_v4  ;;  %3343 = vmatprep.mubr.f32.mxu0 %v4843_v4 }
 0x108   : > { %4229 = vst [vmem:[%s5447_s7 + $0x228] sm:$0xff] %v4760_v0  ;;  %4230 = vst [vmem:[%s5447_s7 + $0x230] sm:$0xff] %v4761_v1  ;;  %v782_v2 = vpop.f32.mrb[18].mxu1  ;;  %v871_v3 = vpop.f32.mrb[18].mxu0 }
 0x109   : > { %v784_v5 = vpop.f32.mrb[19].mxu1  ;;  %v873_v6 = vpop.f32.mrb[19].mxu0  ;;  %4547 = vmatmul.mubr.msk.f32.vlgmr.msra.gmra.mrb[124].mxu1 %vm219_vm1, %v4899_v7  ;;  %4553 = vmatmul.mubr.msk.f32.vlgmr.msra.gmra.mrb[124].mxu0 %vm219_vm1, %v4899_v7 }
 0x10a   : > { %v4793_v9 = vpack.c.bf16 %v784_v5, %v782_v2  ;;  %v4794_v10 = vpack.c.bf16 %v873_v6, %v871_v3  ;;  %3260 = vmatprep.mubr.f32.mxu1 %v4843_v4  ;;  %3349 = vmatprep.mubr.f32.mxu0 %v4843_v4 }
 0x10c   : > { %4262 = vst [vmem:[%s5447_s7 + $0x330] sm:$0xff] %v4793_v9  ;;  %4263 = vst [vmem:[%s5447_s7 + $0x338] sm:$0xff] %v4794_v10  ;;  %v942_v13 = vpop.f32.mrb[20].mxu1  ;;  %v1031_v14 = vpop.f32.mrb[20].mxu0 }
 0x10d   : > { %v944_v15 = vpop.f32.mrb[21].mxu1  ;;  %v1033_v16 = vpop.f32.mrb[21].mxu0  ;;  %4548 = vmatmul.mubr.msk.f32.gmra.mrb[126].mxu1 %vm219_vm1, %v4915_v11  ;;  %4554 = vmatmul.mubr.msk.f32.gmra.mrb[126].mxu0 %vm219_vm1, %v4915_v11 }
 0x10e   : > { %v4696_v7 = vpack.c.bf16 %v944_v15, %v942_v13  ;;  %v4697_v17 = vpack.c.bf16 %v1033_v16, %v1031_v14  ;;  %3266 = vmatprep.mubr.f32.mxu1 %v4843_v4  ;;  %3355 = vmatprep.mubr.f32.mxu0 %v4843_v4 }
 0x110   : > { %4165 = vst [vmem:[%s5447_s7 + $0x28] sm:$0xff] %v4696_v7  ;;  %4166 = vst [vmem:[%s5447_s7 + $0x30] sm:$0xff] %v4697_v17  ;;  %v948_v18 = vpop.f32.mrb[22].mxu1  ;;  %v1037_v19 = vpop.f32.mrb[22].mxu0 }
 0x111   : > { %v950_v20 = vpop.f32.mrb[23].mxu1  ;;  %v1039_v21 = vpop.f32.mrb[23].mxu0  ;;  %4549 = vmatmul.mubr.msk.f32.gmra.mrb[128].mxu1 %vm219_vm1, %v4901_v8  ;;  %4555 = vmatmul.mubr.msk.f32.gmra.mrb[128].mxu0 %vm219_vm1, %v4901_v8 }
 0x112   : > { %v4729_v11 = vpack.c.bf16 %v950_v20, %v948_v18  ;;  %v4730_v22 = vpack.c.bf16 %v1039_v21, %v1037_v19  ;;  %3272 = vmatprep.mubr.f32.mxu1 %v4843_v4  ;;  %3361 = vmatprep.mubr.f32.mxu0 %v4843_v4 }
 0x114   : > { %4198 = vst [vmem:[%s5447_s7 + $0x130] sm:$0xff] %v4729_v11  ;;  %4199 = vst [vmem:[%s5447_s7 + $0x138] sm:$0xff] %v4730_v22  ;;  %v954_v23 = vpop.f32.mrb[24].mxu1  ;;  %v1043_v24 = vpop.f32.mrb[24].mxu0 }
 0x115   : > { %v956_v25 = vpop.f32.mrb[25].mxu1  ;;  %v1045_v26 = vpop.f32.mrb[25].mxu0  ;;  %4550 = vmatmul.mubr.msk.f32.gmra.mrb[130].mxu1 %vm219_vm1, %v4917_v12  ;;  %4556 = vmatmul.mubr.msk.f32.gmra.mrb[130].mxu0 %vm219_vm1, %v4917_v12 }
 0x116   : > { %v4762_v8 = vpack.c.bf16 %v956_v25, %v954_v23  ;;  %v4763_v27 = vpack.c.bf16 %v1045_v26, %v1043_v24 }
 0x118   : > { %4231 = vst [vmem:[%s5447_s7 + $0x238] sm:$0xff] %v4762_v8  ;;  %4232 = vst [vmem:[%s5447_s7 + $0x240] sm:$0xff] %v4763_v27  ;;  %v960_v4 = vpop.f32.mrb[26].mxu1  ;;  %v1049_v28 = vpop.f32.mrb[26].mxu0 }
 0x119   : > { %v962_v29 = vpop.f32.mrb[27].mxu1  ;;  %v1051_v30 = vpop.f32.mrb[27].mxu0 }
 0x11a   : > { %v4795_v31 = vpack.c.bf16 %v962_v29, %v960_v4  ;;  %v4796_v32 = vpack.c.bf16 %v1051_v30, %v1049_v28 }
 0x11c   : > { %4264 = vst [vmem:[%s5447_s7 + $0x340] sm:$0xff] %v4795_v31  ;;  %4265 = vst [vmem:[%s5447_s7 + $0x348] sm:$0xff] %v4796_v32  ;;  %v1120_v33 = vpop.f32.mrb[28].mxu1  ;;  %v1209_v34 = vpop.f32.mrb[28].mxu0 }
 0x11d   : > { %v1122_v35 = vpop.f32.mrb[29].mxu1  ;;  %v1211_v12 = vpop.f32.mrb[29].mxu0 }
 0x11e   : > { %v4698_v36 = vpack.c.bf16 %v1122_v35, %v1120_v33  ;;  %v4699_v37 = vpack.c.bf16 %v1211_v12, %v1209_v34 }
 0x120   : > { %4167 = vst [vmem:[%s5447_s7 + $0x38] sm:$0xff] %v4698_v36  ;;  %4168 = vst [vmem:[%s5447_s7 + $0x40] sm:$0xff] %v4699_v37  ;;  %v1126_v38 = vpop.f32.mrb[30].mxu1  ;;  %v1215_v39 = vpop.f32.mrb[30].mxu0 }
 0x121   : > { %v1128_v40 = vpop.f32.mrb[31].mxu1  ;;  %v1217_v41 = vpop.f32.mrb[31].mxu0 }
 0x122   : > { %v4731_v42 = vpack.c.bf16 %v1128_v40, %v1126_v38  ;;  %v4732_v43 = vpack.c.bf16 %v1217_v41, %v1215_v39 }
 0x124   : > { %4200 = vst [vmem:[%s5447_s7 + $0x140] sm:$0xff] %v4731_v42  ;;  %4201 = vst [vmem:[%s5447_s7 + $0x148] sm:$0xff] %v4732_v43  ;;  %v1132_v44 = vpop.f32.mrb[32].mxu1  ;;  %v1221_v45 = vpop.f32.mrb[32].mxu0 }
 0x125   : > { %v1134_v46 = vpop.f32.mrb[33].mxu1  ;;  %v1223_v47 = vpop.f32.mrb[33].mxu0 }
 0x126   : > { %v4764_v48 = vpack.c.bf16 %v1134_v46, %v1132_v44  ;;  %v4765_v49 = vpack.c.bf16 %v1223_v47, %v1221_v45 }
 0x128   : > { %4233 = vst [vmem:[%s5447_s7 + $0x248] sm:$0xff] %v4764_v48  ;;  %4234 = vst [vmem:[%s5447_s7 + $0x250] sm:$0xff] %v4765_v49  ;;  %v1138_v50 = vpop.f32.mrb[34].mxu1  ;;  %v1227_v51 = vpop.f32.mrb[34].mxu0 }
 0x129   : > { %v1140_v52 = vpop.f32.mrb[35].mxu1  ;;  %v1229_v53 = vpop.f32.mrb[35].mxu0 }
 0x12a   : > { %v4797_v54 = vpack.c.bf16 %v1140_v52, %v1138_v50  ;;  %v4798_v55 = vpack.c.bf16 %v1229_v53, %v1227_v51 }
 0x12c   : > { %4266 = vst [vmem:[%s5447_s7 + $0x350] sm:$0xff] %v4797_v54  ;;  %4267 = vst [vmem:[%s5447_s7 + $0x358] sm:$0xff] %v4798_v55  ;;  %v1298_v56 = vpop.f32.mrb[36].mxu1  ;;  %v1387_v57 = vpop.f32.mrb[36].mxu0 }
 0x12d   : > { %v1300_v58 = vpop.f32.mrb[37].mxu1  ;;  %v1389_v59 = vpop.f32.mrb[37].mxu0 }
 0x12e   : > { %v4700_v60 = vpack.c.bf16 %v1300_v58, %v1298_v56  ;;  %v4701_v61 = vpack.c.bf16 %v1389_v59, %v1387_v57 }
 0x130   : > { %4169 = vst [vmem:[%s5447_s7 + $0x48] sm:$0xff] %v4700_v60  ;;  %4170 = vst [vmem:[%s5447_s7 + $0x50] sm:$0xff] %v4701_v61  ;;  %v1304_v62 = vpop.f32.mrb[38].mxu1  ;;  %v1393_v63 = vpop.f32.mrb[38].mxu0 }
 0x131   : > { %v1306_v0 = vpop.f32.mrb[39].mxu1  ;;  %v1395_v1 = vpop.f32.mrb[39].mxu0 }
 0x132   : > { %v4733_v2 = vpack.c.bf16 %v1306_v0, %v1304_v62  ;;  %v4734_v3 = vpack.c.bf16 %v1395_v1, %v1393_v63 }
 0x134   : > { %4202 = vst [vmem:[%s5447_s7 + $0x150] sm:$0xff] %v4733_v2  ;;  %4203 = vst [vmem:[%s5447_s7 + $0x158] sm:$0xff] %v4734_v3  ;;  %v1310_v5 = vpop.f32.mrb[40].mxu1  ;;  %v1399_v6 = vpop.f32.mrb[40].mxu0 }
 0x135   : > { %v1312_v9 = vpop.f32.mrb[41].mxu1  ;;  %v1401_v10 = vpop.f32.mrb[41].mxu0 }
 0x136   : > { %v4766_v13 = vpack.c.bf16 %v1312_v9, %v1310_v5  ;;  %v4767_v14 = vpack.c.bf16 %v1401_v10, %v1399_v6 }
 0x138   : > { %4235 = vst [vmem:[%s5447_s7 + $0x258] sm:$0xff] %v4766_v13  ;;  %4236 = vst [vmem:[%s5447_s7 + $0x260] sm:$0xff] %v4767_v14  ;;  %v1316_v15 = vpop.f32.mrb[42].mxu1  ;;  %v1405_v16 = vpop.f32.mrb[42].mxu0 }
 0x139   : > { %v1318_v7 = vpop.f32.mrb[43].mxu1  ;;  %v1407_v17 = vpop.f32.mrb[43].mxu0 }
 0x13a   : > { %v4799_v18 = vpack.c.bf16 %v1318_v7, %v1316_v15  ;;  %v4800_v19 = vpack.c.bf16 %v1407_v17, %v1405_v16 }
 0x13c   : > { %4268 = vst [vmem:[%s5447_s7 + $0x360] sm:$0xff] %v4799_v18  ;;  %4269 = vst [vmem:[%s5447_s7 + $0x368] sm:$0xff] %v4800_v19  ;;  %v1476_v20 = vpop.f32.mrb[44].mxu1  ;;  %v1565_v21 = vpop.f32.mrb[44].mxu0 }
 0x13d   : > { %v1478_v11 = vpop.f32.mrb[45].mxu1  ;;  %v1567_v22 = vpop.f32.mrb[45].mxu0 }
 0x13e   : > { %v4702_v23 = vpack.c.bf16 %v1478_v11, %v1476_v20  ;;  %v4703_v24 = vpack.c.bf16 %v1567_v22, %v1565_v21 }
 0x140   : > { %4171 = vst [vmem:[%s5447_s7 + $0x58] sm:$0xff] %v4702_v23  ;;  %4172 = vst [vmem:[%s5447_s7 + $0x60] sm:$0xff] %v4703_v24  ;;  %v1482_v25 = vpop.f32.mrb[46].mxu1  ;;  %v1571_v26 = vpop.f32.mrb[46].mxu0 }
 0x141   : > { %v1484_v8 = vpop.f32.mrb[47].mxu1  ;;  %v1573_v27 = vpop.f32.mrb[47].mxu0 }
 0x142   : > { %v4735_v4 = vpack.c.bf16 %v1484_v8, %v1482_v25  ;;  %v4736_v28 = vpack.c.bf16 %v1573_v27, %v1571_v26 }
 0x144   : > { %4204 = vst [vmem:[%s5447_s7 + $0x160] sm:$0xff] %v4735_v4  ;;  %4205 = vst [vmem:[%s5447_s7 + $0x168] sm:$0xff] %v4736_v28  ;;  %v1488_v29 = vpop.f32.mrb[48].mxu1  ;;  %v1577_v30 = vpop.f32.mrb[48].mxu0 }
 0x145   : > { %v1490_v31 = vpop.f32.mrb[49].mxu1  ;;  %v1579_v32 = vpop.f32.mrb[49].mxu0 }
 0x146   : > { %v4768_v33 = vpack.c.bf16 %v1490_v31, %v1488_v29  ;;  %v4769_v34 = vpack.c.bf16 %v1579_v32, %v1577_v30 }
 0x148   : > { %4237 = vst [vmem:[%s5447_s7 + $0x268] sm:$0xff] %v4768_v33  ;;  %4238 = vst [vmem:[%s5447_s7 + $0x270] sm:$0xff] %v4769_v34  ;;  %v1494_v35 = vpop.f32.mrb[50].mxu1  ;;  %v1583_v12 = vpop.f32.mrb[50].mxu0 }
 0x149   : > { %v1496_v36 = vpop.f32.mrb[51].mxu1  ;;  %v1585_v37 = vpop.f32.mrb[51].mxu0 }
 0x14a   : > { %v4801_v38 = vpack.c.bf16 %v1496_v36, %v1494_v35  ;;  %v4802_v39 = vpack.c.bf16 %v1585_v37, %v1583_v12 }
 0x14c   : > { %4270 = vst [vmem:[%s5447_s7 + $0x370] sm:$0xff] %v4801_v38  ;;  %4271 = vst [vmem:[%s5447_s7 + $0x378] sm:$0xff] %v4802_v39  ;;  %v1654_v40 = vpop.f32.mrb[52].mxu1  ;;  %v1743_v41 = vpop.f32.mrb[52].mxu0 }
 0x14d   : > { %v1656_v42 = vpop.f32.mrb[53].mxu1  ;;  %v1745_v43 = vpop.f32.mrb[53].mxu0 }
 0x14e   : > { %v4704_v44 = vpack.c.bf16 %v1656_v42, %v1654_v40  ;;  %v4705_v45 = vpack.c.bf16 %v1745_v43, %v1743_v41 }
 0x150   : > { %4173 = vst [vmem:[%s5447_s7 + $0x68] sm:$0xff] %v4704_v44  ;;  %4174 = vst [vmem:[%s5447_s7 + $0x70] sm:$0xff] %v4705_v45  ;;  %v1660_v46 = vpop.f32.mrb[54].mxu1  ;;  %v1749_v47 = vpop.f32.mrb[54].mxu0 }
 0x151   : > { %v1662_v48 = vpop.f32.mrb[55].mxu1  ;;  %v1751_v49 = vpop.f32.mrb[55].mxu0 }
 0x152   : > { %v4737_v50 = vpack.c.bf16 %v1662_v48, %v1660_v46  ;;  %v4738_v51 = vpack.c.bf16 %v1751_v49, %v1749_v47 }
 0x154   : > { %4206 = vst [vmem:[%s5447_s7 + $0x170] sm:$0xff] %v4737_v50  ;;  %4207 = vst [vmem:[%s5447_s7 + $0x178] sm:$0xff] %v4738_v51  ;;  %v1666_v52 = vpop.f32.mrb[56].mxu1  ;;  %v1755_v53 = vpop.f32.mrb[56].mxu0 }
 0x155   : > { %v1668_v54 = vpop.f32.mrb[57].mxu1  ;;  %v1757_v55 = vpop.f32.mrb[57].mxu0 }
 0x156   : > { %v4770_v56 = vpack.c.bf16 %v1668_v54, %v1666_v52  ;;  %v4771_v57 = vpack.c.bf16 %v1757_v55, %v1755_v53 }
 0x158   : > { %4239 = vst [vmem:[%s5447_s7 + $0x278] sm:$0xff] %v4770_v56  ;;  %4240 = vst [vmem:[%s5447_s7 + $0x280] sm:$0xff] %v4771_v57  ;;  %v1672_v58 = vpop.f32.mrb[58].mxu1  ;;  %v1761_v59 = vpop.f32.mrb[58].mxu0 }
 0x159   : > { %v1674_v60 = vpop.f32.mrb[59].mxu1  ;;  %v1763_v61 = vpop.f32.mrb[59].mxu0 }
 0x15a   : > { %v4803_v62 = vpack.c.bf16 %v1674_v60, %v1672_v58  ;;  %v4804_v63 = vpack.c.bf16 %v1763_v61, %v1761_v59 }
 0x15c   : > { %4272 = vst [vmem:[%s5447_s7 + $0x380] sm:$0xff] %v4803_v62  ;;  %4273 = vst [vmem:[%s5447_s7 + $0x388] sm:$0xff] %v4804_v63  ;;  %v1832_v0 = vpop.f32.mrb[60].mxu1  ;;  %v1921_v1 = vpop.f32.mrb[60].mxu0 }
 0x15d   : > { %v1834_v2 = vpop.f32.mrb[61].mxu1  ;;  %v1923_v3 = vpop.f32.mrb[61].mxu0 }
 0x15e   : > { %v4706_v5 = vpack.c.bf16 %v1834_v2, %v1832_v0  ;;  %v4707_v6 = vpack.c.bf16 %v1923_v3, %v1921_v1 }
 0x160   : > { %4175 = vst [vmem:[%s5447_s7 + $0x78] sm:$0xff] %v4706_v5  ;;  %4176 = vst [vmem:[%s5447_s7 + $0x80] sm:$0xff] %v4707_v6  ;;  %v1838_v9 = vpop.f32.mrb[62].mxu1  ;;  %v1927_v10 = vpop.f32.mrb[62].mxu0 }
 0x161   : > { %v1840_v13 = vpop.f32.mrb[63].mxu1  ;;  %v1929_v14 = vpop.f32.mrb[63].mxu0 }
 0x162   : > { %v4739_v15 = vpack.c.bf16 %v1840_v13, %v1838_v9  ;;  %v4740_v16 = vpack.c.bf16 %v1929_v14, %v1927_v10 }
 0x164   : > { %4208 = vst [vmem:[%s5447_s7 + $0x180] sm:$0xff] %v4739_v15  ;;  %4209 = vst [vmem:[%s5447_s7 + $0x188] sm:$0xff] %v4740_v16  ;;  %v1844_v7 = vpop.f32.mrb[64].mxu1  ;;  %v1933_v17 = vpop.f32.mrb[64].mxu0 }
 0x165   : > { %v1846_v18 = vpop.f32.mrb[65].mxu1  ;;  %v1935_v19 = vpop.f32.mrb[65].mxu0 }
 0x166   : > { %v4772_v20 = vpack.c.bf16 %v1846_v18, %v1844_v7  ;;  %v4773_v21 = vpack.c.bf16 %v1935_v19, %v1933_v17 }
 0x168   : > { %4241 = vst [vmem:[%s5447_s7 + $0x288] sm:$0xff] %v4772_v20  ;;  %4242 = vst [vmem:[%s5447_s7 + $0x290] sm:$0xff] %v4773_v21  ;;  %v1850_v11 = vpop.f32.mrb[66].mxu1  ;;  %v1939_v22 = vpop.f32.mrb[66].mxu0 }
 0x169   : > { %v1852_v23 = vpop.f32.mrb[67].mxu1  ;;  %v1941_v24 = vpop.f32.mrb[67].mxu0 }
 0x16a   : > { %v4805_v25 = vpack.c.bf16 %v1852_v23, %v1850_v11  ;;  %v4806_v26 = vpack.c.bf16 %v1941_v24, %v1939_v22 }
 0x16c   : > { %4274 = vst [vmem:[%s5447_s7 + $0x390] sm:$0xff] %v4805_v25  ;;  %4275 = vst [vmem:[%s5447_s7 + $0x398] sm:$0xff] %v4806_v26  ;;  %v2010_v8 = vpop.f32.mrb[68].mxu1  ;;  %v2099_v27 = vpop.f32.mrb[68].mxu0 }
 0x16d   : > { %v2012_v4 = vpop.f32.mrb[69].mxu1  ;;  %v2101_v28 = vpop.f32.mrb[69].mxu0 }
 0x16e   : > { %v4708_v29 = vpack.c.bf16 %v2012_v4, %v2010_v8  ;;  %v4709_v30 = vpack.c.bf16 %v2101_v28, %v2099_v27 }
 0x170   : > { %4177 = vst [vmem:[%s5447_s7 + $0x88] sm:$0xff] %v4708_v29  ;;  %4178 = vst [vmem:[%s5447_s7 + $0x90] sm:$0xff] %v4709_v30  ;;  %v2016_v31 = vpop.f32.mrb[70].mxu1  ;;  %v2105_v32 = vpop.f32.mrb[70].mxu0 }
 0x171   : > { %v2018_v33 = vpop.f32.mrb[71].mxu1  ;;  %v2107_v34 = vpop.f32.mrb[71].mxu0 }
 0x172   : > { %v4741_v35 = vpack.c.bf16 %v2018_v33, %v2016_v31  ;;  %v4742_v12 = vpack.c.bf16 %v2107_v34, %v2105_v32 }
 0x174   : > { %4210 = vst [vmem:[%s5447_s7 + $0x190] sm:$0xff] %v4741_v35  ;;  %4211 = vst [vmem:[%s5447_s7 + $0x198] sm:$0xff] %v4742_v12  ;;  %v2022_v36 = vpop.f32.mrb[72].mxu1  ;;  %v2111_v37 = vpop.f32.mrb[72].mxu0 }
 0x175   : > { %v2024_v38 = vpop.f32.mrb[73].mxu1  ;;  %v2113_v39 = vpop.f32.mrb[73].mxu0 }
 0x176   : > { %v4774_v40 = vpack.c.bf16 %v2024_v38, %v2022_v36  ;;  %v4775_v41 = vpack.c.bf16 %v2113_v39, %v2111_v37 }
 0x178   : > { %4243 = vst [vmem:[%s5447_s7 + $0x298] sm:$0xff] %v4774_v40  ;;  %4244 = vst [vmem:[%s5447_s7 + $0x2a0] sm:$0xff] %v4775_v41  ;;  %v2028_v42 = vpop.f32.mrb[74].mxu1  ;;  %v2117_v43 = vpop.f32.mrb[74].mxu0 }
 0x179   : > { %v2030_v44 = vpop.f32.mrb[75].mxu1  ;;  %v2119_v45 = vpop.f32.mrb[75].mxu0 }
 0x17a   : > { %v4807_v46 = vpack.c.bf16 %v2030_v44, %v2028_v42  ;;  %v4808_v47 = vpack.c.bf16 %v2119_v45, %v2117_v43 }
 0x17c   : > { %4276 = vst [vmem:[%s5447_s7 + $0x3a0] sm:$0xff] %v4807_v46  ;;  %4277 = vst [vmem:[%s5447_s7 + $0x3a8] sm:$0xff] %v4808_v47  ;;  %v2188_v48 = vpop.f32.mrb[76].mxu1  ;;  %v2277_v49 = vpop.f32.mrb[76].mxu0 }
 0x17d   : > { %v2190_v50 = vpop.f32.mrb[77].mxu1  ;;  %v2279_v51 = vpop.f32.mrb[77].mxu0 }
 0x17e   : > { %v4710_v52 = vpack.c.bf16 %v2190_v50, %v2188_v48  ;;  %v4711_v53 = vpack.c.bf16 %v2279_v51, %v2277_v49 }
 0x180   : > { %4179 = vst [vmem:[%s5447_s7 + $0x98] sm:$0xff] %v4710_v52  ;;  %4180 = vst [vmem:[%s5447_s7 + $0xa0] sm:$0xff] %v4711_v53  ;;  %v2194_v54 = vpop.f32.mrb[78].mxu1  ;;  %v2283_v55 = vpop.f32.mrb[78].mxu0 }
 0x181   : > { %v2196_v56 = vpop.f32.mrb[79].mxu1  ;;  %v2285_v57 = vpop.f32.mrb[79].mxu0 }
 0x182   : > { %v4743_v58 = vpack.c.bf16 %v2196_v56, %v2194_v54  ;;  %v4744_v59 = vpack.c.bf16 %v2285_v57, %v2283_v55 }
 0x184   : > { %4212 = vst [vmem:[%s5447_s7 + $0x1a0] sm:$0xff] %v4743_v58  ;;  %4213 = vst [vmem:[%s5447_s7 + $0x1a8] sm:$0xff] %v4744_v59  ;;  %v2200_v60 = vpop.f32.mrb[80].mxu1  ;;  %v2289_v61 = vpop.f32.mrb[80].mxu0 }
 0x185   : > { %v2202_v62 = vpop.f32.mrb[81].mxu1  ;;  %v2291_v63 = vpop.f32.mrb[81].mxu0 }
 0x186   : > { %v4776_v0 = vpack.c.bf16 %v2202_v62, %v2200_v60  ;;  %v4777_v1 = vpack.c.bf16 %v2291_v63, %v2289_v61 }
 0x188   : > { %4245 = vst [vmem:[%s5447_s7 + $0x2a8] sm:$0xff] %v4776_v0  ;;  %4246 = vst [vmem:[%s5447_s7 + $0x2b0] sm:$0xff] %v4777_v1  ;;  %v2206_v2 = vpop.f32.mrb[82].mxu1  ;;  %v2295_v3 = vpop.f32.mrb[82].mxu0 }
 0x189   : > { %v2208_v5 = vpop.f32.mrb[83].mxu1  ;;  %v2297_v6 = vpop.f32.mrb[83].mxu0 }
 0x18a   : > { %v4809_v9 = vpack.c.bf16 %v2208_v5, %v2206_v2  ;;  %v4810_v10 = vpack.c.bf16 %v2297_v6, %v2295_v3 }
 0x18c   : > { %4278 = vst [vmem:[%s5447_s7 + $0x3b0] sm:$0xff] %v4809_v9  ;;  %4279 = vst [vmem:[%s5447_s7 + $0x3b8] sm:$0xff] %v4810_v10  ;;  %v2366_v13 = vpop.f32.mrb[84].mxu1  ;;  %v2455_v14 = vpop.f32.mrb[84].mxu0 }
 0x18d   : > { %v2368_v15 = vpop.f32.mrb[85].mxu1  ;;  %v2457_v16 = vpop.f32.mrb[85].mxu0 }
 0x18e   : > { %v4712_v7 = vpack.c.bf16 %v2368_v15, %v2366_v13  ;;  %v4713_v17 = vpack.c.bf16 %v2457_v16, %v2455_v14 }
 0x190   : > { %4181 = vst [vmem:[%s5447_s7 + $0xa8] sm:$0xff] %v4712_v7  ;;  %4182 = vst [vmem:[%s5447_s7 + $0xb0] sm:$0xff] %v4713_v17  ;;  %v2372_v18 = vpop.f32.mrb[86].mxu1  ;;  %v2461_v19 = vpop.f32.mrb[86].mxu0 }
 0x191   : > { %v2374_v20 = vpop.f32.mrb[87].mxu1  ;;  %v2463_v21 = vpop.f32.mrb[87].mxu0 }
 0x192   : > { %v4745_v11 = vpack.c.bf16 %v2374_v20, %v2372_v18  ;;  %v4746_v22 = vpack.c.bf16 %v2463_v21, %v2461_v19 }
 0x194   : > { %4214 = vst [vmem:[%s5447_s7 + $0x1b0] sm:$0xff] %v4745_v11  ;;  %4215 = vst [vmem:[%s5447_s7 + $0x1b8] sm:$0xff] %v4746_v22  ;;  %v2378_v23 = vpop.f32.mrb[88].mxu1  ;;  %v2467_v24 = vpop.f32.mrb[88].mxu0 }
 0x195   : > { %v2380_v25 = vpop.f32.mrb[89].mxu1  ;;  %v2469_v26 = vpop.f32.mrb[89].mxu0 }
 0x196   : > { %v4778_v8 = vpack.c.bf16 %v2380_v25, %v2378_v23  ;;  %v4779_v27 = vpack.c.bf16 %v2469_v26, %v2467_v24 }
 0x198   : > { %4247 = vst [vmem:[%s5447_s7 + $0x2b8] sm:$0xff] %v4778_v8  ;;  %4248 = vst [vmem:[%s5447_s7 + $0x2c0] sm:$0xff] %v4779_v27  ;;  %v2384_v4 = vpop.f32.mrb[90].mxu1  ;;  %v2473_v28 = vpop.f32.mrb[90].mxu0 }
 0x199   : > { %v2386_v29 = vpop.f32.mrb[91].mxu1  ;;  %v2475_v30 = vpop.f32.mrb[91].mxu0 }
 0x19a   : > { %v4811_v31 = vpack.c.bf16 %v2386_v29, %v2384_v4  ;;  %v4812_v32 = vpack.c.bf16 %v2475_v30, %v2473_v28 }
 0x19c   : > { %4280 = vst [vmem:[%s5447_s7 + $0x3c0] sm:$0xff] %v4811_v31  ;;  %4281 = vst [vmem:[%s5447_s7 + $0x3c8] sm:$0xff] %v4812_v32  ;;  %v2544_v33 = vpop.f32.mrb[92].mxu1  ;;  %v2633_v34 = vpop.f32.mrb[92].mxu0 }
 0x19d   : > { %v2546_v35 = vpop.f32.mrb[93].mxu1  ;;  %v2635_v12 = vpop.f32.mrb[93].mxu0 }
 0x19e   : > { %v4714_v36 = vpack.c.bf16 %v2546_v35, %v2544_v33  ;;  %v4715_v37 = vpack.c.bf16 %v2635_v12, %v2633_v34 }
 0x1a0   : > { %4183 = vst [vmem:[%s5447_s7 + $0xb8] sm:$0xff] %v4714_v36  ;;  %4184 = vst [vmem:[%s5447_s7 + $0xc0] sm:$0xff] %v4715_v37  ;;  %v2550_v38 = vpop.f32.mrb[94].mxu1  ;;  %v2639_v39 = vpop.f32.mrb[94].mxu0 }
 0x1a1   : > { %v2552_v40 = vpop.f32.mrb[95].mxu1  ;;  %v2641_v41 = vpop.f32.mrb[95].mxu0 }
 0x1a2   : > { %v4747_v42 = vpack.c.bf16 %v2552_v40, %v2550_v38  ;;  %v4748_v43 = vpack.c.bf16 %v2641_v41, %v2639_v39 }
 0x1a4   : > { %4216 = vst [vmem:[%s5447_s7 + $0x1c0] sm:$0xff] %v4747_v42  ;;  %4217 = vst [vmem:[%s5447_s7 + $0x1c8] sm:$0xff] %v4748_v43  ;;  %v2556_v44 = vpop.f32.mrb[96].mxu1  ;;  %v2645_v45 = vpop.f32.mrb[96].mxu0 }
 0x1a5   : > { %v2558_v46 = vpop.f32.mrb[97].mxu1  ;;  %v2647_v47 = vpop.f32.mrb[97].mxu0 }
 0x1a6   : > { %v4780_v48 = vpack.c.bf16 %v2558_v46, %v2556_v44  ;;  %v4781_v49 = vpack.c.bf16 %v2647_v47, %v2645_v45 }
 0x1a8   : > { %4249 = vst [vmem:[%s5447_s7 + $0x2c8] sm:$0xff] %v4780_v48  ;;  %4250 = vst [vmem:[%s5447_s7 + $0x2d0] sm:$0xff] %v4781_v49  ;;  %v2562_v50 = vpop.f32.mrb[98].mxu1  ;;  %v2651_v51 = vpop.f32.mrb[98].mxu0 }
 0x1a9   : > { %v2564_v52 = vpop.f32.mrb[99].mxu1  ;;  %v2653_v53 = vpop.f32.mrb[99].mxu0 }
 0x1aa   : > { %v4813_v54 = vpack.c.bf16 %v2564_v52, %v2562_v50  ;;  %v4814_v55 = vpack.c.bf16 %v2653_v53, %v2651_v51 }
 0x1ac   : > { %4282 = vst [vmem:[%s5447_s7 + $0x3d0] sm:$0xff] %v4813_v54  ;;  %4283 = vst [vmem:[%s5447_s7 + $0x3d8] sm:$0xff] %v4814_v55  ;;  %v2722_v56 = vpop.f32.mrb[100].mxu1  ;;  %v2811_v57 = vpop.f32.mrb[100].mxu0 }
 0x1ad   : > { %v2724_v58 = vpop.f32.mrb[101].mxu1  ;;  %v2813_v59 = vpop.f32.mrb[101].mxu0 }
 0x1ae   : > { %v4716_v60 = vpack.c.bf16 %v2724_v58, %v2722_v56  ;;  %v4717_v61 = vpack.c.bf16 %v2813_v59, %v2811_v57 }
 0x1b0   : > { %4185 = vst [vmem:[%s5447_s7 + $0xc8] sm:$0xff] %v4716_v60  ;;  %4186 = vst [vmem:[%s5447_s7 + $0xd0] sm:$0xff] %v4717_v61  ;;  %v2728_v62 = vpop.f32.mrb[102].mxu1  ;;  %v2817_v63 = vpop.f32.mrb[102].mxu0 }
 0x1b1   : > { %v2730_v0 = vpop.f32.mrb[103].mxu1  ;;  %v2819_v1 = vpop.f32.mrb[103].mxu0 }
 0x1b2   : > { %v4749_v2 = vpack.c.bf16 %v2730_v0, %v2728_v62  ;;  %v4750_v3 = vpack.c.bf16 %v2819_v1, %v2817_v63 }
 0x1b4   : > { %4218 = vst [vmem:[%s5447_s7 + $0x1d0] sm:$0xff] %v4749_v2  ;;  %4219 = vst [vmem:[%s5447_s7 + $0x1d8] sm:$0xff] %v4750_v3  ;;  %v2734_v5 = vpop.f32.mrb[104].mxu1  ;;  %v2823_v6 = vpop.f32.mrb[104].mxu0 }
 0x1b5   : > { %v2736_v9 = vpop.f32.mrb[105].mxu1  ;;  %v2825_v10 = vpop.f32.mrb[105].mxu0 }
 0x1b6   : > { %v4782_v13 = vpack.c.bf16 %v2736_v9, %v2734_v5  ;;  %v4783_v14 = vpack.c.bf16 %v2825_v10, %v2823_v6 }
 0x1b8   : > { %4251 = vst [vmem:[%s5447_s7 + $0x2d8] sm:$0xff] %v4782_v13  ;;  %4252 = vst [vmem:[%s5447_s7 + $0x2e0] sm:$0xff] %v4783_v14  ;;  %v2740_v15 = vpop.f32.mrb[106].mxu1  ;;  %v2829_v16 = vpop.f32.mrb[106].mxu0 }
 0x1b9   : > { %v2742_v7 = vpop.f32.mrb[107].mxu1  ;;  %v2831_v17 = vpop.f32.mrb[107].mxu0 }
 0x1ba   : > { %v4815_v18 = vpack.c.bf16 %v2742_v7, %v2740_v15  ;;  %v4816_v19 = vpack.c.bf16 %v2831_v17, %v2829_v16 }
 0x1bc   : > { %4284 = vst [vmem:[%s5447_s7 + $0x3e0] sm:$0xff] %v4815_v18  ;;  %4285 = vst [vmem:[%s5447_s7 + $0x3e8] sm:$0xff] %v4816_v19  ;;  %v2900_v20 = vpop.f32.mrb[108].mxu1  ;;  %v2989_v21 = vpop.f32.mrb[108].mxu0 }
 0x1bd   : > { %v2902_v11 = vpop.f32.mrb[109].mxu1  ;;  %v2991_v22 = vpop.f32.mrb[109].mxu0 }
 0x1be   : > { %v4718_v23 = vpack.c.bf16 %v2902_v11, %v2900_v20  ;;  %v4719_v24 = vpack.c.bf16 %v2991_v22, %v2989_v21 }
 0x1c0   : > { %4187 = vst [vmem:[%s5447_s7 + $0xd8] sm:$0xff] %v4718_v23  ;;  %4188 = vst [vmem:[%s5447_s7 + $0xe0] sm:$0xff] %v4719_v24  ;;  %v2906_v25 = vpop.f32.mrb[110].mxu1  ;;  %v2995_v26 = vpop.f32.mrb[110].mxu0 }
 0x1c1   : > { %v2908_v8 = vpop.f32.mrb[111].mxu1  ;;  %v2997_v27 = vpop.f32.mrb[111].mxu0 }
 0x1c2   : > { %v4751_v4 = vpack.c.bf16 %v2908_v8, %v2906_v25  ;;  %v4752_v28 = vpack.c.bf16 %v2997_v27, %v2995_v26 }
 0x1c4   : > { %4220 = vst [vmem:[%s5447_s7 + $0x1e0] sm:$0xff] %v4751_v4  ;;  %4221 = vst [vmem:[%s5447_s7 + $0x1e8] sm:$0xff] %v4752_v28  ;;  %v2912_v29 = vpop.f32.mrb[112].mxu1  ;;  %v3001_v30 = vpop.f32.mrb[112].mxu0 }
 0x1c5   : > { %v2914_v31 = vpop.f32.mrb[113].mxu1  ;;  %v3003_v32 = vpop.f32.mrb[113].mxu0 }
 0x1c6   : > { %v4784_v33 = vpack.c.bf16 %v2914_v31, %v2912_v29  ;;  %v4785_v34 = vpack.c.bf16 %v3003_v32, %v3001_v30 }
 0x1c8   : > { %4253 = vst [vmem:[%s5447_s7 + $0x2e8] sm:$0xff] %v4784_v33  ;;  %4254 = vst [vmem:[%s5447_s7 + $0x2f0] sm:$0xff] %v4785_v34  ;;  %v2918_v35 = vpop.f32.mrb[114].mxu1  ;;  %v3007_v12 = vpop.f32.mrb[114].mxu0 }
 0x1c9   : > { %v2920_v36 = vpop.f32.mrb[115].mxu1  ;;  %v3009_v37 = vpop.f32.mrb[115].mxu0 }
 0x1ca   : > { %v4817_v38 = vpack.c.bf16 %v2920_v36, %v2918_v35  ;;  %v4818_v39 = vpack.c.bf16 %v3009_v37, %v3007_v12 }
 0x1cc   : > { %4286 = vst [vmem:[%s5447_s7 + $0x3f0] sm:$0xff] %v4817_v38  ;;  %4287 = vst [vmem:[%s5447_s7 + $0x3f8] sm:$0xff] %v4818_v39  ;;  %v3078_v40 = vpop.f32.mrb[116].mxu1  ;;  %v3167_v41 = vpop.f32.mrb[116].mxu0 }
 0x1cd   : > { %v3080_v42 = vpop.f32.mrb[117].mxu1  ;;  %v3169_v43 = vpop.f32.mrb[117].mxu0 }
 0x1ce   : > { %v4720_v44 = vpack.c.bf16 %v3080_v42, %v3078_v40  ;;  %v4721_v45 = vpack.c.bf16 %v3169_v43, %v3167_v41 }
 0x1d0   : > { %4189 = vst [vmem:[%s5447_s7 + $0xe8] sm:$0xff] %v4720_v44  ;;  %4190 = vst [vmem:[%s5447_s7 + $0xf0] sm:$0xff] %v4721_v45  ;;  %v3084_v46 = vpop.f32.mrb[118].mxu1  ;;  %v3173_v47 = vpop.f32.mrb[118].mxu0 }
 0x1d1   : > { %v3086_v48 = vpop.f32.mrb[119].mxu1  ;;  %v3175_v49 = vpop.f32.mrb[119].mxu0 }
 0x1d2   : > { %v4753_v50 = vpack.c.bf16 %v3086_v48, %v3084_v46  ;;  %v4754_v51 = vpack.c.bf16 %v3175_v49, %v3173_v47 }
 0x1d4   : > { %4222 = vst [vmem:[%s5447_s7 + $0x1f0] sm:$0xff] %v4753_v50  ;;  %4223 = vst [vmem:[%s5447_s7 + $0x1f8] sm:$0xff] %v4754_v51  ;;  %v3090_v52 = vpop.f32.mrb[120].mxu1  ;;  %v3179_v53 = vpop.f32.mrb[120].mxu0 }
 0x1d5   : > { %v3092_v54 = vpop.f32.mrb[121].mxu1  ;;  %v3181_v55 = vpop.f32.mrb[121].mxu0 }
 0x1d6   : > { %v4786_v56 = vpack.c.bf16 %v3092_v54, %v3090_v52  ;;  %v4787_v57 = vpack.c.bf16 %v3181_v55, %v3179_v53 }
 0x1d8   : > { %4255 = vst [vmem:[%s5447_s7 + $0x2f8] sm:$0xff] %v4786_v56  ;;  %4256 = vst [vmem:[%s5447_s7 + $0x300] sm:$0xff] %v4787_v57  ;;  %v3096_v58 = vpop.f32.mrb[122].mxu1  ;;  %v3185_v59 = vpop.f32.mrb[122].mxu0 }
 0x1d9   : > { %v3098_v60 = vpop.f32.mrb[123].mxu1  ;;  %v3187_v61 = vpop.f32.mrb[123].mxu0 }
 0x1da   : > { %v4819_v62 = vpack.c.bf16 %v3098_v60, %v3096_v58  ;;  %v4820_v63 = vpack.c.bf16 %v3187_v61, %v3185_v59 }
 0x1dc   : > { %4288 = vst [vmem:[%s5447_s7 + $0x400] sm:$0xff] %v4819_v62  ;;  %4289 = vst [vmem:[%s5447_s7 + $0x408] sm:$0xff] %v4820_v63  ;;  %v3256_v0 = vpop.f32.mrb[124].mxu1  ;;  %v3345_v1 = vpop.f32.mrb[124].mxu0 }
 0x1dd   : > { %v3258_v2 = vpop.f32.mrb[125].mxu1  ;;  %v3347_v3 = vpop.f32.mrb[125].mxu0 }
 0x1de   : > { %v4722_v5 = vpack.c.bf16 %v3258_v2, %v3256_v0  ;;  %v4723_v6 = vpack.c.bf16 %v3347_v3, %v3345_v1 }
 0x1e0   : > { %4191 = vst [vmem:[%s5447_s7 + $0xf8] sm:$0xff] %v4722_v5  ;;  %4192 = vst [vmem:[%s5447_s7 + $0x100] sm:$0xff] %v4723_v6  ;;  %v3262_v9 = vpop.f32.mrb[126].mxu1  ;;  %v3351_v10 = vpop.f32.mrb[126].mxu0 }
 0x1e1   : > { %v3264_v13 = vpop.f32.mrb[127].mxu1  ;;  %v3353_v14 = vpop.f32.mrb[127].mxu0 }
 0x1e2   : > { %v4755_v15 = vpack.c.bf16 %v3264_v13, %v3262_v9  ;;  %v4756_v16 = vpack.c.bf16 %v3353_v14, %v3351_v10 }
 0x1e4   : > { %4224 = vst [vmem:[%s5447_s7 + $0x200] sm:$0xff] %v4755_v15  ;;  %4225 = vst [vmem:[%s5447_s7 + $0x208] sm:$0xff] %v4756_v16  ;;  %v3268_v7 = vpop.f32.mrb[128].mxu1  ;;  %v3357_v17 = vpop.f32.mrb[128].mxu0 }
 0x1e5   : > { %v3270_v18 = vpop.f32.mrb[129].mxu1  ;;  %v3359_v19 = vpop.f32.mrb[129].mxu0 }
 0x1e6   : > { %v4788_v20 = vpack.c.bf16 %v3270_v18, %v3268_v7  ;;  %v4789_v21 = vpack.c.bf16 %v3359_v19, %v3357_v17 }
 0x1e8   : > { %4257 = vst [vmem:[%s5447_s7 + $0x308] sm:$0xff] %v4788_v20  ;;  %4258 = vst [vmem:[%s5447_s7 + $0x310] sm:$0xff] %v4789_v21  ;;  %v3274_v11 = vpop.f32.mrb[130].mxu1  ;;  %v3363_v22 = vpop.f32.mrb[130].mxu0 }
 0x1e9   : > { %v3276_v23 = vpop.f32.mrb[131].mxu1  ;;  %v3365_v24 = vpop.f32.mrb[131].mxu0 }
 0x1ea   : > { %v4821_v25 = vpack.c.bf16 %v3276_v23, %v3274_v11  ;;  %v4822_v26 = vpack.c.bf16 %v3365_v24, %v3363_v22 }
 0x1ec   : > { %4290 = vst [vmem:[%s5447_s7 + $0x410] sm:$0xff] %v4821_v25  ;;  %4291 = vst [vmem:[%s5447_s7 + $0x418] sm:$0xff] %v4822_v26 }
 0x1ed PF: > { %s12_s9 = sadd.s32 1, %s4841_s9  }
 0x1ee   : > { %p9_p4 = scmp.ge.s32.totalorder %s12_s9, 4  }
 0x1f0   :  { %11 = sbr.rel (!%p9_p4) target bundleno = 1 (0x1), region = 58 }

// kernel: pspnet_tl_forward.47
= control target key start
LH: loop header
LB: loop body
LE: loop exit
PB: predicated region body
PF: predicated region fallthrough
CT: control target
= control target key end

     0   :  { %s807_s12 = smov 0   ;;  %s941_s0 = inlined_call_operand.vmem [shape: bf16[2304,128], index: 0, kind: input, shape index: {}]   ;;  %s942_s1 = inlined_call_operand.vmem [shape: bf16[128,128], index: 1, kind: input, shape index: {}]   ;;  %s943_s2 = inlined_call_operand.vmem [shape: f32[1,128], index: 2, kind: input, shape index: {}]   ;;  %s944_s3 = inlined_call_operand.vmem [shape: f32[2304,128], index: 3, kind: output, shape index: {}]  }
   0x1 LB: > { %s623_s13 = sadd.s32 4294967295, %s785_s12   ;;  %p627_p0 = scmp.ge.s32.totalorder %s785_s12, 1  ;;  %s785_s12 = sphi %s807_s12, %s13_s12  }
   0x2   : > { %p138_p1 = scmp.lt.s32.totalorder %s785_s12, 10 }
   0x4   : > { %p139_p2 = pnand %p627_p0, %p138_p1 }
   0x5   : > { %v755_v0 = vld [vmem:[%s942_s1] sm:$0xff] (!%p139_p2)   ;;  %s628_s16 = sshll.u32 (!%p139_p2), %s623_s13, 5  ;;  %v756_v1 = vld [vmem:[%s942_s1 + $0x8] sm:$0xff] (!%p139_p2)   ;;  %v757_v2 = vld [vmem:[%s942_s1 + $0x10] sm:$0xff] (!%p139_p2)  }
   0x6   : > { %142 = sbr.rel (%p139_p2) target bundleno = 280 (0x118), region = 32  ;;  %p163_p3 = scmp.lt.s32.totalorder (!%p139_p2), %s628_s16, 287  ;;  %683 = vmatprep.subr.bf16.mxu0 (!%p139_p2), %v755_v0  ;;  %731 = vmatprep.subr.bf16.mxu1 (!%p139_p2), %v755_v0  ;;  %v758_v3 = vld [vmem:[%s942_s1 + $0x18] sm:$0xff] (!%p139_p2)   ;;  %v759_v6 = vld [vmem:[%s942_s1 + $0x20] sm:$0xff] (!%p139_p2)   ;;  %v760_v7 = vld [vmem:[%s942_s1 + $0x28] sm:$0xff] (!%p139_p2)  }
   0x7   : > { %684 = vmatpush3.bf16.msra.mxu0 (!%p139_p2), %v755_v0  ;;  %739 = vmatpush3.bf16.msra.mxu1 (!%p139_p2), %v755_v0  ;;  %v761_v8 = vld [vmem:[%s942_s1 + $0x30] sm:$0xff] (!%p139_p2)   ;;  %v762_v9 = vld [vmem:[%s942_s1 + $0x38] sm:$0xff] (!%p139_p2)   ;;  %v867_v24 = vld [vmem:[%s943_s2] ss:$0 sm:$0xff] (!%p139_p2) }
   0x8   : > { %685 = vmatprep.subr.bf16.mxu0 (!%p139_p2), %v756_v1  ;;  %732 = vmatprep.subr.bf16.mxu1 (!%p139_p2), %v756_v1 }
   0xb   : > { %686 = vmatpush3.bf16.msra.mxu0 (!%p139_p2), %v756_v1  ;;  %740 = vmatpush3.bf16.msra.mxu1 (!%p139_p2), %v756_v1 }
   0xc   : > { %687 = vmatprep.subr.bf16.mxu0 (!%p139_p2), %v757_v2  ;;  %733 = vmatprep.subr.bf16.mxu1 (!%p139_p2), %v757_v2 }
   0xd   : > { %s946_s16 = smov (!%p163_p3, %s628_s16), 287 }
   0xe   : > { %s629_s21 = sshll.u32 %s946_s16, 2  ;;  %s631_s8 = sshll.u32 %s946_s16, 3 }
   0xf   : > { %s830_s24 = scalar_lea.vmem %s941_s0, %s629_s21  ;;  %688 = vmatpush3.bf16.msra.mxu0 %v757_v2  ;;  %741 = vmatpush3.bf16.msra.mxu1 %v757_v2  ;;  %s872_s14 = scalar_lea.vmem %s944_s3, %s631_s8 }
  0x10   : > { %v763_v4 = vld [vmem:[%s830_s24] sm:$0xff]   ;;  %689 = vmatprep.subr.bf16.mxu0 %v758_v3  ;;  %734 = vmatprep.subr.bf16.mxu1 %v758_v3  ;;  %v765_v10 = vld [vmem:[%s830_s24 + $0x8] sm:$0xff]   ;;  %v767_v12 = vld [vmem:[%s830_s24 + $0x10] sm:$0xff]  }
  0x11   : > { %v764_v5 = vld [vmem:[%s830_s24 + $0x40] sm:$0xff]   ;;  %699 = vmatprep.mubr.bf16.mxu0 %v763_v4  ;;  %v766_v11 = vld [vmem:[%s830_s24 + $0x48] sm:$0xff]   ;;  %v768_v13 = vld [vmem:[%s830_s24 + $0x50] sm:$0xff]  }
  0x12   : > { %715 = vmatprep.mubr.bf16.mxu1 %v764_v5  ;;  %v769_v14 = vld [vmem:[%s830_s24 + $0x18] sm:$0xff]   ;;  %v771_v16 = vld [vmem:[%s830_s24 + $0x20] sm:$0xff]   ;;  %v773_v18 = vld [vmem:[%s830_s24 + $0x28] sm:$0xff]  }
  0x13   : > { %690 = vmatpush3.bf16.msra.mxu0 %v758_v3  ;;  %742 = vmatpush3.bf16.msra.mxu1 %v758_v3  ;;  %v770_v15 = vld [vmem:[%s830_s24 + $0x58] sm:$0xff]   ;;  %v772_v17 = vld [vmem:[%s830_s24 + $0x60] sm:$0xff]   ;;  %v774_v19 = vld [vmem:[%s830_s24 + $0x68] sm:$0xff]  }
  0x14   : > { %691 = vmatprep.subr.bf16.mxu0 %v759_v6  ;;  %735 = vmatprep.subr.bf16.mxu1 %v759_v6  ;;  %v775_v20 = vld [vmem:[%s830_s24 + $0x30] sm:$0xff]   ;;  %v777_v22 = vld [vmem:[%s830_s24 + $0x38] sm:$0xff]  }
  0x15   : > { %v776_v21 = vld [vmem:[%s830_s24 + $0x70] sm:$0xff]   ;;  %v778_v23 = vld [vmem:[%s830_s24 + $0x78] sm:$0xff]  }
  0x17   : > { %692 = vmatpush3.bf16.msra.mxu0 %v759_v6  ;;  %743 = vmatpush3.bf16.msra.mxu1 %v759_v6 }
  0x18   : > { %693 = vmatprep.subr.bf16.mxu0 %v760_v7  ;;  %736 = vmatprep.subr.bf16.mxu1 %v760_v7 }
  0x1b   : > { %694 = vmatpush3.bf16.msra.mxu0 %v760_v7  ;;  %744 = vmatpush3.bf16.msra.mxu1 %v760_v7 }
  0x1c   : > { %695 = vmatprep.subr.bf16.mxu0 %v761_v8  ;;  %737 = vmatprep.subr.bf16.mxu1 %v761_v8 }
  0x1f   : > { %696 = vmatpush3.bf16.msra.mxu0 %v761_v8  ;;  %745 = vmatpush3.bf16.msra.mxu1 %v761_v8 }
  0x20   : > { %697 = vmatprep.subr.bf16.mxu0 %v762_v9  ;;  %738 = vmatprep.subr.bf16.mxu1 %v762_v9 }
  0x23   : > { %698 = vmatpush3.bf16.msra.mxu0 %v762_v9  ;;  %746 = vmatpush3.bf16.msra.mxu1 %v762_v9 }
  0x26   : > { %700 = vmatmul.mubr.bf16.vlgmr.msra.gmra.mrb[0].mxu0 %v765_v10  ;;  %716 = vmatmul.mubr.bf16.vlgmr.msra.gmra.mrb[0].mxu1 %v766_v11 }
  0x27   : > { %703 = vmatprep.mubr.bf16.mxu0 %v767_v12  ;;  %719 = vmatprep.mubr.bf16.mxu1 %v768_v13 }
  0x2e   : > { %704 = vmatmul.mubr.bf16.gmra.mrb[4].mxu0 %v769_v14  ;;  %720 = vmatmul.mubr.bf16.gmra.mrb[4].mxu1 %v770_v15 }
  0x2f   : > { %707 = vmatprep.mubr.bf16.mxu0 %v771_v16  ;;  %723 = vmatprep.mubr.bf16.mxu1 %v772_v17 }
  0x36   : > { %708 = vmatmul.mubr.bf16.gmra.mrb[8].mxu0 %v773_v18  ;;  %724 = vmatmul.mubr.bf16.gmra.mrb[8].mxu1 %v774_v19 }
  0x37   : > { %711 = vmatprep.mubr.bf16.mxu0 %v775_v20  ;;  %727 = vmatprep.mubr.bf16.mxu1 %v776_v21 }
  0x3e   : > { %712 = vmatmul.mubr.bf16.gmra.mrb[12].mxu0 %v777_v22  ;;  %728 = vmatmul.mubr.bf16.gmra.mrb[12].mxu1 %v778_v23 }
  0xf9   : > { %v701_v25 = vpop.f32.mrb[0].mxu0  ;;  %v717_v26 = vpop.f32.mrb[0].mxu1 }
  0xfa   : > { %v417_v27 = vadd.f32 %v701_v25, %v867_v24  ;;  %v481_v28 = vadd.f32 %v717_v26, %v867_v24  ;;  %v408_v29 = vpop.f32.mrb[1].mxu0  ;;  %v472_v30 = vpop.f32.mrb[1].mxu1 }
  0xfb   : > { %v409_v31 = vadd.f32 %v867_v24, %v408_v29  ;;  %v473_v32 = vadd.f32 %v867_v24, %v472_v30  ;;  %v702_v33 = vpop.f32.mrb[2].mxu0  ;;  %v718_v34 = vpop.f32.mrb[2].mxu1 }
  0xfc   : > { %537 = vst [vmem:[%s872_s14 + $0x10] sm:$0xff] %v417_v27  ;;  %553 = vst [vmem:[%s872_s14 + $0x90] sm:$0xff] %v481_v28  ;;  %v420_v35 = vadd.f32 %v702_v33, %v867_v24  ;;  %v484_v36 = vadd.f32 %v718_v34, %v867_v24  ;;  %v411_v37 = vpop.f32.mrb[3].mxu0  ;;  %v475_v38 = vpop.f32.mrb[3].mxu1 }
  0xfd   : > { %535 = vst [vmem:[%s872_s14] sm:$0xff] %v409_v31  ;;  %551 = vst [vmem:[%s872_s14 + $0x80] sm:$0xff] %v473_v32  ;;  %v412_v39 = vadd.f32 %v867_v24, %v411_v37  ;;  %v476_v40 = vadd.f32 %v867_v24, %v475_v38 }
  0xfe   : > { %538 = vst [vmem:[%s872_s14 + $0x18] sm:$0xff] %v420_v35  ;;  %554 = vst [vmem:[%s872_s14 + $0x98] sm:$0xff] %v484_v36 }
  0xff   : > { %536 = vst [vmem:[%s872_s14 + $0x8] sm:$0xff] %v412_v39  ;;  %552 = vst [vmem:[%s872_s14 + $0x88] sm:$0xff] %v476_v40 }
 0x101   : > { %v705_v41 = vpop.f32.mrb[4].mxu0  ;;  %v721_v42 = vpop.f32.mrb[4].mxu1 }
 0x102   : > { %v433_v43 = vadd.f32 %v705_v41, %v867_v24  ;;  %v497_v44 = vadd.f32 %v721_v42, %v867_v24  ;;  %v424_v45 = vpop.f32.mrb[5].mxu0  ;;  %v488_v46 = vpop.f32.mrb[5].mxu1 }
 0x103   : > { %v425_v47 = vadd.f32 %v867_v24, %v424_v45  ;;  %v489_v48 = vadd.f32 %v867_v24, %v488_v46  ;;  %v706_v49 = vpop.f32.mrb[6].mxu0  ;;  %v722_v50 = vpop.f32.mrb[6].mxu1 }
 0x104   : > { %541 = vst [vmem:[%s872_s14 + $0x30] sm:$0xff] %v433_v43  ;;  %557 = vst [vmem:[%s872_s14 + $0xb0] sm:$0xff] %v497_v44  ;;  %v436_v51 = vadd.f32 %v706_v49, %v867_v24  ;;  %v500_v52 = vadd.f32 %v722_v50, %v867_v24  ;;  %v427_v53 = vpop.f32.mrb[7].mxu0  ;;  %v491_v54 = vpop.f32.mrb[7].mxu1 }
 0x105   : > { %539 = vst [vmem:[%s872_s14 + $0x20] sm:$0xff] %v425_v47  ;;  %555 = vst [vmem:[%s872_s14 + $0xa0] sm:$0xff] %v489_v48  ;;  %v428_v55 = vadd.f32 %v867_v24, %v427_v53  ;;  %v492_v56 = vadd.f32 %v867_v24, %v491_v54 }
 0x106   : > { %542 = vst [vmem:[%s872_s14 + $0x38] sm:$0xff] %v436_v51  ;;  %558 = vst [vmem:[%s872_s14 + $0xb8] sm:$0xff] %v500_v52 }
 0x107   : > { %540 = vst [vmem:[%s872_s14 + $0x28] sm:$0xff] %v428_v55  ;;  %556 = vst [vmem:[%s872_s14 + $0xa8] sm:$0xff] %v492_v56 }
 0x109   : > { %v709_v57 = vpop.f32.mrb[8].mxu0  ;;  %v725_v58 = vpop.f32.mrb[8].mxu1 }
 0x10a   : > { %v449_v59 = vadd.f32 %v709_v57, %v867_v24  ;;  %v513_v60 = vadd.f32 %v725_v58, %v867_v24  ;;  %v440_v61 = vpop.f32.mrb[9].mxu0  ;;  %v504_v62 = vpop.f32.mrb[9].mxu1 }
 0x10b   : > { %v441_v63 = vadd.f32 %v867_v24, %v440_v61  ;;  %v505_v0 = vadd.f32 %v867_v24, %v504_v62  ;;  %v710_v1 = vpop.f32.mrb[10].mxu0  ;;  %v726_v2 = vpop.f32.mrb[10].mxu1 }
 0x10c   : > { %545 = vst [vmem:[%s872_s14 + $0x50] sm:$0xff] %v449_v59  ;;  %561 = vst [vmem:[%s872_s14 + $0xd0] sm:$0xff] %v513_v60  ;;  %v452_v3 = vadd.f32 %v710_v1, %v867_v24  ;;  %v516_v4 = vadd.f32 %v726_v2, %v867_v24  ;;  %v443_v5 = vpop.f32.mrb[11].mxu0  ;;  %v507_v6 = vpop.f32.mrb[11].mxu1 }
 0x10d   : > { %543 = vst [vmem:[%s872_s14 + $0x40] sm:$0xff] %v441_v63  ;;  %559 = vst [vmem:[%s872_s14 + $0xc0] sm:$0xff] %v505_v0  ;;  %v444_v7 = vadd.f32 %v867_v24, %v443_v5  ;;  %v508_v8 = vadd.f32 %v867_v24, %v507_v6 }
 0x10e   : > { %546 = vst [vmem:[%s872_s14 + $0x58] sm:$0xff] %v452_v3  ;;  %562 = vst [vmem:[%s872_s14 + $0xd8] sm:$0xff] %v516_v4 }
 0x10f   : > { %544 = vst [vmem:[%s872_s14 + $0x48] sm:$0xff] %v444_v7  ;;  %560 = vst [vmem:[%s872_s14 + $0xc8] sm:$0xff] %v508_v8 }
 0x111   : > { %v713_v9 = vpop.f32.mrb[12].mxu0  ;;  %v729_v10 = vpop.f32.mrb[12].mxu1 }
 0x112   : > { %v465_v11 = vadd.f32 %v713_v9, %v867_v24  ;;  %v529_v12 = vadd.f32 %v729_v10, %v867_v24  ;;  %v456_v13 = vpop.f32.mrb[13].mxu0  ;;  %v520_v14 = vpop.f32.mrb[13].mxu1 }
 0x113   : > { %v457_v15 = vadd.f32 %v867_v24, %v456_v13  ;;  %v521_v16 = vadd.f32 %v867_v24, %v520_v14  ;;  %v714_v17 = vpop.f32.mrb[14].mxu0  ;;  %v730_v18 = vpop.f32.mrb[14].mxu1 }
 0x114   : > { %549 = vst [vmem:[%s872_s14 + $0x70] sm:$0xff] %v465_v11  ;;  %565 = vst [vmem:[%s872_s14 + $0xf0] sm:$0xff] %v529_v12  ;;  %v468_v19 = vadd.f32 %v714_v17, %v867_v24  ;;  %v532_v20 = vadd.f32 %v730_v18, %v867_v24  ;;  %v459_v21 = vpop.f32.mrb[15].mxu0  ;;  %v523_v22 = vpop.f32.mrb[15].mxu1 }
 0x115   : > { %547 = vst [vmem:[%s872_s14 + $0x60] sm:$0xff] %v457_v15  ;;  %563 = vst [vmem:[%s872_s14 + $0xe0] sm:$0xff] %v521_v16  ;;  %v460_v23 = vadd.f32 %v867_v24, %v459_v21  ;;  %v524_v25 = vadd.f32 %v867_v24, %v523_v22 }
 0x116   : > { %550 = vst [vmem:[%s872_s14 + $0x78] sm:$0xff] %v468_v19  ;;  %566 = vst [vmem:[%s872_s14 + $0xf8] sm:$0xff] %v532_v20 }
 0x117   : > { %548 = vst [vmem:[%s872_s14 + $0x68] sm:$0xff] %v460_v23  ;;  %564 = vst [vmem:[%s872_s14 + $0xe8] sm:$0xff] %v524_v25 }
 0x118 PF: > { %s13_s12 = sadd.s32 1, %s785_s12  }
 0x119   : > { %p10_p4 = scmp.ge.s32.totalorder %s13_s12, 11  }
 0x11b   :  { %12 = sbr.rel (!%p10_p4) target bundleno = 1 (0x1), region = 62 }

</bundles_post_ra>
